<compile_context>
chip_gen: v5e
topology: v5e:2x2
jax: 0.10.0
libtpu: 0.0.40
codegen_flags: <defaults>
</compile_context>

<pallas_src>
import jax
import jax.numpy as jnp
from jax import lax
from jax.experimental import pallas as pl
from jax.experimental.pallas import tpu as pltpu


def _make_kernel(H, W, cin, cout, groups, eps, has_shortcut):
    Wp = W + 2                       # padded row width (1 zero col each side)
    npix = H * W
    nrow = H * Wp                    # rows of the conv2 accumulator
    n_in = float(npix * (cin // groups))
    n_out = float(npix * (cout // groups))

    def group_norm(xf, M, gamma, beta, n_per_group):
        # xf: (npix, C) f32 ; M: (C, G) one-hot channel->group matrix (f32).
        ch_sum = jnp.sum(xf, axis=0, keepdims=True)          # (1, C)
        ch_ssq = jnp.sum(xf * xf, axis=0, keepdims=True)     # (1, C)
        g_sum = jnp.dot(ch_sum, M, preferred_element_type=jnp.float32)
        g_ssq = jnp.dot(ch_ssq, M, preferred_element_type=jnp.float32)
        mean_g = g_sum / n_per_group
        var_g = g_ssq / n_per_group - mean_g * mean_g        # biased var (torch)
        rstd_g = lax.rsqrt(var_g + eps)
        Mt = M.T                                             # (G, C)
        mean_c = jnp.dot(mean_g, Mt, preferred_element_type=jnp.float32)
        rstd_c = jnp.dot(rstd_g, Mt, preferred_element_type=jnp.float32)
        return (xf - mean_c) * rstd_c * gamma + beta

    def silu(x):
        return x * jax.nn.sigmoid(x)

    def kernel(x_ref, min_ref, g1_ref, b1_ref, w1_ref, cb1_ref,
               mout_ref, g2_ref, b2_ref, w2_ref, cb2_ref, *rest):
        if has_shortcut:
            ws_ref, bs_ref, o_ref, pad_ref, acc_ref = rest
        else:
            o_ref, pad_ref, acc_ref = rest

        xf = x_ref[0].astype(jnp.float32).reshape(npix, cin)

        # ---- norm1 -> SiLU -> conv1 (1x1 == channel matmul, bf16 on MXU) ----
        h = group_norm(xf, min_ref[...], g1_ref[...], b1_ref[...], n_in)
        h = silu(h)
        h = jnp.dot(h.astype(jnp.bfloat16), w1_ref[...],
                    preferred_element_type=jnp.float32) + cb1_ref[...]

        # ---- norm2 -> SiLU -> dropout ---------------------------------------
        h = group_norm(h, mout_ref[...], g2_ref[...], b2_ref[...], n_out)
        h = silu(h)
        # TODO(synk): torch.nn.Dropout is identity in eval mode; stochastic
        # training-mode dropout (pltpu.prng_*) is not implemented here.

        # ---- stage h into the flat zero-padded row buffer --------------------
        # Pixel (y, x) lives at flat row (y+1)*Wp + (x+1); every other row must
        # read as zero for the shifted-matmul taps below.  Only the tiny border
        # rows and the 2-row gaps between image rows are re-zeroed each step
        # (cheap, and correct under megacore partitioning of the batch axis).
        zrow = jnp.zeros((Wp + 1, cout), jnp.float32)
        zgap = jnp.zeros((2, cout), jnp.float32)
        pad_ref[pl.ds(0, Wp + 1), :] = zrow                       # top border
        pad_ref[pl.ds((H + 1) * Wp + 1, Wp + 1), :] = zrow        # bottom border
        for y in range(H):
            base = (y + 1) * Wp + 1
            pad_ref[pl.ds(base, W), :] = h[y * W:(y + 1) * W, :]  # data row
            pad_ref[pl.ds(base + W, 2), :] = zgap                 # inter-row gap

        # ---- conv2: 3x3 as 9 contiguous shifted-slice matmuls ----------------
        # Accumulator row q = y*Wp + x holds output pixel (y, x); the 2 junk
        # columns per row (x >= W) are never read back.
        for t in range(9):
            ky, kx = t // 3, t % 3
            off = ky * Wp + kx
            patch = pad_ref[pl.ds(off, nrow), :].astype(jnp.bfloat16)
            tap = jnp.dot(patch, w2_ref[t], preferred_element_type=jnp.float32)
            if t == 0:
                acc_ref[...] = tap
            else:
                acc_ref[...] += tap

        # ---- shortcut + bias + residual, stored row by row --------------------
        if has_shortcut:
            xs = jnp.dot(xf.astype(jnp.bfloat16), ws_ref[...],
                         preferred_element_type=jnp.float32) + bs_ref[...]
        else:
            xs = xf                                           # cin == cout here
        # TODO(synk): the conv_shortcut=True (3x3 shortcut) variant is not
        # wired up; default configs (out_channels=None or nin_shortcut) only.
        res = xs + cb2_ref[...]                               # (npix, cout) f32
        for y in range(H):
            row = acc_ref[pl.ds(y * Wp, W), :] + res[y * W:(y + 1) * W, :]
            o_ref[0, y, :, :] = row.astype(o_ref.dtype)

    return kernel


def post_quant_resnet_block_nhwc(x_nhwc, params, *, groups=32, eps=1e-6):
    """Fused PostQuantResnetBlock forward on NHWC input (preferred entry)."""
    B, H, W, cin = x_nhwc.shape
    cout = params["w1"].shape[1]
    assert cin % groups == 0 and cout % groups == 0
    has_shortcut = cin != cout
    G = groups
    Wp = W + 2
    npad = (H + 2) * Wp + 2          # rows of the flat zero-padded buffer

    f32, bf16 = jnp.float32, jnp.bfloat16
    # One-hot channel->group matrices keep GroupNorm stats on the MXU.
    min_mat = (jnp.arange(cin)[:, None] // (cin // G)
               == jnp.arange(G)[None, :]).astype(f32)
    mout_mat = (jnp.arange(cout)[:, None] // (cout // G)
                == jnp.arange(G)[None, :]).astype(f32)

    inputs = [x_nhwc, min_mat,
              params["gamma1"].reshape(1, cin).astype(f32),
              params["beta1"].reshape(1, cin).astype(f32),
              params["w1"].astype(bf16),
              params["b1"].reshape(1, cout).astype(f32),
              mout_mat,
              params["gamma2"].reshape(1, cout).astype(f32),
              params["beta2"].reshape(1, cout).astype(f32),
              params["w2"].reshape(9, cout, cout).astype(bf16),   # HWIO, ky-major
              params["b2"].reshape(1, cout).astype(f32)]
    in_specs = [
        pl.BlockSpec((1, H, W, cin), lambda b: (b, 0, 0, 0)),
        pl.BlockSpec((cin, G), lambda b: (0, 0)),
        pl.BlockSpec((1, cin), lambda b: (0, 0)),
        pl.BlockSpec((1, cin), lambda b: (0, 0)),
        pl.BlockSpec((cin, cout), lambda b: (0, 0)),
        pl.BlockSpec((1, cout), lambda b: (0, 0)),
        pl.BlockSpec((cout, G), lambda b: (0, 0)),
        pl.BlockSpec((1, cout), lambda b: (0, 0)),
        pl.BlockSpec((1, cout), lambda b: (0, 0)),
        pl.BlockSpec((9, cout, cout), lambda b: (0, 0, 0)),
        pl.BlockSpec((1, cout), lambda b: (0, 0)),
    ]
    if has_shortcut:
        inputs += [params["ws"].astype(bf16),
                   params["bs"].reshape(1, cout).astype(f32)]
        in_specs += [pl.BlockSpec((cin, cout), lambda b: (0, 0)),
                     pl.BlockSpec((1, cout), lambda b: (0, 0))]

    kernel = _make_kernel(H, W, cin, cout, G, eps, has_shortcut)
    return pl.pallas_call(
        kernel,
        out_shape=jax.ShapeDtypeStruct((B, H, W, cout), x_nhwc.dtype),
        grid_spec=pltpu.PrefetchScalarGridSpec(
            num_scalar_prefetch=0,
            grid=(B,),
            in_specs=in_specs,
            out_specs=pl.BlockSpec((1, H, W, cout), lambda b: (b, 0, 0, 0)),
            scratch_shapes=[pltpu.VMEM((npad, cout), jnp.float32),     # pad buf
                            pltpu.VMEM((H * Wp, cout), jnp.float32)],  # conv acc
        ),
        compiler_params=pltpu.CompilerParams(
            dimension_semantics=("parallel",),
            vmem_limit_bytes=32 * 1024 * 1024),
    )(*inputs)


def post_quant_resnet_block(x_nchw, params, *, groups=32, eps=1e-6):
    """PyTorch-layout (NCHW) adapter around the NHWC kernel.

    TODO(synk): prefer `post_quant_resnet_block_nhwc` end-to-end in the model;
    these two boundary transposes are full HBM passes.
    """
    x = jnp.transpose(x_nchw, (0, 2, 3, 1))
    y = post_quant_resnet_block_nhwc(x, params, groups=groups, eps=eps)
    return jnp.transpose(y, (0, 3, 1, 2))


# ---------------- pure-JAX reference (for correctness check) ----------------
def _group_norm_ref(x, gamma, beta, groups, eps):
    B, C, H, W = x.shape
    xg = x.reshape(B, groups, C // groups, H, W)
    mean = xg.mean(axis=(2, 3, 4), keepdims=True)
    var = xg.var(axis=(2, 3, 4), keepdims=True)
    y = ((xg - mean) / jnp.sqrt(var + eps)).reshape(B, C, H, W)
    return y * gamma[None, :, None, None] + beta[None, :, None, None]


def _ref_forward(x, params, groups=32, eps=1e-6):
    h = _group_norm_ref(x, params["gamma1"], params["beta1"], groups, eps)
    h = h * jax.nn.sigmoid(h)
    h = jnp.einsum("bchw,cd->bdhw", h, params["w1"]) \
        + params["b1"][None, :, None, None]
    h = _group_norm_ref(h, params["gamma2"], params["beta2"], groups, eps)
    h = h * jax.nn.sigmoid(h)
    h = lax.conv_general_dilated(h, params["w2"], window_strides=(1, 1),
                                 padding="SAME",
                                 dimension_numbers=("NCHW", "HWIO", "NCHW"))
    h = h + params["b2"][None, :, None, None]
    if "ws" in params:
        x = jnp.einsum("bchw,cd->bdhw", x, params["ws"]) \
            + params["bs"][None, :, None, None]
    return x + h


def _init_params(key, cin, cout):
    ks = jax.random.split(key, 10)
    p = {
        "gamma1": 1.0 + 0.1 * jax.random.normal(ks[0], (cin,), jnp.float32),
        "beta1": 0.1 * jax.random.normal(ks[1], (cin,), jnp.float32),
        "w1": jax.random.normal(ks[2], (cin, cout), jnp.float32) / jnp.sqrt(cin),
        "b1": 0.1 * jax.random.normal(ks[3], (cout,), jnp.float32),
        "gamma2": 1.0 + 0.1 * jax.random.normal(ks[4], (cout,), jnp.float32),
        "beta2": 0.1 * jax.random.normal(ks[5], (cout,), jnp.float32),
        # conv2 weight stored HWIO: (3, 3, cout, cout)
        "w2": jax.random.normal(ks[6], (3, 3, cout, cout), jnp.float32)
              / jnp.sqrt(9.0 * cout),
        "b2": 0.1 * jax.random.normal(ks[7], (cout,), jnp.float32),
    }
    if cin != cout:  # nin_shortcut (1x1 conv)
        p["ws"] = jax.random.normal(ks[8], (cin, cout), jnp.float32) / jnp.sqrt(cin)
        p["bs"] = 0.1 * jax.random.normal(ks[9], (cout,), jnp.float32)
    return p


def _max_rel_err(a, b):
    return float(jnp.max(jnp.abs(a - b) / (1.0 + jnp.abs(b))))


if __name__ == "__main__":
    key = jax.random.PRNGKey(0)
    kx1, kp1, kx2, kp2 = jax.random.split(key, 4)

    # Config A: cin == cout == 128 (lane-dense output, 128-wide MXU contractions).
    # (GroupNorm(32) forces channels to be a multiple of 32.)
    B, C, H, W = 2, 128, 16, 16
    x = jax.random.normal(kx1, (B, C, H, W), jnp.float32)      # PyTorch NCHW
    params = _init_params(kp1, C, C)
    out = jax.block_until_ready(post_quant_resnet_block(x, params))
    ref = _ref_forward(x, params)
    assert out.shape == ref.shape
    err = _max_rel_err(out, ref)
    assert err < 5e-2, f"config A mismatch: {err}"               # bf16 matmul tol

    # Config B: cin != cout exercises the nin_shortcut (1x1) path.
    B2, Cin2, Cout2, H2, W2 = 1, 64, 128, 8, 8
    x2 = jax.random.normal(kx2, (B2, Cin2, H2, W2), jnp.float32)
    params2 = _init_params(kp2, Cin2, Cout2)
    out2 = jax.block_until_ready(post_quant_resnet_block(x2, params2))
    ref2 = _ref_forward(x2, params2)
    assert out2.shape == ref2.shape
    err2 = _max_rel_err(out2, ref2)
    assert err2 < 5e-2, f"config B mismatch: {err2}"

    print("KERNEL_OK")
</pallas_src>

<mosaic_0001>
module attributes {stable_mosaic.version = 11 : i64} {
  func.func @kernel(%arg0: i32, %arg1: memref<1x16x16x128xf32, #tpu.memory_space<vmem>>, %arg2: memref<128x32xf32, #tpu.memory_space<vmem>>, %arg3: memref<1x128xf32, #tpu.memory_space<vmem>>, %arg4: memref<1x128xf32, #tpu.memory_space<vmem>>, %arg5: memref<128x128xbf16, #tpu.memory_space<vmem>>, %arg6: memref<1x128xf32, #tpu.memory_space<vmem>>, %arg7: memref<128x32xf32, #tpu.memory_space<vmem>>, %arg8: memref<1x128xf32, #tpu.memory_space<vmem>>, %arg9: memref<1x128xf32, #tpu.memory_space<vmem>>, %arg10: memref<9x128x128xbf16, #tpu.memory_space<vmem>>, %arg11: memref<1x128xf32, #tpu.memory_space<vmem>>, %arg12: memref<1x16x16x128xf32, #tpu.memory_space<vmem>>, %arg13: memref<326x128xf32, #tpu.memory_space<vmem>>, %arg14: memref<288x128xf32, #tpu.memory_space<vmem>>) attributes {dimension_semantics = [#tpu.dimension_semantics<parallel>], iteration_bounds = array<i64: 2>, scalar_prefetch = 0 : i64, scratch_operands = 2 : i64, tpu.core_type = #tpu.core_type<tc>, window_params = [{transform_indices = @transform_0, window_bounds = array<i64: 1, 16, 16, 128>}, {pipeline_mode = #tpu.pipeline_mode<synchronous>, transform_indices = @transform_1, window_bounds = array<i64: 128, 32>}, {pipeline_mode = #tpu.pipeline_mode<synchronous>, transform_indices = @transform_2, window_bounds = array<i64: 1, 128>}, {pipeline_mode = #tpu.pipeline_mode<synchronous>, transform_indices = @transform_3, window_bounds = array<i64: 1, 128>}, {pipeline_mode = #tpu.pipeline_mode<synchronous>, transform_indices = @transform_4, window_bounds = array<i64: 128, 128>}, {pipeline_mode = #tpu.pipeline_mode<synchronous>, transform_indices = @transform_5, window_bounds = array<i64: 1, 128>}, {pipeline_mode = #tpu.pipeline_mode<synchronous>, transform_indices = @transform_6, window_bounds = array<i64: 128, 32>}, {pipeline_mode = #tpu.pipeline_mode<synchronous>, transform_indices = @transform_7, window_bounds = array<i64: 1, 128>}, {pipeline_mode = #tpu.pipeline_mode<synchronous>, transform_indices = @transform_8, window_bounds = array<i64: 1, 128>}, {pipeline_mode = #tpu.pipeline_mode<synchronous>, transform_indices = @transform_9, window_bounds = array<i64: 9, 128, 128>}, {pipeline_mode = #tpu.pipeline_mode<synchronous>, transform_indices = @transform_10, window_bounds = array<i64: 1, 128>}, {transform_indices = @transform_11, window_bounds = array<i64: 1, 16, 16, 128>}]} {
    %c0 = arith.constant 0 : index
    %c0_0 = arith.constant 0 : index
    %c0_1 = arith.constant 0 : index
    %c0_2 = arith.constant 0 : index
    %0 = vector.load %arg1[%c0, %c0_0, %c0_1, %c0_2] : memref<1x16x16x128xf32, #tpu.memory_space<vmem>>, vector<1x16x16x128xf32>
    %1 = vector.shape_cast %0 : vector<1x16x16x128xf32> to vector<16x16x128xf32>
    %2 = vector.shape_cast %1 : vector<16x16x128xf32> to vector<256x128xf32>
    %c0_3 = arith.constant 0 : index
    %c0_4 = arith.constant 0 : index
    %3 = vector.load %arg2[%c0_3, %c0_4] : memref<128x32xf32, #tpu.memory_space<vmem>>, vector<128x32xf32>
    %c0_5 = arith.constant 0 : index
    %c0_6 = arith.constant 0 : index
    %4 = vector.load %arg3[%c0_5, %c0_6] : memref<1x128xf32, #tpu.memory_space<vmem>>, vector<1x128xf32>
    %c0_7 = arith.constant 0 : index
    %c0_8 = arith.constant 0 : index
    %5 = vector.load %arg4[%c0_7, %c0_8] : memref<1x128xf32, #tpu.memory_space<vmem>>, vector<1x128xf32>
    %cst = arith.constant dense<0.000000e+00> : vector<128xf32>
    %6 = vector.multi_reduction <add>, %2, %cst [0] : vector<256x128xf32> to vector<128xf32>
    %7 = vector.shape_cast %6 : vector<128xf32> to vector<1x128xf32>
    %8 = arith.mulf %2, %2 : vector<256x128xf32>
    %cst_9 = arith.constant dense<0.000000e+00> : vector<128xf32>
    %9 = vector.multi_reduction <add>, %8, %cst_9 [0] : vector<256x128xf32> to vector<128xf32>
    %10 = vector.shape_cast %9 : vector<128xf32> to vector<1x128xf32>
    %cst_10 = arith.constant dense<0.000000e+00> : vector<1x32xf32>
    %11 = tpu.matmul %7, %3, %cst_10 {dimension_numbers = #tpu.dot_dimension_numbers<[1], [0], [0], [1], [0, 0, 1, 1], [], []>} : vector<1x128xf32>, vector<128x32xf32>, vector<1x32xf32> -> vector<1x32xf32>
    %cst_11 = arith.constant dense<0.000000e+00> : vector<1x32xf32>
    %12 = tpu.matmul %10, %3, %cst_11 {dimension_numbers = #tpu.dot_dimension_numbers<[1], [0], [0], [1], [0, 0, 1, 1], [], []>} : vector<1x128xf32>, vector<128x32xf32>, vector<1x32xf32> -> vector<1x32xf32>
    %cst_12 = arith.constant 1.024000e+03 : f32
    %13 = vector.broadcast %cst_12 : f32 to vector<1x32xf32>
    %14 = arith.divf %11, %13 : vector<1x32xf32>
    %cst_13 = arith.constant 1.024000e+03 : f32
    %15 = vector.broadcast %cst_13 : f32 to vector<1x32xf32>
    %16 = arith.divf %12, %15 : vector<1x32xf32>
    %17 = arith.mulf %14, %14 : vector<1x32xf32>
    %18 = arith.subf %16, %17 : vector<1x32xf32>
    %cst_14 = arith.constant 9.99999997E-7 : f32
    %19 = vector.broadcast %cst_14 : f32 to vector<1x32xf32>
    %20 = arith.addf %18, %19 : vector<1x32xf32>
    %21 = math.rsqrt %20 : vector<1x32xf32>
    %22 = tpu.transpose %3, [1, 0] : vector<128x32xf32> -> vector<32x128xf32>
    %cst_15 = arith.constant dense<0.000000e+00> : vector<1x128xf32>
    %23 = tpu.matmul %14, %22, %cst_15 {dimension_numbers = #tpu.dot_dimension_numbers<[1], [0], [0], [1], [0, 0, 1, 1], [], []>} : vector<1x32xf32>, vector<32x128xf32>, vector<1x128xf32> -> vector<1x128xf32>
    %cst_16 = arith.constant dense<0.000000e+00> : vector<1x128xf32>
    %24 = tpu.matmul %21, %22, %cst_16 {dimension_numbers = #tpu.dot_dimension_numbers<[1], [0], [0], [1], [0, 0, 1, 1], [], []>} : vector<1x32xf32>, vector<32x128xf32>, vector<1x128xf32> -> vector<1x128xf32>
    %25 = vector.broadcast %23 : vector<1x128xf32> to vector<256x128xf32>
    %26 = arith.subf %2, %25 : vector<256x128xf32>
    %27 = vector.broadcast %24 : vector<1x128xf32> to vector<256x128xf32>
    %28 = arith.mulf %26, %27 : vector<256x128xf32>
    %29 = vector.broadcast %4 : vector<1x128xf32> to vector<256x128xf32>
    %30 = arith.mulf %28, %29 : vector<256x128xf32>
    %31 = vector.broadcast %5 : vector<1x128xf32> to vector<256x128xf32>
    %32 = arith.addf %30, %31 : vector<256x128xf32>
    %33 = arith.negf %32 : vector<256x128xf32>
    %34 = math.exp %33 : vector<256x128xf32>
    %cst_17 = arith.constant 1.000000e+00 : f32
    %35 = vector.broadcast %cst_17 : f32 to vector<256x128xf32>
    %36 = arith.addf %35, %34 : vector<256x128xf32>
    %37 = arith.divf %35, %36 : vector<256x128xf32>
    %38 = arith.mulf %32, %37 : vector<256x128xf32>
    %39 = arith.truncf %38 : vector<256x128xf32> to vector<256x128xbf16>
    %c0_18 = arith.constant 0 : index
    %c0_19 = arith.constant 0 : index
    %40 = vector.load %arg5[%c0_18, %c0_19] : memref<128x128xbf16, #tpu.memory_space<vmem>>, vector<128x128xbf16>
    %cst_20 = arith.constant dense<0.000000e+00> : vector<256x128xf32>
    %41 = tpu.matmul %39, %40, %cst_20 {dimension_numbers = #tpu.dot_dimension_numbers<[1], [0], [0], [1], [0, 0, 1, 1], [], []>} : vector<256x128xbf16>, vector<128x128xbf16>, vector<256x128xf32> -> vector<256x128xf32>
    %c0_21 = arith.constant 0 : index
    %c0_22 = arith.constant 0 : index
    %42 = vector.load %arg6[%c0_21, %c0_22] : memref<1x128xf32, #tpu.memory_space<vmem>>, vector<1x128xf32>
    %43 = vector.broadcast %42 : vector<1x128xf32> to vector<256x128xf32>
    %44 = arith.addf %41, %43 : vector<256x128xf32>
    %c0_23 = arith.constant 0 : index
    %c0_24 = arith.constant 0 : index
    %45 = vector.load %arg7[%c0_23, %c0_24] : memref<128x32xf32, #tpu.memory_space<vmem>>, vector<128x32xf32>
    %c0_25 = arith.constant 0 : index
    %c0_26 = arith.constant 0 : index
    %46 = vector.load %arg8[%c0_25, %c0_26] : memref<1x128xf32, #tpu.memory_space<vmem>>, vector<1x128xf32>
    %c0_27 = arith.constant 0 : index
    %c0_28 = arith.constant 0 : index
    %47 = vector.load %arg9[%c0_27, %c0_28] : memref<1x128xf32, #tpu.memory_space<vmem>>, vector<1x128xf32>
    %cst_29 = arith.constant dense<0.000000e+00> : vector<128xf32>
    %48 = vector.multi_reduction <add>, %44, %cst_29 [0] : vector<256x128xf32> to vector<128xf32>
    %49 = vector.shape_cast %48 : vector<128xf32> to vector<1x128xf32>
    %50 = arith.mulf %44, %44 : vector<256x128xf32>
    %cst_30 = arith.constant dense<0.000000e+00> : vector<128xf32>
    %51 = vector.multi_reduction <add>, %50, %cst_30 [0] : vector<256x128xf32> to vector<128xf32>
    %52 = vector.shape_cast %51 : vector<128xf32> to vector<1x128xf32>
    %cst_31 = arith.constant dense<0.000000e+00> : vector<1x32xf32>
    %53 = tpu.matmul %49, %45, %cst_31 {dimension_numbers = #tpu.dot_dimension_numbers<[1], [0], [0], [1], [0, 0, 1, 1], [], []>} : vector<1x128xf32>, vector<128x32xf32>, vector<1x32xf32> -> vector<1x32xf32>
    %cst_32 = arith.constant dense<0.000000e+00> : vector<1x32xf32>
    %54 = tpu.matmul %52, %45, %cst_32 {dimension_numbers = #tpu.dot_dimension_numbers<[1], [0], [0], [1], [0, 0, 1, 1], [], []>} : vector<1x128xf32>, vector<128x32xf32>, vector<1x32xf32> -> vector<1x32xf32>
    %cst_33 = arith.constant 1.024000e+03 : f32
    %55 = vector.broadcast %cst_33 : f32 to vector<1x32xf32>
    %56 = arith.divf %53, %55 : vector<1x32xf32>
    %cst_34 = arith.constant 1.024000e+03 : f32
    %57 = vector.broadcast %cst_34 : f32 to vector<1x32xf32>
    %58 = arith.divf %54, %57 : vector<1x32xf32>
    %59 = arith.mulf %56, %56 : vector<1x32xf32>
    %60 = arith.subf %58, %59 : vector<1x32xf32>
    %cst_35 = arith.constant 9.99999997E-7 : f32
    %61 = vector.broadcast %cst_35 : f32 to vector<1x32xf32>
    %62 = arith.addf %60, %61 : vector<1x32xf32>
    %63 = math.rsqrt %62 : vector<1x32xf32>
    %64 = tpu.transpose %45, [1, 0] : vector<128x32xf32> -> vector<32x128xf32>
    %cst_36 = arith.constant dense<0.000000e+00> : vector<1x128xf32>
    %65 = tpu.matmul %56, %64, %cst_36 {dimension_numbers = #tpu.dot_dimension_numbers<[1], [0], [0], [1], [0, 0, 1, 1], [], []>} : vector<1x32xf32>, vector<32x128xf32>, vector<1x128xf32> -> vector<1x128xf32>
    %cst_37 = arith.constant dense<0.000000e+00> : vector<1x128xf32>
    %66 = tpu.matmul %63, %64, %cst_37 {dimension_numbers = #tpu.dot_dimension_numbers<[1], [0], [0], [1], [0, 0, 1, 1], [], []>} : vector<1x32xf32>, vector<32x128xf32>, vector<1x128xf32> -> vector<1x128xf32>
    %67 = vector.broadcast %65 : vector<1x128xf32> to vector<256x128xf32>
    %68 = arith.subf %44, %67 : vector<256x128xf32>
    %69 = vector.broadcast %66 : vector<1x128xf32> to vector<256x128xf32>
    %70 = arith.mulf %68, %69 : vector<256x128xf32>
    %71 = vector.broadcast %46 : vector<1x128xf32> to vector<256x128xf32>
    %72 = arith.mulf %70, %71 : vector<256x128xf32>
    %73 = vector.broadcast %47 : vector<1x128xf32> to vector<256x128xf32>
    %74 = arith.addf %72, %73 : vector<256x128xf32>
    %75 = arith.negf %74 : vector<256x128xf32>
    %76 = math.exp %75 : vector<256x128xf32>
    %cst_38 = arith.constant 1.000000e+00 : f32
    %77 = vector.broadcast %cst_38 : f32 to vector<256x128xf32>
    %78 = arith.addf %77, %76 : vector<256x128xf32>
    %79 = arith.divf %77, %78 : vector<256x128xf32>
    %80 = arith.mulf %74, %79 : vector<256x128xf32>
    %cst_39 = arith.constant 0.000000e+00 : f32
    %81 = vector.broadcast %cst_39 : f32 to vector<19x128xf32>
    %cst_40 = arith.constant 0.000000e+00 : f32
    %82 = vector.broadcast %cst_40 : f32 to vector<2x128xf32>
    %c0_41 = arith.constant 0 : index
    %c0_42 = arith.constant 0 : index
    %83 = vector.load %arg13[%c0_41, %c0_42] : memref<326x128xf32, #tpu.memory_space<vmem>>, vector<19x128xf32>
    tpu.vector_store %arg13[%c0_41, %c0_42], %81 {strides = array<i32>} : memref<326x128xf32, #tpu.memory_space<vmem>>, vector<19x128xf32>,
    %c307 = arith.constant 307 : index
    %c0_43 = arith.constant 0 : index
    %84 = vector.load %arg13[%c307, %c0_43] : memref<326x128xf32, #tpu.memory_space<vmem>>, vector<19x128xf32>
    tpu.vector_store %arg13[%c307, %c0_43], %81 {strides = array<i32>} : memref<326x128xf32, #tpu.memory_space<vmem>>, vector<19x128xf32>,
    %85 = vector.extract_strided_slice %80 {offsets = [0, 0], sizes = [16, 128], strides = [1, 1]} : vector<256x128xf32> to vector<16x128xf32>
    %c19 = arith.constant 19 : index
    %c0_44 = arith.constant 0 : index
    %86 = vector.load %arg13[%c19, %c0_44] : memref<326x128xf32, #tpu.memory_space<vmem>>, vector<16x128xf32>
    tpu.vector_store %arg13[%c19, %c0_44], %85 {strides = array<i32>} : memref<326x128xf32, #tpu.memory_space<vmem>>, vector<16x128xf32>,
    %c35 = arith.constant 35 : index
    %c0_45 = arith.constant 0 : index
    %87 = vector.load %arg13[%c35, %c0_45] : memref<326x128xf32, #tpu.memory_space<vmem>>, vector<2x128xf32>
    tpu.vector_store %arg13[%c35, %c0_45], %82 {strides = array<i32>} : memref<326x128xf32, #tpu.memory_space<vmem>>, vector<2x128xf32>,
    %88 = vector.extract_strided_slice %80 {offsets = [16, 0], sizes = [16, 128], strides = [1, 1]} : vector<256x128xf32> to vector<16x128xf32>
    %c37 = arith.constant 37 : index
    %c0_46 = arith.constant 0 : index
    %89 = vector.load %arg13[%c37, %c0_46] : memref<326x128xf32, #tpu.memory_space<vmem>>, vector<16x128xf32>
    tpu.vector_store %arg13[%c37, %c0_46], %88 {strides = array<i32>} : memref<326x128xf32, #tpu.memory_space<vmem>>, vector<16x128xf32>,
    %c53 = arith.constant 53 : index
    %c0_47 = arith.constant 0 : index
    %90 = vector.load %arg13[%c53, %c0_47] : memref<326x128xf32, #tpu.memory_space<vmem>>, vector<2x128xf32>
    tpu.vector_store %arg13[%c53, %c0_47], %82 {strides = array<i32>} : memref<326x128xf32, #tpu.memory_space<vmem>>, vector<2x128xf32>,
    %91 = vector.extract_strided_slice %80 {offsets = [32, 0], sizes = [16, 128], strides = [1, 1]} : vector<256x128xf32> to vector<16x128xf32>
    %c55 = arith.constant 55 : index
    %c0_48 = arith.constant 0 : index
    %92 = vector.load %arg13[%c55, %c0_48] : memref<326x128xf32, #tpu.memory_space<vmem>>, vector<16x128xf32>
    tpu.vector_store %arg13[%c55, %c0_48], %91 {strides = array<i32>} : memref<326x128xf32, #tpu.memory_space<vmem>>, vector<16x128xf32>,
    %c71 = arith.constant 71 : index
    %c0_49 = arith.constant 0 : index
    %93 = vector.load %arg13[%c71, %c0_49] : memref<326x128xf32, #tpu.memory_space<vmem>>, vector<2x128xf32>
    tpu.vector_store %arg13[%c71, %c0_49], %82 {strides = array<i32>} : memref<326x128xf32, #tpu.memory_space<vmem>>, vector<2x128xf32>,
    %94 = vector.extract_strided_slice %80 {offsets = [48, 0], sizes = [16, 128], strides = [1, 1]} : vector<256x128xf32> to vector<16x128xf32>
    %c73 = arith.constant 73 : index
    %c0_50 = arith.constant 0 : index
    %95 = vector.load %arg13[%c73, %c0_50] : memref<326x128xf32, #tpu.memory_space<vmem>>, vector<16x128xf32>
    tpu.vector_store %arg13[%c73, %c0_50], %94 {strides = array<i32>} : memref<326x128xf32, #tpu.memory_space<vmem>>, vector<16x128xf32>,
    %c89 = arith.constant 89 : index
    %c0_51 = arith.constant 0 : index
    %96 = vector.load %arg13[%c89, %c0_51] : memref<326x128xf32, #tpu.memory_space<vmem>>, vector<2x128xf32>
    tpu.vector_store %arg13[%c89, %c0_51], %82 {strides = array<i32>} : memref<326x128xf32, #tpu.memory_space<vmem>>, vector<2x128xf32>,
    %97 = vector.extract_strided_slice %80 {offsets = [64, 0], sizes = [16, 128], strides = [1, 1]} : vector<256x128xf32> to vector<16x128xf32>
    %c91 = arith.constant 91 : index
    %c0_52 = arith.constant 0 : index
    %98 = vector.load %arg13[%c91, %c0_52] : memref<326x128xf32, #tpu.memory_space<vmem>>, vector<16x128xf32>
    tpu.vector_store %arg13[%c91, %c0_52], %97 {strides = array<i32>} : memref<326x128xf32, #tpu.memory_space<vmem>>, vector<16x128xf32>,
    %c107 = arith.constant 107 : index
    %c0_53 = arith.constant 0 : index
    %99 = vector.load %arg13[%c107, %c0_53] : memref<326x128xf32, #tpu.memory_space<vmem>>, vector<2x128xf32>
    tpu.vector_store %arg13[%c107, %c0_53], %82 {strides = array<i32>} : memref<326x128xf32, #tpu.memory_space<vmem>>, vector<2x128xf32>,
    %100 = vector.extract_strided_slice %80 {offsets = [80, 0], sizes = [16, 128], strides = [1, 1]} : vector<256x128xf32> to vector<16x128xf32>
    %c109 = arith.constant 109 : index
    %c0_54 = arith.constant 0 : index
    %101 = vector.load %arg13[%c109, %c0_54] : memref<326x128xf32, #tpu.memory_space<vmem>>, vector<16x128xf32>
    tpu.vector_store %arg13[%c109, %c0_54], %100 {strides = array<i32>} : memref<326x128xf32, #tpu.memory_space<vmem>>, vector<16x128xf32>,
    %c125 = arith.constant 125 : index
    %c0_55 = arith.constant 0 : index
    %102 = vector.load %arg13[%c125, %c0_55] : memref<326x128xf32, #tpu.memory_space<vmem>>, vector<2x128xf32>
    tpu.vector_store %arg13[%c125, %c0_55], %82 {strides = array<i32>} : memref<326x128xf32, #tpu.memory_space<vmem>>, vector<2x128xf32>,
    %103 = vector.extract_strided_slice %80 {offsets = [96, 0], sizes = [16, 128], strides = [1, 1]} : vector<256x128xf32> to vector<16x128xf32>
    %c127 = arith.constant 127 : index
    %c0_56 = arith.constant 0 : index
    %104 = vector.load %arg13[%c127, %c0_56] : memref<326x128xf32, #tpu.memory_space<vmem>>, vector<16x128xf32>
    tpu.vector_store %arg13[%c127, %c0_56], %103 {strides = array<i32>} : memref<326x128xf32, #tpu.memory_space<vmem>>, vector<16x128xf32>,
    %c143 = arith.constant 143 : index
    %c0_57 = arith.constant 0 : index
    %105 = vector.load %arg13[%c143, %c0_57] : memref<326x128xf32, #tpu.memory_space<vmem>>, vector<2x128xf32>
    tpu.vector_store %arg13[%c143, %c0_57], %82 {strides = array<i32>} : memref<326x128xf32, #tpu.memory_space<vmem>>, vector<2x128xf32>,
    %106 = vector.extract_strided_slice %80 {offsets = [112, 0], sizes = [16, 128], strides = [1, 1]} : vector<256x128xf32> to vector<16x128xf32>
    %c145 = arith.constant 145 : index
    %c0_58 = arith.constant 0 : index
    %107 = vector.load %arg13[%c145, %c0_58] : memref<326x128xf32, #tpu.memory_space<vmem>>, vector<16x128xf32>
    tpu.vector_store %arg13[%c145, %c0_58], %106 {strides = array<i32>} : memref<326x128xf32, #tpu.memory_space<vmem>>, vector<16x128xf32>,
    %c161 = arith.constant 161 : index
    %c0_59 = arith.constant 0 : index
    %108 = vector.load %arg13[%c161, %c0_59] : memref<326x128xf32, #tpu.memory_space<vmem>>, vector<2x128xf32>
    tpu.vector_store %arg13[%c161, %c0_59], %82 {strides = array<i32>} : memref<326x128xf32, #tpu.memory_space<vmem>>, vector<2x128xf32>,
    %109 = vector.extract_strided_slice %80 {offsets = [128, 0], sizes = [16, 128], strides = [1, 1]} : vector<256x128xf32> to vector<16x128xf32>
    %c163 = arith.constant 163 : index
    %c0_60 = arith.constant 0 : index
    %110 = vector.load %arg13[%c163, %c0_60] : memref<326x128xf32, #tpu.memory_space<vmem>>, vector<16x128xf32>
    tpu.vector_store %arg13[%c163, %c0_60], %109 {strides = array<i32>} : memref<326x128xf32, #tpu.memory_space<vmem>>, vector<16x128xf32>,
    %c179 = arith.constant 179 : index
    %c0_61 = arith.constant 0 : index
    %111 = vector.load %arg13[%c179, %c0_61] : memref<326x128xf32, #tpu.memory_space<vmem>>, vector<2x128xf32>
    tpu.vector_store %arg13[%c179, %c0_61], %82 {strides = array<i32>} : memref<326x128xf32, #tpu.memory_space<vmem>>, vector<2x128xf32>,
    %112 = vector.extract_strided_slice %80 {offsets = [144, 0], sizes = [16, 128], strides = [1, 1]} : vector<256x128xf32> to vector<16x128xf32>
    %c181 = arith.constant 181 : index
    %c0_62 = arith.constant 0 : index
    %113 = vector.load %arg13[%c181, %c0_62] : memref<326x128xf32, #tpu.memory_space<vmem>>, vector<16x128xf32>
    tpu.vector_store %arg13[%c181, %c0_62], %112 {strides = array<i32>} : memref<326x128xf32, #tpu.memory_space<vmem>>, vector<16x128xf32>,
    %c197 = arith.constant 197 : index
    %c0_63 = arith.constant 0 : index
    %114 = vector.load %arg13[%c197, %c0_63] : memref<326x128xf32, #tpu.memory_space<vmem>>, vector<2x128xf32>
    tpu.vector_store %arg13[%c197, %c0_63], %82 {strides = array<i32>} : memref<326x128xf32, #tpu.memory_space<vmem>>, vector<2x128xf32>,
    %115 = vector.extract_strided_slice %80 {offsets = [160, 0], sizes = [16, 128], strides = [1, 1]} : vector<256x128xf32> to vector<16x128xf32>
    %c199 = arith.constant 199 : index
    %c0_64 = arith.constant 0 : index
    %116 = vector.load %arg13[%c199, %c0_64] : memref<326x128xf32, #tpu.memory_space<vmem>>, vector<16x128xf32>
    tpu.vector_store %arg13[%c199, %c0_64], %115 {strides = array<i32>} : memref<326x128xf32, #tpu.memory_space<vmem>>, vector<16x128xf32>,
    %c215 = arith.constant 215 : index
    %c0_65 = arith.constant 0 : index
    %117 = vector.load %arg13[%c215, %c0_65] : memref<326x128xf32, #tpu.memory_space<vmem>>, vector<2x128xf32>
    tpu.vector_store %arg13[%c215, %c0_65], %82 {strides = array<i32>} : memref<326x128xf32, #tpu.memory_space<vmem>>, vector<2x128xf32>,
    %118 = vector.extract_strided_slice %80 {offsets = [176, 0], sizes = [16, 128], strides = [1, 1]} : vector<256x128xf32> to vector<16x128xf32>
    %c217 = arith.constant 217 : index
    %c0_66 = arith.constant 0 : index
    %119 = vector.load %arg13[%c217, %c0_66] : memref<326x128xf32, #tpu.memory_space<vmem>>, vector<16x128xf32>
    tpu.vector_store %arg13[%c217, %c0_66], %118 {strides = array<i32>} : memref<326x128xf32, #tpu.memory_space<vmem>>, vector<16x128xf32>,
    %c233 = arith.constant 233 : index
    %c0_67 = arith.constant 0 : index
    %120 = vector.load %arg13[%c233, %c0_67] : memref<326x128xf32, #tpu.memory_space<vmem>>, vector<2x128xf32>
    tpu.vector_store %arg13[%c233, %c0_67], %82 {strides = array<i32>} : memref<326x128xf32, #tpu.memory_space<vmem>>, vector<2x128xf32>,
    %121 = vector.extract_strided_slice %80 {offsets = [192, 0], sizes = [16, 128], strides = [1, 1]} : vector<256x128xf32> to vector<16x128xf32>
    %c235 = arith.constant 235 : index
    %c0_68 = arith.constant 0 : index
    %122 = vector.load %arg13[%c235, %c0_68] : memref<326x128xf32, #tpu.memory_space<vmem>>, vector<16x128xf32>
    tpu.vector_store %arg13[%c235, %c0_68], %121 {strides = array<i32>} : memref<326x128xf32, #tpu.memory_space<vmem>>, vector<16x128xf32>,
    %c251 = arith.constant 251 : index
    %c0_69 = arith.constant 0 : index
    %123 = vector.load %arg13[%c251, %c0_69] : memref<326x128xf32, #tpu.memory_space<vmem>>, vector<2x128xf32>
    tpu.vector_store %arg13[%c251, %c0_69], %82 {strides = array<i32>} : memref<326x128xf32, #tpu.memory_space<vmem>>, vector<2x128xf32>,
    %124 = vector.extract_strided_slice %80 {offsets = [208, 0], sizes = [16, 128], strides = [1, 1]} : vector<256x128xf32> to vector<16x128xf32>
    %c253 = arith.constant 253 : index
    %c0_70 = arith.constant 0 : index
    %125 = vector.load %arg13[%c253, %c0_70] : memref<326x128xf32, #tpu.memory_space<vmem>>, vector<16x128xf32>
    tpu.vector_store %arg13[%c253, %c0_70], %124 {strides = array<i32>} : memref<326x128xf32, #tpu.memory_space<vmem>>, vector<16x128xf32>,
    %c269 = arith.constant 269 : index
    %c0_71 = arith.constant 0 : index
    %126 = vector.load %arg13[%c269, %c0_71] : memref<326x128xf32, #tpu.memory_space<vmem>>, vector<2x128xf32>
    tpu.vector_store %arg13[%c269, %c0_71], %82 {strides = array<i32>} : memref<326x128xf32, #tpu.memory_space<vmem>>, vector<2x128xf32>,
    %127 = vector.extract_strided_slice %80 {offsets = [224, 0], sizes = [16, 128], strides = [1, 1]} : vector<256x128xf32> to vector<16x128xf32>
    %c271 = arith.constant 271 : index
    %c0_72 = arith.constant 0 : index
    %128 = vector.load %arg13[%c271, %c0_72] : memref<326x128xf32, #tpu.memory_space<vmem>>, vector<16x128xf32>
    tpu.vector_store %arg13[%c271, %c0_72], %127 {strides = array<i32>} : memref<326x128xf32, #tpu.memory_space<vmem>>, vector<16x128xf32>,
    %c287 = arith.constant 287 : index
    %c0_73 = arith.constant 0 : index
    %129 = vector.load %arg13[%c287, %c0_73] : memref<326x128xf32, #tpu.memory_space<vmem>>, vector<2x128xf32>
    tpu.vector_store %arg13[%c287, %c0_73], %82 {strides = array<i32>} : memref<326x128xf32, #tpu.memory_space<vmem>>, vector<2x128xf32>,
    %130 = vector.extract_strided_slice %80 {offsets = [240, 0], sizes = [16, 128], strides = [1, 1]} : vector<256x128xf32> to vector<16x128xf32>
    %c289 = arith.constant 289 : index
    %c0_74 = arith.constant 0 : index
    %131 = vector.load %arg13[%c289, %c0_74] : memref<326x128xf32, #tpu.memory_space<vmem>>, vector<16x128xf32>
    tpu.vector_store %arg13[%c289, %c0_74], %130 {strides = array<i32>} : memref<326x128xf32, #tpu.memory_space<vmem>>, vector<16x128xf32>,
    %c305 = arith.constant 305 : index
    %c0_75 = arith.constant 0 : index
    %132 = vector.load %arg13[%c305, %c0_75] : memref<326x128xf32, #tpu.memory_space<vmem>>, vector<2x128xf32>
    tpu.vector_store %arg13[%c305, %c0_75], %82 {strides = array<i32>} : memref<326x128xf32, #tpu.memory_space<vmem>>, vector<2x128xf32>,
    %c0_76 = arith.constant 0 : index
    %c0_77 = arith.constant 0 : index
    %133 = vector.load %arg13[%c0_76, %c0_77] : memref<326x128xf32, #tpu.memory_space<vmem>>, vector<288x128xf32>
    %134 = arith.truncf %133 : vector<288x128xf32> to vector<288x128xbf16>
    %c0_78 = arith.constant 0 : index
    %c0_79 = arith.constant 0 : index
    %c0_80 = arith.constant 0 : index
    %135 = vector.load %arg10[%c0_78, %c0_79, %c0_80] : memref<9x128x128xbf16, #tpu.memory_space<vmem>>, vector<1x128x128xbf16>
    %136 = vector.shape_cast %135 : vector<1x128x128xbf16> to vector<128x128xbf16>
    %cst_81 = arith.constant dense<0.000000e+00> : vector<288x128xf32>
    %137 = tpu.matmul %134, %136, %cst_81 {dimension_numbers = #tpu.dot_dimension_numbers<[1], [0], [0], [1], [0, 0, 1, 1], [], []>} : vector<288x128xbf16>, vector<128x128xbf16>, vector<288x128xf32> -> vector<288x128xf32>
    %c0_82 = arith.constant 0 : index
    %c0_83 = arith.constant 0 : index
    %138 = vector.load %arg14[%c0_82, %c0_83] : memref<288x128xf32, #tpu.memory_space<vmem>>, vector<288x128xf32>
    tpu.vector_store %arg14[%c0_82, %c0_83], %137 {strides = array<i32>} : memref<288x128xf32, #tpu.memory_space<vmem>>, vector<288x128xf32>,
    %c1 = arith.constant 1 : index
    %c0_84 = arith.constant 0 : index
    %139 = vector.load %arg13[%c1, %c0_84] : memref<326x128xf32, #tpu.memory_space<vmem>>, vector<288x128xf32>
    %140 = arith.truncf %139 : vector<288x128xf32> to vector<288x128xbf16>
    %c1_85 = arith.constant 1 : index
    %c0_86 = arith.constant 0 : index
    %c0_87 = arith.constant 0 : index
    %141 = vector.load %arg10[%c1_85, %c0_86, %c0_87] : memref<9x128x128xbf16, #tpu.memory_space<vmem>>, vector<1x128x128xbf16>
    %142 = vector.shape_cast %141 : vector<1x128x128xbf16> to vector<128x128xbf16>
    %cst_88 = arith.constant dense<0.000000e+00> : vector<288x128xf32>
    %143 = tpu.matmul %140, %142, %cst_88 {dimension_numbers = #tpu.dot_dimension_numbers<[1], [0], [0], [1], [0, 0, 1, 1], [], []>} : vector<288x128xbf16>, vector<128x128xbf16>, vector<288x128xf32> -> vector<288x128xf32>
    %c0_89 = arith.constant 0 : index
    %c0_90 = arith.constant 0 : index
    %144 = vector.load %arg14[%c0_89, %c0_90] : memref<288x128xf32, #tpu.memory_space<vmem>>, vector<288x128xf32>
    %145 = arith.addf %144, %143 : vector<288x128xf32>
    %c0_91 = arith.constant 0 : index
    %c0_92 = arith.constant 0 : index
    %146 = vector.load %arg14[%c0_91, %c0_92] : memref<288x128xf32, #tpu.memory_space<vmem>>, vector<288x128xf32>
    tpu.vector_store %arg14[%c0_91, %c0_92], %145 {strides = array<i32>} : memref<288x128xf32, #tpu.memory_space<vmem>>, vector<288x128xf32>,
    %c2 = arith.constant 2 : index
    %c0_93 = arith.constant 0 : index
    %147 = vector.load %arg13[%c2, %c0_93] : memref<326x128xf32, #tpu.memory_space<vmem>>, vector<288x128xf32>
    %148 = arith.truncf %147 : vector<288x128xf32> to vector<288x128xbf16>
    %c2_94 = arith.constant 2 : index
    %c0_95 = arith.constant 0 : index
    %c0_96 = arith.constant 0 : index
    %149 = vector.load %arg10[%c2_94, %c0_95, %c0_96] : memref<9x128x128xbf16, #tpu.memory_space<vmem>>, vector<1x128x128xbf16>
    %150 = vector.shape_cast %149 : vector<1x128x128xbf16> to vector<128x128xbf16>
    %cst_97 = arith.constant dense<0.000000e+00> : vector<288x128xf32>
    %151 = tpu.matmul %148, %150, %cst_97 {dimension_numbers = #tpu.dot_dimension_numbers<[1], [0], [0], [1], [0, 0, 1, 1], [], []>} : vector<288x128xbf16>, vector<128x128xbf16>, vector<288x128xf32> -> vector<288x128xf32>
    %c0_98 = arith.constant 0 : index
    %c0_99 = arith.constant 0 : index
    %152 = vector.load %arg14[%c0_98, %c0_99] : memref<288x128xf32, #tpu.memory_space<vmem>>, vector<288x128xf32>
    %153 = arith.addf %152, %151 : vector<288x128xf32>
    %c0_100 = arith.constant 0 : index
    %c0_101 = arith.constant 0 : index
    %154 = vector.load %arg14[%c0_100, %c0_101] : memref<288x128xf32, #tpu.memory_space<vmem>>, vector<288x128xf32>
    tpu.vector_store %arg14[%c0_100, %c0_101], %153 {strides = array<i32>} : memref<288x128xf32, #tpu.memory_space<vmem>>, vector<288x128xf32>,
    %c18 = arith.constant 18 : index
    %c0_102 = arith.constant 0 : index
    %155 = vector.load %arg13[%c18, %c0_102] : memref<326x128xf32, #tpu.memory_space<vmem>>, vector<288x128xf32>
    %156 = arith.truncf %155 : vector<288x128xf32> to vector<288x128xbf16>
    %c3 = arith.constant 3 : index
    %c0_103 = arith.constant 0 : index
    %c0_104 = arith.constant 0 : index
    %157 = vector.load %arg10[%c3, %c0_103, %c0_104] : memref<9x128x128xbf16, #tpu.memory_space<vmem>>, vector<1x128x128xbf16>
    %158 = vector.shape_cast %157 : vector<1x128x128xbf16> to vector<128x128xbf16>
    %cst_105 = arith.constant dense<0.000000e+00> : vector<288x128xf32>
    %159 = tpu.matmul %156, %158, %cst_105 {dimension_numbers = #tpu.dot_dimension_numbers<[1], [0], [0], [1], [0, 0, 1, 1], [], []>} : vector<288x128xbf16>, vector<128x128xbf16>, vector<288x128xf32> -> vector<288x128xf32>
    %c0_106 = arith.constant 0 : index
    %c0_107 = arith.constant 0 : index
    %160 = vector.load %arg14[%c0_106, %c0_107] : memref<288x128xf32, #tpu.memory_space<vmem>>, vector<288x128xf32>
    %161 = arith.addf %160, %159 : vector<288x128xf32>
    %c0_108 = arith.constant 0 : index
    %c0_109 = arith.constant 0 : index
    %162 = vector.load %arg14[%c0_108, %c0_109] : memref<288x128xf32, #tpu.memory_space<vmem>>, vector<288x128xf32>
    tpu.vector_store %arg14[%c0_108, %c0_109], %161 {strides = array<i32>} : memref<288x128xf32, #tpu.memory_space<vmem>>, vector<288x128xf32>,
    %c19_110 = arith.constant 19 : index
    %c0_111 = arith.constant 0 : index
    %163 = vector.load %arg13[%c19_110, %c0_111] : memref<326x128xf32, #tpu.memory_space<vmem>>, vector<288x128xf32>
    %164 = arith.truncf %163 : vector<288x128xf32> to vector<288x128xbf16>
    %c4 = arith.constant 4 : index
    %c0_112 = arith.constant 0 : index
    %c0_113 = arith.constant 0 : index
    %165 = vector.load %arg10[%c4, %c0_112, %c0_113] : memref<9x128x128xbf16, #tpu.memory_space<vmem>>, vector<1x128x128xbf16>
    %166 = vector.shape_cast %165 : vector<1x128x128xbf16> to vector<128x128xbf16>
    %cst_114 = arith.constant dense<0.000000e+00> : vector<288x128xf32>
    %167 = tpu.matmul %164, %166, %cst_114 {dimension_numbers = #tpu.dot_dimension_numbers<[1], [0], [0], [1], [0, 0, 1, 1], [], []>} : vector<288x128xbf16>, vector<128x128xbf16>, vector<288x128xf32> -> vector<288x128xf32>
    %c0_115 = arith.constant 0 : index
    %c0_116 = arith.constant 0 : index
    %168 = vector.load %arg14[%c0_115, %c0_116] : memref<288x128xf32, #tpu.memory_space<vmem>>, vector<288x128xf32>
    %169 = arith.addf %168, %167 : vector<288x128xf32>
    %c0_117 = arith.constant 0 : index
    %c0_118 = arith.constant 0 : index
    %170 = vector.load %arg14[%c0_117, %c0_118] : memref<288x128xf32, #tpu.memory_space<vmem>>, vector<288x128xf32>
    tpu.vector_store %arg14[%c0_117, %c0_118], %169 {strides = array<i32>} : memref<288x128xf32, #tpu.memory_space<vmem>>, vector<288x128xf32>,
    %c20 = arith.constant 20 : index
    %c0_119 = arith.constant 0 : index
    %171 = vector.load %arg13[%c20, %c0_119] : memref<326x128xf32, #tpu.memory_space<vmem>>, vector<288x128xf32>
    %172 = arith.truncf %171 : vector<288x128xf32> to vector<288x128xbf16>
    %c5 = arith.constant 5 : index
    %c0_120 = arith.constant 0 : index
    %c0_121 = arith.constant 0 : index
    %173 = vector.load %arg10[%c5, %c0_120, %c0_121] : memref<9x128x128xbf16, #tpu.memory_space<vmem>>, vector<1x128x128xbf16>
    %174 = vector.shape_cast %173 : vector<1x128x128xbf16> to vector<128x128xbf16>
    %cst_122 = arith.constant dense<0.000000e+00> : vector<288x128xf32>
    %175 = tpu.matmul %172, %174, %cst_122 {dimension_numbers = #tpu.dot_dimension_numbers<[1], [0], [0], [1], [0, 0, 1, 1], [], []>} : vector<288x128xbf16>, vector<128x128xbf16>, vector<288x128xf32> -> vector<288x128xf32>
    %c0_123 = arith.constant 0 : index
    %c0_124 = arith.constant 0 : index
    %176 = vector.load %arg14[%c0_123, %c0_124] : memref<288x128xf32, #tpu.memory_space<vmem>>, vector<288x128xf32>
    %177 = arith.addf %176, %175 : vector<288x128xf32>
    %c0_125 = arith.constant 0 : index
    %c0_126 = arith.constant 0 : index
    %178 = vector.load %arg14[%c0_125, %c0_126] : memref<288x128xf32, #tpu.memory_space<vmem>>, vector<288x128xf32>
    tpu.vector_store %arg14[%c0_125, %c0_126], %177 {strides = array<i32>} : memref<288x128xf32, #tpu.memory_space<vmem>>, vector<288x128xf32>,
    %c36 = arith.constant 36 : index
    %c0_127 = arith.constant 0 : index
    %179 = vector.load %arg13[%c36, %c0_127] : memref<326x128xf32, #tpu.memory_space<vmem>>, vector<288x128xf32>
    %180 = arith.truncf %179 : vector<288x128xf32> to vector<288x128xbf16>
    %c6 = arith.constant 6 : index
    %c0_128 = arith.constant 0 : index
    %c0_129 = arith.constant 0 : index
    %181 = vector.load %arg10[%c6, %c0_128, %c0_129] : memref<9x128x128xbf16, #tpu.memory_space<vmem>>, vector<1x128x128xbf16>
    %182 = vector.shape_cast %181 : vector<1x128x128xbf16> to vector<128x128xbf16>
    %cst_130 = arith.constant dense<0.000000e+00> : vector<288x128xf32>
    %183 = tpu.matmul %180, %182, %cst_130 {dimension_numbers = #tpu.dot_dimension_numbers<[1], [0], [0], [1], [0, 0, 1, 1], [], []>} : vector<288x128xbf16>, vector<128x128xbf16>, vector<288x128xf32> -> vector<288x128xf32>
    %c0_131 = arith.constant 0 : index
    %c0_132 = arith.constant 0 : index
    %184 = vector.load %arg14[%c0_131, %c0_132] : memref<288x128xf32, #tpu.memory_space<vmem>>, vector<288x128xf32>
    %185 = arith.addf %184, %183 : vector<288x128xf32>
    %c0_133 = arith.constant 0 : index
    %c0_134 = arith.constant 0 : index
    %186 = vector.load %arg14[%c0_133, %c0_134] : memref<288x128xf32, #tpu.memory_space<vmem>>, vector<288x128xf32>
    tpu.vector_store %arg14[%c0_133, %c0_134], %185 {strides = array<i32>} : memref<288x128xf32, #tpu.memory_space<vmem>>, vector<288x128xf32>,
    %c37_135 = arith.constant 37 : index
    %c0_136 = arith.constant 0 : index
    %187 = vector.load %arg13[%c37_135, %c0_136] : memref<326x128xf32, #tpu.memory_space<vmem>>, vector<288x128xf32>
    %188 = arith.truncf %187 : vector<288x128xf32> to vector<288x128xbf16>
    %c7 = arith.constant 7 : index
    %c0_137 = arith.constant 0 : index
    %c0_138 = arith.constant 0 : index
    %189 = vector.load %arg10[%c7, %c0_137, %c0_138] : memref<9x128x128xbf16, #tpu.memory_space<vmem>>, vector<1x128x128xbf16>
    %190 = vector.shape_cast %189 : vector<1x128x128xbf16> to vector<128x128xbf16>
    %cst_139 = arith.constant dense<0.000000e+00> : vector<288x128xf32>
    %191 = tpu.matmul %188, %190, %cst_139 {dimension_numbers = #tpu.dot_dimension_numbers<[1], [0], [0], [1], [0, 0, 1, 1], [], []>} : vector<288x128xbf16>, vector<128x128xbf16>, vector<288x128xf32> -> vector<288x128xf32>
    %c0_140 = arith.constant 0 : index
    %c0_141 = arith.constant 0 : index
    %192 = vector.load %arg14[%c0_140, %c0_141] : memref<288x128xf32, #tpu.memory_space<vmem>>, vector<288x128xf32>
    %193 = arith.addf %192, %191 : vector<288x128xf32>
    %c0_142 = arith.constant 0 : index
    %c0_143 = arith.constant 0 : index
    %194 = vector.load %arg14[%c0_142, %c0_143] : memref<288x128xf32, #tpu.memory_space<vmem>>, vector<288x128xf32>
    tpu.vector_store %arg14[%c0_142, %c0_143], %193 {strides = array<i32>} : memref<288x128xf32, #tpu.memory_space<vmem>>, vector<288x128xf32>,
    %c38 = arith.constant 38 : index
    %c0_144 = arith.constant 0 : index
    %195 = vector.load %arg13[%c38, %c0_144] : memref<326x128xf32, #tpu.memory_space<vmem>>, vector<288x128xf32>
    %196 = arith.truncf %195 : vector<288x128xf32> to vector<288x128xbf16>
    %c8 = arith.constant 8 : index
    %c0_145 = arith.constant 0 : index
    %c0_146 = arith.constant 0 : index
    %197 = vector.load %arg10[%c8, %c0_145, %c0_146] : memref<9x128x128xbf16, #tpu.memory_space<vmem>>, vector<1x128x128xbf16>
    %198 = vector.shape_cast %197 : vector<1x128x128xbf16> to vector<128x128xbf16>
    %cst_147 = arith.constant dense<0.000000e+00> : vector<288x128xf32>
    %199 = tpu.matmul %196, %198, %cst_147 {dimension_numbers = #tpu.dot_dimension_numbers<[1], [0], [0], [1], [0, 0, 1, 1], [], []>} : vector<288x128xbf16>, vector<128x128xbf16>, vector<288x128xf32> -> vector<288x128xf32>
    %c0_148 = arith.constant 0 : index
    %c0_149 = arith.constant 0 : index
    %200 = vector.load %arg14[%c0_148, %c0_149] : memref<288x128xf32, #tpu.memory_space<vmem>>, vector<288x128xf32>
    %201 = arith.addf %200, %199 : vector<288x128xf32>
    %c0_150 = arith.constant 0 : index
    %c0_151 = arith.constant 0 : index
    %202 = vector.load %arg14[%c0_150, %c0_151] : memref<288x128xf32, #tpu.memory_space<vmem>>, vector<288x128xf32>
    tpu.vector_store %arg14[%c0_150, %c0_151], %201 {strides = array<i32>} : memref<288x128xf32, #tpu.memory_space<vmem>>, vector<288x128xf32>,
    %c0_152 = arith.constant 0 : index
    %c0_153 = arith.constant 0 : index
    %203 = vector.load %arg11[%c0_152, %c0_153] : memref<1x128xf32, #tpu.memory_space<vmem>>, vector<1x128xf32>
    %204 = vector.broadcast %203 : vector<1x128xf32> to vector<256x128xf32>
    %205 = arith.addf %2, %204 : vector<256x128xf32>
    %c0_154 = arith.constant 0 : index
    %c0_155 = arith.constant 0 : index
    %206 = vector.load %arg14[%c0_154, %c0_155] : memref<288x128xf32, #tpu.memory_space<vmem>>, vector<16x128xf32>
    %207 = vector.extract_strided_slice %205 {offsets = [0, 0], sizes = [16, 128], strides = [1, 1]} : vector<256x128xf32> to vector<16x128xf32>
    %208 = arith.addf %206, %207 : vector<16x128xf32>
    %c0_156 = arith.constant 0 : index
    %c0_157 = arith.constant 0 : index
    %c0_158 = arith.constant 0 : index
    %c0_159 = arith.constant 0 : index
    %209 = vector.load %arg12[%c0_156, %c0_157, %c0_158, %c0_159] : memref<1x16x16x128xf32, #tpu.memory_space<vmem>>, vector<1x1x16x128xf32>
    %210 = vector.shape_cast %209 : vector<1x1x16x128xf32> to vector<16x128xf32>
    %211 = vector.shape_cast %208 : vector<16x128xf32> to vector<1x1x16x128xf32>
    tpu.vector_store %arg12[%c0_156, %c0_157, %c0_158, %c0_159], %211 {strides = array<i32>} : memref<1x16x16x128xf32, #tpu.memory_space<vmem>>, vector<1x1x16x128xf32>,
    %c18_160 = arith.constant 18 : index
    %c0_161 = arith.constant 0 : index
    %212 = vector.load %arg14[%c18_160, %c0_161] : memref<288x128xf32, #tpu.memory_space<vmem>>, vector<16x128xf32>
    %213 = vector.extract_strided_slice %205 {offsets = [16, 0], sizes = [16, 128], strides = [1, 1]} : vector<256x128xf32> to vector<16x128xf32>
    %214 = arith.addf %212, %213 : vector<16x128xf32>
    %c0_162 = arith.constant 0 : index
    %c1_163 = arith.constant 1 : index
    %c0_164 = arith.constant 0 : index
    %c0_165 = arith.constant 0 : index
    %215 = vector.load %arg12[%c0_162, %c1_163, %c0_164, %c0_165] : memref<1x16x16x128xf32, #tpu.memory_space<vmem>>, vector<1x1x16x128xf32>
    %216 = vector.shape_cast %215 : vector<1x1x16x128xf32> to vector<16x128xf32>
    %217 = vector.shape_cast %214 : vector<16x128xf32> to vector<1x1x16x128xf32>
    tpu.vector_store %arg12[%c0_162, %c1_163, %c0_164, %c0_165], %217 {strides = array<i32>} : memref<1x16x16x128xf32, #tpu.memory_space<vmem>>, vector<1x1x16x128xf32>,
    %c36_166 = arith.constant 36 : index
    %c0_167 = arith.constant 0 : index
    %218 = vector.load %arg14[%c36_166, %c0_167] : memref<288x128xf32, #tpu.memory_space<vmem>>, vector<16x128xf32>
    %219 = vector.extract_strided_slice %205 {offsets = [32, 0], sizes = [16, 128], strides = [1, 1]} : vector<256x128xf32> to vector<16x128xf32>
    %220 = arith.addf %218, %219 : vector<16x128xf32>
    %c0_168 = arith.constant 0 : index
    %c2_169 = arith.constant 2 : index
    %c0_170 = arith.constant 0 : index
    %c0_171 = arith.constant 0 : index
    %221 = vector.load %arg12[%c0_168, %c2_169, %c0_170, %c0_171] : memref<1x16x16x128xf32, #tpu.memory_space<vmem>>, vector<1x1x16x128xf32>
    %222 = vector.shape_cast %221 : vector<1x1x16x128xf32> to vector<16x128xf32>
    %223 = vector.shape_cast %220 : vector<16x128xf32> to vector<1x1x16x128xf32>
    tpu.vector_store %arg12[%c0_168, %c2_169, %c0_170, %c0_171], %223 {strides = array<i32>} : memref<1x16x16x128xf32, #tpu.memory_space<vmem>>, vector<1x1x16x128xf32>,
    %c54 = arith.constant 54 : index
    %c0_172 = arith.constant 0 : index
    %224 = vector.load %arg14[%c54, %c0_172] : memref<288x128xf32, #tpu.memory_space<vmem>>, vector<16x128xf32>
    %225 = vector.extract_strided_slice %205 {offsets = [48, 0], sizes = [16, 128], strides = [1, 1]} : vector<256x128xf32> to vector<16x128xf32>
    %226 = arith.addf %224, %225 : vector<16x128xf32>
    %c0_173 = arith.constant 0 : index
    %c3_174 = arith.constant 3 : index
    %c0_175 = arith.constant 0 : index
    %c0_176 = arith.constant 0 : index
    %227 = vector.load %arg12[%c0_173, %c3_174, %c0_175, %c0_176] : memref<1x16x16x128xf32, #tpu.memory_space<vmem>>, vector<1x1x16x128xf32>
    %228 = vector.shape_cast %227 : vector<1x1x16x128xf32> to vector<16x128xf32>
    %229 = vector.shape_cast %226 : vector<16x128xf32> to vector<1x1x16x128xf32>
    tpu.vector_store %arg12[%c0_173, %c3_174, %c0_175, %c0_176], %229 {strides = array<i32>} : memref<1x16x16x128xf32, #tpu.memory_space<vmem>>, vector<1x1x16x128xf32>,
    %c72 = arith.constant 72 : index
    %c0_177 = arith.constant 0 : index
    %230 = vector.load %arg14[%c72, %c0_177] : memref<288x128xf32, #tpu.memory_space<vmem>>, vector<16x128xf32>
    %231 = vector.extract_strided_slice %205 {offsets = [64, 0], sizes = [16, 128], strides = [1, 1]} : vector<256x128xf32> to vector<16x128xf32>
    %232 = arith.addf %230, %231 : vector<16x128xf32>
    %c0_178 = arith.constant 0 : index
    %c4_179 = arith.constant 4 : index
    %c0_180 = arith.constant 0 : index
    %c0_181 = arith.constant 0 : index
    %233 = vector.load %arg12[%c0_178, %c4_179, %c0_180, %c0_181] : memref<1x16x16x128xf32, #tpu.memory_space<vmem>>, vector<1x1x16x128xf32>
    %234 = vector.shape_cast %233 : vector<1x1x16x128xf32> to vector<16x128xf32>
    %235 = vector.shape_cast %232 : vector<16x128xf32> to vector<1x1x16x128xf32>
    tpu.vector_store %arg12[%c0_178, %c4_179, %c0_180, %c0_181], %235 {strides = array<i32>} : memref<1x16x16x128xf32, #tpu.memory_space<vmem>>, vector<1x1x16x128xf32>,
    %c90 = arith.constant 90 : index
    %c0_182 = arith.constant 0 : index
    %236 = vector.load %arg14[%c90, %c0_182] : memref<288x128xf32, #tpu.memory_space<vmem>>, vector<16x128xf32>
    %237 = vector.extract_strided_slice %205 {offsets = [80, 0], sizes = [16, 128], strides = [1, 1]} : vector<256x128xf32> to vector<16x128xf32>
    %238 = arith.addf %236, %237 : vector<16x128xf32>
    %c0_183 = arith.constant 0 : index
    %c5_184 = arith.constant 5 : index
    %c0_185 = arith.constant 0 : index
    %c0_186 = arith.constant 0 : index
    %239 = vector.load %arg12[%c0_183, %c5_184, %c0_185, %c0_186] : memref<1x16x16x128xf32, #tpu.memory_space<vmem>>, vector<1x1x16x128xf32>
    %240 = vector.shape_cast %239 : vector<1x1x16x128xf32> to vector<16x128xf32>
    %241 = vector.shape_cast %238 : vector<16x128xf32> to vector<1x1x16x128xf32>
    tpu.vector_store %arg12[%c0_183, %c5_184, %c0_185, %c0_186], %241 {strides = array<i32>} : memref<1x16x16x128xf32, #tpu.memory_space<vmem>>, vector<1x1x16x128xf32>,
    %c108 = arith.constant 108 : index
    %c0_187 = arith.constant 0 : index
    %242 = vector.load %arg14[%c108, %c0_187] : memref<288x128xf32, #tpu.memory_space<vmem>>, vector<16x128xf32>
    %243 = vector.extract_strided_slice %205 {offsets = [96, 0], sizes = [16, 128], strides = [1, 1]} : vector<256x128xf32> to vector<16x128xf32>
    %244 = arith.addf %242, %243 : vector<16x128xf32>
    %c0_188 = arith.constant 0 : index
    %c6_189 = arith.constant 6 : index
    %c0_190 = arith.constant 0 : index
    %c0_191 = arith.constant 0 : index
    %245 = vector.load %arg12[%c0_188, %c6_189, %c0_190, %c0_191] : memref<1x16x16x128xf32, #tpu.memory_space<vmem>>, vector<1x1x16x128xf32>
    %246 = vector.shape_cast %245 : vector<1x1x16x128xf32> to vector<16x128xf32>
    %247 = vector.shape_cast %244 : vector<16x128xf32> to vector<1x1x16x128xf32>
    tpu.vector_store %arg12[%c0_188, %c6_189, %c0_190, %c0_191], %247 {strides = array<i32>} : memref<1x16x16x128xf32, #tpu.memory_space<vmem>>, vector<1x1x16x128xf32>,
    %c126 = arith.constant 126 : index
    %c0_192 = arith.constant 0 : index
    %248 = vector.load %arg14[%c126, %c0_192] : memref<288x128xf32, #tpu.memory_space<vmem>>, vector<16x128xf32>
    %249 = vector.extract_strided_slice %205 {offsets = [112, 0], sizes = [16, 128], strides = [1, 1]} : vector<256x128xf32> to vector<16x128xf32>
    %250 = arith.addf %248, %249 : vector<16x128xf32>
    %c0_193 = arith.constant 0 : index
    %c7_194 = arith.constant 7 : index
    %c0_195 = arith.constant 0 : index
    %c0_196 = arith.constant 0 : index
    %251 = vector.load %arg12[%c0_193, %c7_194, %c0_195, %c0_196] : memref<1x16x16x128xf32, #tpu.memory_space<vmem>>, vector<1x1x16x128xf32>
    %252 = vector.shape_cast %251 : vector<1x1x16x128xf32> to vector<16x128xf32>
    %253 = vector.shape_cast %250 : vector<16x128xf32> to vector<1x1x16x128xf32>
    tpu.vector_store %arg12[%c0_193, %c7_194, %c0_195, %c0_196], %253 {strides = array<i32>} : memref<1x16x16x128xf32, #tpu.memory_space<vmem>>, vector<1x1x16x128xf32>,
    %c144 = arith.constant 144 : index
    %c0_197 = arith.constant 0 : index
    %254 = vector.load %arg14[%c144, %c0_197] : memref<288x128xf32, #tpu.memory_space<vmem>>, vector<16x128xf32>
    %255 = vector.extract_strided_slice %205 {offsets = [128, 0], sizes = [16, 128], strides = [1, 1]} : vector<256x128xf32> to vector<16x128xf32>
    %256 = arith.addf %254, %255 : vector<16x128xf32>
    %c0_198 = arith.constant 0 : index
    %c8_199 = arith.constant 8 : index
    %c0_200 = arith.constant 0 : index
    %c0_201 = arith.constant 0 : index
    %257 = vector.load %arg12[%c0_198, %c8_199, %c0_200, %c0_201] : memref<1x16x16x128xf32, #tpu.memory_space<vmem>>, vector<1x1x16x128xf32>
    %258 = vector.shape_cast %257 : vector<1x1x16x128xf32> to vector<16x128xf32>
    %259 = vector.shape_cast %256 : vector<16x128xf32> to vector<1x1x16x128xf32>
    tpu.vector_store %arg12[%c0_198, %c8_199, %c0_200, %c0_201], %259 {strides = array<i32>} : memref<1x16x16x128xf32, #tpu.memory_space<vmem>>, vector<1x1x16x128xf32>,
    %c162 = arith.constant 162 : index
    %c0_202 = arith.constant 0 : index
    %260 = vector.load %arg14[%c162, %c0_202] : memref<288x128xf32, #tpu.memory_space<vmem>>, vector<16x128xf32>
    %261 = vector.extract_strided_slice %205 {offsets = [144, 0], sizes = [16, 128], strides = [1, 1]} : vector<256x128xf32> to vector<16x128xf32>
    %262 = arith.addf %260, %261 : vector<16x128xf32>
    %c0_203 = arith.constant 0 : index
    %c9 = arith.constant 9 : index
    %c0_204 = arith.constant 0 : index
    %c0_205 = arith.constant 0 : index
    %263 = vector.load %arg12[%c0_203, %c9, %c0_204, %c0_205] : memref<1x16x16x128xf32, #tpu.memory_space<vmem>>, vector<1x1x16x128xf32>
    %264 = vector.shape_cast %263 : vector<1x1x16x128xf32> to vector<16x128xf32>
    %265 = vector.shape_cast %262 : vector<16x128xf32> to vector<1x1x16x128xf32>
    tpu.vector_store %arg12[%c0_203, %c9, %c0_204, %c0_205], %265 {strides = array<i32>} : memref<1x16x16x128xf32, #tpu.memory_space<vmem>>, vector<1x1x16x128xf32>,
    %c180 = arith.constant 180 : index
    %c0_206 = arith.constant 0 : index
    %266 = vector.load %arg14[%c180, %c0_206] : memref<288x128xf32, #tpu.memory_space<vmem>>, vector<16x128xf32>
    %267 = vector.extract_strided_slice %205 {offsets = [160, 0], sizes = [16, 128], strides = [1, 1]} : vector<256x128xf32> to vector<16x128xf32>
    %268 = arith.addf %266, %267 : vector<16x128xf32>
    %c0_207 = arith.constant 0 : index
    %c10 = arith.constant 10 : index
    %c0_208 = arith.constant 0 : index
    %c0_209 = arith.constant 0 : index
    %269 = vector.load %arg12[%c0_207, %c10, %c0_208, %c0_209] : memref<1x16x16x128xf32, #tpu.memory_space<vmem>>, vector<1x1x16x128xf32>
    %270 = vector.shape_cast %269 : vector<1x1x16x128xf32> to vector<16x128xf32>
    %271 = vector.shape_cast %268 : vector<16x128xf32> to vector<1x1x16x128xf32>
    tpu.vector_store %arg12[%c0_207, %c10, %c0_208, %c0_209], %271 {strides = array<i32>} : memref<1x16x16x128xf32, #tpu.memory_space<vmem>>, vector<1x1x16x128xf32>,
    %c198 = arith.constant 198 : index
    %c0_210 = arith.constant 0 : index
    %272 = vector.load %arg14[%c198, %c0_210] : memref<288x128xf32, #tpu.memory_space<vmem>>, vector<16x128xf32>
    %273 = vector.extract_strided_slice %205 {offsets = [176, 0], sizes = [16, 128], strides = [1, 1]} : vector<256x128xf32> to vector<16x128xf32>
    %274 = arith.addf %272, %273 : vector<16x128xf32>
    %c0_211 = arith.constant 0 : index
    %c11 = arith.constant 11 : index
    %c0_212 = arith.constant 0 : index
    %c0_213 = arith.constant 0 : index
    %275 = vector.load %arg12[%c0_211, %c11, %c0_212, %c0_213] : memref<1x16x16x128xf32, #tpu.memory_space<vmem>>, vector<1x1x16x128xf32>
    %276 = vector.shape_cast %275 : vector<1x1x16x128xf32> to vector<16x128xf32>
    %277 = vector.shape_cast %274 : vector<16x128xf32> to vector<1x1x16x128xf32>
    tpu.vector_store %arg12[%c0_211, %c11, %c0_212, %c0_213], %277 {strides = array<i32>} : memref<1x16x16x128xf32, #tpu.memory_space<vmem>>, vector<1x1x16x128xf32>,
    %c216 = arith.constant 216 : index
    %c0_214 = arith.constant 0 : index
    %278 = vector.load %arg14[%c216, %c0_214] : memref<288x128xf32, #tpu.memory_space<vmem>>, vector<16x128xf32>
    %279 = vector.extract_strided_slice %205 {offsets = [192, 0], sizes = [16, 128], strides = [1, 1]} : vector<256x128xf32> to vector<16x128xf32>
    %280 = arith.addf %278, %279 : vector<16x128xf32>
    %c0_215 = arith.constant 0 : index
    %c12 = arith.constant 12 : index
    %c0_216 = arith.constant 0 : index
    %c0_217 = arith.constant 0 : index
    %281 = vector.load %arg12[%c0_215, %c12, %c0_216, %c0_217] : memref<1x16x16x128xf32, #tpu.memory_space<vmem>>, vector<1x1x16x128xf32>
    %282 = vector.shape_cast %281 : vector<1x1x16x128xf32> to vector<16x128xf32>
    %283 = vector.shape_cast %280 : vector<16x128xf32> to vector<1x1x16x128xf32>
    tpu.vector_store %arg12[%c0_215, %c12, %c0_216, %c0_217], %283 {strides = array<i32>} : memref<1x16x16x128xf32, #tpu.memory_space<vmem>>, vector<1x1x16x128xf32>,
    %c234 = arith.constant 234 : index
    %c0_218 = arith.constant 0 : index
    %284 = vector.load %arg14[%c234, %c0_218] : memref<288x128xf32, #tpu.memory_space<vmem>>, vector<16x128xf32>
    %285 = vector.extract_strided_slice %205 {offsets = [208, 0], sizes = [16, 128], strides = [1, 1]} : vector<256x128xf32> to vector<16x128xf32>
    %286 = arith.addf %284, %285 : vector<16x128xf32>
    %c0_219 = arith.constant 0 : index
    %c13 = arith.constant 13 : index
    %c0_220 = arith.constant 0 : index
    %c0_221 = arith.constant 0 : index
    %287 = vector.load %arg12[%c0_219, %c13, %c0_220, %c0_221] : memref<1x16x16x128xf32, #tpu.memory_space<vmem>>, vector<1x1x16x128xf32>
    %288 = vector.shape_cast %287 : vector<1x1x16x128xf32> to vector<16x128xf32>
    %289 = vector.shape_cast %286 : vector<16x128xf32> to vector<1x1x16x128xf32>
    tpu.vector_store %arg12[%c0_219, %c13, %c0_220, %c0_221], %289 {strides = array<i32>} : memref<1x16x16x128xf32, #tpu.memory_space<vmem>>, vector<1x1x16x128xf32>,
    %c252 = arith.constant 252 : index
    %c0_222 = arith.constant 0 : index
    %290 = vector.load %arg14[%c252, %c0_222] : memref<288x128xf32, #tpu.memory_space<vmem>>, vector<16x128xf32>
    %291 = vector.extract_strided_slice %205 {offsets = [224, 0], sizes = [16, 128], strides = [1, 1]} : vector<256x128xf32> to vector<16x128xf32>
    %292 = arith.addf %290, %291 : vector<16x128xf32>
    %c0_223 = arith.constant 0 : index
    %c14 = arith.constant 14 : index
    %c0_224 = arith.constant 0 : index
    %c0_225 = arith.constant 0 : index
    %293 = vector.load %arg12[%c0_223, %c14, %c0_224, %c0_225] : memref<1x16x16x128xf32, #tpu.memory_space<vmem>>, vector<1x1x16x128xf32>
    %294 = vector.shape_cast %293 : vector<1x1x16x128xf32> to vector<16x128xf32>
    %295 = vector.shape_cast %292 : vector<16x128xf32> to vector<1x1x16x128xf32>
    tpu.vector_store %arg12[%c0_223, %c14, %c0_224, %c0_225], %295 {strides = array<i32>} : memref<1x16x16x128xf32, #tpu.memory_space<vmem>>, vector<1x1x16x128xf32>,
    %c270 = arith.constant 270 : index
    %c0_226 = arith.constant 0 : index
    %296 = vector.load %arg14[%c270, %c0_226] : memref<288x128xf32, #tpu.memory_space<vmem>>, vector<16x128xf32>
    %297 = vector.extract_strided_slice %205 {offsets = [240, 0], sizes = [16, 128], strides = [1, 1]} : vector<256x128xf32> to vector<16x128xf32>
    %298 = arith.addf %296, %297 : vector<16x128xf32>
    %c0_227 = arith.constant 0 : index
    %c15 = arith.constant 15 : index
    %c0_228 = arith.constant 0 : index
    %c0_229 = arith.constant 0 : index
    %299 = vector.load %arg12[%c0_227, %c15, %c0_228, %c0_229] : memref<1x16x16x128xf32, #tpu.memory_space<vmem>>, vector<1x1x16x128xf32>
    %300 = vector.shape_cast %299 : vector<1x1x16x128xf32> to vector<16x128xf32>
    %301 = vector.shape_cast %298 : vector<16x128xf32> to vector<1x1x16x128xf32>
    tpu.vector_store %arg12[%c0_227, %c15, %c0_228, %c0_229], %301 {strides = array<i32>} : memref<1x16x16x128xf32, #tpu.memory_space<vmem>>, vector<1x1x16x128xf32>,
    return
  }
  func.func @transform_0(%arg0: i32) -> (i32, i32, i32, i32) {
    %c0_i32 = arith.constant 0 : i32
    %c0_i32_0 = arith.constant 0 : i32
    %c0_i32_1 = arith.constant 0 : i32
    %c0_i32_2 = arith.constant 0 : i32
    return %arg0, %c0_i32, %c0_i32_0, %c0_i32_1 : i32, i32, i32, i32
  }
  func.func @transform_1(%arg0: i32) -> (i32, i32) {
    %c0_i32 = arith.constant 0 : i32
    %c0_i32_0 = arith.constant 0 : i32
    %c0_i32_1 = arith.constant 0 : i32
    return %c0_i32, %c0_i32_0 : i32, i32
  }
  func.func @transform_2(%arg0: i32) -> (i32, i32) {
    %c0_i32 = arith.constant 0 : i32
    %c0_i32_0 = arith.constant 0 : i32
    %c0_i32_1 = arith.constant 0 : i32
    return %c0_i32, %c0_i32_0 : i32, i32
  }
  func.func @transform_3(%arg0: i32) -> (i32, i32) {
    %c0_i32 = arith.constant 0 : i32
    %c0_i32_0 = arith.constant 0 : i32
    %c0_i32_1 = arith.constant 0 : i32
    return %c0_i32, %c0_i32_0 : i32, i32
  }
  func.func @transform_4(%arg0: i32) -> (i32, i32) {
    %c0_i32 = arith.constant 0 : i32
    %c0_i32_0 = arith.constant 0 : i32
    %c0_i32_1 = arith.constant 0 : i32
    return %c0_i32, %c0_i32_0 : i32, i32
  }
  func.func @transform_5(%arg0: i32) -> (i32, i32) {
    %c0_i32 = arith.constant 0 : i32
    %c0_i32_0 = arith.constant 0 : i32
    %c0_i32_1 = arith.constant 0 : i32
    return %c0_i32, %c0_i32_0 : i32, i32
  }
  func.func @transform_6(%arg0: i32) -> (i32, i32) {
    %c0_i32 = arith.constant 0 : i32
    %c0_i32_0 = arith.constant 0 : i32
    %c0_i32_1 = arith.constant 0 : i32
    return %c0_i32, %c0_i32_0 : i32, i32
  }
  func.func @transform_7(%arg0: i32) -> (i32, i32) {
    %c0_i32 = arith.constant 0 : i32
    %c0_i32_0 = arith.constant 0 : i32
    %c0_i32_1 = arith.constant 0 : i32
    return %c0_i32, %c0_i32_0 : i32, i32
  }
  func.func @transform_8(%arg0: i32) -> (i32, i32) {
    %c0_i32 = arith.constant 0 : i32
    %c0_i32_0 = arith.constant 0 : i32
    %c0_i32_1 = arith.constant 0 : i32
    return %c0_i32, %c0_i32_0 : i32, i32
  }
  func.func @transform_9(%arg0: i32) -> (i32, i32, i32) {
    %c0_i32 = arith.constant 0 : i32
    %c0_i32_0 = arith.constant 0 : i32
    %c0_i32_1 = arith.constant 0 : i32
    %c0_i32_2 = arith.constant 0 : i32
    return %c0_i32, %c0_i32_0, %c0_i32_1 : i32, i32, i32
  }
  func.func @transform_10(%arg0: i32) -> (i32, i32) {
    %c0_i32 = arith.constant 0 : i32
    %c0_i32_0 = arith.constant 0 : i32
    %c0_i32_1 = arith.constant 0 : i32
    return %c0_i32, %c0_i32_0 : i32, i32
  }
  func.func @transform_11(%arg0: i32) -> (i32, i32, i32, i32) {
    %c0_i32 = arith.constant 0 : i32
    %c0_i32_0 = arith.constant 0 : i32
    %c0_i32_1 = arith.constant 0 : i32
    %c0_i32_2 = arith.constant 0 : i32
    return %arg0, %c0_i32, %c0_i32_0, %c0_i32_1 : i32, i32, i32, i32
  }
}

</mosaic_0001>

<bundles_post_ra>
// kernel: tpu_custom_call.1
= control target key start
LH: loop header
LB: loop body
LE: loop exit
PB: predicated region body
PF: predicated region fallthrough
CT: control target
= control target key end

     0   :  { %s11001_s0 = inlined_call_operand.hbm [shape: f32[2,16,16,128], index: 0, kind: input, shape index: {}]   ;;  %s11002_s1 = inlined_call_operand.vmem [shape: f32[128,32], index: 1, kind: input, shape index: {}]   ;;  %s11003_s2 = inlined_call_operand.vmem [shape: f32[1,128], index: 2, kind: input, shape index: {}]   ;;  %s11004_s3 = inlined_call_operand.vmem [shape: f32[1,128], index: 3, kind: input, shape index: {}]   ;;  %s11005_s4 = inlined_call_operand.vmem [shape: bf16[128,128], index: 4, kind: input, shape index: {}]   ;;  %s11006_s5 = inlined_call_operand.vmem [shape: f32[1,128], index: 5, kind: input, shape index: {}]   ;;  %s11007_s6 = inlined_call_operand.vmem [shape: f32[128,32], index: 6, kind: input, shape index: {}]   ;;  %s11008_s7 = inlined_call_operand.vmem [shape: f32[1,128], index: 7, kind: input, shape index: {}]   ;;  %s11009_s8 = inlined_call_operand.vmem [shape: f32[1,128], index: 8, kind: input, shape index: {}]   ;;  %s11010_s9 = inlined_call_operand.hbm [shape: bf16[9,128,128], index: 9, kind: input, shape index: {}]   ;;  %s11011_s10 = inlined_call_operand.vmem [shape: f32[1,128], index: 10, kind: input, shape index: {}]   ;;  %s11012_s11 = inlined_call_operand.hbm [shape: f32[2,16,16,128], index: 11, kind: output, shape index: {}]  }
   0x1   :  { %11064 = sst [smem:[#allocation75_spill]] %s11010_s9 }
   0x2   :  { %16 = vsyncpa [#allocation5], 0 }
   0x3   :  { %18 = vsyncpa [#allocation5 + $0x1], 0 }
   0x4   :  { %19 = vsyncpa [#allocation8], 0 }
   0x5   :  { %20 = vsyncpa [#allocation6], 0 }
   0x6   :  { %22 = vsyncpa [#allocation6 + $0x1], 0  ;;  %s7083_s17 = smov 0   ;;  %s7085_s18 = smov 0  }
   0x7   :  { %s7087_s19 = smov 0   ;;  %s7089_s20 = smov 0  }
   0x8 LB: > { %11065 = sst [smem:[#allocation13_spill]] %s7007_s19  ;;  %s7104_s21 = sadd.s32 4294967295, %s7011_s20   ;;  %s7011_s20 = sphi %s7089_s20, %s11496_s20   ;;  %s7007_s19 = sphi %s7087_s19, %s11498_s19   ;;  %s7003_s18 = sphi %s7085_s18, %s11500_s18   ;;  %s6999_s17 = sphi %s7083_s17, %s11499_s17  }
   0x9   : > { %s5896_s22 = sadd.s32 4294967294, %s7011_s20   ;;  %p48_p0 = scmp.ne.s32.totalorder %s7003_s18, %s6999_s17 }
   0xa   : > { %p49_p1 = scmp.eq.s32.totalorder %s7104_s21, 0  ;;  %p282_p2 = scmp.eq.s32.totalorder %s7104_s21, 1 }
   0xb   : > { %p288_p3 = scmp.eq.s32.totalorder %s5896_s22, 1  ;;  %p5897_p5 = scmp.ge.s32.totalorder %s7011_s20, 1 }
   0xc   : > { %p7113_p4 = por %p49_p1, %p48_p0  ;;  %p295_p7 = scmp.lt.s32.totalorder %s7011_s20, 3 }
   0xd   : > { %p7118_p6 = por %p288_p3, %p48_p0  ;;  %s11069_s9 = sld [smem:[#allocation75_spill]] }
   0xe   : > { %p7126_p8 = pnand %p5897_p5, %p295_p7  ;;  %s7013_s29 = smov [#allocation7]  }
   0xf   : > { %s11067_s24 = scalar_select %p7118_p6, 1, 0 }
  0x10   : > { %p6508_p9 = pneg %p7126_p8  ;;  %s332_s30 = sshll.u32 %s7013_s29, 4  ;;  %s333_s30 = int_to_ptr.vmem [resolvable:$true] %s332_s30 }
  0x11   : > { %11068 = sst [smem:[#allocation14_spill]] %s11067_s24  ;;  %s7136_s12 = sadd.s32 1, %s7011_s20  }
  0x12   : > { %p6509_p10 = pnand %p6508_p9, %p49_p1  ;;  %11071 = sst [smem:[#allocation15_spill]] %s7136_s12 }
  0x13   : > { %s330_s27 = sshll.u32 %s11069_s9, 4  ;;  %s7014_s13 = smov 64   ;;  %s331_s27 = int_to_ptr.hbm [resolvable:$true] %s330_s27 }
  0x14   : > { %s7015_s14 = smov 4   ;;  %s32_s15 = ssub.s32 %s7011_s20, %s7136_s12 }
  0x15   : > { %6511 = dma.hbm_to_vmem [thread:$0]  (!%p6509_p10), %s331_s27, 9216, %s333_s30, [#allocation8], %s7014_s13, %s7014_s13, %s7015_s14  }
  0x16   : > { %s35_s16 = sadd.s32 1, %s7007_s19  ;;  %p33_p12 = scmp.eq.s32.totalorder %s32_s15, 0 }
  0x17   : > { %p42_p13 = scmp.ne.s32.totalorder %s7007_s19, %s7003_s18  ;;  %p43_p0 = scmp.eq.s32.totalorder %s7011_s20, 0 }
  0x18   : > { %p6521_p3 = scmp.lt.s32.totalorder %s7011_s20, 2  ;;  %s349_s26 = sand.u32 1, %s7007_s19  }
  0x19   : > { %s7146_s22 = scalar_select %p33_p12, %s7007_s19, %s35_s16  }
  0x1a   : > { %p44_p5 = por %p43_p0, %p42_p13  ;;  %p7150_p7 = por %p282_p2, %p42_p13 }
  0x1b   : > { %11072 = sst [smem:[#allocation16_spill]] %s7146_s22  ;;  %s6394_s29 = sshll.u32 %s7011_s20, 8 }
  0x1c   : > { %s5900_s9 = sshll.u32 %s349_s26, 8  ;;  %s358_s30 = scalar_lea.hbm %s11001_s0, %s6394_s29 }
  0x1d   : > { %s359_s13 = sshll.u32 %s358_s30, 4  ;;  %s353_s14 = scalar_lea.vmem [#allocation4], %s5900_s9  ;;  %s360_s13 = int_to_ptr.hbm [resolvable:$true] %s359_s13 }
  0x1e   : > { %s361_s15 = sshll.u32 %s353_s14, 4  ;;  %p7161_p9 = pnand %p6521_p3, %p44_p5  ;;  %s362_s15 = int_to_ptr.vmem [resolvable:$true] %s361_s15 }
  0x1f   : > { %s350_s22 = scalar_lea.sflag [#allocation5], %s349_s26  ;;  %s6911_s12 = sshra.s32 %s360_s13, 4  ;;  %s6912_s12 = int_to_ptr.hbm [resolvable:$true] %s6911_s12 }
  0x20   : > { %s6913_s19 = scalar_lea.hbm %s6912_s12, 256  ;;  %p6915_p10 = pneg %p7161_p9 }
  0x21   : > { %p6914_p2 = scmp.ne.s32.totalorder %s6912_s12, %s6913_s19  ;;  %s6918_s29 = scalar_lea.hbm %s11001_s0, 512 }
  0x22   : > { %p6919_p0 = scmp.lt.s32.totalorder %s6912_s12, %s11001_s0  ;;  %p6920_p3 = scmp.lt.s32.totalorder %s6918_s29, %s6913_s19 }
  0x23   : > { %p6916_p12 = pnand %p6915_p10, %p6914_p2 }
  0x24   : > { %p6921_p5 = por %p6920_p3, %p6919_p0 }
  0x25   : > { %p6917_p13 = pneg %p6916_p12 }
  0x27   : > { %p6922_p11 = pnand %p6921_p5, %p6917_p13 }
  0x29   : > { %6925 = shalt.err (!%p6922_p11)
}
  0x2a   : > { %s7016_s26 = smov 128   ;;  %s7017_s14 = smov 8  }
  0x2b   : > { %6515 = dma.hbm_to_vmem [thread:$0]  (!%p7161_p9), %s360_s13, 4096, %s362_s15, %s350_s22, %s7016_s26, %s7016_s26, %s7017_s14  }
  0x2c   : > { %373 = sbr.rel (%p7126_p8) target bundleno = 2159 (0x86f), region = 64 }
  0x31   : > { %s7178_s24 = sand.u32 1, %s7003_s18  }
  0x32   : > { %s5904_s12 = sshll.u32 %s7178_s24, 8  ;;  %s376_s19 = scalar_lea.sflag [#allocation5], %s7178_s24 }
  0x33   : > { %s7184_s9 = scalar_lea.vmem [#allocation4], %s5904_s12 }
  0x34   : > { %6986 = dma.done.wait (%p7113_p4), %s376_s19, 4096  }
  0x35   : > { %6988 = vsyncadd (%p7113_p4), %s376_s19, 4294963200 }
  0x36   : > { %6990 = dma.done.wait (%p49_p1), [#allocation8], 9216  }
  0x37   : > { %6992 = vsyncadd (%p49_p1), [#allocation8], 4294958080  ;;  %v7197_v0 = vld [vmem:[%s11002_s1 + $0x78] sm:$0xff]  ;;  %v7202_v1 = vld [vmem:[%s11002_s1 + $0x70] sm:$0xff]  ;;  %vm11017_vm0 = vcmask 261120   ;;  %s10674_s28 = scalar_lea.vmem [#allocation9], %s5904_s12 }
  0x38   : > { %580 = vmatpush.msra.mxu0 %v7197_v0  ;;  %600 = vmatpush.msra.mxu1 %v7197_v0  ;;  %v7209_v2 = vld [vmem:[%s11002_s1 + $0x68] sm:$0xff]  ;;  %v7216_v3 = vld [vmem:[%s11002_s1 + $0x60] sm:$0xff]  ;;  %v7224_v5 = vld [vmem:[%s7184_s9 + $0x8] sm:$0xff]  ;;  %s6475_s13 = sshll.u32 %s7104_s21, 8  ;;  %s5810_s29 = sshll.u32 %s10674_s28, 4  ;;  %s5811_s29 = int_to_ptr.vmem [resolvable:$true] %s5810_s29 }
  0x39   : > { %v7221_v4 = vld [vmem:[%s7184_s9] sm:$0xff]  ;;  %v7229_v6 = vld [vmem:[%s11002_s1 + $0x58] sm:$0xff]  ;;  %v7239_v9 = vld [vmem:[%s7184_s9 + $0x18] sm:$0xff]  ;;  %v512_v14 = vmul.f32 %v7224_v5, %v7224_v5  ;;  %5907 = vmatpush.xpose.msk.msra.mxu3 %vm11017_vm0, %v7197_v0  ;;  %s5809_s16 = scalar_lea.hbm %s11012_s11, %s6475_s13  ;;  %s5798_s30 = scalar_lea.sflag [#allocation6], %s7178_s24 }
  0x3a   : > { %581 = vmatpush.msra.mxu0 %v7202_v1  ;;  %601 = vmatpush.msra.mxu1 %v7202_v1  ;;  %v7232_v7 = vld [vmem:[%s7184_s9 + $0x10] sm:$0xff]  ;;  %v474_v8 = vadd.f32 %v7224_v5, %v7221_v4  ;;  %v7244_v10 = vld [vmem:[%s11002_s1 + $0x50] sm:$0xff]  ;;  %v7250_v12 = vld [vmem:[%s7184_s9 + $0x20] sm:$0xff]  ;;  %v511_v13 = vmul.f32 %v7221_v4, %v7221_v4  ;;  %v514_v22 = vmul.f32 %v7239_v9, %v7239_v9  ;;  %s5812_s27 = sshll.u32 %s5809_s16, 4  ;;  %s5813_s27 = int_to_ptr.hbm [resolvable:$true] %s5812_s27 }
  0x3b   : > { %v7259_v15 = vld [vmem:[%s11002_s1 + $0x48] sm:$0xff]  ;;  %v7265_v17 = vld [vmem:[%s7184_s9 + $0x28] sm:$0xff]  ;;  %v513_v18 = vmul.f32 %v7232_v7, %v7232_v7  ;;  %v7272_v19 = vld [vmem:[%s11002_s1 + $0x40] sm:$0xff]  ;;  %v515_v29 = vmul.f32 %v7250_v12, %v7250_v12  ;;  %s6955_s21 = sshra.s32 %s5813_s27, 4  ;;  %s6956_s21 = int_to_ptr.hbm [resolvable:$true] %s6955_s21 }
  0x3c   : > { %582 = vmatpush.msra.mxu0 %v7209_v2  ;;  %602 = vmatpush.msra.mxu1 %v7209_v2  ;;  %v475_v11 = vadd.f32 %v474_v8, %v7232_v7  ;;  %v7278_v21 = vld [vmem:[%s7184_s9 + $0x30] sm:$0xff]  ;;  %v543_v23 = vadd.f32 %v512_v14, %v511_v13  ;;  %v7293_v26 = vld [vmem:[%s11002_s1 + $0x30] sm:$0xff]  ;;  %v7296_v27 = vld [vmem:[%s7184_s9 + $0x38] sm:$0xff]  ;;  %v516_v32 = vmul.f32 %v7265_v17, %v7265_v17  ;;  %s6957_s26 = scalar_lea.hbm %s6956_s21, 256  ;;  %p6962_p11 = scmp.lt.s32.totalorder %s6956_s21, %s11012_s11 }
  0x3d   : > { %v7285_v24 = vld [vmem:[%s11002_s1 + $0x38] sm:$0xff]  ;;  %v7299_v28 = vld [vmem:[%s7184_s9 + $0x40] sm:$0xff]  ;;  %v7317_v36 = vld [vmem:[%s7184_s9 + $0x48] sm:$0xff]  ;;  %v517_v37 = vmul.f32 %v7278_v21, %v7278_v21  ;;  %v518_v42 = vmul.f32 %v7296_v27, %v7296_v27  ;;  %5908 = vmatpush.xpose.msk.msra.mxu3 %vm11017_vm0, %v7202_v1  ;;  %p6958_p1 = scmp.ne.s32.totalorder %s6956_s21, %s6957_s26 }
  0x3e   : > { %583 = vmatpush.msra.mxu0 %v7216_v3  ;;  %603 = vmatpush.msra.mxu1 %v7216_v3  ;;  %v476_v16 = vadd.f32 %v475_v11, %v7239_v9  ;;  %v544_v30 = vadd.f32 %v543_v23, %v513_v18  ;;  %v7311_v34 = vld [vmem:[%s11002_s1 + $0x28] sm:$0xff]  ;;  %v7324_v39 = vld [vmem:[%s11002_s1 + $0x20] sm:$0xff]  ;;  %v7330_v41 = vld [vmem:[%s7184_s9 + $0x50] sm:$0xff]  ;;  %v519_v47 = vmul.f32 %v7299_v28, %v7299_v28 }
  0x3f   : > { %v7337_v44 = vld [vmem:[%s11002_s1 + $0x18] sm:$0xff]  ;;  %v435_v46 = vld [vmem:[%s7184_s9 + $0x58] sm:$0xff]  ;;  %v7348_v49 = vld [vmem:[%s11002_s1 + $0x10] sm:$0xff]  ;;  %v520_v52 = vmul.f32 %v7317_v36, %v7317_v36  ;;  %v521_v57 = vmul.f32 %v7330_v41, %v7330_v41  ;;  %p6959_p4 = pnand %p6958_p1, %p7150_p7 }
  0x40   : > { %584 = vmatpush.msra.mxu0 %v7229_v6  ;;  %604 = vmatpush.msra.mxu1 %v7229_v6  ;;  %v477_v20 = vadd.f32 %v476_v16, %v7250_v12  ;;  %v545_v33 = vadd.f32 %v544_v30, %v514_v22  ;;  %v436_v51 = vld [vmem:[%s7184_s9 + $0x60] sm:$0xff]  ;;  %v437_v56 = vld [vmem:[%s7184_s9 + $0x68] sm:$0xff]  ;;  %v7369_v59 = vld [vmem:[%s11002_s1] sm:$0xff]  ;;  %v522_v62 = vmul.f32 %v435_v46, %v435_v46 }
  0x41   : > { %v7359_v54 = vld [vmem:[%s11002_s1 + $0x8] sm:$0xff]  ;;  %v438_v61 = vld [vmem:[%s7184_s9 + $0x70] sm:$0xff]  ;;  %v439_v11 = vld [vmem:[%s7184_s9 + $0x78] sm:$0xff]  ;;  %v523_v13 = vmul.f32 %v436_v51, %v436_v51  ;;  %5909 = vmatpush.xpose.msk.msra.mxu3 %vm11017_vm0, %v7209_v2  ;;  %p6960_p8 = pneg %p6959_p4 }
  0x42   : > { %585 = vmatpush.msra.mxu0 %v7244_v10  ;;  %605 = vmatpush.msra.mxu1 %v7244_v10  ;;  %v478_v25 = vadd.f32 %v477_v20, %v7265_v17  ;;  %v546_v38 = vadd.f32 %v545_v33, %v515_v29  ;;  %v440_v18 = vld [vmem:[%s7184_s9 + $0x80] sm:$0xff]  ;;  %v524_v20 = vmul.f32 %v437_v56, %v437_v56 }
  0x43   : > { %v525_v29 = vmul.f32 %v438_v61, %v438_v61  ;;  %v526_v33 = vmul.f32 %v439_v11, %v439_v11 }
  0x44   : > { %586 = vmatpush.msra.mxu0 %v7259_v15  ;;  %606 = vmatpush.msra.mxu1 %v7259_v15  ;;  %v479_v31 = vadd.f32 %v478_v25, %v7278_v21  ;;  %v547_v43 = vadd.f32 %v546_v38, %v516_v32  ;;  %v441_v25 = vld [vmem:[%s7184_s9 + $0x88] sm:$0xff]  ;;  %v442_v32 = vld [vmem:[%s7184_s9 + $0x90] sm:$0xff]  ;;  %v443_v38 = vld [vmem:[%s7184_s9 + $0x98] sm:$0xff] }
  0x45   : > { %5910 = vmatpush.xpose.msk.msra.mxu3 %vm11017_vm0, %v7216_v3 }
  0x46   : > { %587 = vmatpush.msra.mxu0 %v7272_v19  ;;  %607 = vmatpush.msra.mxu1 %v7272_v19  ;;  %v480_v35 = vadd.f32 %v479_v31, %v7296_v27  ;;  %v548_v48 = vadd.f32 %v547_v43, %v517_v37 }
  0x48   : > { %588 = vmatpush.msra.mxu0 %v7285_v24  ;;  %608 = vmatpush.msra.mxu1 %v7285_v24  ;;  %v481_v40 = vadd.f32 %v480_v35, %v7299_v28  ;;  %v549_v53 = vadd.f32 %v548_v48, %v518_v42 }
  0x49   : > { %5911 = vmatpush.xpose.msk.msra.mxu3 %vm11017_vm0, %v7229_v6 }
  0x4a   : > { %589 = vmatpush.msra.mxu0 %v7293_v26  ;;  %609 = vmatpush.msra.mxu1 %v7293_v26  ;;  %v482_v45 = vadd.f32 %v481_v40, %v7317_v36  ;;  %v550_v58 = vadd.f32 %v549_v53, %v519_v47  ;;  %v527_v40 = vmul.f32 %v440_v18, %v440_v18 }
  0x4c   : > { %590 = vmatpush.msra.mxu0 %v7311_v34  ;;  %610 = vmatpush.msra.mxu1 %v7311_v34  ;;  %v483_v50 = vadd.f32 %v482_v45, %v7330_v41  ;;  %v551_v63 = vadd.f32 %v550_v58, %v520_v52  ;;  %v444_v45 = vld [vmem:[%s7184_s9 + $0xa0] sm:$0xff]  ;;  %v447_v58 = vld [vmem:[%s7184_s9 + $0xb8] sm:$0xff] }
  0x4d   : > { %5912 = vmatpush.xpose.msk.msra.mxu3 %vm11017_vm0, %v7244_v10 }
  0x4e   : > { %591 = vmatpush.msra.mxu0 %v7324_v39  ;;  %611 = vmatpush.msra.mxu1 %v7324_v39  ;;  %v484_v55 = vadd.f32 %v483_v50, %v435_v46  ;;  %v552_v14 = vadd.f32 %v551_v63, %v521_v57  ;;  %v528_v46 = vmul.f32 %v441_v25, %v441_v25  ;;  %v445_v50 = vld [vmem:[%s7184_s9 + $0xa8] sm:$0xff]  ;;  %v7386_v63 = vld [vmem:[%s7184_s9 + $0xc0] sm:$0xff] }
  0x50   : > { %592 = vmatpush.msra.mxu0 %v7337_v44  ;;  %612 = vmatpush.msra.mxu1 %v7337_v44  ;;  %v485_v60 = vadd.f32 %v484_v55, %v436_v51  ;;  %v553_v22 = vadd.f32 %v552_v14, %v522_v62  ;;  %v529_v51 = vmul.f32 %v442_v32, %v442_v32  ;;  %v446_v55 = vld [vmem:[%s7184_s9 + $0xb0] sm:$0xff] }
  0x51   : > { %5913 = vmatpush.xpose.msk.msra.mxu3 %vm11017_vm0, %v7259_v15 }
  0x52   : > { %593 = vmatpush.msra.mxu0 %v7348_v49  ;;  %613 = vmatpush.msra.mxu1 %v7348_v49  ;;  %v486_v8 = vadd.f32 %v485_v60, %v437_v56  ;;  %v554_v30 = vadd.f32 %v553_v22, %v523_v13  ;;  %v530_v60 = vmul.f32 %v443_v38, %v443_v38 }
  0x53   : > { %v531_v13 = vmul.f32 %v444_v45, %v444_v45 }
  0x54   : > { %594 = vmatpush.msra.mxu0 %v7359_v54  ;;  %614 = vmatpush.msra.mxu1 %v7359_v54  ;;  %v487_v16 = vadd.f32 %v486_v8, %v438_v61  ;;  %v555_v35 = vadd.f32 %v554_v30, %v524_v20  ;;  %v532_v20 = vmul.f32 %v445_v50, %v445_v50 }
  0x55   : > { %5914 = vmatpush.xpose.msk.msra.mxu3 %vm11017_vm0, %v7272_v19 }
  0x56   : > { %595 = vmatpush.msra.mxu0 %v7369_v59  ;;  %615 = vmatpush.msra.mxu1 %v7369_v59  ;;  %v488_v23 = vadd.f32 %v487_v16, %v439_v11  ;;  %v556_v42 = vadd.f32 %v555_v35, %v525_v29  ;;  %v7389_v11 = vld [vmem:[%s7184_s9 + $0xc8] sm:$0xff] }
  0x58   : > { %v489_v31 = vadd.f32 %v488_v23, %v440_v18  ;;  %v557_v47 = vadd.f32 %v556_v42, %v526_v33  ;;  %v7393_v18 = vld [vmem:[%s7184_s9 + $0xd0] sm:$0xff]  ;;  %v7397_v23 = vld [vmem:[%s7184_s9 + $0xd8] sm:$0xff] }
  0x59   : > { %5915 = vmatpush.xpose.msk.msra.mxu3 %vm11017_vm0, %v7285_v24 }
  0x5a   : > { %v490_v37 = vadd.f32 %v489_v31, %v441_v25  ;;  %v558_v52 = vadd.f32 %v557_v47, %v527_v40  ;;  %v533_v25 = vmul.f32 %v446_v55, %v446_v55  ;;  %v7401_v31 = vld [vmem:[%s7184_s9 + $0xe0] sm:$0xff] }
  0x5c   : > { %v491_v43 = vadd.f32 %v490_v37, %v442_v32  ;;  %v559_v56 = vadd.f32 %v558_v52, %v528_v46  ;;  %v534_v32 = vmul.f32 %v447_v58, %v447_v58  ;;  %v7405_v37 = vld [vmem:[%s7184_s9 + $0xe8] sm:$0xff] }
  0x5d   : > { %5916 = vmatpush.xpose.msk.msra.mxu3 %vm11017_vm0, %v7293_v26 }
  0x5e   : > { %v492_v48 = vadd.f32 %v491_v43, %v443_v38  ;;  %v560_v61 = vadd.f32 %v559_v56, %v529_v51  ;;  %v535_v38 = vmul.f32 %v7386_v63, %v7386_v63  ;;  %v7413_v43 = vld [vmem:[%s7184_s9 + $0xf0] sm:$0xff] }
  0x60   : > { %v493_v53 = vadd.f32 %v492_v48, %v444_v45  ;;  %v561_v14 = vadd.f32 %v560_v61, %v530_v60  ;;  %v536_v45 = vmul.f32 %v7389_v11, %v7389_v11  ;;  %v7419_v48 = vld [vmem:[%s7184_s9 + $0xf8] sm:$0xff]  ;;  %v540_v61 = vmul.f32 %v7405_v37, %v7405_v37 }
  0x61   : > { %5917 = vmatpush.xpose.msk.msra.mxu3 %vm11017_vm0, %v7311_v34 }
  0x62   : > { %v494_v57 = vadd.f32 %v493_v53, %v445_v50  ;;  %v562_v29 = vadd.f32 %v561_v14, %v531_v13  ;;  %v537_v50 = vmul.f32 %v7393_v18, %v7393_v18  ;;  %v538_v53 = vmul.f32 %v7397_v23, %v7397_v23 }
  0x63   : > { %v541_v13 = vmul.f32 %v7413_v43, %v7413_v43 }
  0x64   : > { %v495_v62 = vadd.f32 %v494_v57, %v446_v55  ;;  %v563_v33 = vadd.f32 %v562_v29, %v532_v20  ;;  %v539_v57 = vmul.f32 %v7401_v31, %v7401_v31  ;;  %v542_v20 = vmul.f32 %v7419_v48, %v7419_v48 }
  0x65   : > { %5918 = vmatpush.xpose.msk.msra.mxu3 %vm11017_vm0, %v7324_v39 }
  0x66   : > { %v496_v8 = vadd.f32 %v495_v62, %v447_v58  ;;  %v564_v40 = vadd.f32 %v563_v33, %v533_v25 }
  0x68   : > { %v497_v16 = vadd.f32 %v496_v8, %v7386_v63  ;;  %v565_v46 = vadd.f32 %v564_v40, %v534_v32 }
  0x69   : > { %5919 = vmatpush.xpose.msk.msra.mxu3 %vm11017_vm0, %v7337_v44 }
  0x6a   : > { %v498_v22 = vadd.f32 %v497_v16, %v7389_v11  ;;  %v566_v51 = vadd.f32 %v565_v46, %v535_v38 }
  0x6c   : > { %v499_v30 = vadd.f32 %v498_v22, %v7393_v18  ;;  %v567_v55 = vadd.f32 %v566_v51, %v536_v45 }
  0x6d   : > { %5920 = vmatpush.xpose.msk.msra.mxu3 %vm11017_vm0, %v7348_v49 }
  0x6e   : > { %v500_v35 = vadd.f32 %v499_v30, %v7397_v23  ;;  %v568_v58 = vadd.f32 %v567_v55, %v537_v50  ;;  %v6402_v55 = vld [vmem:[%s11005_s4 + $0x38] sm:$0xff] }
  0x6f   : > { %1597 = vmatpush.bf16.msrb.mxu0 %v6402_v55 }
  0x70   : > { %v501_v42 = vadd.f32 %v500_v35, %v7401_v31  ;;  %v569_v62 = vadd.f32 %v568_v58, %v538_v53  ;;  %v6399_v58 = vld [vmem:[%s11005_s4 + $0x20] sm:$0xff] }
  0x71   : > { %5921 = vmatpush.xpose.msk.msra.mxu3 %vm11017_vm0, %v7359_v54 }
  0x72   : > { %v502_v47 = vadd.f32 %v501_v42, %v7405_v37  ;;  %v570_v14 = vadd.f32 %v569_v62, %v539_v57  ;;  %v6400_v57 = vld [vmem:[%s11005_s4 + $0x28] sm:$0xff] }
  0x73   : > { %v6396_v62 = vld [vmem:[%s11005_s4 + $0x8] sm:$0xff] }
  0x74   : > { %v503_v52 = vadd.f32 %v502_v47, %v7413_v43  ;;  %v571_v22 = vadd.f32 %v570_v14, %v540_v61  ;;  %v6397_v61 = vld [vmem:[%s11005_s4 + $0x10] sm:$0xff] }
  0x75   : > { %5922 = vmatpush.xpose.msk.msra.mxu3 %vm11017_vm0, %v7369_v59 }
  0x76   : > { %v504_v56 = vadd.f32 %v503_v52, %v7419_v48  ;;  %v572_v29 = vadd.f32 %v571_v22, %v541_v13  ;;  %v6395_v13 = vld [vmem:[%s11005_s4] sm:$0xff] }
  0x78   : > { %v505_v60 = vrot.slane %v504_v56, 4  ;;  %v573_v32 = vadd.f32 %v572_v29, %v542_v20  ;;  %v7538_v29 = vld [vmem:[%s11003_s2] ss:$0 sm:$0xff] }
  0x79   : > { %5924 = vmatpush.xpose.msk.msrb.mxu3 %vm11017_vm0, %v7197_v0  ;;  %v7018_v0 = vmov 1024.0  }
  0x7a   : > { %v506_v8 = vadd.f32 %v505_v60, %v504_v56  ;;  %v574_v35 = vrot.slane %v573_v32, 4  ;;  %6571 = vrcp.f32 %v7018_v0  ;;  %v6401_v56 = vld [vmem:[%s11005_s4 + $0x30] sm:$0xff]  ;;  %v6398_v60 = vld [vmem:[%s11005_s4 + $0x18] sm:$0xff] }
  0x7b   : > { %1598 = vmatpush.bf16.msrb.mxu0 %v6401_v56 }
  0x7c   : > { %v507_v16 = vrot.slane %v506_v8, 2  ;;  %v575_v38 = vadd.f32 %v574_v35, %v573_v32 }
  0x7d   : > { %5925 = vmatpush.xpose.msk.msrb.mxu3 %vm11017_vm0, %v7202_v1 }
  0x7e   : > { %v508_v25 = vadd.f32 %v507_v16, %v506_v8  ;;  %v576_v40 = vrot.slane %v575_v38, 2 }
  0x7f   : > { %1599 = vmatpush.bf16.msrb.mxu0 %v6400_v57 }
  0x80   : > { %v509_v30 = vrot.slane %v508_v25, 1  ;;  %v577_v42 = vadd.f32 %v576_v40, %v575_v38  ;;  %v6572_v1 = vpop.eup %6571 }
  0x81   : > { %5926 = vmatpush.xpose.msk.msrb.mxu3 %vm11017_vm0, %v7209_v2  ;;  %v621_v2 = vmul.f32 1024.0, %v6572_v1  ;;  %vm625_vm1 = vweird.f32 %v6572_v1 }
  0x82   : > { %v510_v33 = vadd.f32 %v509_v30, %v508_v25  ;;  %v578_v45 = vrot.slane %v577_v42, 1 }
  0x83   : > { %1600 = vmatpush.bf16.msrb.mxu0 %v6399_v58 }
  0x84   : > { %596 = vmatmul.f32.vlgmr.msra.gmra.mxu0 %v510_v33  ;;  %v579_v46 = vadd.f32 %v578_v45, %v577_v42 }
  0x85   : > { %5927 = vmatpush.xpose.msk.msrb.mxu3 %vm11017_vm0, %v7216_v3  ;;  %v622_v3 = vsub.f32 1.0, %v621_v2 }
  0x86   : > { %616 = vmatmul.f32.vlgmr.msra.gmra.mxu1 %v579_v46 }
  0x87   : > { %1601 = vmatpush.bf16.msrb.mxu0 %v6398_v60 }
  0x89   : > { %5928 = vmatpush.xpose.msk.msrb.mxu3 %vm11017_vm0, %v7229_v6  ;;  %v623_v6 = vmul.f32 %v6572_v1, %v622_v3 }
  0x8b   : > { %1602 = vmatpush.bf16.msrb.mxu0 %v6397_v61 }
  0x8d   : > { %5929 = vmatpush.xpose.msk.msrb.mxu3 %vm11017_vm0, %v7244_v10  ;;  %v624_v10 = vadd.f32 %v6572_v1, %v623_v6 }
  0x8f   : > { %1603 = vmatpush.bf16.msrb.mxu0 %v6396_v62 }
  0x91   : > { %5930 = vmatpush.xpose.msk.msrb.mxu3 %vm11017_vm0, %v7259_v15  ;;  %v7497_v15 = vsel %vm625_vm1, %v6572_v1, %v624_v10 }
  0x92   : > { %11075 = vst [vmem:[#allocation17_spill] sm:$0xff] %v7497_v15 }
  0x93   : > { %1604 = vmatpush.bf16.msrb.mxu0 %v6395_v13 }
  0x95   : > { %5931 = vmatpush.xpose.msk.msrb.mxu3 %vm11017_vm0, %v7272_v19 }
  0x99   : > { %5932 = vmatpush.xpose.msk.msrb.mxu3 %vm11017_vm0, %v7285_v24 }
  0x9d   : > { %5933 = vmatpush.xpose.msk.msrb.mxu3 %vm11017_vm0, %v7293_v26 }
  0xa1   : > { %5934 = vmatpush.xpose.msk.msrb.mxu3 %vm11017_vm0, %v7311_v34 }
  0xa5   : > { %5935 = vmatpush.xpose.msk.msrb.mxu3 %vm11017_vm0, %v7324_v39 }
  0xa9   : > { %5936 = vmatpush.xpose.msk.msrb.mxu3 %vm11017_vm0, %v7337_v44 }
  0xad   : > { %5937 = vmatpush.xpose.msk.msrb.mxu3 %vm11017_vm0, %v7348_v49 }
  0xb1   : > { %5938 = vmatpush.xpose.msk.msrb.mxu3 %vm11017_vm0, %v7359_v54 }
  0xb5   : > { %5939 = vmatpush.xpose.msk.msrb.mxu3 %vm11017_vm0, %v7369_v59 }
 0x101   : > { %v597_v19 = vpop.f32.mrf.mxu0 }
 0x102   : > { %v627_v24 = vmul.f32 %v7497_v15, %v597_v19 }
 0x103   : > { %v617_v34 = vpop.f32.mrf.mxu1 }
 0x104   : > { %5923 = vmatmul.msk.f32.vlgmr.msra.gmra.mxu3 %vm11017_vm0, %v627_v24  ;;  %v629_v26 = vmul.f32 %v627_v24, %v627_v24  ;;  %v628_v39 = vmul.f32 %v7497_v15, %v617_v34 }
 0x105   : > { %6476 = vmatpush.bf16.msra.mxu3 %v6402_v55 }
 0x106   : > { %v630_v44 = vsub.f32 %v628_v39, %v629_v26 }
 0x108   : > { %v631_v49 = vadd.f32 1e-06, %v630_v44 }
 0x109   : > { %6477 = vmatpush.bf16.msra.mxu3 %v6401_v56 }
 0x10a   : > { %6573 = vrsqrt.f32 %v631_v49  ;;  %vm638_vm3 = vweird.f32 %v631_v49 }
 0x10d   : > { %6478 = vmatpush.bf16.msra.mxu3 %v6400_v57 }
 0x110   : > { %v6574_v54 = vpop.eup %6573 }
 0x111   : > { %v633_v59 = vmul.f32 %v6574_v54, %v631_v49  ;;  %vm639_vm2 = vweird.f32 %v6574_v54  ;;  %6479 = vmatpush.bf16.msra.mxu3 %v6399_v58 }
 0x112   : > { %vm640_vm4 = vmor %vm638_vm3, %vm639_vm2 }
 0x113   : > { %v634_v47 = vmul.f32 %v6574_v54, %v633_v59 }
 0x115   : > { %v635_v50 = vmul.f32 0.5, %v634_v47  ;;  %6480 = vmatpush.bf16.msra.mxu3 %v6398_v60 }
 0x117   : > { %v636_v51 = vsub.f32 1.5, %v635_v50 }
 0x119   : > { %v637_v52 = vmul.f32 %v6574_v54, %v636_v51  ;;  %6481 = vmatpush.bf16.msra.mxu3 %v6397_v61 }
 0x11b   : > { %v641_v53 = vsel %vm640_vm4, %v6574_v54, %v637_v52 }
 0x11c   : > { %5940 = vmatmul.msk.f32.vlgmr.msrb.gmra.mxu3 %vm11017_vm0, %v641_v53 }
 0x11d   : > { %6482 = vmatpush.bf16.msra.mxu3 %v6396_v62 }
 0x121   : > { %6483 = vmatpush.bf16.msra.mxu3 %v6395_v13 }
 0x187   : > { %v711_v8 = vpop.f32.mrf.mxu3 }
 0x188   : > { %v7527_v14 = vperm.slane %v711_v8, 0 }
 0x18a   : > { %v738_v20 = vsub.f32 %v7221_v4, %v7527_v14  ;;  %v739_v25 = vsub.f32 %v7224_v5, %v7527_v14  ;;  %v762_v30 = vsub.f32 %v7386_v63, %v7527_v14  ;;  %v763_v32 = vsub.f32 %v7389_v11, %v7527_v14  ;;  %v7557_v63 = vld [vmem:[%s11004_s3] ss:$0 sm:$0xff] }
 0x18b   : > { %v740_v33 = vsub.f32 %v7232_v7, %v7527_v14  ;;  %v741_v4 = vsub.f32 %v7239_v9, %v7527_v14  ;;  %v764_v5 = vsub.f32 %v7393_v18, %v7527_v14  ;;  %v765_v35 = vsub.f32 %v7397_v23, %v7527_v14 }
 0x18c   : > { %v742_v23 = vsub.f32 %v7250_v12, %v7527_v14  ;;  %v743_v44 = vsub.f32 %v7265_v17, %v7527_v14  ;;  %v766_v49 = vsub.f32 %v7401_v31, %v7527_v14  ;;  %v767_v17 = vsub.f32 %v7405_v37, %v7527_v14 }
 0x18d   : > { %v744_v13 = vsub.f32 %v7278_v21, %v7527_v14 }
 0x19f   : > { %v734_v16 = vpop.f32.mrf.mxu3 }
 0x1a0   : > { %v7531_v22 = vperm.slane %v734_v16, 0 }
 0x1a2   : > { %v771_v38 = vmul.f32 %v7531_v22, %v738_v20  ;;  %v772_v40 = vmul.f32 %v7531_v22, %v739_v25  ;;  %v795_v7 = vmul.f32 %v7531_v22, %v762_v30  ;;  %v796_v11 = vmul.f32 %v7531_v22, %v763_v32 }
 0x1a3   : > { %v773_v9 = vmul.f32 %v7531_v22, %v740_v33  ;;  %v774_v18 = vmul.f32 %v7531_v22, %v741_v4  ;;  %v797_v42 = vmul.f32 %v7531_v22, %v764_v5  ;;  %v798_v6 = vmul.f32 %v7531_v22, %v765_v35 }
 0x1a4   : > { %v806_v45 = vmul.f32 %v7538_v29, %v771_v38  ;;  %v807_v46 = vmul.f32 %v7538_v29, %v772_v40  ;;  %v830_v0 = vmul.f32 %v7538_v29, %v795_v7  ;;  %v831_v1 = vmul.f32 %v7538_v29, %v796_v11 }
 0x1a5   : > { %v808_v2 = vmul.f32 %v7538_v29, %v773_v9  ;;  %v809_v3 = vmul.f32 %v7538_v29, %v774_v18  ;;  %v832_v10 = vmul.f32 %v7538_v29, %v797_v42  ;;  %v775_v50 = vmul.f32 %v7531_v22, %v742_v23 }
 0x1a6   : > { %v7575_v19 = vadd.f32 %v7557_v63, %v806_v45  ;;  %v7578_v12 = vadd.f32 %v7557_v63, %v807_v46  ;;  %v7581_v24 = vadd.f32 %v7557_v63, %v830_v0  ;;  %v7584_v26 = vadd.f32 %v7557_v63, %v831_v1 }
 0x1a7   : > { %v7587_v34 = vadd.f32 %v7557_v63, %v808_v2  ;;  %v7590_v39 = vadd.f32 %v7557_v63, %v809_v3  ;;  %v833_v52 = vmul.f32 %v7538_v29, %v798_v6  ;;  %v776_v53 = vmul.f32 %v7531_v22, %v743_v44 }
 0x1a8   : > { %v5941_v54 = vmul.f32 -1.442695, %v7575_v19  ;;  %v5942_v59 = vmul.f32 -1.442695, %v7578_v12  ;;  %v5965_v47 = vmul.f32 -1.442695, %v7581_v24  ;;  %v7607_v55 = vadd.f32 %v7557_v63, %v832_v10 }
 0x1a9   : > { %v5966_v51 = vmul.f32 -1.442695, %v7584_v26  ;;  %v5943_v31 = vmul.f32 -1.442695, %v7587_v34  ;;  %v810_v56 = vmul.f32 %v7538_v29, %v775_v50  ;;  %v5944_v57 = vmul.f32 -1.442695, %v7590_v39 }
 0x1aa   : > { %6575 = vpow2.f32 %v5941_v54  ;;  %v811_v58 = vmul.f32 %v7538_v29, %v776_v53  ;;  %v799_v60 = vmul.f32 %v7531_v22, %v766_v49  ;;  %v800_v61 = vmul.f32 %v7531_v22, %v767_v17 }
 0x1ab   : > { %6577 = vpow2.f32 %v5942_v59  ;;  %v7615_v37 = vadd.f32 %v7557_v63, %v833_v52  ;;  %v5967_v62 = vmul.f32 -1.442695, %v7607_v55  ;;  %v7619_v8 = vadd.f32 %v7557_v63, %v810_v56 }
 0x1ac   : > { %6579 = vpow2.f32 %v5965_v47  ;;  %v7624_v20 = vadd.f32 %v7557_v63, %v811_v58  ;;  %v834_v25 = vmul.f32 %v7538_v29, %v799_v60  ;;  %v835_v30 = vmul.f32 %v7538_v29, %v800_v61 }
 0x1ad   : > { %6581 = vpow2.f32 %v5966_v51  ;;  %v745_v32 = vsub.f32 %v7296_v27, %v7527_v14  ;;  %v5968_v5 = vmul.f32 -1.442695, %v7615_v37  ;;  %v777_v35 = vmul.f32 %v7531_v22, %v744_v13 }
 0x1ae   : > { %6583 = vpow2.f32 %v5943_v31  ;;  %v5945_v7 = vmul.f32 -1.442695, %v7619_v8  ;;  %v7649_v45 = vmul.f32 -1.442695, %v7624_v20  ;;  %v7652_v46 = vadd.f32 %v7557_v63, %v834_v25 }
 0x1af   : > { %6585 = vpow2.f32 %v5944_v57  ;;  %v778_v9 = vmul.f32 %v7531_v22, %v745_v32  ;;  %v7655_v0 = vadd.f32 %v7557_v63, %v835_v30  ;;  %v7662_v6 = vmul.f32 %v7538_v29, %v777_v35 }
 0x1b0   : > { %v6576_v16 = vpop.eup %6575  ;;  %6587 = vpow2.f32 %v5967_v62 }
 0x1b1   : > { %v6578_v33 = vpop.eup %6577  ;;  %v7630_v4 = vadd.f32 1.0, %v6576_v16  ;;  %v7672_v47 = vmul.f32 %v7538_v29, %v778_v9  ;;  %v5969_v16 = vmul.f32 -1.442695, %v7652_v46 }
 0x1b2   : > { %v6580_v38 = vpop.eup %6579  ;;  %v7636_v40 = vadd.f32 1.0, %v6578_v33 }
 0x1b3   : > { %v6582_v27 = vpop.eup %6581  ;;  %6589 = vrcp.f32 %v7630_v4  ;;  %v7657_v2 = vadd.f32 1.0, %v6580_v38  ;;  %v1010_v10 = vand.u32 2147483647, %v7630_v4  ;;  %v1012_v44 = vand.u32 2147483648, %v7630_v4 }
 0x1b4   : > { %v6584_v23 = vpop.eup %6583  ;;  %6591 = vrcp.f32 %v7636_v40  ;;  %v7659_v3 = vadd.f32 1.0, %v6582_v27  ;;  %v1025_v54 = vand.u32 2147483647, %v7636_v40  ;;  %v1027_v59 = vand.u32 2147483648, %v7636_v40 }
 0x1b5   : > { %v6586_v1 = vpop.eup %6585  ;;  %6593 = vpow2.f32 %v5968_v5  ;;  %v7666_v49 = vadd.f32 1.0, %v6584_v23  ;;  %v1372_v51 = vand.u32 2147483648, %v7657_v2  ;;  %vm1006_vm5 = vweird.f32 %v7630_v4 }
 0x1b6   : > { %6595 = vpow2.f32 %v5945_v7  ;;  %v6588_v50 = vpop.eup %6587  ;;  %v7676_v52 = vadd.f32 1.0, %v6586_v1  ;;  %vm1021_vm6 = vweird.f32 %v7636_v40  ;;  %v1387_v31 = vand.u32 2147483648, %v7659_v3 }
 0x1b7   : > { %6597 = vrcp.f32 %v7657_v2  ;;  %vm7685_vm7 = vcmp.eq.f32.partialorder %v1010_v10, 8.507059e+37  ;;  %v1013_v60 = vor.u32 1.1754944e-38, %v1012_v44  ;;  %v1370_v61 = vand.u32 2147483647, %v7657_v2 }
 0x1b8   : > { %6599 = vrcp.f32 %v7659_v3  ;;  %vm7691_vm8 = vcmp.eq.f32.partialorder %v1025_v54, 8.507059e+37  ;;  %v1028_v25 = vor.u32 1.1754944e-38, %v1027_v59  ;;  %v1385_v30 = vand.u32 2147483647, %v7659_v3 }
 0x1b9   : > { %v6590_v17 = vpop.eup %6589  ;;  %6601 = vrcp.f32 %v7666_v49  ;;  %vm1366_vm10 = vweird.f32 %v7657_v2  ;;  %v1373_v5 = vor.u32 1.1754944e-38, %v1372_v51  ;;  %vm1381_vm12 = vweird.f32 %v7659_v3 }
 0x1ba   : > { %v6592_v56 = vpop.eup %6591  ;;  %v1002_v57 = vmul.f32 %v6590_v17, %v7630_v4  ;;  %vm1007_vm9 = vweird.f32 %v6590_v17  ;;  %6603 = vrcp.f32 %v7676_v52  ;;  %v1388_v7 = vor.u32 1.1754944e-38, %v1387_v31 }
 0x1bb   : > { %v6594_v62 = vpop.eup %6593  ;;  %v1017_v13 = vmul.f32 %v6592_v56, %v7636_v40  ;;  %vm1022_vm11 = vweird.f32 %v6592_v56  ;;  %v1040_v27 = vand.u32 2147483647, %v7666_v49  ;;  %vm7703_vm13 = vcmp.eq.f32.partialorder %v1370_v61, 8.507059e+37  ;;  %vm1008_vm3 = vmor %vm1006_vm5, %vm1007_vm9 }
 0x1bc   : > { %v7696_v32 = vpop.eup %6595  ;;  %v1003_v33 = vsub.f32 1.0, %v1002_v57  ;;  %vm1036_vm14 = vweird.f32 %v7666_v49  ;;  %v1042_v44 = vand.u32 2147483648, %v7666_v49  ;;  %v1055_v54 = vand.u32 2147483647, %v7676_v52  ;;  %vm1023_vm0 = vmor %vm1021_vm6, %vm1022_vm11 }
 0x1bd   : > { %v6598_v35 = vpop.eup %6597  ;;  %v1018_v38 = vsub.f32 1.0, %v1017_v13  ;;  %vm7711_vm1 = vcmp.eq.f32.partialorder %v1385_v30, 8.507059e+37  ;;  %v1057_v61 = vand.u32 2147483648, %v7676_v52  ;;  %v7720_v18 = vadd.f32 1.0, %v6588_v50 }
 0x1be   : > { %v6600_v9 = vpop.eup %6599  ;;  %v1004_v23 = vmul.f32 %v6590_v17, %v1003_v33  ;;  %v1362_v1 = vmul.f32 %v6598_v35, %v7657_v2  ;;  %vm1367_vm15 = vweird.f32 %v6598_v35  ;;  %6605 = vpow2.f32 %v7649_v45 }
 0x1bf   : > { %v6602_v59 = vpop.eup %6601  ;;  %v1019_v51 = vmul.f32 %v6592_v56, %v1018_v38  ;;  %v1377_v31 = vmul.f32 %v6600_v9, %v7659_v3  ;;  %vm1382_vm2 = vweird.f32 %v6600_v9  ;;  %vm1368_vm5 = vmor %vm1366_vm10, %vm1367_vm15  ;;  %6607 = vrcp.f32 %v7720_v18 }
 0x1c0   : > { %v1005_v13 = vadd.f32 %v6590_v17, %v1004_v23  ;;  %v1363_v33 = vsub.f32 1.0, %v1362_v1  ;;  %v1032_v53 = vmul.f32 %v6602_v59, %v7666_v49  ;;  %vm1037_vm4 = vweird.f32 %v6602_v59  ;;  %v6604_v30 = vpop.eup %6603 }
 0x1c1   : > { %v1020_v42 = vadd.f32 %v6592_v56, %v1019_v51  ;;  %v1378_v38 = vsub.f32 1.0, %v1377_v31  ;;  %v1047_v51 = vmul.f32 %v6604_v30, %v7676_v52  ;;  %vm1052_vm6 = vweird.f32 %v6604_v30 }
 0x1c2   : > { %v1009_v11 = vsel %vm1008_vm3, %v6590_v17, %v1005_v13  ;;  %v1364_v23 = vmul.f32 %v6598_v35, %v1363_v33  ;;  %v1033_v1 = vsub.f32 1.0, %v1032_v53  ;;  %v1043_v49 = vor.u32 1.1754944e-38, %v1042_v44 }
 0x1c3   : > { %v1014_v21 = vsel %vm7685_vm7, %v1013_v60, %v1009_v11  ;;  %v1024_v4 = vsel %vm1023_vm0, %v6592_v56, %v1020_v42  ;;  %v1379_v15 = vmul.f32 %v6600_v9, %v1378_v38  ;;  %v1048_v53 = vsub.f32 1.0, %v1047_v51  ;;  %vm1383_vm0 = vmor %vm1381_vm12, %vm1382_vm2 }
 0x1c4   : > { %v1029_v50 = vsel %vm7691_vm8, %v1028_v25, %v1024_v4  ;;  %v1481_v17 = vmul.f32 %v1014_v21, %v7575_v19  ;;  %v1365_v31 = vadd.f32 %v6598_v35, %v1364_v23  ;;  %v1034_v13 = vmul.f32 %v6602_v59, %v1033_v1  ;;  %vm7747_vm7 = vmor %vm1036_vm14, %vm1037_vm4  ;;  %v6606_v58 = vpop.eup %6605 }
 0x1c5   : > { %v1482_v40 = vmul.f32 %v1029_v50, %v7578_v12  ;;  %v1380_v45 = vadd.f32 %v6600_v9, %v1379_v15  ;;  %v7736_v11 = vadd.f32 1.0, %v6594_v62  ;;  %v1049_v2 = vmul.f32 %v6604_v30, %v1048_v53 }
 0x1c6   : > { %v1369_v42 = vsel %vm1368_vm5, %v6598_v35, %v1365_v31  ;;  %v1035_v56 = vadd.f32 %v6602_v59, %v1034_v13  ;;  %vm1051_vm8 = vweird.f32 %v7676_v52  ;;  %vm1041_vm9 = vcmp.eq.f32.partialorder %v1040_v27, 8.507059e+37 }
 0x1c7   : > { %v1513_v19 = vpack.c.bf16 %v1482_v40, %v1481_v17  ;;  %v1374_v12 = vsel %vm7703_vm13, %v1373_v5, %v1369_v42  ;;  %v1384_v21 = vsel %vm1383_vm0, %v6600_v9, %v1380_v45  ;;  %v1050_v5 = vadd.f32 %v6604_v30, %v1049_v2  ;;  %vm1053_vm10 = vmor %vm1051_vm8, %vm1052_vm6 }
 0x1c8   : > { %v1389_v3 = vsel %vm7711_vm1, %v1388_v7, %v1384_v21  ;;  %v1505_v60 = vmul.f32 %v1374_v12, %v7581_v24  ;;  %v1039_v62 = vsel %vm7747_vm7, %v6602_v59, %v1035_v56  ;;  %vm1056_vm11 = vcmp.eq.f32.partialorder %v1055_v54, 8.507059e+37  ;;  %v6608_v59 = vpop.eup %6607 }
 0x1c9   : > { %1605 = vmatmul.bf16.vlgmr.msrb.gmra.mxu0 %v1513_v19  ;;  %v1506_v25 = vmul.f32 %v1389_v3, %v7584_v26  ;;  %v1058_v35 = vor.u32 1.1754944e-38, %v1057_v61  ;;  %6609 = vrcp.f32 %v7736_v11  ;;  %v1044_v7 = vsel %vm1041_vm9, %v1043_v49, %v1039_v62 }
 0x1ca   : > { %v1054_v9 = vsel %vm1053_vm10, %v6604_v30, %v1050_v5  ;;  %v1400_v10 = vand.u32 2147483647, %v7720_v18  ;;  %v1402_v26 = vand.u32 2147483648, %v7720_v18  ;;  %v7764_v44 = vadd.f32 1.0, %v7696_v32 }
 0x1cb   : > { %v1525_v24 = vpack.c.bf16 %v1506_v25, %v1505_v60  ;;  %v1059_v57 = vsel %vm1056_vm11, %v1058_v35, %v1054_v9  ;;  %v7766_v52 = vadd.f32 1.0, %v6606_v58  ;;  %v1392_v27 = vmul.f32 %v6608_v59, %v7720_v18 }
 0x1cc   : > { %v1415_v54 = vand.u32 2147483647, %v7736_v11  ;;  %v5970_v61 = vmul.f32 -1.442695, %v7655_v0  ;;  %v7773_v33 = vadd.f32 %v7557_v63, %v7662_v6  ;;  %v1483_v38 = vmul.f32 %v1044_v7, %v7587_v34 }
 0x1cd   : > { %1665 = vmatmul.bf16.vlgmr.msra.gmra.mxu3 %v1525_v24  ;;  %v1484_v30 = vmul.f32 %v1059_v57, %v7590_v39  ;;  %v1417_v32 = vand.u32 2147483648, %v7736_v11  ;;  %6611 = vrcp.f32 %v7764_v44  ;;  %v1393_v23 = vsub.f32 1.0, %v1392_v27 }
 0x1ce   : > { %vm1396_vm12 = vweird.f32 %v7720_v18  ;;  %6613 = vrcp.f32 %v7766_v52  ;;  %v7783_v1 = vadd.f32 %v7557_v63, %v7672_v47  ;;  %vm1397_vm13 = vweird.f32 %v6608_v59 }
 0x1cf   : > { %v6610_v4 = vpop.eup %6609  ;;  %vm7785_vm14 = vcmp.eq.f32.partialorder %v1400_v10, 8.507059e+37  ;;  %v1403_v34 = vor.u32 1.1754944e-38, %v1402_v26  ;;  %vm1411_vm15 = vweird.f32 %v7736_v11  ;;  %v1394_v39 = vmul.f32 %v6608_v59, %v1393_v23  ;;  %vm1398_vm3 = vmor %vm1396_vm12, %vm1397_vm13 }
 0x1d0   : > { %v1407_v51 = vmul.f32 %v6610_v4, %v7736_v11  ;;  %vm7791_vm1 = vcmp.eq.f32.partialorder %v1415_v54, 8.507059e+37  ;;  %v1070_v17 = vand.u32 2147483647, %v7764_v44  ;;  %v1514_v47 = vpack.c.bf16 %v1484_v30, %v1483_v38 }
 0x1d1   : > { %v1418_v31 = vor.u32 1.1754944e-38, %v1417_v32  ;;  %6615 = vpow2.f32 %v5969_v16  ;;  %v5947_v13 = vmul.f32 -1.442695, %v7773_v33  ;;  %v1395_v40 = vadd.f32 %v6608_v59, %v1394_v39 }
 0x1d2   : > { %v1408_v45 = vsub.f32 1.0, %v1407_v51  ;;  %vm1066_vm2 = vweird.f32 %v7764_v44  ;;  %6617 = vpow2.f32 %v5970_v61  ;;  %v5948_v53 = vmul.f32 -1.442695, %v7783_v1 }
 0x1d3   : > { %v6612_v42 = vpop.eup %6611  ;;  %v1072_v56 = vand.u32 2147483648, %v7764_v44  ;;  %vm1081_vm4 = vweird.f32 %v7766_v52  ;;  %v1085_v19 = vand.u32 2147483647, %v7766_v52  ;;  %v1087_v12 = vand.u32 2147483648, %v7766_v52 }
 0x1d4   : > { %v6614_v21 = vpop.eup %6613  ;;  %v1399_v15 = vsel %vm1398_vm3, %v6608_v59, %v1395_v40  ;;  %v1409_v2 = vmul.f32 %v6610_v4, %v1408_v45  ;;  %vm1412_vm5 = vweird.f32 %v6610_v4  ;;  %v1062_v58 = vmul.f32 %v6612_v42, %v7764_v44 }
 0x1d5   : > { %vm7807_vm0 = vcmp.eq.f32.partialorder %v1070_v17, 8.507059e+37  ;;  %v1404_v18 = vsel %vm7785_vm14, %v1403_v34, %v1399_v15  ;;  %v1077_v60 = vmul.f32 %v6614_v21, %v7766_v52  ;;  %6619 = vpow2.f32 %v5947_v13  ;;  %vm1413_vm6 = vmor %vm1411_vm15, %vm1412_vm5 }
 0x1d6   : > { %v11092_v62 = vsub.f32 %v7413_v43, %v7527_v14  ;;  %v1410_v25 = vadd.f32 %v6610_v4, %v1409_v2  ;;  %v1063_v49 = vsub.f32 1.0, %v1062_v58  ;;  %6621 = vpow2.f32 %v5948_v53 }
 0x1d7   : > { %v11093_v5 = vsub.f32 %v7419_v48, %v7527_v14  ;;  %v6616_v24 = vpop.eup %6615  ;;  %vm1067_vm7 = vweird.f32 %v6612_v42  ;;  %v1078_v7 = vsub.f32 1.0, %v1077_v60  ;;  %vm1082_vm8 = vweird.f32 %v6614_v21 }
 0x1d8   : > { %v801_v16 = vmul.f32 %v7531_v22, %v11092_v62  ;;  %v11094_v43 = vsub.f32 %v7299_v28, %v7527_v14  ;;  %v6618_v10 = vpop.eup %6617  ;;  %v1414_v59 = vsel %vm1413_vm6, %v6610_v4, %v1410_v25  ;;  %v1507_v57 = vmul.f32 %v1404_v18, %v7607_v55  ;;  %vm1068_vm9 = vmor %vm1066_vm2, %vm1067_vm7 }
 0x1d9   : > { %v802_v35 = vmul.f32 %v7531_v22, %v11093_v5  ;;  %1610 = vmatmul.bf16.gmra.mxu0 %v1514_v47  ;;  %v1064_v48 = vmul.f32 %v6612_v42, %v1063_v49  ;;  %v7829_v26 = vadd.f32 1.0, %v6616_v24  ;;  %v1419_v11 = vsel %vm7791_vm1, %v1418_v31, %v1414_v59  ;;  %vm1083_vm11 = vmor %vm1081_vm4, %vm1082_vm8 }
 0x1da   : > { %v779_v9 = vmul.f32 %v7531_v22, %v11094_v43  ;;  %v1079_v27 = vmul.f32 %v6614_v21, %v1078_v7  ;;  %v7833_v54 = vadd.f32 1.0, %v6618_v10  ;;  %v836_v61 = vmul.f32 %v7538_v29, %v801_v16 }
 0x1db   : > { %v1508_v28 = vmul.f32 %v1419_v11, %v7615_v37  ;;  %v1065_v38 = vadd.f32 %v6612_v42, %v1064_v48  ;;  %6623 = vrcp.f32 %v7829_v26  ;;  %v837_v30 = vmul.f32 %v7538_v29, %v802_v35  ;;  %v6620_v32 = vpop.eup %6619 }
 0x1dc   : > { %v1073_v55 = vor.u32 1.1754944e-38, %v1072_v56  ;;  %v1080_v23 = vadd.f32 %v6614_v21, %v1079_v27  ;;  %vm1086_vm10 = vcmp.eq.f32.partialorder %v1085_v19, 8.507059e+37  ;;  %6625 = vrcp.f32 %v7833_v54  ;;  %v6622_v4 = vpop.eup %6621 }
 0x1dd   : > { %v1526_v6 = vpack.c.bf16 %v1508_v28, %v1507_v57  ;;  %v1069_v34 = vsel %vm1068_vm9, %v6612_v42, %v1065_v38  ;;  %v1088_v37 = vor.u32 1.1754944e-38, %v1087_v12  ;;  %v11095_v39 = vsub.f32 %v7317_v36, %v7527_v14  ;;  %v6833_v38 = vld [vmem:[%s7184_s9 + $0x58] sm:$0xff] }
 0x1de   : > { %v1074_v44 = vsel %vm7807_vm0, %v1073_v55, %v1069_v34  ;;  %v1084_v50 = vsel %vm1083_vm11, %v6614_v21, %v1080_v23  ;;  %v7853_v17 = vadd.f32 %v7557_v63, %v836_v61  ;;  %v814_v47 = vmul.f32 %v7538_v29, %v779_v9 }
 0x1df   : > { %v780_v51 = vmul.f32 %v7531_v22, %v11095_v39  ;;  %1670 = vmatmul.bf16.gmra.mxu3 %v1526_v6  ;;  %v1089_v31 = vsel %vm1086_vm10, %v1088_v37, %v1084_v50  ;;  %v1430_v52 = vand.u32 2147483647, %v7829_v26  ;;  %v1432_v13 = vand.u32 2147483648, %v7829_v26 }
 0x1e0   : > { %v7859_v40 = vadd.f32 %v7557_v63, %v837_v30  ;;  %vm1426_vm12 = vweird.f32 %v7829_v26  ;;  %v1445_v36 = vand.u32 2147483647, %v7833_v54  ;;  %v7863_v45 = vadd.f32 1.0, %v6620_v32 }
 0x1e1   : > { %v7865_v53 = vadd.f32 1.0, %v6622_v4  ;;  %v6624_v42 = vpop.eup %6623  ;;  %v1485_v56 = vmul.f32 %v1074_v44, %v7619_v8  ;;  %v1486_v19 = vmul.f32 %v1089_v31, %v7624_v20  ;;  %vm1441_vm13 = vweird.f32 %v7833_v54 }
 0x1e2   : > { %v1447_v12 = vand.u32 2147483648, %v7833_v54  ;;  %v6626_v21 = vpop.eup %6625  ;;  %v1422_v15 = vmul.f32 %v6624_v42, %v7829_v26  ;;  %6627 = vrcp.f32 %v7863_v45  ;;  %v5971_v2 = vmul.f32 -1.442695, %v7853_v17 }
 0x1e3   : > { %v815_v58 = vmul.f32 %v7538_v29, %v780_v51  ;;  %vm7875_vm14 = vcmp.eq.f32.partialorder %v1430_v52, 8.507059e+37  ;;  %v1433_v8 = vor.u32 1.1754944e-38, %v1432_v13  ;;  %v1437_v20 = vmul.f32 %v6626_v21, %v7833_v54 }
 0x1e4   : > { %v5972_v18 = vmul.f32 -1.442695, %v7859_v40  ;;  %v1423_v60 = vsub.f32 1.0, %v1422_v15  ;;  %vm7881_vm15 = vcmp.eq.f32.partialorder %v1445_v36, 8.507059e+37  ;;  %6629 = vrcp.f32 %v7865_v53  ;;  %v6834_v15 = vld [vmem:[%s7184_s9 + $0x60] sm:$0xff] }
 0x1e5   : > { %v7887_v16 = vadd.f32 %v7557_v63, %v814_v47  ;;  %v1515_v25 = vpack.c.bf16 %v1486_v19, %v1485_v56  ;;  %vm1427_vm1 = vweird.f32 %v6624_v42  ;;  %v1438_v49 = vsub.f32 1.0, %v1437_v20 }
 0x1e6   : > { %v1448_v5 = vor.u32 1.1754944e-38, %v1447_v12  ;;  %v1424_v35 = vmul.f32 %v6624_v42, %v1423_v60  ;;  %vm1442_vm2 = vweird.f32 %v6626_v21  ;;  %6631 = vpow2.f32 %v5971_v2  ;;  %vm1428_vm4 = vmor %vm1426_vm12, %vm1427_vm1 }
 0x1e7   : > { %v7890_v24 = vadd.f32 %v7557_v63, %v815_v58  ;;  %v1439_v7 = vmul.f32 %v6626_v21, %v1438_v49  ;;  %vm1096_vm3 = vweird.f32 %v7863_v45  ;;  %v1100_v43 = vand.u32 2147483647, %v7863_v45  ;;  %vm1443_vm0 = vmor %vm1441_vm13, %vm1442_vm2 }
 0x1e8   : > { %v1102_v9 = vand.u32 2147483648, %v7863_v45  ;;  %6633 = vpow2.f32 %v5972_v18  ;;  %v6628_v10 = vpop.eup %6627  ;;  %v1425_v59 = vadd.f32 %v6624_v42, %v1424_v35  ;;  %v1115_v57 = vand.u32 2147483647, %v7865_v53 }
 0x1e9   : > { %v5949_v48 = vmul.f32 -1.442695, %v7887_v16  ;;  %v5950_v11 = vmul.f32 -1.442695, %v7890_v24  ;;  %1615 = vmatmul.bf16.gmra.mxu0 %v1515_v25  ;;  %v1440_v27 = vadd.f32 %v6626_v21, %v1439_v7  ;;  %v1092_v61 = vmul.f32 %v6628_v10, %v7863_v45 }
 0x1ea   : > { %vm1111_vm5 = vweird.f32 %v7865_v53  ;;  %v1117_v28 = vand.u32 2147483648, %v7865_v53  ;;  %v749_v30 = vsub.f32 %v6833_v38, %v7527_v14  ;;  %v6630_v32 = vpop.eup %6629  ;;  %v1429_v55 = vsel %vm1428_vm4, %v6624_v42, %v1425_v59 }
 0x1eb   : > { %vm1097_vm6 = vweird.f32 %v6628_v10  ;;  %6635 = vpow2.f32 %v5949_v48  ;;  %v11100_v26 = vsub.f32 %v7330_v41, %v7527_v14  ;;  %v1434_v4 = vsel %vm7875_vm14, %v1433_v8, %v1429_v55 }
 0x1ec   : > { %v1444_v6 = vsel %vm1443_vm0, %v6626_v21, %v1440_v27  ;;  %v1093_v34 = vsub.f32 1.0, %v1092_v61  ;;  %v1107_v37 = vmul.f32 %v6630_v32, %v7865_v53  ;;  %v6632_v39 = vpop.eup %6631  ;;  %v1509_v54 = vmul.f32 %v1434_v4, %v7652_v46  ;;  %vm1098_vm9 = vmor %vm1096_vm3, %vm1097_vm6 }
 0x1ed   : > { %v781_v23 = vmul.f32 %v7531_v22, %v11100_v26  ;;  %v1449_v51 = vsel %vm7881_vm15, %v1448_v5, %v1444_v6  ;;  %6637 = vpow2.f32 %v5950_v11  ;;  %v782_v44 = vmul.f32 %v7531_v22, %v749_v30 }
 0x1ee   : > { %v6634_v50 = vpop.eup %6633  ;;  %v1510_v41 = vmul.f32 %v1449_v51, %v7655_v0  ;;  %v1094_v47 = vmul.f32 %v6628_v10, %v1093_v34  ;;  %v1108_v31 = vsub.f32 1.0, %v1107_v37  ;;  %v7921_v52 = vadd.f32 1.0, %v6632_v39 }
 0x1ef   : > { %vm7923_vm7 = vcmp.eq.f32.partialorder %v1100_v43, 8.507059e+37  ;;  %v1103_v36 = vor.u32 1.1754944e-38, %v1102_v9  ;;  %vm1112_vm8 = vweird.f32 %v6630_v32  ;;  %v7927_v42 = vadd.f32 1.0, %v6634_v50  ;;  %v6835_v9 = vld [vmem:[%s7184_s9 + $0x68] sm:$0xff] }
 0x1f0   : > { %v1527_v46 = vpack.c.bf16 %v1510_v41, %v1509_v54  ;;  %v1095_v56 = vadd.f32 %v6628_v10, %v1094_v47  ;;  %v1109_v19 = vmul.f32 %v6630_v32, %v1108_v31  ;;  %6639 = vrcp.f32 %v7921_v52  ;;  %vm1113_vm11 = vmor %vm1111_vm5, %vm1112_vm8 }
 0x1f1   : > { %v6636_v12 = vpop.eup %6635  ;;  %vm7933_vm10 = vcmp.eq.f32.partialorder %v1115_v57, 8.507059e+37  ;;  %v1118_v21 = vor.u32 1.1754944e-38, %v1117_v28  ;;  %6641 = vrcp.f32 %v7927_v42  ;;  %v750_v2 = vsub.f32 %v6834_v15, %v7527_v14 }
 0x1f2   : > { %1675 = vmatmul.bf16.gmra.mxu3 %v1527_v46  ;;  %v1099_v58 = vsel %vm1098_vm9, %v6628_v10, %v1095_v56  ;;  %v1110_v3 = vadd.f32 %v6630_v32, %v1109_v19  ;;  %v816_v8 = vmul.f32 %v7538_v29, %v781_v23  ;;  %v817_v20 = vmul.f32 %v7538_v29, %v782_v44 }
 0x1f3   : > { %v6638_v45 = vpop.eup %6637  ;;  %v1104_v18 = vsel %vm7923_vm7, %v1103_v36, %v1099_v58  ;;  %v1460_v60 = vand.u32 2147483647, %v7921_v52  ;;  %v1462_v62 = vand.u32 2147483648, %v7921_v52  ;;  %v1475_v25 = vand.u32 2147483647, %v7927_v42 }
 0x1f4   : > { %v1114_v49 = vsel %vm1113_vm11, %v6630_v32, %v1110_v3  ;;  %v1487_v5 = vmul.f32 %v1104_v18, %v7773_v33  ;;  %v1477_v35 = vand.u32 2147483648, %v7927_v42  ;;  %v7952_v7 = vadd.f32 1.0, %v6636_v12 }
 0x1f5   : > { %v1119_v43 = vsel %vm7933_vm10, %v1118_v21, %v1114_v49  ;;  %vm1456_vm12 = vweird.f32 %v7921_v52  ;;  %v7957_v53 = vadd.f32 1.0, %v6638_v45  ;;  %v751_v10 = vsub.f32 %v6835_v9, %v7527_v14 }
 0x1f6   : > { %v6640_v59 = vpop.eup %6639  ;;  %v1488_v57 = vmul.f32 %v1119_v43, %v7783_v1  ;;  %vm1471_vm13 = vweird.f32 %v7927_v42  ;;  %6643 = vrcp.f32 %v7952_v7  ;;  %v7965_v33 = vadd.f32 %v7557_v63, %v816_v8 }
 0x1f7   : > { %v6642_v48 = vpop.eup %6641  ;;  %v1452_v11 = vmul.f32 %v6640_v59, %v7921_v52  ;;  %vm7968_vm14 = vcmp.eq.f32.partialorder %v1460_v60, 8.507059e+37  ;;  %v1463_v61 = vor.u32 1.1754944e-38, %v1462_v62  ;;  %v1132_v28 = vand.u32 2147483648, %v7952_v7 }
 0x1f8   : > { %6645 = vrcp.f32 %v7957_v53  ;;  %v1516_v1 = vpack.c.bf16 %v1488_v57, %v1487_v5  ;;  %v1467_v38 = vmul.f32 %v6642_v48, %v7927_v42  ;;  %vm7975_vm15 = vcmp.eq.f32.partialorder %v1475_v25, 8.507059e+37  ;;  %v6836_v5 = vld [vmem:[%s7184_s9 + $0x70] sm:$0xff] }
 0x1f9   : > { %v1478_v32 = vor.u32 1.1754944e-38, %v1477_v35  ;;  %v1453_v55 = vsub.f32 1.0, %v1452_v11  ;;  %vm1457_vm1 = vweird.f32 %v6640_v59  ;;  %vm1472_vm2 = vweird.f32 %v6642_v48 }
 0x1fa   : > { %v1130_v26 = vand.u32 2147483647, %v7952_v7  ;;  %1620 = vmatmul.bf16.gmra.mxu0 %v1516_v1  ;;  %v1468_v23 = vsub.f32 1.0, %v1467_v38  ;;  %v1147_v4 = vand.u32 2147483648, %v7957_v53  ;;  %v7982_v6 = vadd.f32 %v7557_v63, %v817_v20  ;;  %vm1458_vm0 = vmor %vm1456_vm12, %vm1457_vm1 }
 0x1fb   : > { %v5951_v34 = vmul.f32 -1.442695, %v7965_v33  ;;  %v1454_v37 = vmul.f32 %v6640_v59, %v1453_v55  ;;  %vm1126_vm3 = vweird.f32 %v7952_v7  ;;  %v1133_v39 = vor.u32 1.1754944e-38, %v1132_v28  ;;  %vm1473_vm7 = vmor %vm1471_vm13, %vm1472_vm2 }
 0x1fc   : > { %v783_v51 = vmul.f32 %v7531_v22, %v750_v2  ;;  %v784_v54 = vmul.f32 %v7531_v22, %v751_v10  ;;  %v6644_v44 = vpop.eup %6643  ;;  %v1469_v50 = vmul.f32 %v6642_v48, %v1468_v23  ;;  %vm1141_vm4 = vweird.f32 %v7957_v53 }
 0x1fd   : > { %v1145_v41 = vand.u32 2147483647, %v7957_v53  ;;  %6647 = vpow2.f32 %v5951_v34  ;;  %v5952_v47 = vmul.f32 -1.442695, %v7982_v6  ;;  %v1455_v13 = vadd.f32 %v6640_v59, %v1454_v37 }
 0x1fe   : > { %v6646_v31 = vpop.eup %6645  ;;  %v1122_v36 = vmul.f32 %v6644_v44, %v7952_v7  ;;  %vm7992_vm5 = vcmp.eq.f32.partialorder %v1130_v26, 8.507059e+37  ;;  %v1148_v56 = vor.u32 1.1754944e-38, %v1147_v4  ;;  %v818_v19 = vmul.f32 %v7538_v29, %v783_v51  ;;  %v6838_v4 = vld [vmem:[%s7184_s9 + $0x80] sm:$0xff] }
 0x1ff   : > { %v1470_v12 = vadd.f32 %v6642_v48, %v1469_v50  ;;  %vm1127_vm6 = vweird.f32 %v6644_v44  ;;  %v1137_v0 = vmul.f32 %v6646_v31, %v7957_v53  ;;  %6649 = vpow2.f32 %v5952_v47 }
 0x200   : > { %v1459_v21 = vsel %vm1458_vm0, %v6640_v59, %v1455_v13  ;;  %v1123_v15 = vsub.f32 1.0, %v1122_v36  ;;  %v819_v2 = vmul.f32 %v7538_v29, %v784_v54  ;;  %v8006_v58 = vadd.f32 %v7557_v63, %v818_v19  ;;  %v6837_v59 = vld [vmem:[%s7184_s9 + $0x78] sm:$0xff]  ;;  %vm1128_vm9 = vmor %vm1126_vm3, %vm1127_vm6 }
 0x201   : > { %v1464_v52 = vsel %vm7968_vm14, %v1463_v61, %v1459_v21  ;;  %v1474_v3 = vsel %vm1473_vm7, %v6642_v48, %v1470_v12  ;;  %v1138_v8 = vsub.f32 1.0, %v1137_v0  ;;  %vm1142_vm8 = vweird.f32 %v6646_v31 }
 0x202   : > { %v1479_v20 = vsel %vm7975_vm15, %v1478_v32, %v1474_v3  ;;  %v1511_v42 = vmul.f32 %v1464_v52, %v7853_v17  ;;  %v1124_v45 = vmul.f32 %v6644_v44, %v1123_v15  ;;  %v8014_v18 = vadd.f32 %v7557_v63, %v819_v2  ;;  %vm1143_vm10 = vmor %vm1141_vm4, %vm1142_vm8 }
 0x203   : > { %v6648_v60 = vpop.eup %6647  ;;  %v1512_v62 = vmul.f32 %v1479_v20, %v7859_v40  ;;  %v1139_v25 = vmul.f32 %v6646_v31, %v1138_v8  ;;  %v5953_v49 = vmul.f32 -1.442695, %v8006_v58  ;;  %v752_v35 = vsub.f32 %v6836_v5, %v7527_v14  ;;  %v8073_v8 = vld [vmem:[%s11003_s2] ss:$0 sm:$0xff] }
 0x204   : > { %v1125_v43 = vadd.f32 %v6644_v44, %v1124_v45  ;;  %v8020_v9 = vadd.f32 1.0, %v6648_v60  ;;  %v5954_v10 = vmul.f32 -1.442695, %v8014_v18  ;;  %v753_v17 = vsub.f32 %v6837_v59, %v7527_v14 }
 0x205   : > { %v6650_v57 = vpop.eup %6649  ;;  %v1528_v48 = vpack.c.bf16 %v1512_v62, %v1511_v42  ;;  %v1140_v40 = vadd.f32 %v6646_v31, %v1139_v25  ;;  %6651 = vpow2.f32 %v5953_v49  ;;  %v785_v11 = vmul.f32 %v7531_v22, %v752_v35 }
 0x206   : > { %v1129_v27 = vsel %vm1128_vm9, %v6644_v44, %v1125_v43  ;;  %v8032_v61 = vadd.f32 1.0, %v6650_v57  ;;  %6653 = vrcp.f32 %v8020_v9  ;;  %v786_v28 = vmul.f32 %v7531_v22, %v753_v17 }
 0x207   : > { %1680 = vmatmul.bf16.gmra.mxu3 %v1528_v48  ;;  %v1134_v7 = vsel %vm7992_vm5, %v1133_v39, %v1129_v27  ;;  %v1144_v1 = vsel %vm1143_vm10, %v6646_v31, %v1140_v40  ;;  %vm1146_vm11 = vcmp.eq.f32.partialorder %v1145_v41, 8.507059e+37  ;;  %v820_v32 = vmul.f32 %v7538_v29, %v785_v11 }
 0x208   : > { %v1149_v38 = vsel %vm1146_vm11, %v1148_v56, %v1144_v1  ;;  %v1489_v30 = vmul.f32 %v1134_v7, %v7887_v16  ;;  %6655 = vrcp.f32 %v8032_v61  ;;  %v821_v55 = vmul.f32 %v7538_v29, %v786_v28 }
 0x209   : > { %v1490_v53 = vmul.f32 %v1149_v38, %v7890_v24  ;;  %6657 = vpow2.f32 %v5954_v10  ;;  %v754_v34 = vsub.f32 %v6838_v4, %v7527_v14  ;;  %v8048_v51 = vadd.f32 %v7557_v63, %v820_v32  ;;  %v6839_v24 = vld [vmem:[%s7184_s9 + $0x88] sm:$0xff]  ;;  %v6842_v32 = vld [vmem:[%s7184_s9 + $0x90] sm:$0xff] }
 0x20a   : > { %v8051_v16 = vadd.f32 %v7557_v63, %v821_v55  ;;  %v755_v54 = vsub.f32 %v6839_v24, %v7527_v14  ;;  %vm1156_vm12 = vweird.f32 %v8020_v9  ;;  %v1160_v47 = vand.u32 2147483647, %v8020_v9 }
 0x20b   : > { %v6652_v26 = vpop.eup %6651  ;;  %v1517_v23 = vpack.c.bf16 %v1490_v53, %v1489_v30  ;;  %v787_v50 = vmul.f32 %v7531_v22, %v754_v34  ;;  %v1162_v36 = vand.u32 2147483648, %v8020_v9  ;;  %v5955_v56 = vmul.f32 -1.442695, %v8048_v51 }
 0x20c   : > { %v6654_v37 = vpop.eup %6653  ;;  %v8045_v39 = vadd.f32 1.0, %v6652_v26  ;;  %v788_v31 = vmul.f32 %v7531_v22, %v755_v54  ;;  %v1175_v12 = vand.u32 2147483647, %v8032_v61  ;;  %v5956_v0 = vmul.f32 -1.442695, %v8051_v16 }
 0x20d   : > { %1625 = vmatmul.bf16.gmra.mxu0 %v1517_v23  ;;  %v1152_v44 = vmul.f32 %v6654_v37, %v8020_v9  ;;  %vm1157_vm13 = vweird.f32 %v6654_v37  ;;  %v822_v21 = vmul.f32 %v7538_v29, %v787_v50  ;;  %v1177_v3 = vand.u32 2147483648, %v8032_v61 }
 0x20e   : > { %v6656_v41 = vpop.eup %6655  ;;  %6659 = vrcp.f32 %v8045_v39  ;;  %v823_v20 = vmul.f32 %v8073_v8, %v788_v31  ;;  %vm1158_vm15 = vmor %vm1156_vm12, %vm1157_vm13  ;;  %vm1161_vm1 = vcmp.eq.f32.partialorder %v1160_v47, 8.507059e+37  ;;  %v1163_v62 = vor.u32 1.1754944e-38, %v1162_v36 }
 0x20f   : > { %v1153_v13 = vsub.f32 1.0, %v1152_v44  ;;  %v1167_v46 = vmul.f32 %v6656_v41, %v8032_v61  ;;  %v6658_v19 = vpop.eup %6657  ;;  %6661 = vpow2.f32 %v5955_v56  ;;  %v8077_v42 = vadd.f32 %v7557_v63, %v822_v21  ;;  %v8089_v63 = vld [vmem:[%s11004_s3] ss:$0 sm:$0xff] }
 0x210   : > { %v8067_v52 = vadd.f32 1.0, %v6658_v19  ;;  %6663 = vpow2.f32 %v5956_v0  ;;  %vm1172_vm14 = vweird.f32 %v6656_v41  ;;  %vm1171_vm2 = vweird.f32 %v8032_v61  ;;  %v6843_v44 = vld [vmem:[%s7184_s9 + $0x98] sm:$0xff] }
 0x211   : > { %v1154_v15 = vmul.f32 %v6654_v37, %v1153_v13  ;;  %v1168_v2 = vsub.f32 1.0, %v1167_v46  ;;  %v8092_v25 = vadd.f32 %v8089_v63, %v823_v20  ;;  %v5957_v43 = vmul.f32 -1.442695, %v8077_v42  ;;  %vm1173_vm3 = vmor %vm1171_vm2, %vm1172_vm14 }
 0x212   : > { %6665 = vrcp.f32 %v8067_v52  ;;  %vm1176_vm4 = vcmp.eq.f32.partialorder %v1175_v12, 8.507059e+37  ;;  %v1178_v10 = vor.u32 1.1754944e-38, %v1177_v3  ;;  %v756_v55 = vsub.f32 %v6842_v32, %v7527_v14 }
 0x213   : > { %v1155_v45 = vadd.f32 %v6654_v37, %v1154_v15  ;;  %v1169_v29 = vmul.f32 %v6656_v41, %v1168_v2  ;;  %v5958_v40 = vmul.f32 -1.442695, %v8092_v25  ;;  %6667 = vpow2.f32 %v5957_v43 }
 0x214   : > { %v8080_v60 = vpop.eup %6659  ;;  %v1192_v26 = vand.u32 2147483648, %v8045_v39  ;;  %v1207_v4 = vand.u32 2147483648, %v8067_v52  ;;  %v789_v34 = vmul.f32 %v7531_v22, %v756_v55  ;;  %vm1186_vm6 = vweird.f32 %v8045_v39 }
 0x215   : > { %v1159_v49 = vsel %vm1158_vm15, %v6654_v37, %v1155_v45  ;;  %v1170_v5 = vadd.f32 %v6656_v41, %v1169_v29  ;;  %v1182_v35 = vmul.f32 %v8080_v60, %v8045_v39  ;;  %v6662_v59 = vpop.eup %6661  ;;  %vm1187_vm5 = vweird.f32 %v8080_v60 }
 0x216   : > { %v1164_v9 = vsel %vm1161_vm1, %v1163_v62, %v1159_v49  ;;  %v6664_v11 = vpop.eup %6663  ;;  %v8099_v61 = vadd.f32 1.0, %v6662_v59  ;;  %v1190_v24 = vand.u32 2147483647, %v8045_v39  ;;  %v1205_v54 = vand.u32 2147483647, %v8067_v52  ;;  %vm8122_vm7 = vmor %vm1186_vm6, %vm1187_vm5 }
 0x217   : > { %v1174_v17 = vsel %vm1173_vm3, %v6656_v41, %v1170_v5  ;;  %v1491_v57 = vmul.f32 %v1164_v9, %v7965_v33  ;;  %v1183_v48 = vsub.f32 1.0, %v1182_v35  ;;  %v8103_v38 = vadd.f32 1.0, %v6664_v11  ;;  %v6844_v9 = vld [vmem:[%s7184_s9 + $0xa0] sm:$0xff] }
 0x218   : > { %v1179_v27 = vsel %vm1176_vm4, %v1178_v10, %v1174_v17  ;;  %v6666_v28 = vpop.eup %6665  ;;  %6669 = vrcp.f32 %v8099_v61  ;;  %v757_v50 = vsub.f32 %v6843_v44, %v7527_v14  ;;  %vm1201_vm8 = vweird.f32 %v8067_v52 }
 0x219   : > { %v1492_v7 = vmul.f32 %v1179_v27, %v7982_v6  ;;  %v1184_v1 = vmul.f32 %v8080_v60, %v1183_v48  ;;  %v1197_v30 = vmul.f32 %v6666_v28, %v8067_v52  ;;  %6671 = vpow2.f32 %v5958_v40  ;;  %v6668_v37 = vpop.eup %6667 }
 0x21a   : > { %6673 = vrcp.f32 %v8103_v38  ;;  %vm1202_vm0 = vweird.f32 %v6666_v28  ;;  %v790_v46 = vmul.f32 %v7531_v22, %v757_v50  ;;  %v1193_v19 = vor.u32 1.1754944e-38, %v1192_v26 }
 0x21b   : > { %v1518_v33 = vpack.c.bf16 %v1492_v7, %v1491_v57  ;;  %v1198_v53 = vsub.f32 1.0, %v1197_v30  ;;  %v1185_v6 = vadd.f32 %v8080_v60, %v1184_v1  ;;  %vm1203_vm9 = vmor %vm1201_vm8, %vm1202_vm0  ;;  %v1208_v0 = vor.u32 1.1754944e-38, %v1207_v4 }
 0x21c   : > { %v824_v21 = vmul.f32 %v8073_v8, %v789_v34  ;;  %vm1191_vm10 = vcmp.eq.f32.partialorder %v1190_v24, 8.507059e+37  ;;  %vm1206_vm11 = vcmp.eq.f32.partialorder %v1205_v54, 8.507059e+37  ;;  %v8139_v2 = vadd.f32 1.0, %v6668_v37 }
 0x21d   : > { %1630 = vmatmul.bf16.gmra.mxu0 %v1518_v33  ;;  %v1199_v23 = vmul.f32 %v6666_v28, %v1198_v53  ;;  %v1189_v36 = vsel %vm8122_vm7, %v8080_v60, %v1185_v6  ;;  %v825_v60 = vmul.f32 %v8073_v8, %v790_v46  ;;  %v758_v10 = vsub.f32 %v6844_v9, %v7527_v14 }
 0x21e   : > { %v8120_v41 = vpop.eup %6669  ;;  %v1194_v52 = vsel %vm1191_vm10, %v1193_v19, %v1189_v36  ;;  %v8145_v62 = vadd.f32 %v8089_v63, %v824_v21  ;;  %6675 = vrcp.f32 %v8139_v2  ;;  %vm1216_vm14 = vweird.f32 %v8099_v61 }
 0x21f   : > { %v1200_v31 = vadd.f32 %v6666_v28, %v1199_v23  ;;  %v6672_v13 = vpop.eup %6671  ;;  %v1212_v39 = vmul.f32 %v8120_v41, %v8099_v61  ;;  %v1493_v49 = vmul.f32 %v1194_v52, %v8006_v58  ;;  %v8152_v35 = vadd.f32 %v8089_v63, %v825_v60 }
 0x220   : > { %v8134_v56 = vpop.eup %6673  ;;  %v8141_v20 = vadd.f32 1.0, %v6672_v13  ;;  %v5959_v43 = vmul.f32 -1.442695, %v8145_v62  ;;  %v791_v48 = vmul.f32 %v7531_v22, %v758_v10  ;;  %vm1217_vm12 = vweird.f32 %v8120_v41 }
 0x221   : > { %v1204_v12 = vsel %vm1203_vm9, %v6666_v28, %v1200_v31  ;;  %v1227_v15 = vmul.f32 %v8134_v56, %v8103_v38  ;;  %v1213_v45 = vsub.f32 1.0, %v1212_v39  ;;  %v5960_v58 = vmul.f32 -1.442695, %v8152_v35  ;;  %vm8176_vm15 = vmor %vm1216_vm14, %vm1217_vm12 }
 0x222   : > { %v1209_v3 = vsel %vm1206_vm11, %v1208_v0, %v1204_v12  ;;  %6677 = vrcp.f32 %v8141_v20  ;;  %vm1232_vm13 = vweird.f32 %v8134_v56  ;;  %v1222_v30 = vand.u32 2147483648, %v8099_v61  ;;  %v6846_v0 = vld [vmem:[%s7184_s9 + $0xb0] sm:$0xff] }
 0x223   : > { %v1228_v29 = vsub.f32 1.0, %v1227_v15  ;;  %v1494_v5 = vmul.f32 %v1209_v3, %v8014_v18  ;;  %v1214_v59 = vmul.f32 %v8120_v41, %v1213_v45  ;;  %6679 = vpow2.f32 %v5959_v43  ;;  %v6845_v18 = vld [vmem:[%s7184_s9 + $0xa8] sm:$0xff]  ;;  %v6847_v3 = vld [vmem:[%s7184_s9 + $0xb8] sm:$0xff] }
 0x224   : > { %v759_v57 = vsub.f32 %v6845_v18, %v7527_v14  ;;  %6681 = vpow2.f32 %v5960_v58  ;;  %v8165_v27 = vpop.eup %6675  ;;  %v1237_v33 = vand.u32 2147483648, %v8103_v38  ;;  %v826_v53 = vmul.f32 %v8073_v8, %v791_v48 }
 0x225   : > { %v1229_v17 = vmul.f32 %v8134_v56, %v1228_v29  ;;  %v1519_v40 = vpack.c.bf16 %v1494_v5, %v1493_v49  ;;  %v1215_v28 = vadd.f32 %v8120_v41, %v1214_v59  ;;  %v1220_v55 = vand.u32 2147483647, %v8099_v61 }
 0x226   : > { %v792_v11 = vmul.f32 %v7531_v22, %v759_v57  ;;  %vm1231_vm1 = vweird.f32 %v8103_v38  ;;  %v1235_v6 = vand.u32 2147483647, %v8103_v38  ;;  %v1242_v37 = vmul.f32 %v8165_v27, %v8139_v2 }
 0x227   : > { %v1230_v7 = vadd.f32 %v8134_v56, %v1229_v17  ;;  %vm1233_vm2 = vmor %vm1231_vm1, %vm1232_vm13  ;;  %v1219_v4 = vsel %vm8176_vm15, %v8120_v41, %v1215_v28  ;;  %v1223_v54 = vor.u32 1.1754944e-38, %v1222_v30  ;;  %v1238_v44 = vor.u32 1.1754944e-38, %v1237_v33 }
 0x228   : > { %v8170_v1 = vpop.eup %6677  ;;  %v827_v26 = vmul.f32 %v8073_v8, %v792_v11  ;;  %v8193_v38 = vadd.f32 %v8089_v63, %v826_v53  ;;  %vm1221_vm3 = vcmp.eq.f32.partialorder %v1220_v55, 8.507059e+37  ;;  %vm1236_vm4 = vcmp.eq.f32.partialorder %v1235_v6, 8.507059e+37 }
 0x229   : > { %v6680_v23 = vpop.eup %6679  ;;  %v1234_v34 = vsel %vm1233_vm2, %v8134_v56, %v1230_v7  ;;  %v1257_v61 = vmul.f32 %v8170_v1, %v8141_v20  ;;  %v1224_v47 = vsel %vm1221_vm3, %v1223_v54, %v1219_v4  ;;  %v1243_v36 = vsub.f32 1.0, %v1242_v37 }
 0x22a   : > { %v6682_v24 = vpop.eup %6681  ;;  %v8195_v50 = vadd.f32 1.0, %v6680_v23  ;;  %v8198_v41 = vadd.f32 %v8089_v63, %v827_v26  ;;  %v1239_v31 = vsel %vm1236_vm4, %v1238_v44, %v1234_v34  ;;  %v5961_v46 = vmul.f32 -1.442695, %v8193_v38 }
 0x22b   : > { %v8200_v13 = vadd.f32 1.0, %v6682_v24  ;;  %v1258_v39 = vsub.f32 1.0, %v1257_v61  ;;  %v1495_v56 = vmul.f32 %v1224_v47, %v8048_v51  ;;  %v1496_v19 = vmul.f32 %v1239_v31, %v8051_v16 }
 0x22c   : > { %6683 = vrcp.f32 %v8195_v50  ;;  %v5962_v12 = vmul.f32 -1.442695, %v8198_v41  ;;  %v760_v21 = vsub.f32 %v6846_v0, %v7527_v14  ;;  %v1244_v15 = vmul.f32 %v8165_v27, %v1243_v36 }
 0x22d   : > { %1635 = vmatmul.bf16.gmra.mxu0 %v1519_v40  ;;  %6685 = vrcp.f32 %v8200_v13  ;;  %v1259_v52 = vmul.f32 %v8170_v1, %v1258_v39  ;;  %v761_v45 = vsub.f32 %v6847_v3, %v7527_v14  ;;  %v1520_v16 = vpack.c.bf16 %v1496_v19, %v1495_v56 }
 0x22e   : > { %6687 = vpow2.f32 %v5961_v46  ;;  %v793_v51 = vmul.f32 %v7531_v22, %v760_v21  ;;  %vm1247_vm5 = vweird.f32 %v8165_v27  ;;  %v1245_v49 = vadd.f32 %v8165_v27, %v1244_v15 }
 0x22f   : > { %6689 = vpow2.f32 %v5962_v12  ;;  %v794_v29 = vmul.f32 %v7531_v22, %v761_v45  ;;  %v1260_v5 = vadd.f32 %v8170_v1, %v1259_v52  ;;  %vm1262_vm0 = vweird.f32 %v8170_v1 }
 0x230   : > { %vm1246_vm6 = vweird.f32 %v8139_v2  ;;  %v1252_v14 = vand.u32 2147483648, %v8139_v2  ;;  %v1267_v9 = vand.u32 2147483648, %v8141_v20  ;;  %v828_v22 = vmul.f32 %v8073_v8, %v793_v51 }
 0x231   : > { %vm8228_vm7 = vmor %vm1246_vm6, %vm1247_vm5  ;;  %v1250_v59 = vand.u32 2147483647, %v8139_v2  ;;  %vm1261_vm8 = vweird.f32 %v8141_v20  ;;  %v1265_v17 = vand.u32 2147483647, %v8141_v20  ;;  %v829_v58 = vmul.f32 %v8073_v8, %v794_v29 }
 0x232   : > { %v8217_v60 = vpop.eup %6683  ;;  %vm1263_vm9 = vmor %vm1261_vm8, %vm1262_vm0  ;;  %v1249_v48 = vsel %vm8228_vm7, %v8165_v27, %v1245_v49  ;;  %v1253_v28 = vor.u32 1.1754944e-38, %v1252_v14  ;;  %v1268_v7 = vor.u32 1.1754944e-38, %v1267_v9  ;;  %v8245_v20 = vadd.f32 %v8089_v63, %v828_v22 }
 0x233   : > { %v8222_v43 = vpop.eup %6685  ;;  %v1264_v40 = vsel %vm1263_vm9, %v8170_v1, %v1260_v5  ;;  %v1272_v11 = vmul.f32 %v8217_v60, %v8195_v50  ;;  %vm1251_vm10 = vcmp.eq.f32.partialorder %v1250_v59, 8.507059e+37  ;;  %vm1266_vm11 = vcmp.eq.f32.partialorder %v1265_v17, 8.507059e+37 }
 0x234   : > { %v6688_v18 = vpop.eup %6687  ;;  %v1287_v2 = vmul.f32 %v8222_v43, %v8200_v13  ;;  %v8250_v30 = vadd.f32 %v8089_v63, %v829_v58  ;;  %v1254_v27 = vsel %vm1251_vm10, %v1253_v28, %v1249_v48  ;;  %v1269_v1 = vsel %vm1266_vm11, %v1268_v7, %v1264_v40 }
 0x235   : > { %v6690_v57 = vpop.eup %6689  ;;  %v8247_v8 = vadd.f32 1.0, %v6688_v18  ;;  %v1273_v53 = vsub.f32 1.0, %v1272_v11  ;;  %v5963_v55 = vmul.f32 -1.442695, %v8245_v20  ;;  %v1497_v6 = vmul.f32 %v1254_v27, %v8077_v42 }
 0x236   : > { %v8252_v33 = vadd.f32 1.0, %v6690_v57  ;;  %v1288_v32 = vsub.f32 1.0, %v1287_v2  ;;  %v1498_v26 = vmul.f32 %v1269_v1, %v8092_v25  ;;  %v5964_v23 = vmul.f32 -1.442695, %v8250_v30 }
 0x237   : > { %6691 = vrcp.f32 %v8247_v8  ;;  %v1274_v63 = vmul.f32 %v8217_v60, %v1273_v53  ;;  %vm1277_vm12 = vweird.f32 %v8217_v60  ;;  %vm1292_vm13 = vweird.f32 %v8222_v43 }
 0x238   : > { %6693 = vrcp.f32 %v8252_v33  ;;  %v1289_v34 = vmul.f32 %v8222_v43, %v1288_v32  ;;  %v1521_v37 = vpack.c.bf16 %v1498_v26, %v1497_v6  ;;  %vm1276_vm14 = vweird.f32 %v8195_v50 }
 0x239   : > { %6695 = vpow2.f32 %v5963_v55  ;;  %v1275_v25 = vadd.f32 %v8217_v60, %v1274_v63  ;;  %v1282_v54 = vand.u32 2147483648, %v8195_v50  ;;  %v1297_v44 = vand.u32 2147483648, %v8200_v13  ;;  %vm8273_vm15 = vmor %vm1276_vm14, %vm1277_vm12 }
 0x23a   : > { %6697 = vpow2.f32 %v5964_v23  ;;  %v1290_v61 = vadd.f32 %v8222_v43, %v1289_v34  ;;  %v1280_v31 = vand.u32 2147483647, %v8195_v50  ;;  %vm1291_vm1 = vweird.f32 %v8200_v13 }
 0x23b   : > { %v1295_v36 = vand.u32 2147483647, %v8200_v13  ;;  %vm1293_vm2 = vmor %vm1291_vm1, %vm1292_vm13  ;;  %v1279_v19 = vsel %vm8273_vm15, %v8217_v60, %v1275_v25  ;;  %v1283_v21 = vor.u32 1.1754944e-38, %v1282_v54  ;;  %v1298_v15 = vor.u32 1.1754944e-38, %v1297_v44 }
 0x23c   : > { %v1294_v12 = vsel %vm1293_vm2, %v8222_v43, %v1290_v61  ;;  %vm1281_vm3 = vcmp.eq.f32.partialorder %v1280_v31, 8.507059e+37  ;;  %vm1306_vm6 = vweird.f32 %v8247_v8  ;;  %v1327_v59 = vand.u32 2147483648, %v8252_v33 }
 0x23d   : > { %1640 = vmatmul.bf16.gmra.mxu0 %v1520_v16  ;;  %v8265_v42 = vpop.eup %6691  ;;  %vm1296_vm4 = vcmp.eq.f32.partialorder %v1295_v36, 8.507059e+37  ;;  %v1284_v52 = vsel %vm1281_vm3, %v1283_v21, %v1279_v19  ;;  %v1310_v17 = vand.u32 2147483647, %v8247_v8  ;;  %vm1321_vm8 = vweird.f32 %v8252_v33 }
 0x23e   : > { %v6694_v24 = vpop.eup %6693  ;;  %v1302_v0 = vmul.f32 %v8265_v42, %v8247_v8  ;;  %v1299_v3 = vsel %vm1296_vm4, %v1298_v15, %v1294_v12  ;;  %v1499_v29 = vmul.f32 %v1284_v52, %v8145_v62  ;;  %vm1307_vm5 = vweird.f32 %v8265_v42 }
 0x23f   : > { %v6696_v39 = vpop.eup %6695  ;;  %v1317_v50 = vmul.f32 %v6694_v24, %v8252_v33  ;;  %v1500_v60 = vmul.f32 %v1299_v3, %v8152_v35  ;;  %vm1322_vm0 = vweird.f32 %v6694_v24  ;;  %v1312_v35 = vand.u32 2147483648, %v8247_v8  ;;  %vm1308_vm7 = vmor %vm1306_vm6, %vm1307_vm5 }
 0x240   : > { %v6698_v56 = vpop.eup %6697  ;;  %v8289_v13 = vadd.f32 1.0, %v6696_v39  ;;  %v1303_v51 = vsub.f32 1.0, %v1302_v0  ;;  %v1325_v58 = vand.u32 2147483647, %v8252_v33  ;;  %vm1323_vm9 = vmor %vm1321_vm8, %vm1322_vm0  ;;  %v1328_v28 = vor.u32 1.1754944e-38, %v1327_v59 }
 0x241   : > { %v8291_v45 = vadd.f32 1.0, %v6698_v56  ;;  %v1318_v16 = vsub.f32 1.0, %v1317_v50  ;;  %v1522_v14 = vpack.c.bf16 %v1500_v60, %v1499_v29  ;;  %v1313_v2 = vor.u32 1.1754944e-38, %v1312_v35  ;;  %v8364_v29 = vld [vmem:[%s11007_s6 + $0x68] sm:$0xff] }
 0x242   : > { %6699 = vrcp.f32 %v8289_v13  ;;  %v1304_v5 = vmul.f32 %v8265_v42, %v1303_v51  ;;  %vm1311_vm10 = vcmp.eq.f32.partialorder %v1310_v17, 8.507059e+37  ;;  %vm1326_vm11 = vcmp.eq.f32.partialorder %v1325_v58, 8.507059e+37  ;;  %v8351_v51 = vld [vmem:[%s11007_s6 + $0x70] sm:$0xff] }
 0x243   : > { %6701 = vrcp.f32 %v8291_v45  ;;  %v1319_v43 = vmul.f32 %v6694_v24, %v1318_v16  ;;  %vm1336_vm14 = vweird.f32 %v8289_v13  ;;  %v1342_v34 = vand.u32 2147483648, %v8289_v13  ;;  %v8356_v16 = vld [vmem:[%s11006_s5] ss:$0 sm:$0xff]  ;;  %v8422_v17 = vld [vmem:[%s11007_s6 + $0x50] sm:$0xff] }
 0x244   : > { %v1305_v22 = vadd.f32 %v8265_v42, %v1304_v5  ;;  %vm1351_vm1 = vweird.f32 %v8291_v45  ;;  %vm11119_vm5 = vcmask 261120  }
 0x245   : > { %v1320_v10 = vadd.f32 %v6694_v24, %v1319_v43  ;;  %vm11120_vm0 = vmmov %vm11119_vm5 }
 0x246   : > { %v8259_v4 = vpop.f32.mrf.mxu0  ;;  %v1309_v57 = vsel %vm1308_vm7, %v8265_v42, %v1305_v22  ;;  %vm11121_vm6 = vmmov %vm11120_vm0 }
 0x247   : > { %v1324_v48 = vsel %vm1323_vm9, %v6694_v24, %v1320_v10  ;;  %v1314_v7 = vsel %vm1311_vm10, %v1313_v2, %v1309_v57  ;;  %v1343_v24 = vor.u32 1.1754944e-38, %v1342_v34  ;;  %vm11122_vm7 = vmmov %vm11120_vm0 }
 0x248   : > { %v6700_v9 = vpop.eup %6699  ;;  %v1329_v8 = vsel %vm1326_vm11, %v1328_v28, %v1324_v48  ;;  %v1501_v33 = vmul.f32 %v1314_v7, %v8193_v38  ;;  %v1340_v38 = vand.u32 2147483647, %v8289_v13  ;;  %vm11123_vm8 = vmmov %vm11120_vm0 }
 0x249   : > { %v6702_v62 = vpop.eup %6701  ;;  %v1332_v40 = vmul.f32 %v6700_v9, %v8289_v13  ;;  %v1502_v53 = vmul.f32 %v1329_v8, %v8198_v41  ;;  %vm1337_vm12 = vweird.f32 %v6700_v9  ;;  %v1355_v41 = vand.u32 2147483647, %v8291_v45  ;;  %vm11124_vm9 = vmmov %vm11120_vm0 }
 0x24a   : > { %v1347_v11 = vmul.f32 %v6702_v62, %v8291_v45  ;;  %vm1352_vm13 = vweird.f32 %v6702_v62  ;;  %vm1338_vm15 = vmor %vm1336_vm14, %vm1337_vm12  ;;  %vm1341_vm3 = vcmp.eq.f32.partialorder %v1340_v38, 8.507059e+37 }
 0x24b   : > { %v1333_v27 = vsub.f32 1.0, %v1332_v40  ;;  %v1523_v26 = vpack.c.bf16 %v1502_v53, %v1501_v33  ;;  %vm1353_vm2 = vmor %vm1351_vm1, %vm1352_vm13  ;;  %vm1356_vm4 = vcmp.eq.f32.partialorder %v1355_v41, 8.507059e+37 }
 0x24c   : > { %v1348_v1 = vsub.f32 1.0, %v1347_v11  ;;  %v8438_v11 = vld [vmem:[%s11007_s6 + $0x48] sm:$0xff]  ;;  %vm11125_vm10 = vmmov %vm11120_vm0 }
 0x24d   : > { %1645 = vmatmul.bf16.gmra.mxu0 %v1521_v37  ;;  %v1334_v55 = vmul.f32 %v6700_v9, %v1333_v27  ;;  %v1357_v37 = vand.u32 2147483648, %v8291_v45  ;;  %v8346_v45 = vld [vmem:[%s11007_s6 + $0x78] sm:$0xff]  ;;  %vm11126_vm11 = vmmov %vm11120_vm0 }
 0x24e   : > { %v8280_v46 = vpop.f32.mrf.mxu0  ;;  %v1349_v6 = vmul.f32 %v6702_v62, %v1348_v1  ;;  %1810 = vmatpush.msrb.mxu1 %v8346_v45  ;;  %6005 = vmatpush.xpose.msk.msra.mxu2 %vm11119_vm5, %v8346_v45  ;;  %vm11127_vm12 = vmmov %vm11120_vm0 }
 0x24f   : > { %v1335_v23 = vadd.f32 %v6700_v9, %v1334_v55  ;;  %v1358_v54 = vor.u32 1.1754944e-38, %v1357_v37  ;;  %6022 = vmatpush.xpose.msk.msrb.mxu3 %vm11120_vm0, %v8346_v45  ;;  %v8370_v60 = vadd.f32 %v8356_v16, %v8280_v46  ;;  %v8463_v55 = vld [vmem:[%s11007_s6 + $0x40] sm:$0xff]  ;;  %v8482_v37 = vld [vmem:[%s11007_s6 + $0x30] sm:$0xff]  ;;  %vm11128_vm13 = vmmov %vm11120_vm0 }
 0x250   : > { %v1350_v63 = vadd.f32 %v6702_v62, %v1349_v6  ;;  %1811 = vmatpush.msrb.mxu1 %v8351_v51  ;;  %v8468_v6 = vld [vmem:[%s11007_s6 + $0x38] sm:$0xff]  ;;  %vm11129_vm14 = vmmov %vm11120_vm0 }
 0x251   : > { %v1339_v25 = vsel %vm1338_vm15, %v6700_v9, %v1335_v23  ;;  %v1742_v46 = vmul.f32 %v8370_v60, %v8370_v60  ;;  %vm11130_vm15 = vmmov %vm11120_vm0 }
 0x252   : > { %v1354_v61 = vsel %vm1353_vm2, %v6702_v62, %v1350_v63  ;;  %v1344_v44 = vsel %vm1341_vm3, %v1343_v24, %v1339_v25  ;;  %1812 = vmatpush.msrb.mxu1 %v8364_v29  ;;  %6006 = vmatpush.xpose.msk.msra.mxu2 %vm11121_vm6, %v8351_v51  ;;  %v8499_v24 = vld [vmem:[%s11007_s6 + $0x28] sm:$0xff]  ;;  %vm11131_vm1 = vmmov %vm11120_vm0 }
 0x253   : > { %v1359_v47 = vsel %vm1356_vm4, %v1358_v54, %v1354_v61  ;;  %v1503_v31 = vmul.f32 %v1344_v44, %v8245_v20  ;;  %6023 = vmatpush.xpose.msk.msrb.mxu3 %vm11122_vm7, %v8351_v51  ;;  %vm11132_vm2 = vmmov %vm11120_vm0 }
 0x254   : > { %v1504_v36 = vmul.f32 %v1359_v47, %v8250_v30  ;;  %v8339_v30 = vpop.f32.mrf.mxu3  ;;  %vm11133_vm3 = vmmov %vm11120_vm0 }
 0x255   : > { %vm11134_vm4 = vmmov %vm11120_vm0 }
 0x256   : > { %v8296_v49 = vpop.f32.mrf.mxu0  ;;  %v1524_v56 = vpack.c.bf16 %v1504_v36, %v1503_v31  ;;  %6007 = vmatpush.xpose.msk.msra.mxu2 %vm11123_vm8, %v8364_v29  ;;  %vm11135_vm5 = vmmov %vm11120_vm0 }
 0x257   : > { %v8383_v9 = vadd.f32 %v8356_v16, %v8296_v49  ;;  %v8404_v49 = vld [vmem:[%s11007_s6 + $0x58] sm:$0xff]  ;;  %6024 = vmatpush.xpose.msk.msrb.mxu3 %vm11124_vm9, %v8364_v29  ;;  %vm11136_vm6 = vmmov %vm11120_vm0 }
 0x258   : > { %vm11137_vm7 = vmmov %vm11120_vm0 }
 0x259   : > { %v1743_v62 = vmul.f32 %v8383_v9, %v8383_v9  ;;  %vm11138_vm8 = vmmov %vm11120_vm0 }
 0x25a   : > { %vm11139_vm9 = vmmov %vm11120_vm0 }
 0x25c   : > { %v8372_v5 = vpop.f32.mrf.mxu3 }
 0x25d   : > { %1650 = vmatmul.bf16.gmra.mxu0 %v1522_v14  ;;  %v8379_v14 = vadd.f32 %v8356_v16, %v8259_v4  ;;  %v8399_v4 = vld [vmem:[%s11007_s6 + $0x60] sm:$0xff] }
 0x25e   : > { %v8308_v18 = vpop.f32.mrf.mxu0  ;;  %1813 = vmatpush.msrb.mxu1 %v8399_v4  ;;  %6008 = vmatpush.xpose.msk.msra.mxu2 %vm11125_vm10, %v8399_v4  ;;  %vm11140_vm10 = vmmov %vm11120_vm0 }
 0x25f   : > { %v8394_v22 = vadd.f32 %v8356_v16, %v8308_v18  ;;  %v1741_v10 = vmul.f32 %v8379_v14, %v8379_v14  ;;  %v1704_v59 = vadd.f32 %v8370_v60, %v8379_v14  ;;  %6025 = vmatpush.xpose.msk.msrb.mxu3 %vm11126_vm11, %v8399_v4  ;;  %vm11141_vm11 = vmmov %vm11120_vm0 }
 0x260   : > { %1814 = vmatpush.msrb.mxu1 %v8404_v49 }
 0x261   : > { %v1773_v58 = vadd.f32 %v1742_v46, %v1741_v10  ;;  %v1744_v18 = vmul.f32 %v8394_v22, %v8394_v22  ;;  %v1705_v40 = vadd.f32 %v1704_v59, %v8383_v9 }
 0x262   : > { %1815 = vmatpush.msrb.mxu1 %v8422_v17  ;;  %6009 = vmatpush.xpose.msk.msra.mxu2 %vm11127_vm12, %v8404_v49  ;;  %vm11142_vm12 = vmmov %vm11120_vm0 }
 0x263   : > { %v1774_v2 = vadd.f32 %v1773_v58, %v1743_v62  ;;  %v1706_v27 = vadd.f32 %v1705_v40, %v8394_v22  ;;  %6026 = vmatpush.xpose.msk.msrb.mxu3 %vm11128_vm13, %v8404_v49  ;;  %vm11143_vm13 = vmmov %vm11120_vm0 }
 0x264   : > { %v8440_v28 = vpop.f32.mrf.mxu3  ;;  %1816 = vmatpush.msrb.mxu1 %v8438_v11 }
 0x265   : > { %v1775_v1 = vadd.f32 %v1774_v2, %v1744_v18 }
 0x266   : > { %v8315_v32 = vpop.f32.mrf.mxu0  ;;  %1817 = vmatpush.msrb.mxu1 %v8463_v55  ;;  %6010 = vmatpush.xpose.msk.msra.mxu2 %vm11129_vm14, %v8422_v17  ;;  %vm11144_vm14 = vmmov %vm11120_vm0 }
 0x267   : > { %v8412_v35 = vadd.f32 %v8356_v16, %v8315_v32  ;;  %6027 = vmatpush.xpose.msk.msrb.mxu3 %vm11130_vm15, %v8422_v17  ;;  %vm11145_vm15 = vmmov %vm11120_vm0 }
 0x268   : > { %1818 = vmatpush.msrb.mxu1 %v8468_v6 }
 0x269   : > { %v1745_v7 = vmul.f32 %v8412_v35, %v8412_v35  ;;  %v1707_v32 = vadd.f32 %v1706_v27, %v8412_v35 }
 0x26a   : > { %1819 = vmatpush.msrb.mxu1 %v8482_v37  ;;  %6011 = vmatpush.xpose.msk.msra.mxu2 %vm11131_vm1, %v8438_v11  ;;  %vm11146_vm1 = vmmov %vm11120_vm0 }
 0x26b   : > { %6028 = vmatpush.xpose.msk.msrb.mxu3 %vm11132_vm2, %v8438_v11  ;;  %vm11147_vm2 = vmmov %vm11120_vm0 }
 0x26c   : > { %v8513_v36 = vpop.f32.mrf.mxu3  ;;  %1820 = vmatpush.msrb.mxu1 %v8499_v24 }
 0x26d   : > { %1655 = vmatmul.bf16.gmra.mxu0 %v1523_v26  ;;  %v1776_v26 = vadd.f32 %v1775_v1, %v1745_v7 }
 0x26e   : > { %v1618_v42 = vpop.f32.mrf.mxu0  ;;  %6012 = vmatpush.xpose.msk.msra.mxu2 %vm11133_vm3, %v8463_v55  ;;  %vm11148_vm3 = vmmov %vm11120_vm0 }
 0x26f   : > { %v8429_v57 = vadd.f32 %v8356_v16, %v1618_v42  ;;  %6029 = vmatpush.xpose.msk.msrb.mxu3 %vm11134_vm4, %v8463_v55  ;;  %vm11149_vm4 = vmmov %vm11120_vm0 }
 0x271   : > { %v1746_v33 = vmul.f32 %v8429_v57, %v8429_v57  ;;  %v1708_v34 = vadd.f32 %v1707_v32, %v8429_v57 }
 0x272   : > { %6013 = vmatpush.xpose.msk.msra.mxu2 %vm11135_vm5, %v8468_v6  ;;  %vm11151_vm5 = vmmov %vm11120_vm0 }
 0x273   : > { %v1777_v38 = vadd.f32 %v1776_v26, %v1746_v33  ;;  %6030 = vmatpush.xpose.msk.msrb.mxu3 %vm11120_vm0, %v8468_v6 }
 0x276   : > { %6014 = vmatpush.xpose.msk.msra.mxu2 %vm11136_vm6, %v8482_v37 }
 0x277   : > { %v1621_v39 = vpop.f32.mrf.mxu0  ;;  %6031 = vmatpush.xpose.msk.msrb.mxu3 %vm11137_vm7, %v8482_v37 }
 0x278   : > { %v8445_v8 = vadd.f32 %v8356_v16, %v1621_v39 }
 0x27a   : > { %v1747_v23 = vmul.f32 %v8445_v8, %v8445_v8  ;;  %v1709_v61 = vadd.f32 %v1708_v34, %v8445_v8  ;;  %6015 = vmatpush.xpose.msk.msra.mxu2 %vm11138_vm8, %v8499_v24  ;;  %vm11152_vm8 = vmmov %vm11146_vm1 }
 0x27b   : > { %6032 = vmatpush.xpose.msk.msrb.mxu3 %vm11139_vm9, %v8499_v24 }
 0x27c   : > { %v1778_v54 = vadd.f32 %v1777_v38, %v1747_v23  ;;  %v8578_v38 = vld [vmem:[%s11007_s6 + $0x18] sm:$0xff] }
 0x27d   : > { %1660 = vmatmul.bf16.gmra.mxu0 %v1524_v56 }
 0x27f   : > { %v1623_v19 = vpop.f32.mrf.mxu0 }
 0x280   : > { %v8456_v53 = vadd.f32 %v8356_v16, %v1623_v19 }
 0x282   : > { %v1748_v41 = vmul.f32 %v8456_v53, %v8456_v53  ;;  %v1710_v31 = vadd.f32 %v1709_v61, %v8456_v53 }
 0x284   : > { %v1779_v39 = vadd.f32 %v1778_v54, %v1748_v41 }
 0x28a   : > { %v1626_v12 = vpop.f32.mrf.mxu0 }
 0x28b   : > { %v8473_v63 = vadd.f32 %v8356_v16, %v1626_v12 }
 0x28d   : > { %v1749_v44 = vmul.f32 %v8473_v63, %v8473_v63  ;;  %v1711_v12 = vadd.f32 %v1710_v31, %v8473_v63  ;;  %v8593_v31 = vld [vmem:[%s11007_s6 + $0x10] sm:$0xff] }
 0x292   : > { %v8325_v0 = vpop.f32.mrf.mxu0 }
 0x293   : > { %v8490_v42 = vadd.f32 %v8356_v16, %v8325_v0  ;;  %v1780_v0 = vadd.f32 %v1779_v39, %v1749_v44 }
 0x295   : > { %v1750_v56 = vmul.f32 %v8490_v42, %v8490_v42  ;;  %v1712_v10 = vadd.f32 %v1711_v12, %v8490_v42 }
 0x29a   : > { %v8327_v50 = vpop.f32.mrf.mxu0 }
 0x29b   : > { %v8505_v47 = vadd.f32 %v8356_v16, %v8327_v50 }
 0x29d   : > { %v1751_v50 = vmul.f32 %v8505_v47, %v8505_v47 }
 0x2a2   : > { %v8329_v21 = vpop.f32.mrf.mxu0 }
 0x2a3   : > { %v8519_v19 = vadd.f32 %v8356_v16, %v8329_v21  ;;  %v1781_v21 = vadd.f32 %v1780_v0, %v1750_v56  ;;  %v8608_v0 = vld [vmem:[%s11007_s6 + $0x8] sm:$0xff] }
 0x2a5   : > { %v1752_v62 = vmul.f32 %v8519_v19, %v8519_v19  ;;  %v1782_v18 = vadd.f32 %v1781_v21, %v1751_v50 }
 0x2aa   : > { %v8331_v15 = vpop.f32.mrf.mxu0 }
 0x2ab   : > { %v8527_v46 = vadd.f32 %v8356_v16, %v8331_v15  ;;  %v1713_v15 = vadd.f32 %v1712_v10, %v8505_v47 }
 0x2ad   : > { %v1753_v40 = vmul.f32 %v8527_v46, %v8527_v46  ;;  %v1714_v7 = vadd.f32 %v1713_v15, %v8519_v19 }
 0x2af   : > { %v1715_v33 = vadd.f32 %v1714_v7, %v8527_v46 }
 0x2b2   : > { %v8333_v13 = vpop.f32.mrf.mxu0 }
 0x2b3   : > { %v8538_v59 = vadd.f32 %v8356_v16, %v8333_v13  ;;  %v1783_v13 = vadd.f32 %v1782_v18, %v1752_v62  ;;  %v8623_v62 = vld [vmem:[%s11007_s6] sm:$0xff] }
 0x2b5   : > { %v1754_v27 = vmul.f32 %v8538_v59, %v8538_v59  ;;  %v1784_v32 = vadd.f32 %v1783_v13, %v1753_v40  ;;  %v1716_v34 = vadd.f32 %v1715_v33, %v8538_v59 }
 0x2ba   : > { %v8335_v52 = vpop.f32.mrf.mxu0 }
 0x2bb   : > { %v8545_v2 = vadd.f32 %v8356_v16, %v8335_v52  ;;  %v8559_v52 = vpop.f32.mrf.mxu3 }
 0x2bd   : > { %v1755_v26 = vmul.f32 %v8545_v2, %v8545_v2  ;;  %v1717_v44 = vadd.f32 %v1716_v34, %v8545_v2 }
 0x2c2   : > { %v8337_v20 = vpop.f32.mrf.mxu0 }
 0x2c3   : > { %v8556_v1 = vadd.f32 %v8356_v16, %v8337_v20  ;;  %v8573_v20 = vld [vmem:[%s11007_s6 + $0x20] sm:$0xff] }
 0x2c4   : > { %1821 = vmatpush.msrb.mxu1 %v8573_v20  ;;  %6016 = vmatpush.xpose.msk.msra.mxu2 %vm11140_vm10, %v8573_v20 }
 0x2c5   : > { %v1756_v41 = vmul.f32 %v8556_v1, %v8556_v1  ;;  %6033 = vmatpush.xpose.msk.msrb.mxu3 %vm11141_vm11, %v8573_v20 }
 0x2c6   : > { %1822 = vmatpush.msrb.mxu1 %v8578_v38 }
 0x2c8   : > { %1823 = vmatpush.msrb.mxu1 %v8593_v31  ;;  %6017 = vmatpush.xpose.msk.msra.mxu2 %vm11142_vm12, %v8578_v38 }
 0x2c9   : > { %6034 = vmatpush.xpose.msk.msrb.mxu3 %vm11143_vm13, %v8578_v38 }
 0x2ca   : > { %v8341_v3 = vpop.f32.mrf.mxu0  ;;  %1824 = vmatpush.msrb.mxu1 %v8608_v0 }
 0x2cb   : > { %v8565_v23 = vadd.f32 %v8356_v16, %v8341_v3  ;;  %v1785_v3 = vadd.f32 %v1784_v32, %v1754_v27 }
 0x2cc   : > { %1825 = vmatpush.msrb.mxu1 %v8623_v62  ;;  %6018 = vmatpush.xpose.msk.msra.mxu2 %vm11144_vm14, %v8593_v31 }
 0x2cd   : > { %v1786_v39 = vadd.f32 %v1785_v3, %v1755_v26  ;;  %v1757_v56 = vmul.f32 %v8565_v23, %v8565_v23  ;;  %6035 = vmatpush.xpose.msk.msrb.mxu3 %vm11145_vm15, %v8593_v31 }
 0x2ce   : > { %1830 = vmatpush.msra.mxu1 %v8346_v45 }
 0x2cf   : > { %v1787_v50 = vadd.f32 %v1786_v39, %v1756_v41 }
 0x2d0   : > { %1831 = vmatpush.msra.mxu1 %v8351_v51  ;;  %6019 = vmatpush.xpose.msk.msra.mxu2 %vm11146_vm1, %v8608_v0 }
 0x2d1   : > { %v1788_v15 = vadd.f32 %v1787_v50, %v1757_v56  ;;  %v8669_v50 = vadd.f32 %v8356_v16, %v8339_v30  ;;  %6036 = vmatpush.xpose.msk.msrb.mxu3 %vm11147_vm2, %v8608_v0 }
 0x2d2   : > { %v8374_v43 = vpop.f32.mrf.mxu0  ;;  %1832 = vmatpush.msra.mxu1 %v8364_v29 }
 0x2d3   : > { %v8586_v61 = vadd.f32 %v8356_v16, %v8374_v43  ;;  %v1718_v43 = vadd.f32 %v1717_v44, %v8556_v1 }
 0x2d4   : > { %1833 = vmatpush.msra.mxu1 %v8399_v4  ;;  %6020 = vmatpush.xpose.msk.msra.mxu2 %vm11148_vm3, %v8623_v62 }
 0x2d5   : > { %v1719_v10 = vadd.f32 %v1718_v43, %v8565_v23  ;;  %6037 = vmatpush.xpose.msk.msrb.mxu3 %vm11149_vm4, %v8623_v62 }
 0x2d6   : > { %1834 = vmatpush.msra.mxu1 %v8404_v49  ;;  %v1765_v49 = vmul.f32 %v8669_v50, %v8669_v50 }
 0x2d7   : > { %v1720_v40 = vadd.f32 %v1719_v10, %v8586_v61 }
 0x2d8   : > { %1835 = vmatpush.msra.mxu1 %v8422_v17 }
 0x2da   : > { %v8431_v48 = vpop.f32.mrf.mxu0  ;;  %1836 = vmatpush.msra.mxu1 %v8438_v11 }
 0x2db   : > { %v8599_v12 = vadd.f32 %v8356_v16, %v8431_v48  ;;  %v1758_v48 = vmul.f32 %v8586_v61, %v8586_v61 }
 0x2dc   : > { %1837 = vmatpush.msra.mxu1 %v8463_v55 }
 0x2dd   : > { %v1759_v18 = vmul.f32 %v8599_v12, %v8599_v12  ;;  %v1789_v13 = vadd.f32 %v1788_v15, %v1758_v48  ;;  %v1721_v33 = vadd.f32 %v1720_v40, %v8599_v12  ;;  %v8678_v15 = vadd.f32 %v8356_v16, %v8372_v5 }
 0x2de   : > { %v8692_v5 = vadd.f32 %v8356_v16, %v8440_v28  ;;  %v8712_v28 = vadd.f32 %v8356_v16, %v8559_v52  ;;  %1838 = vmatpush.msra.mxu1 %v8468_v6 }
 0x2df   : > { %v1766_v17 = vmul.f32 %v8678_v15, %v8678_v15 }
 0x2e0   : > { %v1767_v11 = vmul.f32 %v8692_v5, %v8692_v5  ;;  %1839 = vmatpush.msra.mxu1 %v8482_v37  ;;  %v1769_v6 = vmul.f32 %v8712_v28, %v8712_v28 }
 0x2e2   : > { %v8492_v25 = vpop.f32.mrf.mxu0  ;;  %1840 = vmatpush.msra.mxu1 %v8499_v24 }
 0x2e3   : > { %v8618_v21 = vadd.f32 %v8356_v16, %v8492_v25  ;;  %v1678_v25 = vpop.f32.mrf.mxu3 }
 0x2e4   : > { %v8721_v55 = vadd.f32 %v8356_v16, %v1678_v25  ;;  %1841 = vmatpush.msra.mxu1 %v8573_v20 }
 0x2e5   : > { %v1760_v32 = vmul.f32 %v8618_v21, %v8618_v21  ;;  %v1722_v34 = vadd.f32 %v1721_v33, %v8618_v21  ;;  %v8698_v33 = vadd.f32 %v8356_v16, %v8513_v36 }
 0x2e6   : > { %1842 = vmatpush.msra.mxu1 %v8578_v38 }
 0x2e8   : > { %1843 = vmatpush.msra.mxu1 %v8593_v31 }
 0x2ea   : > { %v1656_v58 = vpop.f32.mrf.mxu0  ;;  %1844 = vmatpush.msra.mxu1 %v8608_v0 }
 0x2eb   : > { %v8632_v7 = vadd.f32 %v8356_v16, %v1656_v58  ;;  %v1790_v58 = vadd.f32 %v1789_v13, %v1759_v18  ;;  %v1681_v4 = vpop.f32.mrf.mxu3 }
 0x2ec   : > { %1845 = vmatpush.msra.mxu1 %v8623_v62 }
 0x2ed   : > { %v1761_v3 = vmul.f32 %v8632_v7, %v8632_v7  ;;  %v1723_v45 = vadd.f32 %v1722_v34, %v8632_v7 }
 0x2f2   : > { %v1658_v54 = vpop.f32.mrf.mxu0 }
 0x2f3   : > { %v8641_v26 = vadd.f32 %v8356_v16, %v1658_v54  ;;  %v1791_v54 = vadd.f32 %v1790_v58, %v1760_v32  ;;  %v1683_v52 = vpop.f32.mrf.mxu3 }
 0x2f4   : > { %v8737_v37 = vadd.f32 %v8356_v16, %v1683_v52 }
 0x2f5   : > { %v1762_v44 = vmul.f32 %v8641_v26, %v8641_v26  ;;  %v1792_v39 = vadd.f32 %v1791_v54, %v1761_v3  ;;  %v1724_v56 = vadd.f32 %v1723_v45, %v8641_v26  ;;  %v1768_v3 = vmul.f32 %v8698_v33, %v8698_v33 }
 0x2f7   : > { %v1793_v29 = vadd.f32 %v1792_v39, %v1762_v44  ;;  %v8730_v44 = vadd.f32 %v8356_v16, %v1681_v4  ;;  %v1772_v4 = vmul.f32 %v8737_v37, %v8737_v37 }
 0x2fa   : > { %v1661_v27 = vpop.f32.mrf.mxu0 }
 0x2fb   : > { %v8650_v41 = vadd.f32 %v8356_v16, %v1661_v27 }
 0x2fd   : > { %v1763_v51 = vmul.f32 %v8650_v41, %v8650_v41  ;;  %v1725_v48 = vadd.f32 %v1724_v56, %v8650_v41  ;;  %v1770_v56 = vmul.f32 %v8721_v55, %v8721_v55 }
 0x2ff   : > { %v1794_v18 = vadd.f32 %v1793_v29, %v1763_v51  ;;  %v1771_v29 = vmul.f32 %v8730_v44, %v8730_v44 }
 0x302   : > { %v1663_v43 = vpop.f32.mrf.mxu0 }
 0x303   : > { %v8673_v10 = vadd.f32 %v8356_v16, %v1663_v43 }
 0x305   : > { %v1726_v30 = vadd.f32 %v1725_v48, %v8673_v10  ;;  %v1764_v40 = vmul.f32 %v8673_v10, %v8673_v10 }
 0x307   : > { %v1727_v13 = vadd.f32 %v1726_v30, %v8669_v50  ;;  %v1795_v27 = vadd.f32 %v1794_v18, %v1764_v40 }
 0x309   : > { %v1728_v32 = vadd.f32 %v1727_v13, %v8678_v15  ;;  %v1796_v58 = vadd.f32 %v1795_v27, %v1765_v49 }
 0x30b   : > { %v1729_v36 = vadd.f32 %v1728_v32, %v8692_v5  ;;  %v1797_v34 = vadd.f32 %v1796_v58, %v1766_v17 }
 0x30d   : > { %v1730_v54 = vadd.f32 %v1729_v36, %v8698_v33  ;;  %v1798_v45 = vadd.f32 %v1797_v34, %v1767_v11 }
 0x30f   : > { %v1799_v39 = vadd.f32 %v1798_v45, %v1768_v3  ;;  %v1731_v25 = vadd.f32 %v1730_v54, %v8712_v28  ;;  %v11150_v3 = vld [vmem:[#allocation17_spill] sm:$0xff] }
 0x311   : > { %v1800_v51 = vadd.f32 %v1799_v39, %v1769_v6  ;;  %v1732_v43 = vadd.f32 %v1731_v25, %v8721_v55 }
 0x313   : > { %v1733_v48 = vadd.f32 %v1732_v43, %v8730_v44  ;;  %v1801_v24 = vadd.f32 %v1800_v51, %v1770_v56 }
 0x315   : > { %v1734_v18 = vadd.f32 %v1733_v48, %v8737_v37  ;;  %v1802_v16 = vadd.f32 %v1801_v24, %v1771_v29 }
 0x317   : > { %v1735_v30 = vrot.slane %v1734_v18, 4  ;;  %v1803_v20 = vadd.f32 %v1802_v16, %v1772_v4 }
 0x319   : > { %v1736_v40 = vadd.f32 %v1735_v30, %v1734_v18  ;;  %v1804_v49 = vrot.slane %v1803_v20, 4 }
 0x31b   : > { %v1737_v13 = vrot.slane %v1736_v40, 2  ;;  %v1805_v27 = vadd.f32 %v1804_v49, %v1803_v20 }
 0x31d   : > { %v1738_v38 = vadd.f32 %v1737_v13, %v1736_v40  ;;  %v1806_v17 = vrot.slane %v1805_v27, 2 }
 0x31f   : > { %v1739_v32 = vrot.slane %v1738_v38, 1  ;;  %v1807_v11 = vadd.f32 %v1806_v17, %v1805_v27 }
 0x321   : > { %v1740_v58 = vadd.f32 %v1739_v32, %v1738_v38  ;;  %v1808_v36 = vrot.slane %v1807_v11, 1 }
 0x323   : > { %1826 = vmatmul.f32.vlgmr.msrb.gmra.mxu1 %v1740_v58  ;;  %v1809_v34 = vadd.f32 %v1808_v36, %v1807_v11 }
 0x32b   : > { %1846 = vmatmul.f32.vlgmr.msra.gmra.mxu1 %v1809_v34 }
 0x3a0   : > { %v1827_v31 = vpop.f32.mrf.mxu1 }
 0x3a1   : > { %v1850_v54 = vmul.f32 %v1827_v31, %v11150_v3 }
 0x3a3   : > { %6021 = vmatmul.msk.f32.vlgmr.msra.gmra.mxu2 %vm11151_vm5, %v1850_v54  ;;  %v1852_v45 = vmul.f32 %v1850_v54, %v1850_v54 }
 0x3a8   : > { %v1847_v0 = vpop.f32.mrf.mxu1 }
 0x3a9   : > { %v1851_v62 = vmul.f32 %v1847_v0, %v11150_v3 }
 0x3ab   : > { %v1853_v52 = vsub.f32 %v1851_v62, %v1852_v45 }
 0x3ad   : > { %v1854_v6 = vadd.f32 1e-06, %v1853_v52 }
 0x3af   : > { %6703 = vrsqrt.f32 %v1854_v6  ;;  %vm1861_vm6 = vweird.f32 %v1854_v6 }
 0x3b5   : > { %v6704_v39 = vpop.eup %6703 }
 0x3b6   : > { %v1856_v25 = vmul.f32 %v6704_v39, %v1854_v6  ;;  %vm1862_vm0 = vweird.f32 %v6704_v39 }
 0x3b7   : > { %vm1863_vm7 = vmor %vm1861_vm6, %vm1862_vm0 }
 0x3b8   : > { %v1857_v56 = vmul.f32 %v6704_v39, %v1856_v25 }
 0x3ba   : > { %v1858_v51 = vmul.f32 0.5, %v1857_v56 }
 0x3bc   : > { %v1859_v43 = vsub.f32 1.5, %v1858_v51 }
 0x3be   : > { %v1860_v29 = vmul.f32 %v6704_v39, %v1859_v43 }
 0x3c0   : > { %v1864_v48 = vsel %vm1863_vm7, %v6704_v39, %v1860_v29 }
 0x3c1   : > { %6038 = vmatmul.msk.f32.vlgmr.msrb.gmra.mxu3 %vm11152_vm8, %v1864_v48 }
 0x426   : > { %v1933_v24 = vpop.f32.mrf.mxu2 }
 0x427   : > { %v8755_v4 = vperm.slane %v1933_v24, 0 }
 0x429   : > { %v1960_v18 = vsub.f32 %v8379_v14, %v8755_v4  ;;  %v1961_v16 = vsub.f32 %v8370_v60, %v8755_v4  ;;  %v1962_v30 = vsub.f32 %v8383_v9, %v8755_v4  ;;  %v1963_v40 = vsub.f32 %v8394_v22, %v8755_v4 }
 0x42a   : > { %v1964_v49 = vsub.f32 %v8412_v35, %v8755_v4  ;;  %v1965_v13 = vsub.f32 %v8429_v57, %v8755_v4  ;;  %v1966_v27 = vsub.f32 %v8445_v8, %v8755_v4  ;;  %v1967_v14 = vsub.f32 %v8456_v53, %v8755_v4 }
 0x42b   : > { %v1968_v60 = vsub.f32 %v8473_v63, %v8755_v4  ;;  %v1969_v9 = vsub.f32 %v8490_v42, %v8755_v4  ;;  %v1970_v22 = vsub.f32 %v8505_v47, %v8755_v4  ;;  %v1971_v35 = vsub.f32 %v8519_v19, %v8755_v4 }
 0x42c   : > { %v1972_v57 = vsub.f32 %v8527_v46, %v8755_v4  ;;  %v1973_v8 = vsub.f32 %v8538_v59, %v8755_v4  ;;  %v1974_v53 = vsub.f32 %v8545_v2, %v8755_v4  ;;  %v1975_v63 = vsub.f32 %v8556_v1, %v8755_v4 }
 0x42d   : > { %v1976_v42 = vsub.f32 %v8565_v23, %v8755_v4  ;;  %v1977_v47 = vsub.f32 %v8586_v61, %v8755_v4  ;;  %v1978_v19 = vsub.f32 %v8599_v12, %v8755_v4  ;;  %v1979_v46 = vsub.f32 %v8618_v21, %v8755_v4  ;;  %v8814_v21 = vld [vmem:[%s11008_s7] ss:$0 sm:$0xff] }
 0x42e   : > { %v1980_v59 = vsub.f32 %v8632_v7, %v8755_v4  ;;  %v1981_v2 = vsub.f32 %v8641_v26, %v8755_v4  ;;  %v1982_v1 = vsub.f32 %v8650_v41, %v8755_v4  ;;  %v1983_v23 = vsub.f32 %v8673_v10, %v8755_v4 }
 0x42f   : > { %v1984_v61 = vsub.f32 %v8669_v50, %v8755_v4  ;;  %v1985_v12 = vsub.f32 %v8678_v15, %v8755_v4  ;;  %v1986_v7 = vsub.f32 %v8692_v5, %v8755_v4  ;;  %v1987_v26 = vsub.f32 %v8698_v33, %v8755_v4 }
 0x430   : > { %v1988_v41 = vsub.f32 %v8712_v28, %v8755_v4  ;;  %v1989_v50 = vsub.f32 %v8721_v55, %v8755_v4  ;;  %v1990_v15 = vsub.f32 %v8730_v44, %v8755_v4  ;;  %v1991_v17 = vsub.f32 %v8737_v37, %v8755_v4  ;;  %v8841_v37 = vld [vmem:[%s11009_s8] ss:$0 sm:$0xff] }
 0x444   : > { %v1956_v20 = vpop.f32.mrf.mxu3 }
 0x445   : > { %v8785_v38 = vperm.slane %v1956_v20, 0 }
 0x447   : > { %v1993_v10 = vmul.f32 %v8785_v38, %v1960_v18  ;;  %v1994_v32 = vmul.f32 %v8785_v38, %v1961_v16  ;;  %v1995_v5 = vmul.f32 %v8785_v38, %v1962_v30  ;;  %v1996_v33 = vmul.f32 %v8785_v38, %v1963_v40 }
 0x448   : > { %v1997_v58 = vmul.f32 %v8785_v38, %v1964_v49  ;;  %v1998_v28 = vmul.f32 %v8785_v38, %v1965_v13  ;;  %v1999_v11 = vmul.f32 %v8785_v38, %v1966_v27  ;;  %v2000_v55 = vmul.f32 %v8785_v38, %v1967_v14 }
 0x449   : > { %v2001_v36 = vmul.f32 %v8785_v38, %v1968_v60  ;;  %v2002_v44 = vmul.f32 %v8785_v38, %v1969_v9  ;;  %v2003_v34 = vmul.f32 %v8785_v38, %v1970_v22  ;;  %v2004_v31 = vmul.f32 %v8785_v38, %v1971_v35 }
 0x44a   : > { %v2005_v3 = vmul.f32 %v8785_v38, %v1972_v57  ;;  %v2028_v54 = vmul.f32 %v8814_v21, %v1993_v10  ;;  %v2006_v0 = vmul.f32 %v8785_v38, %v1973_v8  ;;  %v2007_v45 = vmul.f32 %v8785_v38, %v1974_v53 }
 0x44b   : > { %v2008_v62 = vmul.f32 %v8785_v38, %v1975_v63  ;;  %v2029_v52 = vmul.f32 %v8814_v21, %v1994_v32  ;;  %v2009_v6 = vmul.f32 %v8785_v38, %v1976_v42  ;;  %v2010_v39 = vmul.f32 %v8785_v38, %v1977_v47 }
 0x44c   : > { %v2011_v25 = vmul.f32 %v8785_v38, %v1978_v19  ;;  %v2030_v56 = vmul.f32 %v8814_v21, %v1995_v5  ;;  %v2012_v51 = vmul.f32 %v8785_v38, %v1979_v46  ;;  %v2013_v43 = vmul.f32 %v8785_v38, %v1980_v59 }
 0x44d   : > { %v8858_v29 = vmul.f32 %v8785_v38, %v1981_v2  ;;  %v2031_v48 = vmul.f32 %v8814_v21, %v1996_v33  ;;  %v8862_v24 = vmul.f32 %v8785_v38, %v1982_v1  ;;  %v8865_v4 = vmul.f32 %v8785_v38, %v1983_v23 }
 0x44e   : > { %v2032_v18 = vmul.f32 %v8814_v21, %v1997_v58  ;;  %v8869_v16 = vadd.f32 %v8841_v37, %v2028_v54  ;;  %v8872_v30 = vmul.f32 %v8785_v38, %v1984_v61  ;;  %v8875_v20 = vmul.f32 %v8785_v38, %v1985_v12 }
 0x44f   : > { %v2033_v40 = vmul.f32 %v8814_v21, %v1998_v28  ;;  %v8879_v49 = vadd.f32 %v8841_v37, %v2029_v52  ;;  %v8882_v13 = vmul.f32 %v8785_v38, %v1986_v7  ;;  %v8885_v27 = vmul.f32 %v8785_v38, %v1987_v26 }
 0x450   : > { %11153 = vst [vmem:[#allocation17_spill] sm:$0xff] %v8869_v16  ;;  %v2034_v14 = vmul.f32 %v8814_v21, %v1999_v11  ;;  %v8889_v60 = vadd.f32 %v8841_v37, %v2030_v56  ;;  %v8892_v9 = vmul.f32 %v8785_v38, %v1988_v41  ;;  %v8895_v22 = vmul.f32 %v8785_v38, %v1989_v50 }
 0x451   : > { %11154 = vst [vmem:[#allocation18_spill] sm:$0xff] %v8879_v49  ;;  %v2035_v35 = vmul.f32 %v8814_v21, %v2000_v55  ;;  %v8899_v57 = vadd.f32 %v8841_v37, %v2031_v48  ;;  %v8902_v8 = vmul.f32 %v8785_v38, %v1990_v15  ;;  %v2036_v53 = vmul.f32 %v8814_v21, %v2001_v36 }
 0x452   : > { %11155 = vst [vmem:[#allocation19_spill] sm:$0xff] %v8889_v60  ;;  %v8906_v63 = vadd.f32 %v8841_v37, %v2032_v18  ;;  %v6039_v42 = vmul.f32 -1.442695, %v8869_v16  ;;  %v8910_v47 = vmul.f32 %v8785_v38, %v1991_v17  ;;  %v2037_v19 = vmul.f32 %v8814_v21, %v2002_v44 }
 0x453   : > { %11156 = vst [vmem:[#allocation20_spill] sm:$0xff] %v8899_v57  ;;  %v8914_v46 = vadd.f32 %v8841_v37, %v2033_v40  ;;  %v6040_v59 = vmul.f32 -1.442695, %v8879_v49  ;;  %v2038_v2 = vmul.f32 %v8814_v21, %v2003_v34  ;;  %v2039_v1 = vmul.f32 %v8814_v21, %v2004_v31 }
 0x454   : > { %11157 = vst [vmem:[#allocation21_spill] sm:$0xff] %v8906_v63  ;;  %v8920_v23 = vadd.f32 %v8841_v37, %v2034_v14  ;;  %v6041_v61 = vmul.f32 -1.442695, %v8889_v60  ;;  %v2040_v12 = vmul.f32 %v8814_v21, %v2005_v3  ;;  %v2041_v38 = vmul.f32 %v8814_v21, %v2006_v0 }
 0x455   : > { %11158 = vst [vmem:[#allocation22_spill] sm:$0xff] %v8914_v46  ;;  %v8926_v7 = vadd.f32 %v8841_v37, %v2035_v35  ;;  %v6042_v26 = vmul.f32 -1.442695, %v8899_v57  ;;  %v2042_v41 = vmul.f32 %v8814_v21, %v2007_v45  ;;  %v8931_v10 = vadd.f32 %v8841_v37, %v2036_v53 }
 0x456   : > { %11159 = vst [vmem:[#allocation23_spill] sm:$0xff] %v8920_v23  ;;  %6705 = vpow2.f32 %v6039_v42  ;;  %v6043_v50 = vmul.f32 -1.442695, %v8906_v63  ;;  %v2043_v15 = vmul.f32 %v8814_v21, %v2008_v62  ;;  %v8936_v17 = vadd.f32 %v8841_v37, %v2037_v19 }
 0x457   : > { %11160 = vst [vmem:[#allocation24_spill] sm:$0xff] %v8926_v7  ;;  %6707 = vpow2.f32 %v6040_v59  ;;  %v6044_v32 = vmul.f32 -1.442695, %v8914_v46  ;;  %v2044_v5 = vmul.f32 %v8814_v21, %v2009_v6  ;;  %v8941_v33 = vadd.f32 %v8841_v37, %v2038_v2 }
 0x458   : > { %11161 = vst [vmem:[#allocation25_spill] sm:$0xff] %v8931_v10  ;;  %6709 = vpow2.f32 %v6041_v61  ;;  %v6045_v58 = vmul.f32 -1.442695, %v8920_v23  ;;  %v2045_v28 = vmul.f32 %v8814_v21, %v2010_v39  ;;  %v8946_v11 = vadd.f32 %v8841_v37, %v2039_v1 }
 0x459   : > { %11162 = vst [vmem:[#allocation26_spill] sm:$0xff] %v8936_v17  ;;  %6711 = vpow2.f32 %v6042_v26  ;;  %v6046_v55 = vmul.f32 -1.442695, %v8926_v7  ;;  %v2046_v36 = vmul.f32 %v8814_v21, %v2011_v25  ;;  %v8951_v44 = vadd.f32 %v8841_v37, %v2040_v12 }
 0x45a   : > { %11163 = vst [vmem:[#allocation27_spill] sm:$0xff] %v8941_v33  ;;  %6713 = vpow2.f32 %v6043_v50  ;;  %v6047_v34 = vmul.f32 -1.442695, %v8931_v10  ;;  %v2047_v31 = vmul.f32 %v8814_v21, %v2012_v51  ;;  %v8956_v3 = vadd.f32 %v8841_v37, %v2041_v38 }
 0x45b   : > { %11164 = vst [vmem:[#allocation28_spill] sm:$0xff] %v8946_v11  ;;  %6715 = vpow2.f32 %v6044_v32  ;;  %v6048_v54 = vmul.f32 -1.442695, %v8936_v17  ;;  %v2048_v45 = vmul.f32 %v8814_v21, %v2013_v43  ;;  %v8963_v62 = vadd.f32 %v8841_v37, %v2042_v41 }
 0x45c   : > { %11165 = vst [vmem:[#allocation29_spill] sm:$0xff] %v8951_v44  ;;  %v8959_v0 = vpop.eup %6705  ;;  %6717 = vpow2.f32 %v6045_v58  ;;  %v6049_v52 = vmul.f32 -1.442695, %v8941_v33  ;;  %v2049_v39 = vmul.f32 %v8814_v21, %v8858_v29  ;;  %v8971_v25 = vadd.f32 %v8841_v37, %v2043_v15 }
 0x45d   : > { %11166 = vst [vmem:[#allocation30_spill] sm:$0xff] %v8956_v3  ;;  %v8966_v6 = vpop.eup %6707  ;;  %6719 = vpow2.f32 %v6046_v55  ;;  %v6050_v56 = vmul.f32 -1.442695, %v8946_v11  ;;  %v2050_v43 = vmul.f32 %v8814_v21, %v8862_v24  ;;  %v8979_v48 = vadd.f32 %v8841_v37, %v2044_v5 }
 0x45e   : > { %11167 = vst [vmem:[#allocation31_spill] sm:$0xff] %v8963_v62  ;;  %v8974_v51 = vpop.eup %6709  ;;  %6721 = vpow2.f32 %v6047_v34  ;;  %v6051_v18 = vmul.f32 -1.442695, %v8951_v44  ;;  %v2051_v29 = vmul.f32 %v8814_v21, %v8865_v4  ;;  %v8987_v14 = vadd.f32 %v8841_v37, %v2045_v28 }
 0x45f   : > { %11168 = vst [vmem:[#allocation32_spill] sm:$0xff] %v8971_v25  ;;  %v8982_v40 = vpop.eup %6711  ;;  %6723 = vpow2.f32 %v6048_v54  ;;  %v6052_v35 = vmul.f32 -1.442695, %v8956_v3  ;;  %v2052_v24 = vmul.f32 %v8814_v21, %v8872_v30  ;;  %v8995_v42 = vadd.f32 %v8841_v37, %v2046_v36 }
 0x460   : > { %11169 = vst [vmem:[#allocation33_spill] sm:$0xff] %v8979_v48  ;;  %v8990_v53 = vpop.eup %6713  ;;  %6725 = vpow2.f32 %v6049_v52  ;;  %v6053_v19 = vmul.f32 -1.442695, %v8963_v62  ;;  %v2053_v4 = vmul.f32 %v8814_v21, %v8875_v20  ;;  %v9003_v2 = vadd.f32 %v8841_v37, %v2047_v31 }
 0x461   : > { %11170 = vst [vmem:[#allocation34_spill] sm:$0xff] %v8987_v14  ;;  %v8998_v59 = vpop.eup %6715  ;;  %6727 = vpow2.f32 %v6050_v56  ;;  %v6054_v1 = vmul.f32 -1.442695, %v8971_v25  ;;  %v2054_v30 = vmul.f32 %v8814_v21, %v8882_v13  ;;  %v9011_v12 = vadd.f32 %v8841_v37, %v2048_v45 }
 0x462   : > { %11171 = vst [vmem:[#allocation35_spill] sm:$0xff] %v8995_v42  ;;  %v9006_v61 = vpop.eup %6717  ;;  %6729 = vpow2.f32 %v6051_v18  ;;  %v6055_v38 = vmul.f32 -1.442695, %v8979_v48  ;;  %v2055_v20 = vmul.f32 %v8814_v21, %v8885_v27  ;;  %v9019_v41 = vadd.f32 %v8841_v37, %v2049_v39 }
 0x463   : > { %11172 = vst [vmem:[#allocation36_spill] sm:$0xff] %v9003_v2  ;;  %v9014_v26 = vpop.eup %6719  ;;  %6731 = vpow2.f32 %v6052_v35  ;;  %v6056_v50 = vmul.f32 -1.442695, %v8987_v14  ;;  %v2056_v13 = vmul.f32 %v8814_v21, %v8892_v9  ;;  %v9027_v32 = vadd.f32 %v8841_v37, %v2050_v43 }
 0x464   : > { %11173 = vst [vmem:[#allocation37_spill] sm:$0xff] %v9011_v12  ;;  %v9022_v15 = vpop.eup %6721  ;;  %6733 = vpow2.f32 %v6053_v19  ;;  %v6057_v5 = vmul.f32 -1.442695, %v8995_v42  ;;  %v2057_v27 = vmul.f32 %v8814_v21, %v8895_v22  ;;  %v9033_v28 = vadd.f32 %v8841_v37, %v2051_v29 }
 0x465   : > { %11174 = vst [vmem:[#allocation38_spill] sm:$0xff] %v9019_v41  ;;  %v6724_v58 = vpop.eup %6723  ;;  %6735 = vpow2.f32 %v6054_v1  ;;  %v6058_v55 = vmul.f32 -1.442695, %v9003_v2  ;;  %v2058_v9 = vmul.f32 %v8814_v21, %v8902_v8  ;;  %v9039_v34 = vadd.f32 %v8841_v37, %v2052_v24 }
 0x466   : > { %11175 = vst [vmem:[#allocation39_spill] sm:$0xff] %v9027_v32  ;;  %v6726_v36 = vpop.eup %6725  ;;  %6737 = vpow2.f32 %v6055_v38  ;;  %v6059_v31 = vmul.f32 -1.442695, %v9011_v12  ;;  %v2059_v22 = vmul.f32 %v8814_v21, %v8910_v47  ;;  %v9045_v45 = vadd.f32 %v8841_v37, %v2053_v4 }
 0x467   : > { %11176 = vst [vmem:[#allocation40_spill] sm:$0xff] %v9033_v28  ;;  %v6728_v54 = vpop.eup %6727  ;;  %6739 = vpow2.f32 %v6056_v50  ;;  %v6060_v52 = vmul.f32 -1.442695, %v9019_v41  ;;  %v9049_v56 = vadd.f32 %v8841_v37, %v2054_v30  ;;  %v6061_v8 = vmul.f32 -1.442695, %v9027_v32 }
 0x468   : > { %11177 = vst [vmem:[#allocation41_spill] sm:$0xff] %v9039_v34  ;;  %v6730_v39 = vpop.eup %6729  ;;  %6741 = vpow2.f32 %v6057_v5  ;;  %v9053_v18 = vadd.f32 %v8841_v37, %v2055_v20  ;;  %v9056_v29 = vadd.f32 %v8841_v37, %v2056_v13  ;;  %v6062_v21 = vmul.f32 -1.442695, %v9033_v28 }
 0x469   : > { %11178 = vst [vmem:[#allocation42_spill] sm:$0xff] %v9045_v45  ;;  %v6732_v43 = vpop.eup %6731  ;;  %6743 = vpow2.f32 %v6058_v55  ;;  %v9060_v35 = vadd.f32 %v8841_v37, %v2057_v27  ;;  %v9063_v24 = vadd.f32 %v8841_v37, %v2058_v9  ;;  %v6063_v19 = vmul.f32 -1.442695, %v9039_v34 }
 0x46a   : > { %11179 = vst [vmem:[#allocation43_spill] sm:$0xff] %v9049_v56  ;;  %v6734_v47 = vpop.eup %6733  ;;  %6745 = vpow2.f32 %v6059_v31  ;;  %v9067_v1 = vadd.f32 %v8841_v37, %v2059_v22  ;;  %v6064_v30 = vmul.f32 -1.442695, %v9045_v45  ;;  %v6065_v20 = vmul.f32 -1.442695, %v9049_v56 }
 0x46b   : > { %11180 = vst [vmem:[#allocation44_spill] sm:$0xff] %v9053_v18  ;;  %v6736_v4 = vpop.eup %6735  ;;  %6747 = vpow2.f32 %v6060_v52  ;;  %v9072_v50 = vadd.f32 1.0, %v8959_v0  ;;  %v6066_v5 = vmul.f32 -1.442695, %v9053_v18  ;;  %v6067_v27 = vmul.f32 -1.442695, %v9056_v29 }
 0x46c   : > { %11181 = vst [vmem:[#allocation45_spill] sm:$0xff] %v9056_v29  ;;  %v6738_v38 = vpop.eup %6737  ;;  %6749 = vpow2.f32 %v6061_v8  ;;  %v6068_v37 = vmul.f32 -1.442695, %v9060_v35  ;;  %v6069_v9 = vmul.f32 -1.442695, %v9063_v24  ;;  %v9079_v31 = vadd.f32 1.0, %v8966_v6 }
 0x46d   : > { %11182 = vst [vmem:[#allocation46_spill] sm:$0xff] %v9060_v35  ;;  %v6740_v13 = vpop.eup %6739  ;;  %6751 = vpow2.f32 %v6062_v21  ;;  %v9082_v0 = vmul.f32 -1.442695, %v9067_v1  ;;  %v9085_v52 = vadd.f32 1.0, %v8974_v51  ;;  %v9088_v8 = vadd.f32 1.0, %v8982_v40 }
 0x46e   : > { %11183 = vst [vmem:[#allocation47_spill] sm:$0xff] %v9063_v24  ;;  %v6742_v55 = vpop.eup %6741  ;;  %6753 = vpow2.f32 %v6063_v19  ;;  %v9091_v19 = vadd.f32 1.0, %v8990_v53  ;;  %v9094_v24 = vadd.f32 1.0, %v8998_v59  ;;  %v2234_v6 = vand.u32 2147483648, %v9072_v50 }
 0x46f   : > { %11184 = vst [vmem:[#allocation48_spill] sm:$0xff] %v9067_v1  ;;  %v6744_v22 = vpop.eup %6743  ;;  %6755 = vpow2.f32 %v6064_v30  ;;  %v9098_v1 = vadd.f32 1.0, %v9006_v61  ;;  %v9101_v51 = vadd.f32 1.0, %v9014_v26  ;;  %v9104_v40 = vadd.f32 1.0, %v9022_v15 }
 0x470   : > { %v6746_v21 = vpop.eup %6745  ;;  %6757 = vpow2.f32 %v6065_v20  ;;  %v9107_v53 = vadd.f32 1.0, %v6724_v58  ;;  %v2249_v35 = vand.u32 2147483648, %v9079_v31  ;;  %v9112_v61 = vadd.f32 1.0, %v6726_v36 }
 0x471   : > { %v6748_v30 = vpop.eup %6747  ;;  %6759 = vrcp.f32 %v9072_v50  ;;  %v2264_v15 = vand.u32 2147483648, %v9085_v52  ;;  %v9117_v56 = vadd.f32 1.0, %v6728_v54  ;;  %v9119_v58 = vadd.f32 1.0, %v6730_v39 }
 0x472   : > { %v6750_v20 = vpop.eup %6749  ;;  %6761 = vrcp.f32 %v9079_v31  ;;  %v9121_v45 = vor.u32 1.1754944e-38, %v2234_v6  ;;  %v9124_v34 = vadd.f32 1.0, %v6732_v43  ;;  %v2279_v26 = vand.u32 2147483648, %v9088_v8 }
 0x473   : > { %v6752_v29 = vpop.eup %6751  ;;  %6763 = vrcp.f32 %v9085_v52  ;;  %v9128_v32 = vadd.f32 1.0, %v6734_v47  ;;  %v9130_v54 = vor.u32 1.1754944e-38, %v2249_v35  ;;  %v2294_v39 = vand.u32 2147483648, %v9091_v19 }
 0x474   : > { %v6754_v18 = vpop.eup %6753  ;;  %6765 = vrcp.f32 %v9088_v8  ;;  %v9135_v41 = vadd.f32 1.0, %v6736_v4  ;;  %v9137_v12 = vor.u32 1.1754944e-38, %v2264_v15  ;;  %v9143_v36 = vadd.f32 1.0, %v6738_v38 }
 0x475   : > { %v6756_v59 = vpop.eup %6755  ;;  %6767 = vpow2.f32 %v6066_v5  ;;  %v9145_v47 = vadd.f32 1.0, %v6740_v13  ;;  %v9151_v4 = vadd.f32 1.0, %v6742_v55  ;;  %v9153_v15 = vadd.f32 1.0, %v6744_v22 }
 0x476   : > { %v6758_v28 = vpop.eup %6757  ;;  %6769 = vpow2.f32 %v6067_v27  ;;  %v9155_v2 = vor.u32 1.1754944e-38, %v2279_v26  ;;  %v9160_v38 = vadd.f32 1.0, %v6746_v21  ;;  %v9162_v13 = vor.u32 1.1754944e-38, %v2294_v39 }
 0x477   : > { %v9133_v6 = vpop.eup %6759  ;;  %6771 = vrcp.f32 %v9091_v19  ;;  %v2309_v35 = vand.u32 2147483648, %v9094_v24  ;;  %v9165_v14 = vadd.f32 1.0, %v6748_v30  ;;  %v2324_v22 = vand.u32 2147483648, %v9098_v1 }
 0x478   : > { %v9141_v5 = vpop.eup %6761  ;;  %6773 = vrcp.f32 %v9094_v24  ;;  %11185 = vst [vmem:[#allocation49_spill] sm:$0xff] %v9160_v38  ;;  %v9170_v48 = vadd.f32 1.0, %v6750_v20  ;;  %v9186_v20 = vadd.f32 1.0, %v6752_v29  ;;  %v9188_v25 = vadd.f32 1.0, %v6754_v18 }
 0x479   : > { %v9149_v27 = vpop.eup %6763  ;;  %6775 = vrcp.f32 %v9098_v1  ;;  %11186 = vst [vmem:[#allocation50_spill] sm:$0xff] %v9165_v14  ;;  %v2239_v21 = vmul.f32 %v9141_v5, %v9079_v31  ;;  %v9190_v62 = vor.u32 1.1754944e-38, %v2309_v35  ;;  %v9195_v44 = vadd.f32 1.0, %v6756_v59 }
 0x47a   : > { %v9158_v43 = vpop.eup %6765  ;;  %6777 = vpow2.f32 %v6068_v37  ;;  %11187 = vst [vmem:[#allocation51_spill] sm:$0xff] %v9170_v48  ;;  %v2224_v37 = vmul.f32 %v9133_v6, %v9072_v50  ;;  %v9197_v11 = vor.u32 1.1754944e-38, %v2324_v22  ;;  %v2339_v55 = vand.u32 2147483648, %v9101_v51 }
 0x47b   : > { %v6768_v42 = vpop.eup %6767  ;;  %6779 = vpow2.f32 %v6069_v9  ;;  %v2254_v9 = vmul.f32 %v9149_v27, %v9085_v52  ;;  %v2269_v30 = vmul.f32 %v9158_v43, %v9088_v8  ;;  %11188 = vst [vmem:[#allocation52_spill] sm:$0xff] %v9186_v20  ;;  %vm2228_vm9 = vweird.f32 %v9072_v50 }
 0x47c   : > { %v6770_v26 = vpop.eup %6769  ;;  %6781 = vpow2.f32 %v9082_v0  ;;  %11189 = vst [vmem:[#allocation53_spill] sm:$0xff] %v9188_v25  ;;  %v2225_v17 = vsub.f32 1.0, %v2224_v37  ;;  %v2240_v18 = vsub.f32 1.0, %v2239_v21  ;;  %v2354_v35 = vand.u32 2147483648, %v9104_v40 }
 0x47d   : > { %v9176_v39 = vpop.eup %6771  ;;  %6783 = vrcp.f32 %v9101_v51  ;;  %11190 = vst [vmem:[#allocation54_spill] sm:$0xff] %v9195_v44  ;;  %vm2243_vm10 = vweird.f32 %v9079_v31  ;;  %v2255_v59 = vsub.f32 1.0, %v2254_v9  ;;  %v2270_v7 = vsub.f32 1.0, %v2269_v30 }
 0x47e   : > { %v9184_v0 = vpop.eup %6773  ;;  %6785 = vrcp.f32 %v9104_v40  ;;  %v2284_v22 = vmul.f32 %v9176_v39, %v9091_v19  ;;  %v9208_v46 = vadd.f32 1.0, %v6758_v28  ;;  %v9210_v37 = vadd.f32 1.0, %v6768_v42 }
 0x47f   : > { %v9193_v3 = vpop.eup %6775  ;;  %6787 = vrcp.f32 %v9107_v53  ;;  %vm2258_vm11 = vweird.f32 %v9085_v52  ;;  %v2299_v21 = vmul.f32 %v9184_v0, %v9094_v24  ;;  %v9219_v30 = vadd.f32 1.0, %v6770_v26 }
 0x480   : > { %v6778_v33 = vpop.eup %6777  ;;  %6789 = vrcp.f32 %v9112_v61  ;;  %11191 = vst [vmem:[#allocation55_spill] sm:$0xff] %v9208_v46  ;;  %v2314_v29 = vmul.f32 %v9193_v3, %v9098_v1  ;;  %vm2273_vm12 = vweird.f32 %v9088_v8  ;;  %v9224_v28 = vor.u32 1.1754944e-38, %v2339_v55 }
 0x481   : > { %v6780_v10 = vpop.eup %6779  ;;  %11192 = vst [vmem:[#allocation56_spill] sm:$0xff] %v9210_v37  ;;  %v9221_v63 = vadd.f32 1.0, %v6778_v33  ;;  %v2226_v49 = vmul.f32 %v9133_v6, %v2225_v17  ;;  %v9232_v16 = vor.u32 1.1754944e-38, %v2354_v35  ;;  %v2241_v33 = vmul.f32 %v9141_v5, %v2240_v18 }
 0x482   : > { %v6782_v23 = vpop.eup %6781  ;;  %11193 = vst [vmem:[#allocation57_spill] sm:$0xff] %v9219_v30  ;;  %v9229_v60 = vadd.f32 1.0, %v6780_v10  ;;  %v2271_v55 = vmul.f32 %v9158_v43, %v2270_v7  ;;  %v2285_v30 = vsub.f32 1.0, %v2284_v22  ;;  %vm2229_vm13 = vweird.f32 %v9133_v6 }
 0x483   : > { %v9217_v9 = vpop.eup %6783  ;;  %11194 = vst [vmem:[#allocation58_spill] sm:$0xff] %v9221_v63  ;;  %v2256_v63 = vmul.f32 %v9149_v27, %v2255_v59  ;;  %v11196_v10 = vand.u32 2147483647, %v9072_v50  ;;  %vm2288_vm15 = vweird.f32 %v9091_v19  ;;  %v2300_v17 = vsub.f32 1.0, %v2299_v21  ;;  %vm9286_vm8 = vmor %vm2228_vm9, %vm2229_vm13 }
 0x484   : > { %v9227_v57 = vpop.eup %6785  ;;  %11195 = vst [vmem:[#allocation59_spill] sm:$0xff] %v9229_v60  ;;  %v2315_v35 = vsub.f32 1.0, %v2314_v29  ;;  %v2369_v37 = vand.u32 2147483648, %v9107_v53  ;;  %vm2244_vm1 = vweird.f32 %v9141_v5  ;;  %v11199_v7 = vand.u32 2147483647, %v9079_v31 }
 0x485   : > { %v9235_v26 = vpop.eup %6787  ;;  %vm9243_vm14 = vcmp.eq.f32.partialorder %v11196_v10, 8.507059e+37  ;;  %v2329_v22 = vmul.f32 %v9217_v9, %v9101_v51  ;;  %v2344_v29 = vmul.f32 %v9227_v57, %v9104_v40  ;;  %6791 = vrcp.f32 %v9117_v56  ;;  %vm9300_vm7 = vmor %vm2243_vm10, %vm2244_vm1 }
 0x486   : > { %v9249_v18 = vpop.eup %6789  ;;  %vm9254_vm2 = vcmp.eq.f32.partialorder %v11199_v7, 8.507059e+37  ;;  %v2227_v21 = vadd.f32 %v9133_v6, %v2226_v49  ;;  %vm2259_vm4 = vweird.f32 %v9149_v27  ;;  %v11202_v10 = vand.u32 2147483647, %v9085_v52 }
 0x487   : > { %vm2274_vm0 = vweird.f32 %v9158_v43  ;;  %v11205_v60 = vand.u32 2147483647, %v9088_v8  ;;  %v2359_v49 = vmul.f32 %v9235_v26, %v9107_v53  ;;  %v2242_v44 = vadd.f32 %v9141_v5, %v2241_v33  ;;  %vm9312_vm9 = vmor %vm2258_vm11, %vm2259_vm4 }
 0x488   : > { %vm9268_vm5 = vcmp.eq.f32.partialorder %v11202_v10, 8.507059e+37  ;;  %v2272_v25 = vadd.f32 %v9158_v43, %v2271_v55  ;;  %v2286_v20 = vmul.f32 %v9176_v39, %v2285_v30  ;;  %v9294_v48 = vadd.f32 1.0, %v6782_v23  ;;  %vm9332_vm11 = vmor %vm2273_vm12, %vm2274_vm0 }
 0x489   : > { %vm9275_vm6 = vcmp.eq.f32.partialorder %v11205_v60, 8.507059e+37  ;;  %v2257_v60 = vadd.f32 %v9149_v27, %v2256_v63  ;;  %v2301_v14 = vmul.f32 %v9184_v0, %v2300_v17  ;;  %v2316_v33 = vmul.f32 %v9193_v3, %v2315_v35 }
 0x48a   : > { %11210 = vst [vmem:[#allocation60_spill] sm:$0xff] %v9294_v48  ;;  %v2374_v63 = vmul.f32 %v9249_v18, %v9112_v61  ;;  %vm2289_vm10 = vweird.f32 %v9176_v39  ;;  %v11215_v31 = vand.u32 2147483647, %v9091_v19  ;;  %v2330_v55 = vsub.f32 1.0, %v2329_v22 }
 0x48b   : > { %v2345_v17 = vsub.f32 1.0, %v2344_v29  ;;  %v9323_v35 = vor.u32 1.1754944e-38, %v2369_v37  ;;  %v2231_v52 = vsel %vm9286_vm8, %v9133_v6, %v2227_v21  ;;  %vm2304_vm1 = vweird.f32 %v9184_v0  ;;  %v9351_v29 = vpop.eup %6791 }
 0x48c   : > { %vm9319_vm13 = vcmp.eq.f32.partialorder %v11215_v31, 8.507059e+37  ;;  %v11220_v31 = vand.u32 2147483647, %v9094_v24  ;;  %vm2319_vm3 = vweird.f32 %v9193_v3  ;;  %v11223_v6 = vand.u32 2147483647, %v9098_v1 }
 0x48d   : > { %v2360_v8 = vsub.f32 1.0, %v2359_v49  ;;  %v2246_v21 = vsel %vm9300_vm7, %v9141_v5, %v2242_v44  ;;  %v2261_v10 = vsel %vm9312_vm9, %v9149_v27, %v2257_v60  ;;  %vm2348_vm0 = vweird.f32 %v9104_v40  ;;  %vm9377_vm7 = vmor %vm2288_vm15, %vm2289_vm10 }
 0x48e   : > { %vm9339_vm4 = vcmp.eq.f32.partialorder %v11220_v31, 8.507059e+37  ;;  %vm9346_vm8 = vcmp.eq.f32.partialorder %v11223_v6, 8.507059e+37  ;;  %v2276_v31 = vsel %vm9332_vm11, %v9158_v43, %v2272_v25  ;;  %v2287_v6 = vadd.f32 %v9176_v39, %v2286_v20 }
 0x48f   : > { %v2302_v49 = vadd.f32 %v9184_v0, %v2301_v14  ;;  %v2317_v38 = vadd.f32 %v9193_v3, %v2316_v33  ;;  %vm2363_vm12 = vweird.f32 %v9107_v53  ;;  %v2375_v50 = vsub.f32 1.0, %v2374_v63 }
 0x490   : > { %6793 = vrcp.f32 %v9119_v58  ;;  %v9371_v44 = vsel %vm9243_vm14, %v9121_v45, %v2231_v52  ;;  %v2331_v48 = vmul.f32 %v9217_v9, %v2330_v55  ;;  %v2346_v14 = vmul.f32 %v9227_v57, %v2345_v17 }
 0x491   : > { %6795 = vrcp.f32 %v9124_v34  ;;  %v9387_v43 = vsel %vm9254_vm2, %v9130_v54, %v2246_v21  ;;  %vm11228_vm14 = vweird.f32 %v9094_v24  ;;  %v2361_v19 = vmul.f32 %v9235_v26, %v2360_v8 }
 0x492   : > { %vm9393_vm9 = vmor %vm11228_vm14, %vm2304_vm1  ;;  %vm2378_vm15 = vweird.f32 %v9112_v61  ;;  %v2389_v5 = vmul.f32 %v9351_v29, %v9117_v56  ;;  %6797 = vrcp.f32 %v9128_v32  ;;  %v9405_v54 = vsel %vm9268_vm5, %v9137_v12, %v2261_v10 }
 0x493   : > { %v9410_v24 = vsel %vm9275_vm6, %v9155_v2, %v2276_v31  ;;  %v2291_v27 = vsel %vm9377_vm7, %v9176_v39, %v2287_v6  ;;  %vm11231_vm2 = vweird.f32 %v9098_v1  ;;  %vm2334_vm5 = vweird.f32 %v9217_v9 }
 0x494   : > { %vm9419_vm10 = vmor %vm11231_vm2, %vm2319_vm3  ;;  %v11234_v12 = vand.u32 2147483647, %v9101_v51  ;;  %v11237_v2 = vand.u32 2147483647, %v9104_v40  ;;  %v2306_v1 = vsel %vm9393_vm9, %v9184_v0, %v2302_v49  ;;  %v11240_v59 = vand.u32 2147483647, %v9107_v53 }
 0x495   : > { %v2321_v42 = vsel %vm9419_vm10, %v9193_v3, %v2317_v38  ;;  %v2376_v60 = vmul.f32 %v9249_v18, %v2375_v50  ;;  %v2382_v33 = vand.u32 2147483647, %v9112_v61  ;;  %v2332_v63 = vadd.f32 %v9217_v9, %v2331_v48 }
 0x496   : > { %vm9426_vm11 = vcmp.eq.f32.partialorder %v11234_v12, 8.507059e+37  ;;  %vm9432_vm6 = vcmp.eq.f32.partialorder %v11237_v2, 8.507059e+37  ;;  %vm9444_vm3 = vcmp.eq.f32.partialorder %v11240_v59, 8.507059e+37  ;;  %v2347_v23 = vadd.f32 %v9227_v57, %v2346_v14  ;;  %v9454_v0 = vpop.eup %6793 }
 0x497   : > { %vm2349_vm1 = vweird.f32 %v9227_v57  ;;  %6799 = vrcp.f32 %v9135_v41  ;;  %v9459_v3 = vsel %vm9319_vm13, %v9162_v13, %v2291_v27  ;;  %v2362_v38 = vadd.f32 %v9235_v26, %v2361_v19  ;;  %v9463_v17 = vpop.eup %6795  ;;  %v11265_v19 = vld [vmem:[#allocation50_spill] sm:$0xff] }
 0x498   : > { %vm2364_vm7 = vweird.f32 %v9235_v26  ;;  %v2390_v55 = vsub.f32 1.0, %v2389_v5  ;;  %v9468_v52 = vsel %vm9339_vm4, %v9190_v62, %v2306_v1  ;;  %v9473_v8 = vsel %vm9346_vm8, %v9197_v11, %v2321_v42  ;;  %v9485_v22 = vpop.eup %6797  ;;  %vm9489_vm4 = vmor %vm2348_vm0, %vm2349_vm1 }
 0x499   : > { %vm11243_vm13 = vweird.f32 %v9101_v51  ;;  %v2384_v30 = vand.u32 2147483648, %v9112_v61  ;;  %6801 = vrcp.f32 %v9143_v36  ;;  %v2377_v11 = vadd.f32 %v9249_v18, %v2376_v60  ;;  %vm9510_vm0 = vmor %vm2363_vm12, %vm2364_vm7 }
 0x49a   : > { %vm9479_vm14 = vmor %vm11243_vm13, %vm2334_vm5  ;;  %vm2379_vm8 = vweird.f32 %v9249_v18  ;;  %vm9495_vm9 = vcmp.eq.f32.partialorder %v2382_v33, 8.507059e+37  ;;  %v2397_v37 = vand.u32 2147483647, %v9117_v56  ;;  %v2351_v40 = vsel %vm9489_vm4, %v9227_v57, %v2347_v23 }
 0x49b   : > { %v2336_v21 = vsel %vm9479_vm14, %v9217_v9, %v2332_v63  ;;  %v2399_v31 = vand.u32 2147483648, %v9117_v56  ;;  %v2404_v6 = vmul.f32 %v9454_v0, %v9119_v58  ;;  %v2366_v9 = vsel %vm9510_vm0, %v9235_v26, %v2362_v38  ;;  %vm9528_vm12 = vmor %vm2378_vm15, %vm2379_vm8 }
 0x49c   : > { %v2391_v49 = vmul.f32 %v9351_v29, %v2390_v55  ;;  %v2419_v57 = vmul.f32 %v9463_v17, %v9124_v34  ;;  %6803 = vrcp.f32 %v9145_v47  ;;  %v2385_v25 = vor.u32 1.1754944e-38, %v2384_v30 }
 0x49d   : > { %v9524_v53 = vpop.eup %6799  ;;  %vm2393_vm2 = vweird.f32 %v9117_v56  ;;  %v2414_v26 = vand.u32 2147483648, %v9119_v58  ;;  %v2434_v48 = vmul.f32 %v9485_v22, %v9128_v32  ;;  %v9539_v14 = vsel %vm9426_vm11, %v9224_v28, %v2336_v21 }
 0x49e   : > { %v9544_v61 = vsel %vm9432_vm6, %v9232_v16, %v2351_v40  ;;  %v2381_v45 = vsel %vm9528_vm12, %v9249_v18, %v2377_v11  ;;  %vm9549_vm15 = vcmp.eq.f32.partialorder %v2397_v37, 8.507059e+37  ;;  %v9558_v28 = vsel %vm9444_vm3, %v9323_v35, %v2366_v9 }
 0x49f   : > { %v9553_v5 = vpop.eup %6801  ;;  %v2400_v27 = vor.u32 1.1754944e-38, %v2399_v31  ;;  %v2405_v20 = vsub.f32 1.0, %v2404_v6  ;;  %v2412_v16 = vand.u32 2147483647, %v9119_v58  ;;  %v2392_v12 = vadd.f32 %v9351_v29, %v2391_v49 }
 0x4a0   : > { %vm2394_vm10 = vweird.f32 %v9351_v29  ;;  %v2420_v18 = vsub.f32 1.0, %v2419_v57  ;;  %v2449_v46 = vmul.f32 %v9524_v53, %v9135_v41  ;;  %v9567_v2 = vsel %vm9495_vm9, %v2385_v25, %v2381_v45  ;;  %v11264_v25 = vld [vmem:[#allocation49_spill] sm:$0xff] }
 0x4a1   : > { %vm2408_vm5 = vweird.f32 %v9119_v58  ;;  %v9570_v35 = vor.u32 1.1754944e-38, %v2414_v26  ;;  %v2429_v39 = vand.u32 2147483648, %v9124_v34  ;;  %v2435_v1 = vsub.f32 1.0, %v2434_v48  ;;  %vm9583_vm6 = vmor %vm2393_vm2, %vm2394_vm10 }
 0x4a2   : > { %v9573_v42 = vpop.eup %6803  ;;  %vm2423_vm11 = vweird.f32 %v9124_v34  ;;  %v2427_v59 = vand.u32 2147483647, %v9124_v34  ;;  %v2444_v7 = vand.u32 2147483648, %v9128_v32  ;;  %v2464_v60 = vmul.f32 %v9553_v5, %v9143_v36 }
 0x4a3   : > { %6805 = vrcp.f32 %v9151_v4  ;;  %v2406_v63 = vmul.f32 %v9454_v0, %v2405_v20  ;;  %vm2409_vm3 = vweird.f32 %v9454_v0  ;;  %vm2438_vm1 = vweird.f32 %v9128_v32 }
 0x4a4   : > { %v2442_v23 = vand.u32 2147483647, %v9128_v32  ;;  %v2396_v38 = vsel %vm9583_vm6, %v9351_v29, %v2392_v12  ;;  %v2421_v55 = vmul.f32 %v9463_v17, %v2420_v18  ;;  %v2450_v13 = vsub.f32 1.0, %v2449_v46  ;;  %vm9638_vm12 = vmor %vm2408_vm5, %vm2409_vm3  ;;  %v11268_v18 = vld [vmem:[#allocation51_spill] sm:$0xff] }
 0x4a5   : > { %6807 = vrcp.f32 %v9153_v15  ;;  %vm9596_vm7 = vcmp.eq.f32.partialorder %v2412_v16, 8.507059e+37  ;;  %v2430_v30 = vor.u32 1.1754944e-38, %v2429_v39  ;;  %v2436_v62 = vmul.f32 %v9485_v22, %v2435_v1 }
 0x4a6   : > { %v2459_v11 = vand.u32 2147483648, %v9135_v41  ;;  %v2479_v51 = vmul.f32 %v9573_v42, %v9145_v47  ;;  %vm9604_vm13 = vcmp.eq.f32.partialorder %v2427_v59, 8.507059e+37  ;;  %v2445_v29 = vor.u32 1.1754944e-38, %v2444_v7 }
 0x4a7   : > { %vm2453_vm14 = vweird.f32 %v9135_v41  ;;  %v2457_v21 = vand.u32 2147483647, %v9135_v41  ;;  %v2465_v40 = vsub.f32 1.0, %v2464_v60  ;;  %v9612_v10 = vsel %vm9549_vm15, %v2400_v27, %v2396_v38  ;;  %v6410_v38 = vld [vmem:[#allocation7 + $0x38] sm:$0xff] }
 0x4a8   : > { %v2407_v31 = vadd.f32 %v9454_v0, %v2406_v63  ;;  %vm2424_vm4 = vweird.f32 %v9463_v17  ;;  %vm9616_vm8 = vcmp.eq.f32.partialorder %v2442_v23, 8.507059e+37  ;;  %v2472_v9 = vand.u32 2147483647, %v9143_v36  ;;  %v11277_v23 = vld [vmem:[#allocation52_spill] sm:$0xff]  ;;  %2907 = vmatpush.bf16.msrb.mxu1 %v6410_v38  ;;  %6484 = vmatpush.bf16.msrb.mxu2 %v6410_v38  ;;  %v6424_v38 = vld [vmem:[#allocation7 + $0xa8] sm:$0xff] }
 0x4a9   : > { %v9621_v49 = vpop.eup %6805  ;;  %v2422_v57 = vadd.f32 %v9463_v17, %v2421_v55  ;;  %vm2439_vm9 = vweird.f32 %v9485_v22  ;;  %v2451_v50 = vmul.f32 %v9524_v53, %v2450_v13  ;;  %vm2468_vm0 = vweird.f32 %v9143_v36  ;;  %vm9653_vm15 = vmor %vm2423_vm11, %vm2424_vm4  ;;  %v6426_v55 = vld [vmem:[#allocation7 + $0xb8] sm:$0xff] }
 0x4aa   : > { %6809 = vrcp.f32 %v11264_v25  ;;  %v2437_v26 = vadd.f32 %v9485_v22, %v2436_v62  ;;  %v9629_v48 = vor.u32 1.1754944e-38, %v2459_v11  ;;  %v2480_v45 = vsub.f32 1.0, %v2479_v51  ;;  %vm9672_vm5 = vmor %vm2438_vm1, %vm2439_vm9  ;;  %3487 = vmatpush.bf16.msra.mxu3 %v6426_v55 }
 0x4ab   : > { %6811 = vrcp.f32 %v11265_v19  ;;  %v9632_v27 = vpop.eup %6807  ;;  %vm2454_vm2 = vweird.f32 %v9524_v53  ;;  %v2466_v16 = vmul.f32 %v9553_v5, %v2465_v40  ;;  %v2474_v12 = vand.u32 2147483648, %v9143_v36 }
 0x4ac   : > { %6813 = vrcp.f32 %v11268_v18  ;;  %v2411_v46 = vsel %vm9638_vm12, %v9454_v0, %v2407_v31  ;;  %vm9657_vm10 = vcmp.eq.f32.partialorder %v2457_v21, 8.507059e+37  ;;  %v2487_v1 = vand.u32 2147483647, %v9145_v47  ;;  %vm9708_vm1 = vmor %vm2453_vm14, %vm2454_vm2 }
 0x4ad   : > { %v2489_v59 = vand.u32 2147483648, %v9145_v47  ;;  %v2494_v7 = vmul.f32 %v9621_v49, %v9151_v4  ;;  %v2426_v0 = vsel %vm9653_vm15, %v9463_v17, %v2422_v57  ;;  %v2452_v60 = vadd.f32 %v9524_v53, %v2451_v50 }
 0x4ae   : > { %vm9677_vm11 = vcmp.eq.f32.partialorder %v2472_v9, 8.507059e+37  ;;  %vm2483_vm6 = vweird.f32 %v9145_v47  ;;  %v2441_v17 = vsel %vm9672_vm5, %v9485_v22, %v2437_v26  ;;  %v2481_v63 = vmul.f32 %v9573_v42, %v2480_v45  ;;  %v6409_v26 = vld [vmem:[#allocation7 + $0x30] sm:$0xff] }
 0x4af   : > { %v2509_v32 = vmul.f32 %v9632_v27, %v9153_v15  ;;  %6815 = vrcp.f32 %v11277_v23  ;;  %v9694_v62 = vsel %vm9596_vm7, %v9570_v35, %v2411_v46  ;;  %v2467_v11 = vadd.f32 %v9553_v5, %v2466_v16  ;;  %v6425_v45 = vld [vmem:[#allocation7 + $0xb0] sm:$0xff]  ;;  %2908 = vmatpush.bf16.msrb.mxu1 %v6409_v26  ;;  %6485 = vmatpush.bf16.msrb.mxu2 %v6409_v26  ;;  %v6423_v26 = vld [vmem:[#allocation7 + $0xa0] sm:$0xff] }
 0x4b0   : > { %v9689_v13 = vpop.eup %6809  ;;  %vm2469_vm3 = vweird.f32 %v9553_v5  ;;  %v2475_v22 = vor.u32 1.1754944e-38, %v2474_v12  ;;  %v9702_v21 = vsel %vm9604_vm13, %v2430_v30, %v2426_v0  ;;  %vm9712_vm7 = vcmp.eq.f32.partialorder %v2487_v1, 8.507059e+37  ;;  %v11284_v12 = vld [vmem:[#allocation53_spill] sm:$0xff]  ;;  %3488 = vmatpush.bf16.msra.mxu3 %v6425_v45  ;;  %v11309_v45 = vld [vmem:[#allocation56_spill] sm:$0xff] }
 0x4b1   : > { %v9698_v51 = vpop.eup %6811  ;;  %v2490_v56 = vor.u32 1.1754944e-38, %v2489_v59  ;;  %v2495_v31 = vsub.f32 1.0, %v2494_v7  ;;  %v9720_v30 = vsel %vm9616_vm8, %v2445_v29, %v2441_v17  ;;  %v2456_v41 = vsel %vm9708_vm1, %v9524_v53, %v2452_v60  ;;  %vm9731_vm13 = vmor %vm2468_vm0, %vm2469_vm3 }
 0x4b2   : > { %v9716_v9 = vpop.eup %6813  ;;  %v2502_v37 = vand.u32 2147483647, %v9151_v4  ;;  %v2504_v57 = vand.u32 2147483648, %v9151_v4  ;;  %v2482_v29 = vadd.f32 %v9573_v42, %v2481_v63  ;;  %vm2484_vm14 = vweird.f32 %v9573_v42 }
 0x4b3   : > { %vm2498_vm4 = vweird.f32 %v9151_v4  ;;  %v2510_v53 = vsub.f32 1.0, %v2509_v32  ;;  %v2524_v6 = vmul.f32 %v9689_v13, %v11264_v25  ;;  %v2471_v36 = vsel %vm9731_vm13, %v9553_v5, %v2467_v11  ;;  %vm9763_vm8 = vmor %vm2483_vm6, %vm2484_vm14  ;;  %v6408_v32 = vld [vmem:[#allocation7 + $0x28] sm:$0xff] }
 0x4b4   : > { %v2517_v20 = vand.u32 2147483647, %v9153_v15  ;;  %v2539_v16 = vmul.f32 %v9698_v51, %v11265_v19  ;;  %6817 = vrcp.f32 %v11284_v12  ;;  %v2496_v58 = vmul.f32 %v9621_v49, %v2495_v31  ;;  %v11289_v11 = vld [vmem:[#allocation54_spill] sm:$0xff]  ;;  %2909 = vmatpush.bf16.msrb.mxu1 %v6408_v32  ;;  %3489 = vmatpush.bf16.msra.mxu3 %v6424_v38  ;;  %v6406_v38 = vld [vmem:[#allocation7 + $0x18] sm:$0xff] }
 0x4b5   : > { %v9747_v46 = vpop.eup %6815  ;;  %v2519_v1 = vand.u32 2147483648, %v9153_v15  ;;  %v2534_v59 = vand.u32 2147483648, %v11264_v25  ;;  %v2554_v7 = vmul.f32 %v9716_v9, %v11268_v18  ;;  %v9757_v5 = vsel %vm9657_vm10, %v9629_v48, %v2456_v41  ;;  %6486 = vmatpush.bf16.msrb.mxu2 %v6408_v32 }
 0x4b6   : > { %v9767_v34 = vor.u32 1.1754944e-38, %v2504_v57  ;;  %vm2513_vm9 = vweird.f32 %v9153_v15  ;;  %v2532_v60 = vand.u32 2147483647, %v11264_v25  ;;  %v9773_v48 = vsel %vm9677_vm11, %v2475_v22, %v2471_v36 }
 0x4b7   : > { %v2486_v47 = vsel %vm9763_vm8, %v9573_v42, %v2482_v29  ;;  %vm9778_vm0 = vcmp.eq.f32.partialorder %v2502_v37, 8.507059e+37  ;;  %v2511_v17 = vmul.f32 %v9632_v27, %v2510_v53  ;;  %v2525_v63 = vsub.f32 1.0, %v2524_v6 }
 0x4b8   : > { %vm2499_vm12 = vweird.f32 %v9621_v49  ;;  %vm2528_vm2 = vweird.f32 %v11264_v25  ;;  %v2540_v33 = vsub.f32 1.0, %v2539_v16  ;;  %v2569_v55 = vmul.f32 %v9747_v46, %v11277_v23  ;;  %3490 = vmatpush.bf16.msra.mxu3 %v6423_v26 }
 0x4b9   : > { %6819 = vrcp.f32 %v11289_v11  ;;  %v2497_v42 = vadd.f32 %v9621_v49, %v2496_v58  ;;  %vm9789_vm15 = vcmp.eq.f32.partialorder %v2517_v20, 8.507059e+37  ;;  %v2520_v40 = vor.u32 1.1754944e-38, %v2519_v1  ;;  %vm9813_vm6 = vmor %vm2498_vm4, %vm2499_vm12 }
 0x4ba   : > { %v9793_v31 = vor.u32 1.1754944e-38, %v2534_v59  ;;  %v2555_v41 = vsub.f32 1.0, %v2554_v7  ;;  %v9795_v37 = vpop.eup %6817  ;;  %v9799_v57 = vsel %vm9712_vm7, %v2490_v56, %v2486_v47  ;;  %vm2543_vm10 = vweird.f32 %v11265_v19  ;;  %v6407_v56 = vld [vmem:[#allocation7 + $0x20] sm:$0xff]  ;;  %v11296_v7 = vld [vmem:[#allocation55_spill] sm:$0xff] }
 0x4bb   : > { %v2547_v50 = vand.u32 2147483647, %v11265_v19  ;;  %v2549_v29 = vand.u32 2147483648, %v11265_v19  ;;  %v2512_v53 = vadd.f32 %v9632_v27, %v2511_v17  ;;  %vm2514_vm5 = vweird.f32 %v9632_v27  ;;  %2910 = vmatpush.bf16.msrb.mxu1 %v6407_v56  ;;  %6487 = vmatpush.bf16.msrb.mxu2 %v6407_v56 }
 0x4bc   : > { %v2526_v6 = vmul.f32 %v9689_v13, %v2525_v63  ;;  %vm2558_vm11 = vweird.f32 %v11268_v18  ;;  %v2562_v35 = vand.u32 2147483647, %v11268_v18  ;;  %vm2529_vm3 = vweird.f32 %v9689_v13  ;;  %vm9837_vm7 = vmor %vm2513_vm9, %vm2514_vm5 }
 0x4bd   : > { %v2541_v36 = vmul.f32 %v9698_v51, %v2540_v33  ;;  %v2564_v20 = vand.u32 2147483648, %v11268_v18  ;;  %v2570_v16 = vsub.f32 1.0, %v2569_v55  ;;  %v2501_v58 = vsel %vm9813_vm6, %v9621_v49, %v2497_v42  ;;  %v6422_v33 = vld [vmem:[#allocation7 + $0x98] sm:$0xff]  ;;  %vm9867_vm9 = vmor %vm2528_vm2, %vm2529_vm3  ;;  %v11312_v49 = vld [vmem:[#allocation57_spill] sm:$0xff] }
 0x4be   : > { %vm9823_vm1 = vcmp.eq.f32.partialorder %v2532_v60, 8.507059e+37  ;;  %v2556_v4 = vmul.f32 %v9716_v9, %v2555_v41  ;;  %v2584_v59 = vmul.f32 %v9795_v37, %v11284_v12  ;;  %6821 = vrcp.f32 %v11296_v7  ;;  %v6434_v55 = vld [vmem:[#allocation7 + $0xf8] sm:$0xff]  ;;  %3491 = vmatpush.bf16.msra.mxu3 %v6422_v33 }
 0x4bf   : > { %v9831_v0 = vpop.eup %6819  ;;  %vm9841_vm13 = vcmp.eq.f32.partialorder %v2547_v50, 8.507059e+37  ;;  %v2550_v47 = vor.u32 1.1754944e-38, %v2549_v29  ;;  %vm2573_vm14 = vweird.f32 %v11277_v23  ;;  %v2577_v17 = vand.u32 2147483647, %v11277_v23  ;;  %2911 = vmatpush.bf16.msrb.mxu1 %v6406_v38  ;;  %3813 = vmatpush.bf16.msra.mxu0 %v6434_v55  ;;  %v11316_v55 = vld [vmem:[#allocation59_spill] sm:$0xff]  ;;  %v6420_v29 = vld [vmem:[#allocation7 + $0x88] sm:$0xff] }
 0x4c0   : > { %v2516_v63 = vsel %vm9837_vm7, %v9632_v27, %v2512_v53  ;;  %v2527_v15 = vadd.f32 %v9689_v13, %v2526_v6  ;;  %vm2544_vm4 = vweird.f32 %v9698_v51  ;;  %vm9852_vm8 = vcmp.eq.f32.partialorder %v2562_v35, 8.507059e+37  ;;  %6488 = vmatpush.bf16.msrb.mxu2 %v6406_v38 }
 0x4c1   : > { %v9859_v42 = vsel %vm9778_vm0, %v9767_v34, %v2501_v58  ;;  %v2542_v41 = vadd.f32 %v9698_v51, %v2541_v36  ;;  %v2565_v50 = vor.u32 1.1754944e-38, %v2564_v20  ;;  %v2571_v27 = vmul.f32 %v9747_v46, %v2570_v16  ;;  %vm9883_vm0 = vmor %vm2543_vm10, %vm2544_vm4  ;;  %v6405_v36 = vld [vmem:[#allocation7 + $0x10] sm:$0xff] }
 0x4c2   : > { %v2557_v53 = vadd.f32 %v9716_v9, %v2556_v4  ;;  %vm2559_vm12 = vweird.f32 %v9716_v9  ;;  %v2585_v39 = vsub.f32 1.0, %v2584_v59  ;;  %v2599_v34 = vmul.f32 %v9831_v0, %v11289_v11  ;;  %v6421_v20 = vld [vmem:[#allocation7 + $0x90] sm:$0xff] }
 0x4c3   : > { %v9877_v6 = vsel %vm9789_vm15, %v2520_v40, %v2516_v63  ;;  %vm9887_vm2 = vcmp.eq.f32.partialorder %v2577_v17, 8.507059e+37  ;;  %v2579_v56 = vand.u32 2147483648, %v11277_v23  ;;  %v2592_v26 = vand.u32 2147483647, %v11284_v12  ;;  %v6433_v16 = vld [vmem:[#allocation7 + $0xf0] sm:$0xff]  ;;  %vm9909_vm5 = vmor %vm2558_vm11, %vm2559_vm12  ;;  %2912 = vmatpush.bf16.msrb.mxu1 %v6405_v36  ;;  %3492 = vmatpush.bf16.msra.mxu3 %v6421_v20 }
 0x4c4   : > { %v9893_v22 = vpop.eup %6821  ;;  %v2531_v19 = vsel %vm9867_vm9, %v9689_v13, %v2527_v15  ;;  %vm2574_vm15 = vweird.f32 %v9747_v46  ;;  %vm2588_vm10 = vweird.f32 %v11284_v12  ;;  %v2594_v40 = vand.u32 2147483648, %v11284_v12  ;;  %v11313_v15 = vld [vmem:[#allocation58_spill] sm:$0xff]  ;;  %3814 = vmatpush.bf16.msra.mxu0 %v6433_v16  ;;  %6489 = vmatpush.bf16.msrb.mxu2 %v6405_v36  ;;  %v11322_v16 = vld [vmem:[#allocation19_spill] sm:$0xff]  ;;  %v11323_v13 = vld [vmem:[#allocation20_spill] sm:$0xff] }
 0x4c5   : > { %6823 = vrcp.f32 %v11309_v45  ;;  %v2546_v58 = vsel %vm9883_vm0, %v9698_v51, %v2542_v41  ;;  %v2572_v4 = vadd.f32 %v9747_v46, %v2571_v27  ;;  %v2609_v59 = vand.u32 2147483648, %v11289_v11  ;;  %vm9930_vm11 = vmor %vm2573_vm14, %vm2574_vm15  ;;  %v11317_v41 = vld [vmem:[#allocation60_spill] sm:$0xff]  ;;  %v6404_v27 = vld [vmem:[#allocation7 + $0x8] sm:$0xff] }
 0x4c6   : > { %6825 = vrcp.f32 %v11312_v49  ;;  %v2561_v17 = vsel %vm9909_vm5, %v9716_v9, %v2557_v53  ;;  %v2586_v51 = vmul.f32 %v9795_v37, %v2585_v39  ;;  %v2600_v63 = vsub.f32 1.0, %v2599_v34  ;;  %v6432_v53 = vld [vmem:[#allocation7 + $0xe8] sm:$0xff] }
 0x4c7   : > { %6827 = vrcp.f32 %v11313_v15  ;;  %v9924_v18 = vsel %vm9823_vm1, %v9793_v31, %v2531_v19  ;;  %v2580_v9 = vor.u32 1.1754944e-38, %v2579_v56  ;;  %v2614_v33 = vmul.f32 %v9893_v22, %v11296_v7  ;;  %v11320_v19 = vld [vmem:[#allocation17_spill] sm:$0xff]  ;;  %2913 = vmatpush.bf16.msrb.mxu1 %v6404_v27  ;;  %v11321_v36 = vld [vmem:[#allocation18_spill] sm:$0xff]  ;;  %3493 = vmatpush.bf16.msra.mxu3 %v6420_v29 }
 0x4c8   : > { %6829 = vrcp.f32 %v11316_v55  ;;  %v9939_v31 = vsel %vm9841_vm13, %v2550_v47, %v2546_v58  ;;  %v9941_v1 = vor.u32 1.1754944e-38, %v2594_v40  ;;  %v2607_v23 = vand.u32 2147483647, %v11289_v11  ;;  %3815 = vmatpush.bf16.msra.mxu0 %v6432_v53  ;;  %6490 = vmatpush.bf16.msrb.mxu2 %v6404_v27  ;;  %v11329_v27 = vld [vmem:[#allocation22_spill] sm:$0xff] }
 0x4c9   : > { %6831 = vrcp.f32 %v11317_v41  ;;  %v9947_v39 = vsel %vm9852_vm8, %v2565_v50, %v2561_v17  ;;  %v2576_v34 = vsel %vm9930_vm11, %v9747_v46, %v2572_v4  ;;  %vm2589_vm6 = vweird.f32 %v9795_v37 }
 0x4ca   : > { %vm9953_vm3 = vcmp.eq.f32.partialorder %v2592_v26, 8.507059e+37  ;;  %vm2603_vm1 = vweird.f32 %v11289_v11  ;;  %v2624_v47 = vand.u32 2147483648, %v11296_v7  ;;  %v2587_v32 = vadd.f32 %v9795_v37, %v2586_v51  ;;  %vm9997_vm13 = vmor %vm2588_vm10, %vm2589_vm6 }
 0x4cb   : > { %v9959_v25 = vpop.eup %6823  ;;  %v2601_v50 = vmul.f32 %v9831_v0, %v2600_v63  ;;  %v9963_v56 = vor.u32 1.1754944e-38, %v2609_v59  ;;  %v9967_v46 = vmul.f32 %v9371_v44, %v11320_v19  ;;  %v2615_v40 = vsub.f32 1.0, %v2614_v33  ;;  %v9979_v59 = vld [vmem:[#allocation7] sm:$0xff] }
 0x4cc   : > { %v9969_v26 = vpop.eup %6825  ;;  %v9973_v20 = vmul.f32 %v9387_v43, %v11321_v36  ;;  %v2705_v58 = vmul.f32 %v9405_v54, %v11322_v16  ;;  %v2706_v4 = vmul.f32 %v9410_v24, %v11323_v13  ;;  %v9985_v17 = vsel %vm9887_vm2, %v2580_v9, %v2576_v34  ;;  %v11328_v9 = vld [vmem:[#allocation21_spill] sm:$0xff]  ;;  %2914 = vmatpush.bf16.msrb.mxu1 %v9979_v59  ;;  %v11331_v16 = vld [vmem:[#allocation24_spill] sm:$0xff] }
 0x4cd   : > { %v9981_v44 = vpop.eup %6827  ;;  %vm2604_vm7 = vweird.f32 %v9831_v0  ;;  %v2622_v43 = vand.u32 2147483647, %v11296_v7  ;;  %v2637_v51 = vand.u32 2147483647, %v11309_v45  ;;  %2741 = vst [vmem:[#allocation2 + $0x13] sm:$0xff] %v9967_v46  ;;  %vm10001_vm14 = vcmp.eq.f32.partialorder %v2607_v23, 8.507059e+37  ;;  %6491 = vmatpush.bf16.msrb.mxu2 %v9979_v59 }
 0x4ce   : > { %v9991_v54 = vpop.eup %6829  ;;  %vm2618_vm4 = vweird.f32 %v11296_v7  ;;  %v10006_v63 = vor.u32 1.1754944e-38, %v2624_v47  ;;  %v2629_v38 = vmul.f32 %v9959_v25, %v11309_v45  ;;  %v2707_v33 = vmul.f32 %v9459_v3, %v11328_v9  ;;  %2742 = vst [vmem:[#allocation2 + $0x1b] sm:$0xff] %v9973_v20  ;;  %v11330_v47 = vld [vmem:[#allocation23_spill] sm:$0xff]  ;;  %vm10054_vm9 = vmor %vm2603_vm1, %vm2604_vm7 }
 0x4cf   : > { %v2708_v12 = vmul.f32 %v9468_v52, %v11329_v27  ;;  %v10015_v29 = vpop.eup %6831  ;;  %v2591_v23 = vsel %vm9997_vm13, %v9795_v37, %v2587_v32  ;;  %v2639_v53 = vand.u32 2147483648, %v11309_v45  ;;  %v2644_v34 = vmul.f32 %v9969_v26, %v11312_v49  ;;  %2744 = vst [vmem:[#allocation2 + $0x25] sm:$0xff] %v2705_v58  ;;  %v11332_v58 = vld [vmem:[#allocation25_spill] sm:$0xff]  ;;  %v11338_v27 = vld [vmem:[#allocation27_spill] sm:$0xff] }
 0x4d0   : > { %v2709_v19 = vmul.f32 %v9473_v8, %v11330_v47  ;;  %v2602_v3 = vadd.f32 %v9831_v0, %v2601_v50  ;;  %v2616_v52 = vmul.f32 %v9893_v22, %v2615_v40  ;;  %v2659_v36 = vmul.f32 %v9981_v44, %v11313_v15  ;;  %2745 = vst [vmem:[#allocation2 + $0x2d] sm:$0xff] %v2706_v4  ;;  %v6431_v47 = vld [vmem:[#allocation7 + $0xe0] sm:$0xff] }
 0x4d1   : > { %v2710_v37 = vmul.f32 %v9539_v14, %v11331_v16  ;;  %vm2619_vm8 = vweird.f32 %v9893_v22  ;;  %v2652_v32 = vand.u32 2147483647, %v11312_v49  ;;  %v2674_v8 = vmul.f32 %v9991_v54, %v11316_v55  ;;  %2747 = vst [vmem:[#allocation2 + $0x37] sm:$0xff] %v2707_v33  ;;  %v11333_v14 = vld [vmem:[#allocation26_spill] sm:$0xff]  ;;  %3816 = vmatpush.bf16.msra.mxu0 %v6431_v47 }
 0x4d2   : > { %v10038_v13 = vmul.f32 %v9544_v61, %v11332_v58  ;;  %v2630_v50 = vsub.f32 1.0, %v2629_v38  ;;  %v2654_v40 = vand.u32 2147483648, %v11312_v49  ;;  %v2689_v24 = vmul.f32 %v10015_v29, %v11317_v41  ;;  %2748 = vst [vmem:[#allocation2 + $0x3f] sm:$0xff] %v2708_v12  ;;  %vm10092_vm10 = vmor %vm2618_vm4, %vm2619_vm8  ;;  %v11358_v38 = vld [vmem:[#allocation37_spill] sm:$0xff] }
 0x4d3   : > { %v2712_v4 = vmul.f32 %v9558_v28, %v11333_v14  ;;  %v10048_v9 = vsel %vm9953_vm3, %v9941_v1, %v2591_v23  ;;  %vm10058_vm12 = vcmp.eq.f32.partialorder %v2622_v43, 8.507059e+37  ;;  %v10062_v33 = vor.u32 1.1754944e-38, %v2639_v53  ;;  %2750 = vst [vmem:[#allocation2 + $0x49] sm:$0xff] %v2709_v19  ;;  %v11339_v43 = vld [vmem:[#allocation28_spill] sm:$0xff]  ;;  %v6419_v53 = vld [vmem:[#allocation7 + $0x80] sm:$0xff] }
 0x4d4   : > { %v2645_v28 = vsub.f32 1.0, %v2644_v34  ;;  %v2713_v60 = vmul.f32 %v9567_v2, %v11338_v27  ;;  %v2606_v1 = vsel %vm10054_vm9, %v9831_v0, %v2602_v3  ;;  %v2617_v11 = vadd.f32 %v9893_v22, %v2616_v52  ;;  %2751 = vst [vmem:[#allocation2 + $0x51] sm:$0xff] %v2710_v37  ;;  %v11340_v19 = vld [vmem:[#allocation29_spill] sm:$0xff]  ;;  %3494 = vmatpush.bf16.msra.mxu3 %v6419_v53 }
 0x4d5   : > { %vm2633_vm0 = vweird.f32 %v11309_v45  ;;  %v2660_v12 = vsub.f32 1.0, %v2659_v36  ;;  %v2714_v23 = vmul.f32 %v9612_v10, %v11339_v43  ;;  %vm2634_vm2 = vweird.f32 %v9959_v25  ;;  %2753 = vst [vmem:[#allocation2 + $0x5b] sm:$0xff] %v10038_v13  ;;  %v11341_v36 = vld [vmem:[#allocation30_spill] sm:$0xff]  ;;  %v11355_v43 = vld [vmem:[#allocation36_spill] sm:$0xff] }
 0x4d6   : > { %vm2648_vm15 = vweird.f32 %v11312_v49  ;;  %v2667_v2 = vand.u32 2147483647, %v11313_v15  ;;  %v2675_v34 = vsub.f32 1.0, %v2674_v8  ;;  %v2715_v0 = vmul.f32 %v9694_v62, %v11340_v19  ;;  %2754 = vst [vmem:[#allocation2 + $0x63] sm:$0xff] %v2712_v4  ;;  %v6416_v49 = vld [vmem:[#allocation7 + $0x68] sm:$0xff] }
 0x4d7   : > { %v2631_v3 = vmul.f32 %v9959_v25, %v2630_v50  ;;  %v2669_v52 = vand.u32 2147483648, %v11313_v15  ;;  %v2690_v10 = vsub.f32 1.0, %v2689_v24  ;;  %v2716_v16 = vmul.f32 %v9702_v21, %v11341_v36  ;;  %v11344_v50 = vld [vmem:[#allocation31_spill] sm:$0xff]  ;;  %2756 = vst [vmem:[#allocation2 + $0x6d] sm:$0xff] %v2713_v60  ;;  %v11347_v24 = vld [vmem:[#allocation32_spill] sm:$0xff]  ;;  %v2794_v45 = vld [vmem:[#allocation2 + $0x28] sm:$0xff] }
 0x4d8   : > { %v10086_v37 = vsel %vm10001_vm14, %v9963_v56, %v2606_v1  ;;  %v2646_v8 = vmul.f32 %v9969_v26, %v2645_v28  ;;  %v10097_v58 = vor.u32 1.1754944e-38, %v2654_v40  ;;  %v2717_v21 = vmul.f32 %v9720_v30, %v11344_v50  ;;  %2757 = vst [vmem:[#allocation2 + $0x75] sm:$0xff] %v2714_v23  ;;  %v11353_v28 = vld [vmem:[#allocation34_spill] sm:$0xff]  ;;  %vm10146_vm14 = vmor %vm2633_vm0, %vm2634_vm2  ;;  %v11367_v36 = vld [vmem:[#allocation40_spill] sm:$0xff] }
 0x4d9   : > { %v2621_v56 = vsel %vm10092_vm10, %v9893_v22, %v2617_v11  ;;  %vm10106_vm5 = vcmp.eq.f32.partialorder %v2637_v51, 8.507059e+37  ;;  %v2661_v35 = vmul.f32 %v9981_v44, %v2660_v12  ;;  %v2718_v40 = vmul.f32 %v9757_v5, %v11347_v24  ;;  %v11350_v51 = vld [vmem:[#allocation33_spill] sm:$0xff]  ;;  %2759 = vst [vmem:[#allocation2 + $0x7f] sm:$0xff] %v2715_v0  ;;  %v6430_v11 = vld [vmem:[#allocation7 + $0xd8] sm:$0xff] }
 0x4da   : > { %vm10113_vm11 = vcmp.eq.f32.partialorder %v2652_v32, 8.507059e+37  ;;  %vm2663_vm6 = vweird.f32 %v11313_v15  ;;  %v2676_v22 = vmul.f32 %v9991_v54, %v2675_v34  ;;  %v2719_v14 = vmul.f32 %v9773_v48, %v11350_v51  ;;  %2760 = vst [vmem:[#allocation2 + $0x87] sm:$0xff] %v2716_v16  ;;  %v11354_v48 = vld [vmem:[#allocation35_spill] sm:$0xff]  ;;  %3817 = vmatpush.bf16.msra.mxu0 %v6430_v11  ;;  %v11361_v34 = vld [vmem:[#allocation38_spill] sm:$0xff] }
 0x4db   : > { %v2632_v4 = vadd.f32 %v9959_v25, %v2631_v3  ;;  %vm10123_vm3 = vcmp.eq.f32.partialorder %v2667_v2, 8.507059e+37  ;;  %v2670_v32 = vor.u32 1.1754944e-38, %v2669_v52  ;;  %v2691_v61 = vmul.f32 %v10015_v29, %v2690_v10  ;;  %2762 = vst [vmem:[#allocation2 + $0x91] sm:$0xff] %v2717_v21  ;;  %v11364_v3 = vld [vmem:[#allocation39_spill] sm:$0xff]  ;;  %v6428_v21 = vld [vmem:[#allocation7 + $0xc8] sm:$0xff] }
 0x4dc   : > { %v2720_v27 = vmul.f32 %v9799_v57, %v11353_v28  ;;  %v2647_v60 = vadd.f32 %v9969_v26, %v2646_v8  ;;  %vm2649_vm1 = vweird.f32 %v9969_v26  ;;  %vm2678_vm7 = vweird.f32 %v11316_v55  ;;  %2763 = vst [vmem:[#allocation2 + $0x99] sm:$0xff] %v2718_v40  ;;  %v6429_v52 = vld [vmem:[#allocation7 + $0xd0] sm:$0xff]  ;;  %v11377_v28 = vld [vmem:[#allocation48_spill] sm:$0xff] }
 0x4dd   : > { %v2721_v59 = vmul.f32 %v9859_v42, %v11354_v48  ;;  %v7019_v1 = vmov 0.0|0.0   ;;  %v2626_v12 = vsel %vm10058_vm12, %v10006_v63, %v2621_v56  ;;  %v2662_v57 = vadd.f32 %v9981_v44, %v2661_v35  ;;  %2765 = vst [vmem:[#allocation2 + $0xa3] sm:$0xff] %v2719_v14  ;;  %vm10162_vm8 = vmor %vm2648_vm15, %vm2649_vm1  ;;  %v11372_v35 = vld [vmem:[#allocation43_spill] sm:$0xff]  ;;  %v6427_v14 = vld [vmem:[#allocation7 + $0xc0] sm:$0xff] }
 0x4de   : > { %2915 = vmatmul.bf16.vlgmr.msrb.gmra.mxu1 %v7019_v1  ;;  %vm2664_vm13 = vweird.f32 %v9981_v44  ;;  %v2722_v23 = vmul.f32 %v9877_v6, %v11355_v43  ;;  %v2677_v53 = vadd.f32 %v9991_v54, %v2676_v22  ;;  %vm2679_vm4 = vweird.f32 %v9991_v54  ;;  %2766 = vst [vmem:[#allocation2 + $0xab] sm:$0xff] %v2720_v27  ;;  %3818 = vmatpush.bf16.msra.mxu0 %v6429_v52  ;;  %v11374_v22 = vld [vmem:[#allocation45_spill] sm:$0xff]  ;;  %v2792_v48 = vld [vmem:[#allocation2 + $0x18] sm:$0xff] }
 0x4df   : > { %v2684_v63 = vand.u32 2147483648, %v11316_v55  ;;  %v2723_v47 = vmul.f32 %v9924_v18, %v11358_v38  ;;  %v2636_v6 = vsel %vm10146_vm14, %v9959_v25, %v2632_v4  ;;  %v2692_v2 = vadd.f32 %v10015_v29, %v2691_v61  ;;  %vm10177_vm12 = vmor %vm2663_vm6, %vm2664_vm13  ;;  %2768 = vst [vmem:[#allocation2 + $0xb5] sm:$0xff] %v2721_v59  ;;  %v11375_v4 = vld [vmem:[#allocation46_spill] sm:$0xff]  ;;  %v3371_v59 = vld [vmem:[#allocation2 + $0x1a] sm:$0xff] }
 0x4e0   : > { %vm2694_vm9 = vweird.f32 %v10015_v29  ;;  %v2724_v18 = vmul.f32 %v9939_v31, %v11361_v34  ;;  %v2651_v25 = vsel %vm10162_vm8, %v9969_v26, %v2647_v60  ;;  %v2682_v19 = vand.u32 2147483647, %v11316_v55  ;;  %vm10192_vm0 = vmor %vm2678_vm7, %vm2679_vm4  ;;  %2769 = vst [vmem:[#allocation2 + $0xbd] sm:$0xff] %v2722_v23  ;;  %v3373_v34 = vld [vmem:[#allocation2 + $0x2a] sm:$0xff]  ;;  %v2796_v52 = vld [vmem:[#allocation2 + $0x38] sm:$0xff] }
 0x4e1   : > { %v2699_v0 = vand.u32 2147483648, %v11317_v41  ;;  %v2725_v31 = vmul.f32 %v9947_v39, %v11364_v3  ;;  %v2666_v26 = vsel %vm10177_vm12, %v9981_v44, %v2662_v57  ;;  %vm2693_vm2 = vweird.f32 %v11317_v41  ;;  %2771 = vst [vmem:[#allocation2 + $0xc7] sm:$0xff] %v2723_v47  ;;  %v3375_v15 = vld [vmem:[#allocation2 + $0x3a] sm:$0xff] }
 0x4e2   : > { %v2697_v10 = vand.u32 2147483647, %v11317_v41  ;;  %v2726_v39 = vmul.f32 %v9985_v17, %v11367_v36  ;;  %v2641_v44 = vsel %vm10106_vm5, %v10062_v33, %v2636_v6  ;;  %v2681_v55 = vsel %vm10192_vm0, %v9991_v54, %v2677_v53  ;;  %vm10208_vm15 = vmor %vm2693_vm2, %vm2694_vm9  ;;  %v11370_v41 = vld [vmem:[#allocation41_spill] sm:$0xff]  ;;  %v11371_v33 = vld [vmem:[#allocation42_spill] sm:$0xff]  ;;  %2772 = vst [vmem:[#allocation2 + $0xcf] sm:$0xff] %v2724_v18  ;;  %3819 = vmatpush.bf16.msra.mxu0 %v6428_v21 }
 0x4e3   : > { %v2685_v16 = vor.u32 1.1754944e-38, %v2684_v63  ;;  %v2727_v8 = vmul.f32 %v10048_v9, %v11370_v41  ;;  %v2656_v17 = vsel %vm10113_vm11, %v10097_v58, %v2651_v25  ;;  %v2696_v54 = vsel %vm10208_vm15, %v10015_v29, %v2692_v2  ;;  %2774 = vst [vmem:[#allocation2 + $0xd9] sm:$0xff] %v2725_v31  ;;  %v6418_v58 = vld [vmem:[#allocation7 + $0x78] sm:$0xff]  ;;  %v6417_v53 = vld [vmem:[#allocation7 + $0x70] sm:$0xff] }
 0x4e4   : > { %v2728_v50 = vmul.f32 %v10086_v37, %v11371_v33  ;;  %v4056_v56 = vpack.c.bf16 %v9973_v20, %v9967_v46  ;;  %v2671_v9 = vsel %vm10123_vm3, %v2670_v32, %v2666_v26  ;;  %vm2683_vm10 = vcmp.eq.f32.partialorder %v2682_v19, 8.507059e+37  ;;  %v11373_v29 = vld [vmem:[#allocation44_spill] sm:$0xff]  ;;  %2775 = vst [vmem:[#allocation2 + $0xe1] sm:$0xff] %v2726_v39  ;;  %3161 = vmatpush.bf16.msra.mxu2 %v6418_v58  ;;  %v11376_v32 = vld [vmem:[#allocation47_spill] sm:$0xff]  ;;  %v2799_v58 = vld [vmem:[#allocation2 + $0x50] sm:$0xff] }
 0x4e5   : > { %v2700_v7 = vor.u32 1.1754944e-38, %v2699_v0  ;;  %v2729_v24 = vmul.f32 %v2626_v12, %v11372_v35  ;;  %v2686_v40 = vsel %vm2683_vm10, %v2685_v16, %v2681_v55  ;;  %vm2698_vm5 = vcmp.eq.f32.partialorder %v2697_v10, 8.507059e+37  ;;  %2777 = vst [vmem:[#allocation2 + $0xeb] sm:$0xff] %v2727_v8  ;;  %v2808_v63 = vld [vmem:[#allocation2 + $0x98] sm:$0xff]  ;;  %v2810_v0 = vld [vmem:[#allocation2 + $0xa8] sm:$0xff]  ;;  %v6442_v39 = vld [vmem:[#allocation7 + $0x138] sm:$0xff] }
 0x4e6   : > { %v2730_v30 = vmul.f32 %v2641_v44, %v11373_v29  ;;  %v2731_v51 = vmul.f32 %v2656_v17, %v11374_v22  ;;  %v2732_v5 = vmul.f32 %v2671_v9, %v11375_v4  ;;  %2778 = vst [vmem:[#allocation2 + $0xf3] sm:$0xff] %v2728_v50  ;;  %v2733_v61 = vmul.f32 %v2686_v40, %v11376_v32  ;;  %v6415_v44 = vld [vmem:[#allocation7 + $0x60] sm:$0xff]  ;;  %v6441_v21 = vld [vmem:[#allocation7 + $0x130] sm:$0xff]  ;;  %v6414_v9 = vld [vmem:[#allocation7 + $0x58] sm:$0xff] }
 0x4e7   : > { %v2701_v37 = vsel %vm2698_vm5, %v2700_v7, %v2696_v54  ;;  %2780 = vst [vmem:[#allocation2 + $0xfd] sm:$0xff] %v2729_v24  ;;  %3820 = vmatpush.bf16.msra.mxu0 %v6427_v14  ;;  %v7020_v60 = vmov 0.0   ;;  %4139 = vmatpush.bf16.msra.mxu1 %v6442_v39  ;;  %v2812_v16 = vld [vmem:[#allocation2 + $0xb8] sm:$0xff]  ;;  %v3377_v54 = vld [vmem:[#allocation2 + $0x4a] sm:$0xff] }
 0x4e8   : > { %v2734_v27 = vmul.f32 %v2701_v37, %v11377_v28  ;;  %2781 = vst [vmem:[#allocation2 + $0x105] sm:$0xff] %v2730_v30  ;;  %3162 = vmatpush.bf16.msra.mxu2 %v6417_v53  ;;  %v6413_v14 = vld [vmem:[#allocation7 + $0x50] sm:$0xff]  ;;  %v4023_v46 = vld [vmem:[#allocation2 + $0x2b] sm:$0xff] }
 0x4e9   : > { %2783 = vst [vmem:[#allocation2 + $0x10f] sm:$0xff] %v2731_v51  ;;  %v2814_v35 = vld [vmem:[#allocation2 + $0xc8] sm:$0xff]  ;;  %v6440_v51 = vld [vmem:[#allocation7 + $0x128] sm:$0xff] }
 0x4ea   : > { %2784 = vst [vmem:[#allocation2 + $0x117] sm:$0xff] %v2732_v5  ;;  %v3382_v53 = vld [vmem:[#allocation2 + $0x72] sm:$0xff] }
 0x4eb   : > { %2786 = vst [vmem:[#allocation2 + $0x121] sm:$0xff] %v2733_v61  ;;  %4140 = vmatpush.bf16.msra.mxu1 %v6441_v21  ;;  %v2801_v61 = vld [vmem:[#allocation2 + $0x60] sm:$0xff] }
 0x4ec   : > { %2787 = vst [vmem:[#allocation2 + $0x129] sm:$0xff] %v2734_v27  ;;  %3163 = vmatpush.bf16.msra.mxu2 %v6416_v49  ;;  %v3380_v27 = vld [vmem:[#allocation2 + $0x62] sm:$0xff] }
 0x4ed   : > { %2735 = vst [vmem:[#allocation2] sm:$0xff] %v7020_v60 }
 0x4ee   : > { %2736 = vst [vmem:[#allocation2 + $0x8] sm:$0xff] %v7020_v60 }
 0x4ef   : > { %2737 = vst [vmem:[#allocation2 + $0x10] sm:$0x7] %v7020_v60  ;;  %4141 = vmatpush.bf16.msra.mxu1 %v6440_v51  ;;  %v2821_v39 = vld [vmem:[#allocation2 + $0x100] sm:$0xff] }
 0x4f0   : > { %2738 = vst [vmem:[#allocation2 + $0x133] sm:$0xff] %v7020_v60  ;;  %3164 = vmatpush.bf16.msra.mxu2 %v6415_v44 }
 0x4f1   : > { %2739 = vst [vmem:[#allocation2 + $0x13b] sm:$0xff] %v7020_v60  ;;  %v2823_v21 = vld [vmem:[#allocation2 + $0x110] sm:$0xff] }
 0x4f2   : > { %2740 = vst [vmem:[#allocation2 + $0x143] sm:$0x7] %v7020_v60 }
 0x4f3   : > { %2743 = vst [vmem:[#allocation2 + $0x23] sm:$0x3] %v7020_v60 }
 0x4f4   : > { %2746 = vst [vmem:[#allocation2 + $0x35] sm:$0x3] %v7020_v60  ;;  %3165 = vmatpush.bf16.msra.mxu2 %v6414_v9 }
 0x4f5   : > { %2749 = vst [vmem:[#allocation2 + $0x47] sm:$0x3] %v7020_v60  ;;  %v3368_v1 = vld [vmem:[#allocation2 + $0x2] sm:$0xff] }
 0x4f6   : > { %2752 = vst [vmem:[#allocation2 + $0x59] sm:$0x3] %v7020_v60  ;;  %v3369_v11 = vld [vmem:[#allocation2 + $0xa] sm:$0xff]  ;;  %v3370_v57 = vld [vmem:[#allocation2 + $0x12] sm:$0xff] }
 0x4f7   : > { %v2791_v12 = vld [vmem:[#allocation2 + $0x10] sm:$0xff]  ;;  %2755 = vst [vmem:[#allocation2 + $0x6b] sm:$0x3] %v7020_v60  ;;  %v3404_v43 = vpack.c.bf16 %v3369_v11, %v3368_v1  ;;  %v3405_v42 = vpack.c.bf16 %v3371_v59, %v3370_v57  ;;  %v6439_v1 = vld [vmem:[#allocation7 + $0x120] sm:$0xff] }
 0x4f8   : > { %v2826_v23 = vpack.c.bf16 %v2792_v48, %v2791_v12  ;;  %2758 = vst [vmem:[#allocation2 + $0x7d] sm:$0x3] %v7020_v60  ;;  %3166 = vmatpush.bf16.msra.mxu2 %v6413_v14  ;;  %v6412_v11 = vld [vmem:[#allocation7 + $0x48] sm:$0xff]  ;;  %4142 = vmatpush.bf16.msra.mxu1 %v6439_v1  ;;  %v2817_v12 = vld [vmem:[#allocation2 + $0xe0] sm:$0xff] }
 0x4f9   : > { %2761 = vst [vmem:[#allocation2 + $0x8f] sm:$0x3] %v7020_v60  ;;  %3495 = vmatmul.bf16.vlgmr.msra.gmra.mxu3 %v3404_v43  ;;  %3821 = vmatmul.bf16.vlgmr.msra.gmra.mxu0 %v3405_v42  ;;  %v4025_v1 = vld [vmem:[#allocation2 + $0x3b] sm:$0xff] }
 0x4fa   : > { %2920 = vmatmul.bf16.gmra.mxu1 %v2826_v23  ;;  %2764 = vst [vmem:[#allocation2 + $0xa1] sm:$0x3] %v7020_v60  ;;  %v2793_v6 = vld [vmem:[#allocation2 + $0x20] sm:$0xff]  ;;  %v2803_v23 = vld [vmem:[#allocation2 + $0x70] sm:$0xff] }
 0x4fb   : > { %2767 = vst [vmem:[#allocation2 + $0xb3] sm:$0x3] %v7020_v60  ;;  %v3372_v2 = vld [vmem:[#allocation2 + $0x22] sm:$0xff]  ;;  %v2827_v18 = vpack.c.bf16 %v2794_v45, %v2793_v6  ;;  %v2795_v31 = vld [vmem:[#allocation2 + $0x30] sm:$0xff]  ;;  %v6437_v45 = vld [vmem:[#allocation7 + $0x110] sm:$0xff] }
 0x4fc   : > { %2770 = vst [vmem:[#allocation2 + $0xc5] sm:$0x3] %v7020_v60  ;;  %v3406_v25 = vpack.c.bf16 %v3373_v34, %v3372_v2  ;;  %v3374_v26 = vld [vmem:[#allocation2 + $0x32] sm:$0xff]  ;;  %v2828_v10 = vpack.c.bf16 %v2796_v52, %v2795_v31  ;;  %v2797_v41 = vld [vmem:[#allocation2 + $0x40] sm:$0xff]  ;;  %v2798_v8 = vld [vmem:[#allocation2 + $0x48] sm:$0xff]  ;;  %3167 = vmatpush.bf16.msra.mxu2 %v6412_v11 }
 0x4fd   : > { %2773 = vst [vmem:[#allocation2 + $0xd7] sm:$0x3] %v7020_v60  ;;  %v3407_v36 = vpack.c.bf16 %v3375_v15, %v3374_v26  ;;  %v3376_v17 = vld [vmem:[#allocation2 + $0x42] sm:$0xff]  ;;  %v2829_v33 = vpack.c.bf16 %v2798_v8, %v2797_v41  ;;  %v2800_v40 = vld [vmem:[#allocation2 + $0x58] sm:$0xff]  ;;  %v2819_v2 = vld [vmem:[#allocation2 + $0xf0] sm:$0xff] }
 0x4fe   : > { %2776 = vst [vmem:[#allocation2 + $0xe9] sm:$0x3] %v7020_v60  ;;  %v3408_v50 = vpack.c.bf16 %v3377_v54, %v3376_v17  ;;  %v3378_v29 = vld [vmem:[#allocation2 + $0x52] sm:$0xff]  ;;  %v3379_v30 = vld [vmem:[#allocation2 + $0x5a] sm:$0xff]  ;;  %v2830_v37 = vpack.c.bf16 %v2800_v40, %v2799_v58  ;;  %v2802_v28 = vld [vmem:[#allocation2 + $0x68] sm:$0xff] }
 0x4ff   : > { %2779 = vst [vmem:[#allocation2 + $0xfb] sm:$0x3] %v7020_v60  ;;  %v3409_v22 = vpack.c.bf16 %v3379_v30, %v3378_v29  ;;  %v2831_v48 = vpack.c.bf16 %v2802_v28, %v2801_v61  ;;  %v6438_v6 = vld [vmem:[#allocation7 + $0x118] sm:$0xff]  ;;  %v6411_v31 = vld [vmem:[#allocation7 + $0x40] sm:$0xff] }
 0x500   : > { %2782 = vst [vmem:[#allocation2 + $0x10d] sm:$0x3] %v7020_v60  ;;  %v2807_v38 = vld [vmem:[#allocation2 + $0x90] sm:$0xff]  ;;  %4143 = vmatpush.bf16.msra.mxu1 %v6438_v6  ;;  %v3384_v52 = vld [vmem:[#allocation2 + $0x82] sm:$0xff]  ;;  %3168 = vmatpush.bf16.msra.mxu2 %v6411_v31 }
 0x501   : > { %2785 = vst [vmem:[#allocation2 + $0x11f] sm:$0x3] %v7020_v60  ;;  %v2834_v47 = vpack.c.bf16 %v2808_v63, %v2807_v38  ;;  %v2809_v19 = vld [vmem:[#allocation2 + $0xa0] sm:$0xff]  ;;  %v3385_v26 = vld [vmem:[#allocation2 + $0x8a] sm:$0xff] }
 0x502   : > { %2788 = vst [vmem:[#allocation2 + $0x131] sm:$0x3] %v7020_v60  ;;  %v2835_v3 = vpack.c.bf16 %v2810_v0, %v2809_v19  ;;  %v2811_v55 = vld [vmem:[#allocation2 + $0xb0] sm:$0xff]  ;;  %v3383_v63 = vld [vmem:[#allocation2 + $0x7a] sm:$0xff]  ;;  %v2806_v0 = vld [vmem:[#allocation2 + $0x88] sm:$0xff] }
 0x503   : > { %2960 = vmatmul.bf16.vlgmr.msrb.gmra.mxu2 %v2834_v47  ;;  %v2836_v62 = vpack.c.bf16 %v2812_v16, %v2811_v55  ;;  %v2813_v7 = vld [vmem:[#allocation2 + $0xc0] sm:$0xff]  ;;  %v3381_v60 = vld [vmem:[#allocation2 + $0x6a] sm:$0xff]  ;;  %v3411_v47 = vpack.c.bf16 %v3383_v63, %v3382_v53  ;;  %v3386_v16 = vld [vmem:[#allocation2 + $0x92] sm:$0xff] }
 0x504   : > { %v2837_v24 = vpack.c.bf16 %v2814_v35, %v2813_v7  ;;  %v2815_v4 = vld [vmem:[#allocation2 + $0xd0] sm:$0xff]  ;;  %v2816_v5 = vld [vmem:[#allocation2 + $0xd8] sm:$0xff]  ;;  %v3410_v59 = vpack.c.bf16 %v3381_v60, %v3380_v27  ;;  %4144 = vmatpush.bf16.msra.mxu1 %v6437_v45  ;;  %v2805_v19 = vld [vmem:[#allocation2 + $0x80] sm:$0xff] }
 0x505   : > { %v2838_v32 = vpack.c.bf16 %v2816_v5, %v2815_v4  ;;  %v2818_v57 = vld [vmem:[#allocation2 + $0xe8] sm:$0xff]  ;;  %v2833_v15 = vpack.c.bf16 %v2806_v0, %v2805_v19  ;;  %v6450_v54 = vld [vmem:[#allocation7 + $0x178] sm:$0xff]  ;;  %v3390_v11 = vld [vmem:[#allocation2 + $0xb2] sm:$0xff] }
 0x506   : > { %v2839_v43 = vpack.c.bf16 %v2818_v57, %v2817_v12  ;;  %v2820_v34 = vld [vmem:[#allocation2 + $0xf8] sm:$0xff]  ;;  %4465 = vmatpush.bf16.msrb.mxu2 %v6450_v54  ;;  %v4022_v40 = vld [vmem:[#allocation2 + $0x23] sm:$0xff]  ;;  %v4027_v0 = vld [vmem:[#allocation2 + $0x4b] sm:$0xff] }
 0x507   : > { %v2822_v44 = vld [vmem:[#allocation2 + $0x108] sm:$0xff]  ;;  %v3391_v12 = vld [vmem:[#allocation2 + $0xba] sm:$0xff]  ;;  %v3044_v6 = vld [vmem:[#allocation2 + $0x11] sm:$0xff] }
 0x508   : > { %v2841_v55 = vpack.c.bf16 %v2822_v44, %v2821_v39  ;;  %v2824_v9 = vld [vmem:[#allocation2 + $0x118] sm:$0xff]  ;;  %v3388_v20 = vld [vmem:[#allocation2 + $0xa2] sm:$0xff]  ;;  %v3415_v53 = vpack.c.bf16 %v3391_v12, %v3390_v11 }
 0x509   : > { %3500 = vmatmul.bf16.gmra.mxu3 %v3405_v42  ;;  %3826 = vmatmul.bf16.gmra.mxu0 %v3406_v25  ;;  %v2804_v42 = vld [vmem:[#allocation2 + $0x78] sm:$0xff]  ;;  %v3042_v4 = vld [vmem:[#allocation2 + $0x1] sm:$0xff]  ;;  %v3043_v5 = vld [vmem:[#allocation2 + $0x9] sm:$0xff] }
 0x50a   : > { %2925 = vmatmul.bf16.gmra.mxu1 %v2827_v18  ;;  %v2832_v38 = vpack.c.bf16 %v2804_v42, %v2803_v23  ;;  %v6436_v18 = vld [vmem:[#allocation7 + $0x108] sm:$0xff]  ;;  %v3078_v27 = vpack.c.bf16 %v3043_v5, %v3042_v4  ;;  %v3045_v45 = vld [vmem:[#allocation2 + $0x19] sm:$0xff]  ;;  %v4026_v19 = vld [vmem:[#allocation2 + $0x43] sm:$0xff] }
 0x50b   : > { %4145 = vmatpush.bf16.msra.mxu1 %v6436_v18  ;;  %v3079_v18 = vpack.c.bf16 %v3045_v45, %v3044_v6  ;;  %v3392_v31 = vld [vmem:[#allocation2 + $0xc2] sm:$0xff]  ;;  %v4059_v39 = vpack.c.bf16 %v4027_v0, %v4026_v19 }
 0x50c   : > { %v3047_v54 = vld [vmem:[#allocation2 + $0x29] sm:$0xff] }
 0x513   : > { %2965 = vmatmul.bf16.gmra.mxu2 %v2835_v3  ;;  %v6435_v3 = vld [vmem:[#allocation7 + $0x100] sm:$0xff] }
 0x514   : > { %4146 = vmatpush.bf16.msra.mxu1 %v6435_v3  ;;  %v6457_v3 = vld [vmem:[#allocation7 + $0x1b0] sm:$0xff] }
 0x519   : > { %3505 = vmatmul.bf16.gmra.mxu3 %v3406_v25  ;;  %3831 = vmatmul.bf16.gmra.mxu0 %v3407_v36  ;;  %v2840_v25 = vpack.c.bf16 %v2820_v34, %v2819_v2 }
 0x51a   : > { %2930 = vmatmul.bf16.gmra.mxu1 %v2828_v10  ;;  %v3412_v10 = vpack.c.bf16 %v3385_v26, %v3384_v52  ;;  %v3393_v52 = vld [vmem:[#allocation2 + $0xca] sm:$0xff] }
 0x51b   : > { %v3416_v44 = vpack.c.bf16 %v3393_v52, %v3392_v31  ;;  %v10309_v52 = vld [vmem:[#allocation7 + $0x230] sm:$0xff] }
 0x523   : > { %2970 = vmatmul.bf16.gmra.mxu2 %v2836_v62  ;;  %v3387_v62 = vld [vmem:[#allocation2 + $0x9a] sm:$0xff] }
 0x524   : > { %v3413_v17 = vpack.c.bf16 %v3387_v62, %v3386_v16  ;;  %v10281_v16 = vld [vmem:[#allocation7 + $0x238] sm:$0xff] }
 0x525   : > { %5443 = vmatpush.bf16.msrb.mxu1 %v10281_v16 }
 0x529   : > { %3510 = vmatmul.bf16.gmra.mxu3 %v3407_v36  ;;  %3836 = vmatmul.bf16.gmra.mxu0 %v3408_v50 }
 0x52a   : > { %2935 = vmatmul.bf16.gmra.mxu1 %v2829_v33 }
 0x52b   : > { %5444 = vmatpush.bf16.msrb.mxu1 %v10309_v52 }
 0x533   : > { %2975 = vmatmul.bf16.gmra.mxu2 %v2837_v24  ;;  %v2842_v24 = vpack.c.bf16 %v2824_v9, %v2823_v21 }
 0x539   : > { %3515 = vmatmul.bf16.gmra.mxu3 %v3408_v50  ;;  %3841 = vmatmul.bf16.gmra.mxu0 %v3409_v22  ;;  %v6458_v50 = vld [vmem:[#allocation7 + $0x1b8] sm:$0xff] }
 0x53a   : > { %2940 = vmatmul.bf16.gmra.mxu1 %v2830_v37  ;;  %4791 = vmatpush.bf16.msrb.mxu3 %v6458_v50 }
 0x53e   : > { %4792 = vmatpush.bf16.msrb.mxu3 %v6457_v3  ;;  %v6456_v3 = vld [vmem:[#allocation7 + $0x1a8] sm:$0xff] }
 0x542   : > { %4793 = vmatpush.bf16.msrb.mxu3 %v6456_v3 }
 0x543   : > { %2980 = vmatmul.bf16.gmra.mxu2 %v2838_v32  ;;  %v6466_v32 = vld [vmem:[#allocation7 + $0x1f8] sm:$0xff] }
 0x544   : > { %5117 = vmatpush.bf16.msrb.mxu0 %v6466_v32 }
 0x549   : > { %3520 = vmatmul.bf16.gmra.mxu3 %v3409_v22  ;;  %3846 = vmatmul.bf16.gmra.mxu0 %v3410_v59  ;;  %v4057_v22 = vpack.c.bf16 %v4023_v46, %v4022_v40  ;;  %v4028_v40 = vld [vmem:[#allocation2 + $0x53] sm:$0xff] }
 0x54a   : > { %2945 = vmatmul.bf16.gmra.mxu1 %v2831_v48  ;;  %v6465_v46 = vld [vmem:[#allocation7 + $0x1f0] sm:$0xff]  ;;  %v4060_v4 = vpack.c.bf16 %v10038_v13, %v4028_v40  ;;  %v4030_v13 = vld [vmem:[#allocation2 + $0x63] sm:$0xff] }
 0x54b   : > { %5118 = vmatpush.bf16.msrb.mxu0 %v6465_v46  ;;  %v4032_v40 = vld [vmem:[#allocation2 + $0x73] sm:$0xff]  ;;  %v4033_v46 = vld [vmem:[#allocation2 + $0x7b] sm:$0xff] }
 0x553   : > { %2985 = vmatmul.bf16.gmra.mxu2 %v2839_v43 }
 0x559   : > { %3525 = vmatmul.bf16.gmra.mxu3 %v3410_v59  ;;  %3851 = vmatmul.bf16.gmra.mxu0 %v3411_v47  ;;  %v4024_v59 = vld [vmem:[#allocation2 + $0x33] sm:$0xff] }
 0x55a   : > { %2950 = vmatmul.bf16.gmra.mxu1 %v2832_v38  ;;  %v4058_v42 = vpack.c.bf16 %v4025_v1, %v4024_v59  ;;  %v6449_v38 = vld [vmem:[#allocation7 + $0x170] sm:$0xff] }
 0x55b   : > { %v10232_v49 = vpop.f32.mrf.mxu1  ;;  %4466 = vmatpush.bf16.msrb.mxu2 %v6449_v38  ;;  %v3048_v59 = vld [vmem:[#allocation2 + $0x31] sm:$0xff]  ;;  %v3049_v1 = vld [vmem:[#allocation2 + $0x39] sm:$0xff]  ;;  %v3396_v38 = vld [vmem:[#allocation2 + $0xe2] sm:$0xff] }
 0x563   : > { %2990 = vmatmul.bf16.gmra.mxu2 %v2840_v25  ;;  %v10234_v36 = vpop.f32.mrf.mxu1 }
 0x569   : > { %3530 = vmatmul.bf16.gmra.mxu3 %v3411_v47  ;;  %3856 = vmatmul.bf16.gmra.mxu0 %v3412_v10 }
 0x56a   : > { %2955 = vmatmul.bf16.gmra.mxu1 %v2833_v15 }
 0x573   : > { %2995 = vmatmul.bf16.gmra.mxu2 %v2841_v55 }
 0x576   : > { %v10238_v8 = vpop.f32.mrf.mxu0 }
 0x577   : > { %v10236_v41 = vpop.f32.mrf.mxu1 }
 0x579   : > { %3535 = vmatmul.bf16.gmra.mxu3 %v3412_v10  ;;  %3861 = vmatmul.bf16.gmra.mxu0 %v3413_v17 }
 0x57a   : > { %4147 = vmatmul.bf16.vlgmr.msra.gmra.mxu1 %v4056_v56  ;;  %v3389_v56 = vld [vmem:[#allocation2 + $0xaa] sm:$0xff] }
 0x57b   : > { %v3414_v51 = vpack.c.bf16 %v3389_v56, %v3388_v20  ;;  %v3394_v20 = vld [vmem:[#allocation2 + $0xd2] sm:$0xff]  ;;  %v3395_v56 = vld [vmem:[#allocation2 + $0xda] sm:$0xff] }
 0x57c   : > { %v10243_v33 = vpop.f32.mrf.mxu3  ;;  %v3417_v5 = vpack.c.bf16 %v3395_v56, %v3394_v20  ;;  %v3398_v20 = vld [vmem:[#allocation2 + $0xf2] sm:$0xff]  ;;  %v3399_v56 = vld [vmem:[#allocation2 + $0xfa] sm:$0xff] }
 0x57e   : > { %v10247_v35 = vpop.f32.mrf.mxu0 }
 0x57f   : > { %v10245_v7 = vpop.f32.mrf.mxu1 }
 0x583   : > { %3000 = vmatmul.bf16.gmra.mxu2 %v2842_v24 }
 0x584   : > { %v10249_v58 = vpop.f32.mrf.mxu3 }
 0x586   : > { %v2961_v29 = vpop.f32.mrf.mxu2  ;;  %v10253_v37 = vpop.f32.mrf.mxu0 }
 0x587   : > { %v10251_v30 = vpop.f32.mrf.mxu1  ;;  %3024 = vst [vmem:[#allocation3 + $0x90] sm:$0xff] %v2961_v29 }
 0x589   : > { %3540 = vmatmul.bf16.gmra.mxu3 %v3413_v17  ;;  %3866 = vmatmul.bf16.gmra.mxu0 %v3414_v51  ;;  %v3046_v17 = vld [vmem:[#allocation2 + $0x21] sm:$0xff] }
 0x58a   : > { %4152 = vmatmul.bf16.gmra.mxu1 %v4057_v22  ;;  %v3080_v9 = vpack.c.bf16 %v3047_v54, %v3046_v17 }
 0x58c   : > { %v10255_v14 = vpop.f32.mrf.mxu3 }
 0x58e   : > { %v2963_v61 = vpop.f32.mrf.mxu2  ;;  %v10259_v60 = vpop.f32.mrf.mxu0 }
 0x58f   : > { %v10257_v28 = vpop.f32.mrf.mxu1  ;;  %3025 = vst [vmem:[#allocation3 + $0x98] sm:$0xff] %v2963_v61  ;;  %v6448_v61 = vld [vmem:[#allocation7 + $0x168] sm:$0xff] }
 0x590   : > { %11378 = vst [vmem:[#allocation49_spill] sm:$0xff] %v10259_v60  ;;  %4467 = vmatpush.bf16.msrb.mxu2 %v6448_v61  ;;  %v4062_v61 = vpack.c.bf16 %v4033_v46, %v4032_v40 }
 0x593   : > { %3169 = vmatmul.bf16.vlgmr.msra.gmra.mxu2 %v3078_v27 }
 0x594   : > { %v10261_v48 = vpop.f32.mrf.mxu3 }
 0x596   : > { %v2966_v57 = vpop.f32.mrf.mxu2  ;;  %v10265_v23 = vpop.f32.mrf.mxu0 }
 0x597   : > { %v10263_v43 = vpop.f32.mrf.mxu1  ;;  %3026 = vst [vmem:[#allocation3 + $0xa0] sm:$0xff] %v2966_v57  ;;  %v3081_v57 = vpack.c.bf16 %v3049_v1, %v3048_v59  ;;  %v6464_v59 = vld [vmem:[#allocation7 + $0x1e8] sm:$0xff] }
 0x598   : > { %11379 = vst [vmem:[#allocation50_spill] sm:$0xff] %v10265_v23  ;;  %5119 = vmatpush.bf16.msrb.mxu0 %v6464_v59 }
 0x599   : > { %3545 = vmatmul.bf16.gmra.mxu3 %v3414_v51  ;;  %3871 = vmatmul.bf16.gmra.mxu0 %v3415_v53 }
 0x59a   : > { %4157 = vmatmul.bf16.gmra.mxu1 %v4058_v42 }
 0x59c   : > { %v10267_v63 = vpop.f32.mrf.mxu3 }
 0x59e   : > { %v2968_v47 = vpop.f32.mrf.mxu2  ;;  %v10271_v34 = vpop.f32.mrf.mxu0 }
 0x59f   : > { %v10269_v2 = vpop.f32.mrf.mxu1  ;;  %3027 = vst [vmem:[#allocation3 + $0xa8] sm:$0xff] %v2968_v47  ;;  %v3397_v47 = vld [vmem:[#allocation2 + $0xea] sm:$0xff] }
 0x5a0   : > { %11380 = vst [vmem:[#allocation51_spill] sm:$0xff] %v10271_v34  ;;  %v3418_v0 = vpack.c.bf16 %v3397_v47, %v3396_v38 }
 0x5a3   : > { %3174 = vmatmul.bf16.gmra.mxu2 %v3079_v18 }
 0x5a4   : > { %v10273_v25 = vpop.f32.mrf.mxu3 }
 0x5a6   : > { %v2971_v26 = vpop.f32.mrf.mxu2  ;;  %v10277_v10 = vpop.f32.mrf.mxu0 }
 0x5a7   : > { %v10275_v15 = vpop.f32.mrf.mxu1  ;;  %3028 = vst [vmem:[#allocation3 + $0xb0] sm:$0xff] %v2971_v26 }
 0x5a8   : > { %11381 = vst [vmem:[#allocation52_spill] sm:$0xff] %v10277_v10 }
 0x5a9   : > { %3550 = vmatmul.bf16.gmra.mxu3 %v3415_v53  ;;  %3876 = vmatmul.bf16.gmra.mxu0 %v3416_v44  ;;  %v4031_v53 = vld [vmem:[#allocation2 + $0x6b] sm:$0xff] }
 0x5aa   : > { %4162 = vmatmul.bf16.gmra.mxu1 %v4059_v39  ;;  %v4061_v19 = vpack.c.bf16 %v4031_v53, %v4030_v13  ;;  %v3050_v39 = vld [vmem:[#allocation2 + $0x41] sm:$0xff]  ;;  %v3052_v13 = vld [vmem:[#allocation2 + $0x51] sm:$0xff]  ;;  %v3053_v53 = vld [vmem:[#allocation2 + $0x59] sm:$0xff] }
 0x5ac   : > { %v10279_v55 = vpop.f32.mrf.mxu3 }
 0x5ae   : > { %v2973_v62 = vpop.f32.mrf.mxu2  ;;  %v10286_v21 = vpop.f32.mrf.mxu0 }
 0x5af   : > { %v10283_v50 = vpop.f32.mrf.mxu1  ;;  %3029 = vst [vmem:[#allocation3 + $0xb8] sm:$0xff] %v2973_v62 }
 0x5b0   : > { %11382 = vst [vmem:[#allocation53_spill] sm:$0xff] %v10286_v21 }
 0x5b3   : > { %3179 = vmatmul.bf16.gmra.mxu2 %v3080_v9 }
 0x5b4   : > { %v10288_v24 = vpop.f32.mrf.mxu3 }
 0x5b6   : > { %v2976_v29 = vpop.f32.mrf.mxu2  ;;  %v10292_v51 = vpop.f32.mrf.mxu0 }
 0x5b7   : > { %v10290_v22 = vpop.f32.mrf.mxu1  ;;  %3030 = vst [vmem:[#allocation3 + $0xc0] sm:$0xff] %v2976_v29 }
 0x5b8   : > { %11383 = vst [vmem:[#allocation54_spill] sm:$0xff] %v10292_v51 }
 0x5b9   : > { %3555 = vmatmul.bf16.gmra.mxu3 %v3416_v44  ;;  %3881 = vmatmul.bf16.gmra.mxu0 %v3417_v5  ;;  %v3051_v44 = vld [vmem:[#allocation2 + $0x49] sm:$0xff] }
 0x5ba   : > { %4167 = vmatmul.bf16.gmra.mxu1 %v4060_v4  ;;  %v3082_v54 = vpack.c.bf16 %v3051_v44, %v3050_v39  ;;  %v6455_v39 = vld [vmem:[#allocation7 + $0x1a0] sm:$0xff] }
 0x5bb   : > { %v3400_v44 = vld [vmem:[#allocation2 + $0x102] sm:$0xff]  ;;  %4794 = vmatpush.bf16.msrb.mxu3 %v6455_v39  ;;  %v6452_v39 = vld [vmem:[#allocation7 + $0x188] sm:$0xff] }
 0x5bc   : > { %v10295_v32 = vpop.f32.mrf.mxu3 }
 0x5be   : > { %v2978_v27 = vpop.f32.mrf.mxu2  ;;  %v10299_v12 = vpop.f32.mrf.mxu0 }
 0x5bf   : > { %v10297_v11 = vpop.f32.mrf.mxu1  ;;  %3031 = vst [vmem:[#allocation3 + $0xc8] sm:$0xff] %v2978_v27  ;;  %v3419_v27 = vpack.c.bf16 %v3399_v56, %v3398_v20 }
 0x5c0   : > { %11384 = vst [vmem:[#allocation55_spill] sm:$0xff] %v10299_v12  ;;  %v3057_v12 = vld [vmem:[#allocation2 + $0x79] sm:$0xff] }
 0x5c3   : > { %3184 = vmatmul.bf16.gmra.mxu2 %v3081_v57 }
 0x5c4   : > { %v10301_v42 = vpop.f32.mrf.mxu3 }
 0x5c6   : > { %v2981_v6 = vpop.f32.mrf.mxu2  ;;  %v10305_v18 = vpop.f32.mrf.mxu0 }
 0x5c7   : > { %v10303_v45 = vpop.f32.mrf.mxu1  ;;  %3032 = vst [vmem:[#allocation3 + $0xd0] sm:$0xff] %v2981_v6  ;;  %v3083_v6 = vpack.c.bf16 %v3053_v53, %v3052_v13  ;;  %v3054_v53 = vld [vmem:[#allocation2 + $0x61] sm:$0xff] }
 0x5c8   : > { %11385 = vst [vmem:[#allocation56_spill] sm:$0xff] %v10305_v18  ;;  %v3056_v18 = vld [vmem:[#allocation2 + $0x71] sm:$0xff] }
 0x5c9   : > { %3560 = vmatmul.bf16.gmra.mxu3 %v3417_v5  ;;  %3886 = vmatmul.bf16.gmra.mxu0 %v3418_v0 }
 0x5ca   : > { %4172 = vmatmul.bf16.gmra.mxu1 %v4061_v19  ;;  %v4034_v19 = vld [vmem:[#allocation2 + $0x83] sm:$0xff] }
 0x5cc   : > { %v10307_v31 = vpop.f32.mrf.mxu3 }
 0x5ce   : > { %v2983_v26 = vpop.f32.mrf.mxu2  ;;  %v10314_v17 = vpop.f32.mrf.mxu0 }
 0x5cf   : > { %v10311_v62 = vpop.f32.mrf.mxu1  ;;  %3033 = vst [vmem:[#allocation3 + $0xd8] sm:$0xff] %v2983_v26  ;;  %v6447_v26 = vld [vmem:[#allocation7 + $0x160] sm:$0xff] }
 0x5d0   : > { %11386 = vst [vmem:[#allocation57_spill] sm:$0xff] %v10314_v17  ;;  %4468 = vmatpush.bf16.msrb.mxu2 %v6447_v26 }
 0x5d3   : > { %3189 = vmatmul.bf16.gmra.mxu2 %v3082_v54  ;;  %v3401_v54 = vld [vmem:[#allocation2 + $0x10a] sm:$0xff] }
 0x5d4   : > { %v10316_v9 = vpop.f32.mrf.mxu3 }
 0x5d6   : > { %v2986_v29 = vpop.f32.mrf.mxu2  ;;  %v10320_v5 = vpop.f32.mrf.mxu0 }
 0x5d7   : > { %v10318_v4 = vpop.f32.mrf.mxu1  ;;  %3034 = vst [vmem:[#allocation3 + $0xe0] sm:$0xff] %v2986_v29  ;;  %v3420_v29 = vpack.c.bf16 %v3401_v54, %v3400_v44  ;;  %v10342_v54 = vld [vmem:[#allocation7 + $0x228] sm:$0xff] }
 0x5d8   : > { %11387 = vst [vmem:[#allocation58_spill] sm:$0xff] %v10320_v5  ;;  %5445 = vmatpush.bf16.msrb.mxu1 %v10342_v54 }
 0x5d9   : > { %3565 = vmatmul.bf16.gmra.mxu3 %v3418_v0  ;;  %3891 = vmatmul.bf16.gmra.mxu0 %v3419_v27  ;;  %v4035_v0 = vld [vmem:[#allocation2 + $0x8b] sm:$0xff] }
 0x5da   : > { %4177 = vmatmul.bf16.gmra.mxu1 %v4062_v61  ;;  %v4063_v56 = vpack.c.bf16 %v4035_v0, %v4034_v19  ;;  %v6454_v61 = vld [vmem:[#allocation7 + $0x198] sm:$0xff] }
 0x5db   : > { %4795 = vmatpush.bf16.msrb.mxu3 %v6454_v61  ;;  %v4037_v0 = vld [vmem:[#allocation2 + $0x9b] sm:$0xff]  ;;  %v3402_v61 = vld [vmem:[#allocation2 + $0x112] sm:$0xff] }
 0x5dc   : > { %v10322_v1 = vpop.f32.mrf.mxu3 }
 0x5de   : > { %v2988_v57 = vpop.f32.mrf.mxu2  ;;  %v10326_v47 = vpop.f32.mrf.mxu0 }
 0x5df   : > { %v10324_v38 = vpop.f32.mrf.mxu1  ;;  %3035 = vst [vmem:[#allocation3 + $0xe8] sm:$0xff] %v2988_v57  ;;  %v6453_v57 = vld [vmem:[#allocation7 + $0x190] sm:$0xff] }
 0x5e0   : > { %11388 = vst [vmem:[#allocation59_spill] sm:$0xff] %v10326_v47  ;;  %4796 = vmatpush.bf16.msrb.mxu3 %v6453_v57 }
 0x5e3   : > { %3194 = vmatmul.bf16.gmra.mxu2 %v3083_v6  ;;  %v3055_v6 = vld [vmem:[#allocation2 + $0x69] sm:$0xff] }
 0x5e4   : > { %v10328_v3 = vpop.f32.mrf.mxu3  ;;  %v3084_v19 = vpack.c.bf16 %v3055_v6, %v3054_v53  ;;  %4797 = vmatpush.bf16.msrb.mxu3 %v6452_v39  ;;  %v6462_v6 = vld [vmem:[#allocation7 + $0x1d8] sm:$0xff] }
 0x5e6   : > { %v2991_v40 = vpop.f32.mrf.mxu2  ;;  %v10332_v20 = vpop.f32.mrf.mxu0 }
 0x5e7   : > { %v10330_v46 = vpop.f32.mrf.mxu1  ;;  %3036 = vst [vmem:[#allocation3 + $0xf0] sm:$0xff] %v2991_v40  ;;  %v6451_v40 = vld [vmem:[#allocation7 + $0x180] sm:$0xff] }
 0x5e8   : > { %11389 = vst [vmem:[#allocation60_spill] sm:$0xff] %v10332_v20  ;;  %v3403_v20 = vld [vmem:[#allocation2 + $0x11a] sm:$0xff]  ;;  %4798 = vmatpush.bf16.msrb.mxu3 %v6451_v40  ;;  %v6459_v40 = vld [vmem:[#allocation7 + $0x1c0] sm:$0xff] }
 0x5e9   : > { %3570 = vmatmul.bf16.gmra.mxu3 %v3419_v27  ;;  %3896 = vmatmul.bf16.gmra.mxu0 %v3420_v29  ;;  %v4036_v27 = vld [vmem:[#allocation2 + $0x93] sm:$0xff]  ;;  %v3421_v53 = vpack.c.bf16 %v3403_v20, %v3402_v61  ;;  %v4038_v20 = vld [vmem:[#allocation2 + $0xa3] sm:$0xff] }
 0x5ea   : > { %4182 = vmatmul.bf16.gmra.mxu1 %v4063_v56  ;;  %v6463_v56 = vld [vmem:[#allocation7 + $0x1e0] sm:$0xff]  ;;  %v6446_v61 = vld [vmem:[#allocation7 + $0x158] sm:$0xff] }
 0x5eb   : > { %5120 = vmatpush.bf16.msrb.mxu0 %v6463_v56  ;;  %v3085_v56 = vpack.c.bf16 %v3057_v12, %v3056_v18  ;;  %4469 = vmatpush.bf16.msrb.mxu2 %v6446_v61  ;;  %v4672_v61 = vld [vmem:[#allocation2 + $0x24] sm:$0xff] }
 0x5ec   : > { %v10334_v59 = vpop.f32.mrf.mxu3 }
 0x5ee   : > { %v2993_v13 = vpop.f32.mrf.mxu2  ;;  %v10338_v26 = vpop.f32.mrf.mxu0 }
 0x5ef   : > { %v10336_v47 = vpop.f32.mrf.mxu1  ;;  %3037 = vst [vmem:[#allocation3 + $0xf8] sm:$0xff] %v2993_v13  ;;  %v4064_v13 = vpack.c.bf16 %v4037_v0, %v4036_v27  ;;  %5121 = vmatpush.bf16.msrb.mxu0 %v6462_v6  ;;  %v4039_v0 = vld [vmem:[#allocation2 + $0xab] sm:$0xff] }
 0x5f0   : > { %11390 = vst [vmem:[#allocation17_spill] sm:$0xff] %v10338_v26  ;;  %v3729_v6 = vld [vmem:[#allocation2 + $0x12a] sm:$0xff] }
 0x5f3   : > { %3199 = vmatmul.bf16.gmra.mxu2 %v3084_v19  ;;  %v6461_v19 = vld [vmem:[#allocation7 + $0x1d0] sm:$0xff] }
 0x5f4   : > { %v10340_v44 = vpop.f32.mrf.mxu3  ;;  %5122 = vmatpush.bf16.msrb.mxu0 %v6461_v19 }
 0x5f6   : > { %v2996_v5 = vpop.f32.mrf.mxu2  ;;  %v10347_v57 = vpop.f32.mrf.mxu0 }
 0x5f7   : > { %v10344_v17 = vpop.f32.mrf.mxu1  ;;  %3038 = vst [vmem:[#allocation3 + $0x100] sm:$0xff] %v2996_v5  ;;  %v6460_v5 = vld [vmem:[#allocation7 + $0x1c8] sm:$0xff] }
 0x5f8   : > { %11391 = vst [vmem:[#allocation18_spill] sm:$0xff] %v10347_v57  ;;  %5123 = vmatpush.bf16.msrb.mxu0 %v6460_v5 }
 0x5f9   : > { %3575 = vmatmul.bf16.gmra.mxu3 %v3420_v29  ;;  %3901 = vmatmul.bf16.gmra.mxu0 %v3421_v53 }
 0x5fa   : > { %4187 = vmatmul.bf16.gmra.mxu1 %v4064_v13  ;;  %v3728_v13 = vld [vmem:[#allocation2 + $0x122] sm:$0xff] }
 0x5fb   : > { %v3747_v12 = vpack.c.bf16 %v3729_v6, %v3728_v13  ;;  %v4998_v13 = vld [vmem:[#allocation2 + $0x25] sm:$0xff]  ;;  %v4999_v6 = vld [vmem:[#allocation2 + $0x2d] sm:$0xff] }
 0x5fc   : > { %v10349_v39 = vpop.f32.mrf.mxu3  ;;  %5124 = vmatpush.bf16.msrb.mxu0 %v6459_v40 }
 0x5fe   : > { %v2998_v26 = vpop.f32.mrf.mxu2  ;;  %v10353_v27 = vpop.f32.mrf.mxu0 }
 0x5ff   : > { %v10351_v51 = vpop.f32.mrf.mxu1  ;;  %3039 = vst [vmem:[#allocation3 + $0x108] sm:$0xff] %v2998_v26  ;;  %v4065_v26 = vpack.c.bf16 %v4039_v0, %v4038_v20  ;;  %v4040_v20 = vld [vmem:[#allocation2 + $0xb3] sm:$0xff]  ;;  %v4041_v0 = vld [vmem:[#allocation2 + $0xbb] sm:$0xff] }
 0x600   : > { %11392 = vst [vmem:[#allocation19_spill] sm:$0xff] %v10353_v27  ;;  %v3059_v27 = vld [vmem:[#allocation2 + $0x89] sm:$0xff] }
 0x603   : > { %3204 = vmatmul.bf16.gmra.mxu2 %v3085_v56  ;;  %v3058_v56 = vld [vmem:[#allocation2 + $0x81] sm:$0xff] }
 0x604   : > { %v10355_v29 = vpop.f32.mrf.mxu3  ;;  %v3086_v34 = vpack.c.bf16 %v3059_v27, %v3058_v56  ;;  %v5034_v27 = vpack.c.bf16 %v4999_v6, %v4998_v13  ;;  %v10376_v56 = vld [vmem:[#allocation7 + $0x220] sm:$0xff]  ;;  %v4675_v13 = vld [vmem:[#allocation2 + $0x3c] sm:$0xff] }
 0x605   : > { %5446 = vmatpush.bf16.msrb.mxu1 %v10376_v56  ;;  %v4042_v6 = vld [vmem:[#allocation2 + $0xc3] sm:$0xff] }
 0x606   : > { %v3001_v57 = vpop.f32.mrf.mxu2  ;;  %v10359_v18 = vpop.f32.mrf.mxu0 }
 0x607   : > { %v10357_v21 = vpop.f32.mrf.mxu1  ;;  %3040 = vst [vmem:[#allocation3 + $0x110] sm:$0xff] %v3001_v57  ;;  %v4673_v57 = vld [vmem:[#allocation2 + $0x2c] sm:$0xff] }
 0x608   : > { %11393 = vst [vmem:[#allocation20_spill] sm:$0xff] %v10357_v21 }
 0x609   : > { %3580 = vmatmul.bf16.gmra.mxu3 %v3421_v53  ;;  %3906 = vmatmul.bf16.gmra.mxu0 %v3747_v12  ;;  %11394 = vst [vmem:[#allocation21_spill] sm:$0xff] %v10359_v18  ;;  %v10371_v18 = vpack.c.bf16 %v4673_v57, %v4672_v61 }
 0x60a   : > { %4192 = vmatmul.bf16.gmra.mxu1 %v4065_v26 }
 0x60c   : > { %v10361_v19 = vpop.f32.mrf.mxu3 }
 0x60e   : > { %v3003_v5 = vpop.f32.mrf.mxu2  ;;  %v10367_v53 = vpop.f32.mrf.mxu0 }
 0x60f   : > { %v10363_v10 = vpop.f32.mrf.mxu1  ;;  %3041 = vst [vmem:[#allocation3 + $0x118] sm:$0xff] %v3003_v5  ;;  %v4066_v5 = vpack.c.bf16 %v4041_v0, %v4040_v20  ;;  %v4674_v0 = vld [vmem:[#allocation2 + $0x34] sm:$0xff] }
 0x610   : > { %11395 = vst [vmem:[#allocation22_spill] sm:$0xff] %v10363_v10  ;;  %v3060_v10 = vld [vmem:[#allocation2 + $0x91] sm:$0xff] }
 0x611   : > { %11396 = vst [vmem:[#allocation23_spill] sm:$0xff] %v10367_v53 }
 0x613   : > { %3209 = vmatmul.bf16.gmra.mxu2 %v3086_v34 }
 0x614   : > { %v10365_v40 = vpop.f32.mrf.mxu3 }
 0x616   : > { %v3170_v26 = vpop.f32.mrf.mxu2  ;;  %v10384_v20 = vpop.f32.mrf.mxu0 }
 0x617   : > { %v10369_v12 = vpop.f32.mrf.mxu1  ;;  %v3296_v23 = vadd.f32 %v3170_v26, %v10232_v49  ;;  %11399 = vst [vmem:[#allocation26_spill] sm:$0xff] %v10384_v20  ;;  %v4043_v26 = vld [vmem:[#allocation2 + $0xcb] sm:$0xff] }
 0x618   : > { %11397 = vst [vmem:[#allocation24_spill] sm:$0xff] %v10369_v12  ;;  %v3061_v12 = vld [vmem:[#allocation2 + $0x99] sm:$0xff] }
 0x619   : > { %4799 = vmatmul.bf16.vlgmr.msrb.gmra.mxu3 %v10371_v18  ;;  %v3622_v34 = vadd.f32 %v10243_v33, %v3296_v23  ;;  %5125 = vmatmul.bf16.vlgmr.msrb.gmra.mxu0 %v5034_v27  ;;  %v3087_v23 = vpack.c.bf16 %v3061_v12, %v3060_v10  ;;  %v5001_v27 = vld [vmem:[#allocation2 + $0x3d] sm:$0xff] }
 0x61a   : > { %4197 = vmatmul.bf16.gmra.mxu1 %v4066_v5  ;;  %v5000_v5 = vld [vmem:[#allocation2 + $0x35] sm:$0xff] }
 0x61b   : > { %3658 = vst [vmem:[#allocation3] sm:$0xff] %v3622_v34  ;;  %v5035_v20 = vpack.c.bf16 %v5001_v27, %v5000_v5  ;;  %v6445_v12 = vld [vmem:[#allocation7 + $0x150] sm:$0xff]  ;;  %v4677_v5 = vld [vmem:[#allocation2 + $0x4c] sm:$0xff] }
 0x61c   : > { %v10381_v57 = vpop.f32.mrf.mxu3  ;;  %4470 = vmatpush.bf16.msrb.mxu2 %v6445_v12  ;;  %v4044_v27 = vld [vmem:[#allocation2 + $0xd3] sm:$0xff] }
 0x61e   : > { %v3172_v53 = vpop.f32.mrf.mxu2  ;;  %v10396_v10 = vpop.f32.mrf.mxu0 }
 0x61f   : > { %v10379_v61 = vpop.f32.mrf.mxu1  ;;  %v3297_v49 = vadd.f32 %v3172_v53, %v10234_v36  ;;  %v4067_v53 = vpack.c.bf16 %v4043_v26, %v4042_v6  ;;  %11400 = vst [vmem:[#allocation27_spill] sm:$0xff] %v10396_v10 }
 0x620   : > { %11398 = vst [vmem:[#allocation25_spill] sm:$0xff] %v10379_v61  ;;  %v10389_v61 = vpack.c.bf16 %v4675_v13, %v4674_v0 }
 0x621   : > { %v3623_v33 = vadd.f32 %v10249_v58, %v3297_v49 }
 0x623   : > { %3659 = vst [vmem:[#allocation3 + $0x8] sm:$0xff] %v3623_v33  ;;  %3214 = vmatmul.bf16.gmra.mxu2 %v3087_v23  ;;  %v3062_v33 = vld [vmem:[#allocation2 + $0xa1] sm:$0xff]  ;;  %v3063_v23 = vld [vmem:[#allocation2 + $0xa9] sm:$0xff] }
 0x624   : > { %v10392_v21 = vpop.f32.mrf.mxu3  ;;  %v3088_v6 = vpack.c.bf16 %v3063_v23, %v3062_v33  ;;  %v10413_v23 = vld [vmem:[#allocation7 + $0x218] sm:$0xff] }
 0x625   : > { %5447 = vmatpush.bf16.msrb.mxu1 %v10413_v23 }
 0x626   : > { %v3175_v34 = vpop.f32.mrf.mxu2 }
 0x627   : > { %v10387_v60 = vpop.f32.mrf.mxu1  ;;  %v3298_v36 = vadd.f32 %v3175_v34, %v10236_v41  ;;  %v4045_v34 = vld [vmem:[#allocation2 + $0xdb] sm:$0xff] }
 0x629   : > { %4804 = vmatmul.bf16.gmra.mxu3 %v10389_v61  ;;  %v3624_v58 = vadd.f32 %v10255_v14, %v3298_v36  ;;  %5130 = vmatmul.bf16.gmra.mxu0 %v5035_v20  ;;  %v10404_v14 = vpop.f32.mrf.mxu0  ;;  %v4676_v20 = vld [vmem:[#allocation2 + $0x44] sm:$0xff] }
 0x62a   : > { %4202 = vmatmul.bf16.gmra.mxu1 %v4067_v53  ;;  %11401 = vst [vmem:[#allocation28_spill] sm:$0xff] %v10404_v14  ;;  %v5002_v36 = vld [vmem:[#allocation2 + $0x45] sm:$0xff]  ;;  %v5003_v53 = vld [vmem:[#allocation2 + $0x4d] sm:$0xff]  ;;  %v10408_v12 = vpack.c.bf16 %v4677_v5, %v4676_v20  ;;  %v3065_v5 = vld [vmem:[#allocation2 + $0xb9] sm:$0xff] }
 0x62b   : > { %3660 = vst [vmem:[#allocation3 + $0x10] sm:$0xff] %v3624_v58  ;;  %v3064_v20 = vld [vmem:[#allocation2 + $0xb1] sm:$0xff] }
 0x62c   : > { %v10402_v26 = vpop.f32.mrf.mxu3 }
 0x62e   : > { %v3177_v49 = vpop.f32.mrf.mxu2 }
 0x62f   : > { %v10398_v0 = vpop.f32.mrf.mxu1  ;;  %v3299_v41 = vadd.f32 %v3177_v49, %v10245_v7  ;;  %v5036_v49 = vpack.c.bf16 %v5003_v53, %v5002_v36  ;;  %v4679_v36 = vld [vmem:[#allocation2 + $0x5c] sm:$0xff] }
 0x630   : > { %v4046_v53 = vld [vmem:[#allocation2 + $0xe3] sm:$0xff] }
 0x631   : > { %v3625_v13 = vadd.f32 %v10261_v48, %v3299_v41  ;;  %v4068_v48 = vpack.c.bf16 %v4045_v34, %v4044_v27  ;;  %v3089_v27 = vpack.c.bf16 %v3065_v5, %v3064_v20  ;;  %v4678_v34 = vld [vmem:[#allocation2 + $0x54] sm:$0xff] }
 0x632   : > { %v6444_v5 = vld [vmem:[#allocation7 + $0x148] sm:$0xff] }
 0x633   : > { %3661 = vst [vmem:[#allocation3 + $0x18] sm:$0xff] %v3625_v13  ;;  %3219 = vmatmul.bf16.gmra.mxu2 %v3088_v6  ;;  %v10417_v13 = vpop.f32.mrf.mxu0 }
 0x634   : > { %v10415_v41 = vpop.f32.mrf.mxu3  ;;  %11403 = vst [vmem:[#allocation30_spill] sm:$0xff] %v10417_v13  ;;  %4471 = vmatpush.bf16.msrb.mxu2 %v6444_v5 }
 0x636   : > { %v3180_v58 = vpop.f32.mrf.mxu2 }
 0x637   : > { %v10406_v10 = vpop.f32.mrf.mxu1  ;;  %v3300_v7 = vadd.f32 %v3180_v58, %v10251_v30  ;;  %v4047_v58 = vld [vmem:[#allocation2 + $0xeb] sm:$0xff] }
 0x638   : > { %11402 = vst [vmem:[#allocation29_spill] sm:$0xff] %v10406_v10  ;;  %v10430_v10 = vpack.c.bf16 %v4679_v36, %v4678_v34 }
 0x639   : > { %4809 = vmatmul.bf16.gmra.mxu3 %v10408_v12  ;;  %v3626_v33 = vadd.f32 %v10267_v63, %v3300_v7  ;;  %5135 = vmatmul.bf16.gmra.mxu0 %v5036_v49  ;;  %v5004_v7 = vld [vmem:[#allocation2 + $0x55] sm:$0xff] }
 0x63a   : > { %4207 = vmatmul.bf16.gmra.mxu1 %v4068_v48  ;;  %v5005_v48 = vld [vmem:[#allocation2 + $0x5d] sm:$0xff] }
 0x63b   : > { %3662 = vst [vmem:[#allocation3 + $0x20] sm:$0xff] %v3626_v33 }
 0x63c   : > { %v10426_v13 = vpop.f32.mrf.mxu3 }
 0x63e   : > { %v3182_v6 = vpop.f32.mrf.mxu2 }
 0x63f   : > { %v10419_v14 = vpop.f32.mrf.mxu1  ;;  %v3301_v30 = vadd.f32 %v3182_v6, %v10257_v28  ;;  %v5037_v6 = vpack.c.bf16 %v5005_v48, %v5004_v7  ;;  %v4681_v7 = vld [vmem:[#allocation2 + $0x6c] sm:$0xff] }
 0x640   : > { %11404 = vst [vmem:[#allocation31_spill] sm:$0xff] %v10419_v14  ;;  %v10428_v14 = vpop.f32.mrf.mxu0  ;;  %v4048_v48 = vld [vmem:[#allocation2 + $0xf3] sm:$0xff] }
 0x641   : > { %v3627_v63 = vadd.f32 %v10273_v25, %v3301_v30  ;;  %11406 = vst [vmem:[#allocation33_spill] sm:$0xff] %v10428_v14  ;;  %v4069_v25 = vpack.c.bf16 %v4047_v58, %v4046_v53 }
 0x643   : > { %3663 = vst [vmem:[#allocation3 + $0x28] sm:$0xff] %v3627_v63  ;;  %3224 = vmatmul.bf16.gmra.mxu2 %v3089_v27  ;;  %v3066_v63 = vld [vmem:[#allocation2 + $0xc1] sm:$0xff]  ;;  %v3067_v27 = vld [vmem:[#allocation2 + $0xc9] sm:$0xff] }
 0x644   : > { %v10438_v36 = vpop.f32.mrf.mxu3  ;;  %v3090_v58 = vpack.c.bf16 %v3067_v27, %v3066_v63 }
 0x646   : > { %v3185_v49 = vpop.f32.mrf.mxu2 }
 0x647   : > { %v10424_v33 = vpop.f32.mrf.mxu1  ;;  %v3302_v28 = vadd.f32 %v3185_v49, %v10263_v43  ;;  %v4049_v49 = vld [vmem:[#allocation2 + $0xfb] sm:$0xff] }
 0x648   : > { %11405 = vst [vmem:[#allocation32_spill] sm:$0xff] %v10424_v33  ;;  %v10440_v43 = vpop.f32.mrf.mxu0 }
 0x649   : > { %4814 = vmatmul.bf16.gmra.mxu3 %v10430_v10  ;;  %v3628_v20 = vadd.f32 %v10279_v55, %v3302_v28  ;;  %5140 = vmatmul.bf16.gmra.mxu0 %v5037_v6  ;;  %11407 = vst [vmem:[#allocation34_spill] sm:$0xff] %v10440_v43  ;;  %v4680_v55 = vld [vmem:[#allocation2 + $0x64] sm:$0xff] }
 0x64a   : > { %4212 = vmatmul.bf16.gmra.mxu1 %v4069_v25  ;;  %v5006_v28 = vld [vmem:[#allocation2 + $0x65] sm:$0xff]  ;;  %v5007_v25 = vld [vmem:[#allocation2 + $0x6d] sm:$0xff]  ;;  %v10445_v5 = vpack.c.bf16 %v4681_v7, %v4680_v55  ;;  %v3069_v55 = vld [vmem:[#allocation2 + $0xd9] sm:$0xff] }
 0x64b   : > { %3664 = vst [vmem:[#allocation3 + $0x30] sm:$0xff] %v3628_v20  ;;  %v5038_v43 = vpack.c.bf16 %v5007_v25, %v5006_v28  ;;  %v4050_v28 = vld [vmem:[#allocation2 + $0x103] sm:$0xff]  ;;  %v4051_v25 = vld [vmem:[#allocation2 + $0x10b] sm:$0xff] }
 0x64c   : > { %v10450_v63 = vpop.f32.mrf.mxu3 }
 0x64e   : > { %v3187_v30 = vpop.f32.mrf.mxu2 }
 0x64f   : > { %v10435_v33 = vpop.f32.mrf.mxu1  ;;  %v3303_v34 = vadd.f32 %v3187_v30, %v10269_v2  ;;  %v4070_v30 = vpack.c.bf16 %v4049_v49, %v4048_v48  ;;  %v4683_v49 = vld [vmem:[#allocation2 + $0x7c] sm:$0xff] }
 0x650   : > { %v10452_v27 = vpop.f32.mrf.mxu0 }
 0x651   : > { %v3629_v53 = vadd.f32 %v10288_v24, %v3303_v34  ;;  %11408 = vst [vmem:[#allocation35_spill] sm:$0xff] %v10452_v27  ;;  %v10454_v34 = vld [vmem:[#allocation7 + $0x210] sm:$0xff] }
 0x652   : > { %5448 = vmatpush.bf16.msrb.mxu1 %v10454_v34 }
 0x653   : > { %3665 = vst [vmem:[#allocation3 + $0x38] sm:$0xff] %v3629_v53  ;;  %3229 = vmatmul.bf16.gmra.mxu2 %v3090_v58  ;;  %v3068_v58 = vld [vmem:[#allocation2 + $0xd1] sm:$0xff] }
 0x654   : > { %v3091_v48 = vpack.c.bf16 %v3069_v55, %v3068_v58 }
 0x656   : > { %v3190_v6 = vpop.f32.mrf.mxu2 }
 0x657   : > { %v10443_v20 = vpop.f32.mrf.mxu1  ;;  %v3304_v2 = vadd.f32 %v3190_v6, %v10275_v15  ;;  %v10461_v6 = vpop.f32.mrf.mxu3 }
 0x659   : > { %4819 = vmatmul.bf16.gmra.mxu3 %v10445_v5  ;;  %v3630_v24 = vadd.f32 %v10295_v32, %v3304_v2  ;;  %5145 = vmatmul.bf16.gmra.mxu0 %v5038_v43  ;;  %v4682_v43 = vld [vmem:[#allocation2 + $0x74] sm:$0xff]  ;;  %v10463_v2 = vpop.f32.mrf.mxu0 }
 0x65a   : > { %4217 = vmatmul.bf16.gmra.mxu1 %v4070_v30  ;;  %11410 = vst [vmem:[#allocation37_spill] sm:$0xff] %v10463_v2  ;;  %v5008_v30 = vld [vmem:[#allocation2 + $0x75] sm:$0xff] }
 0x65b   : > { %3666 = vst [vmem:[#allocation3 + $0x40] sm:$0xff] %v3630_v24  ;;  %v5009_v24 = vld [vmem:[#allocation2 + $0x7d] sm:$0xff] }
 0x65e   : > { %v3192_v53 = vpop.f32.mrf.mxu2 }
 0x65f   : > { %v10456_v7 = vpop.f32.mrf.mxu1  ;;  %v3305_v15 = vadd.f32 %v3192_v53, %v10283_v50  ;;  %v5039_v53 = vpack.c.bf16 %v5009_v24, %v5008_v30  ;;  %v10474_v2 = vpop.f32.mrf.mxu3  ;;  %v4053_v30 = vld [vmem:[#allocation2 + $0x11b] sm:$0xff]  ;;  %v6443_v24 = vld [vmem:[#allocation7 + $0x140] sm:$0xff] }
 0x660   : > { %11409 = vst [vmem:[#allocation36_spill] sm:$0xff] %v10456_v7  ;;  %v10467_v7 = vpack.c.bf16 %v4683_v49, %v4682_v43  ;;  %4472 = vmatpush.bf16.msrb.mxu2 %v6443_v24 }
 0x661   : > { %v3631_v32 = vadd.f32 %v10301_v42, %v3305_v15  ;;  %v4071_v42 = vpack.c.bf16 %v4051_v25, %v4050_v28  ;;  %v3070_v15 = vld [vmem:[#allocation2 + $0xe1] sm:$0xff]  ;;  %v10476_v43 = vpop.f32.mrf.mxu0  ;;  %v4685_v28 = vld [vmem:[#allocation2 + $0x8c] sm:$0xff] }
 0x662   : > { %11412 = vst [vmem:[#allocation39_spill] sm:$0xff] %v10476_v43  ;;  %v4052_v25 = vld [vmem:[#allocation2 + $0x113] sm:$0xff] }
 0x663   : > { %3667 = vst [vmem:[#allocation3 + $0x48] sm:$0xff] %v3631_v32  ;;  %3234 = vmatmul.bf16.gmra.mxu2 %v3091_v48  ;;  %v3071_v32 = vld [vmem:[#allocation2 + $0xe9] sm:$0xff] }
 0x664   : > { %v3092_v49 = vpack.c.bf16 %v3071_v32, %v3070_v15  ;;  %6492 = vmatpush.bf16.msra.mxu2 %v10281_v16 }
 0x666   : > { %v3195_v27 = vpop.f32.mrf.mxu2 }
 0x667   : > { %v10465_v14 = vpop.f32.mrf.mxu1  ;;  %v3306_v50 = vadd.f32 %v3195_v27, %v10290_v22  ;;  %v10486_v15 = vpop.f32.mrf.mxu3 }
 0x668   : > { %6493 = vmatpush.bf16.msra.mxu2 %v10309_v52  ;;  %v4686_v52 = vld [vmem:[#allocation2 + $0x94] sm:$0xff] }
 0x669   : > { %4824 = vmatmul.bf16.gmra.mxu3 %v10467_v7  ;;  %v3632_v58 = vadd.f32 %v10307_v31, %v3306_v50  ;;  %5150 = vmatmul.bf16.gmra.mxu0 %v5039_v53  ;;  %v4684_v31 = vld [vmem:[#allocation2 + $0x84] sm:$0xff]  ;;  %v10488_v32 = vpop.f32.mrf.mxu0 }
 0x66a   : > { %4222 = vmatmul.bf16.gmra.mxu1 %v4071_v42  ;;  %v5010_v50 = vld [vmem:[#allocation2 + $0x85] sm:$0xff]  ;;  %v5011_v42 = vld [vmem:[#allocation2 + $0x8d] sm:$0xff]  ;;  %11413 = vst [vmem:[#allocation40_spill] sm:$0xff] %v10488_v32 }
 0x66b   : > { %3668 = vst [vmem:[#allocation3 + $0x50] sm:$0xff] %v3632_v58 }
 0x66c   : > { %6494 = vmatpush.bf16.msra.mxu2 %v10342_v54 }
 0x66e   : > { %v3197_v55 = vpop.f32.mrf.mxu2 }
 0x66f   : > { %v10472_v48 = vpop.f32.mrf.mxu1  ;;  %v3307_v22 = vadd.f32 %v3197_v55, %v10297_v11  ;;  %v4072_v55 = vpack.c.bf16 %v4053_v30, %v4052_v25 }
 0x670   : > { %11411 = vst [vmem:[#allocation38_spill] sm:$0xff] %v10472_v48  ;;  %v10482_v48 = vpack.c.bf16 %v4685_v28, %v4684_v31  ;;  %v3073_v31 = vld [vmem:[#allocation2 + $0xf9] sm:$0xff]  ;;  %6495 = vmatpush.bf16.msra.mxu2 %v10376_v56 }
 0x671   : > { %v3633_v27 = vadd.f32 %v10316_v9, %v3307_v22  ;;  %v5040_v9 = vpack.c.bf16 %v5011_v42, %v5010_v50  ;;  %v10500_v24 = vpop.f32.mrf.mxu0  ;;  %v4687_v50 = vld [vmem:[#allocation2 + $0x9c] sm:$0xff] }
 0x672   : > { %11414 = vst [vmem:[#allocation41_spill] sm:$0xff] %v10500_v24  ;;  %v4054_v42 = vld [vmem:[#allocation2 + $0x123] sm:$0xff] }
 0x673   : > { %3669 = vst [vmem:[#allocation3 + $0x58] sm:$0xff] %v3633_v27  ;;  %3239 = vmatmul.bf16.gmra.mxu2 %v3092_v49  ;;  %v6468_v27 = vld [vmem:[#allocation7 + $0x208] sm:$0xff] }
 0x674   : > { %5449 = vmatpush.bf16.msrb.mxu1 %v6468_v27  ;;  %6496 = vmatpush.bf16.msra.mxu2 %v10413_v23 }
 0x676   : > { %v3200_v53 = vpop.f32.mrf.mxu2 }
 0x677   : > { %v10480_v58 = vpop.f32.mrf.mxu1  ;;  %v3308_v11 = vadd.f32 %v3200_v53, %v10303_v45  ;;  %v3072_v45 = vld [vmem:[#allocation2 + $0xf1] sm:$0xff] }
 0x678   : > { %v3093_v30 = vpack.c.bf16 %v3073_v31, %v3072_v45  ;;  %v4055_v53 = vld [vmem:[#allocation2 + $0x12b] sm:$0xff]  ;;  %6497 = vmatpush.bf16.msra.mxu2 %v10454_v34 }
 0x679   : > { %4829 = vmatmul.bf16.gmra.mxu3 %v10482_v48  ;;  %v3634_v22 = vadd.f32 %v10322_v1, %v3308_v11  ;;  %5155 = vmatmul.bf16.gmra.mxu0 %v5040_v9  ;;  %v10498_v1 = vpop.f32.mrf.mxu3  ;;  %v6467_v11 = vld [vmem:[#allocation7 + $0x200] sm:$0xff] }
 0x67a   : > { %4227 = vmatmul.bf16.gmra.mxu1 %v4072_v55  ;;  %v5012_v55 = vld [vmem:[#allocation2 + $0x95] sm:$0xff]  ;;  %v5324_v34 = vld [vmem:[#allocation2 + $0x26] sm:$0xff] }
 0x67b   : > { %3670 = vst [vmem:[#allocation3 + $0x60] sm:$0xff] %v3634_v22  ;;  %5450 = vmatpush.bf16.msrb.mxu1 %v6467_v11 }
 0x67c   : > { %6498 = vmatpush.bf16.msra.mxu2 %v6468_v27 }
 0x67e   : > { %v3202_v49 = vpop.f32.mrf.mxu2 }
 0x67f   : > { %v10493_v28 = vpop.f32.mrf.mxu1  ;;  %v3309_v16 = vadd.f32 %v3202_v49, %v10311_v62  ;;  %v5013_v62 = vld [vmem:[#allocation2 + $0x9d] sm:$0xff]  ;;  %v4073_v49 = vpack.c.bf16 %v4055_v53, %v4054_v42  ;;  %v4689_v53 = vld [vmem:[#allocation2 + $0xac] sm:$0xff] }
 0x680   : > { %v5041_v45 = vpack.c.bf16 %v5013_v62, %v5012_v55  ;;  %v4688_v42 = vld [vmem:[#allocation2 + $0xa4] sm:$0xff]  ;;  %v5325_v55 = vld [vmem:[#allocation2 + $0x2e] sm:$0xff]  ;;  %6499 = vmatpush.bf16.msra.mxu2 %v6467_v11 }
 0x681   : > { %v3635_v25 = vadd.f32 %v10328_v3, %v3309_v16  ;;  %v10505_v3 = vpack.c.bf16 %v4687_v50, %v4686_v52  ;;  %v10512_v56 = vpop.f32.mrf.mxu3  ;;  %v10514_v16 = vpop.f32.mrf.mxu0  ;;  %v5014_v62 = vld [vmem:[#allocation2 + $0xa5] sm:$0xff]  ;;  %v5360_v27 = vpack.c.bf16 %v5325_v55, %v5324_v34  ;;  %v4691_v55 = vld [vmem:[#allocation2 + $0xbc] sm:$0xff] }
 0x682   : > { %11415 = vst [vmem:[#allocation42_spill] sm:$0xff] %v10514_v16  ;;  %v4347_v16 = vld [vmem:[#allocation2 + $0x1c] sm:$0xff] }
 0x683   : > { %3671 = vst [vmem:[#allocation3 + $0x68] sm:$0xff] %v3635_v25  ;;  %3244 = vmatmul.bf16.gmra.mxu2 %v3093_v30  ;;  %v3074_v30 = vld [vmem:[#allocation2 + $0x101] sm:$0xff] }
 0x686   : > { %v3205_v9 = vpop.f32.mrf.mxu2 }
 0x687   : > { %v10503_v54 = vpop.f32.mrf.mxu1  ;;  %v3310_v22 = vadd.f32 %v3205_v9, %v10318_v4  ;;  %v3075_v4 = vld [vmem:[#allocation2 + $0x109] sm:$0xff] }
 0x688   : > { %v5015_v9 = vld [vmem:[#allocation2 + $0xad] sm:$0xff] }
 0x689   : > { %4834 = vmatmul.bf16.gmra.mxu3 %v10505_v3  ;;  %v3636_v31 = vadd.f32 %v10334_v59, %v3310_v22  ;;  %5160 = vmatmul.bf16.gmra.mxu0 %v5041_v45  ;;  %v3094_v59 = vpack.c.bf16 %v3075_v4, %v3074_v30  ;;  %v10522_v45 = vpop.f32.mrf.mxu3  ;;  %v3076_v4 = vld [vmem:[#allocation2 + $0x111] sm:$0xff] }
 0x68a   : > { %4232 = vmatmul.bf16.gmra.mxu1 %v4073_v49 }
 0x68b   : > { %3672 = vst [vmem:[#allocation3 + $0x70] sm:$0xff] %v3636_v31  ;;  %v10524_v31 = vpop.f32.mrf.mxu0 }
 0x68c   : > { %11417 = vst [vmem:[#allocation44_spill] sm:$0xff] %v10524_v31 }
 0x68e   : > { %v3207_v25 = vpop.f32.mrf.mxu2 }
 0x68f   : > { %v10516_v52 = vpop.f32.mrf.mxu1  ;;  %v3311_v23 = vadd.f32 %v3207_v25, %v10324_v38  ;;  %v10526_v38 = vpack.c.bf16 %v4689_v53, %v4688_v42  ;;  %v5042_v25 = vpack.c.bf16 %v5015_v9, %v5014_v62  ;;  %v5326_v62 = vld [vmem:[#allocation2 + $0x36] sm:$0xff]  ;;  %v5327_v9 = vld [vmem:[#allocation2 + $0x3e] sm:$0xff] }
 0x690   : > { %v5361_v31 = vpack.c.bf16 %v5327_v9, %v5326_v62 }
 0x691   : > { %v3637_v50 = vadd.f32 %v10340_v44, %v3311_v23  ;;  %v3077_v23 = vld [vmem:[#allocation2 + $0x119] sm:$0xff]  ;;  %v10534_v42 = vpop.f32.mrf.mxu3 }
 0x692   : > { %v3095_v34 = vpack.c.bf16 %v3077_v23, %v3076_v4 }
 0x693   : > { %3673 = vst [vmem:[#allocation3 + $0x78] sm:$0xff] %v3637_v50  ;;  %3249 = vmatmul.bf16.gmra.mxu2 %v3094_v59  ;;  %v10536_v53 = vpop.f32.mrf.mxu0 }
 0x694   : > { %11419 = vst [vmem:[#allocation46_spill] sm:$0xff] %v10536_v53 }
 0x696   : > { %v3210_v22 = vpop.f32.mrf.mxu2 }
 0x697   : > { %v10520_v49 = vpop.f32.mrf.mxu1  ;;  %v3312_v44 = vadd.f32 %v3210_v22, %v10330_v46  ;;  %v5016_v22 = vld [vmem:[#allocation2 + $0xb5] sm:$0xff] }
 0x698   : > { %11416 = vst [vmem:[#allocation43_spill] sm:$0xff] %v10520_v49 }
 0x699   : > { %4839 = vmatmul.bf16.gmra.mxu3 %v10526_v38  ;;  %v3638_v30 = vadd.f32 %v10349_v39, %v3312_v44  ;;  %5165 = vmatmul.bf16.gmra.mxu0 %v5042_v25  ;;  %v4690_v39 = vld [vmem:[#allocation2 + $0xb4] sm:$0xff]  ;;  %v5017_v44 = vld [vmem:[#allocation2 + $0xbd] sm:$0xff]  ;;  %v10545_v4 = vpop.f32.mrf.mxu3 }
 0x69a   : > { %5451 = vmatmul.bf16.vlgmr.msrb.gmra.mxu1 %v5360_v27  ;;  %v3278_v25 = vld [vmem:[#allocation3 + $0x90] sm:$0xff]  ;;  %v5043_v53 = vpack.c.bf16 %v5017_v44, %v5016_v22  ;;  %v5329_v22 = vld [vmem:[#allocation2 + $0x4e] sm:$0xff] }
 0x69b   : > { %3674 = vst [vmem:[#allocation3 + $0x80] sm:$0xff] %v3638_v30  ;;  %v10547_v23 = vpop.f32.mrf.mxu0 }
 0x69c   : > { %11421 = vst [vmem:[#allocation48_spill] sm:$0xff] %v10547_v23  ;;  %v3280_v23 = vld [vmem:[#allocation3 + $0xa0] sm:$0xff] }
 0x69e   : > { %v3212_v11 = vpop.f32.mrf.mxu2 }
 0x69f   : > { %v10531_v50 = vpop.f32.mrf.mxu1  ;;  %v3313_v59 = vadd.f32 %v3212_v11, %v10336_v47  ;;  %v10541_v47 = vpack.c.bf16 %v4691_v55, %v4690_v39 }
 0x6a0   : > { %11418 = vst [vmem:[#allocation45_spill] sm:$0xff] %v10531_v50 }
 0x6a1   : > { %v3639_v46 = vadd.f32 %v10355_v29, %v3313_v59  ;;  %v10552_v44 = vpop.f32.mrf.mxu3 }
 0x6a3   : > { %3675 = vst [vmem:[#allocation3 + $0x88] sm:$0xff] %v3639_v46  ;;  %3254 = vmatmul.bf16.gmra.mxu2 %v3095_v34  ;;  %v3279_v46 = vld [vmem:[#allocation3 + $0x98] sm:$0xff]  ;;  %v4346_v34 = vld [vmem:[#allocation2 + $0x14] sm:$0xff] }
 0x6a4   : > { %v4382_v9 = vpack.c.bf16 %v4347_v16, %v4346_v34 }
 0x6a6   : > { %v3215_v27 = vpop.f32.mrf.mxu2 }
 0x6a7   : > { %v10539_v30 = vpop.f32.mrf.mxu1  ;;  %v3314_v11 = vadd.f32 %v3278_v25, %v3215_v27  ;;  %v10554_v27 = vpop.f32.mrf.mxu0  ;;  %v5018_v25 = vld [vmem:[#allocation2 + $0xc5] sm:$0xff] }
 0x6a8   : > { %11420 = vst [vmem:[#allocation47_spill] sm:$0xff] %v10539_v30 }
 0x6a9   : > { %4844 = vmatmul.bf16.gmra.mxu3 %v10541_v47  ;;  %v3640_v29 = vadd.f32 %v10361_v19, %v3314_v11  ;;  %5170 = vmatmul.bf16.gmra.mxu0 %v5043_v53  ;;  %v4692_v19 = vld [vmem:[#allocation2 + $0xc4] sm:$0xff]  ;;  %11423 = vst [vmem:[#allocation62_spill] sm:$0xff] %v10554_v27  ;;  %v5019_v11 = vld [vmem:[#allocation2 + $0xcd] sm:$0xff]  ;;  %v10564_v27 = vpop.f32.mrf.mxu3 }
 0x6aa   : > { %5456 = vmatmul.bf16.gmra.mxu1 %v5361_v31  ;;  %v4693_v31 = vld [vmem:[#allocation2 + $0xcc] sm:$0xff] }
 0x6ab   : > { %3676 = vst [vmem:[#allocation3 + $0x90] sm:$0xff] %v3640_v29  ;;  %v5328_v53 = vld [vmem:[#allocation2 + $0x46] sm:$0xff] }
 0x6ac   : > { %v5362_v16 = vpack.c.bf16 %v5329_v22, %v5328_v53  ;;  %v4695_v53 = vld [vmem:[#allocation2 + $0xdc] sm:$0xff] }
 0x6ad   : > { %v5331_v22 = vld [vmem:[#allocation2 + $0x5e] sm:$0xff] }
 0x6ae   : > { %v3217_v59 = vpop.f32.mrf.mxu2 }
 0x6af   : > { %v10549_v39 = vpop.f32.mrf.mxu1  ;;  %v3315_v55 = vadd.f32 %v3279_v46, %v3217_v59  ;;  %v10558_v59 = vpack.c.bf16 %v4693_v31, %v4692_v19  ;;  %v5044_v46 = vpack.c.bf16 %v5019_v11, %v5018_v25  ;;  %v10566_v32 = vpop.f32.mrf.mxu0  ;;  %v4694_v31 = vld [vmem:[#allocation2 + $0xd4] sm:$0xff]  ;;  %v5021_v11 = vld [vmem:[#allocation2 + $0xdd] sm:$0xff] }
 0x6b0   : > { %11422 = vst [vmem:[#allocation61_spill] sm:$0xff] %v10549_v39  ;;  %v5020_v25 = vld [vmem:[#allocation2 + $0xd5] sm:$0xff] }
 0x6b1   : > { %v3641_v62 = vadd.f32 %v10365_v40, %v3315_v55 }
 0x6b3   : > { %3677 = vst [vmem:[#allocation3 + $0x98] sm:$0xff] %v3641_v62  ;;  %4473 = vmatmul.bf16.vlgmr.msrb.gmra.mxu2 %v4382_v9  ;;  %v3281_v62 = vld [vmem:[#allocation3 + $0xa8] sm:$0xff] }
 0x6b6   : > { %v3220_v29 = vpop.f32.mrf.mxu2 }
 0x6b7   : > { %v10556_v24 = vpop.f32.mrf.mxu1  ;;  %v3316_v40 = vadd.f32 %v3280_v23, %v3220_v29 }
 0x6b8   : > { %11424 = vst [vmem:[#allocation63_spill] sm:$0xff] %v10556_v24  ;;  %v3285_v24 = vld [vmem:[#allocation3 + $0xc8] sm:$0xff] }
 0x6b9   : > { %4849 = vmatmul.bf16.gmra.mxu3 %v10558_v59  ;;  %v3642_v34 = vadd.f32 %v10381_v57, %v3316_v40  ;;  %5175 = vmatmul.bf16.gmra.mxu0 %v5044_v46  ;;  %v5330_v57 = vld [vmem:[#allocation2 + $0x56] sm:$0xff]  ;;  %v10572_v46 = vpack.c.bf16 %v4695_v53, %v4694_v31 }
 0x6ba   : > { %5461 = vmatmul.bf16.gmra.mxu1 %v5362_v16  ;;  %v3282_v40 = vld [vmem:[#allocation3 + $0xb0] sm:$0xff]  ;;  %v5363_v43 = vpack.c.bf16 %v5331_v22, %v5330_v57 }
 0x6bb   : > { %3678 = vst [vmem:[#allocation3 + $0xa0] sm:$0xff] %v3642_v34 }
 0x6be   : > { %v3222_v55 = vpop.f32.mrf.mxu2 }
 0x6bf   : > { %v10562_v9 = vpop.f32.mrf.mxu1  ;;  %v3317_v19 = vadd.f32 %v3281_v62, %v3222_v55  ;;  %v5045_v55 = vpack.c.bf16 %v5021_v11, %v5020_v25  ;;  %v10574_v62 = vpop.f32.mrf.mxu3  ;;  %v4696_v25 = vld [vmem:[#allocation2 + $0xe4] sm:$0xff]  ;;  %v4697_v11 = vld [vmem:[#allocation2 + $0xec] sm:$0xff] }
 0x6c0   : > { %11425 = vst [vmem:[#allocation64_spill] sm:$0xff] %v10562_v9 }
 0x6c1   : > { %v3643_v23 = vadd.f32 %v10392_v21, %v3317_v19  ;;  %v10576_v21 = vpop.f32.mrf.mxu0 }
 0x6c3   : > { %3679 = vst [vmem:[#allocation3 + $0xa8] sm:$0xff] %v3643_v23  ;;  %4478 = vmatmul.bf16.gmra.mxu2 %v10371_v18  ;;  %v3283_v23 = vld [vmem:[#allocation3 + $0xb8] sm:$0xff] }
 0x6c6   : > { %v3225_v29 = vpop.f32.mrf.mxu2 }
 0x6c7   : > { %v10570_v16 = vpop.f32.mrf.mxu1  ;;  %v3318_v34 = vadd.f32 %v3282_v40, %v3225_v29  ;;  %v10583_v57 = vpop.f32.mrf.mxu3  ;;  %v5022_v29 = vld [vmem:[#allocation2 + $0xe5] sm:$0xff]  ;;  %v5023_v40 = vld [vmem:[#allocation2 + $0xed] sm:$0xff] }
 0x6c8   : > { %11426 = vst [vmem:[#allocation65_spill] sm:$0xff] %v10570_v16 }
 0x6c9   : > { %4854 = vmatmul.bf16.gmra.mxu3 %v10572_v46  ;;  %v3644_v18 = vadd.f32 %v10402_v26, %v3318_v34  ;;  %5180 = vmatmul.bf16.gmra.mxu0 %v5045_v55  ;;  %v10585_v22 = vpop.f32.mrf.mxu0  ;;  %v5332_v26 = vld [vmem:[#allocation2 + $0x66] sm:$0xff] }
 0x6ca   : > { %5466 = vmatmul.bf16.gmra.mxu1 %v5363_v43  ;;  %v5333_v43 = vld [vmem:[#allocation2 + $0x6e] sm:$0xff] }
 0x6cb   : > { %3680 = vst [vmem:[#allocation3 + $0xb0] sm:$0xff] %v3644_v18  ;;  %v3284_v55 = vld [vmem:[#allocation3 + $0xc0] sm:$0xff] }
 0x6ce   : > { %v3227_v19 = vpop.f32.mrf.mxu2 }
 0x6cf   : > { %v10580_v9 = vpop.f32.mrf.mxu1  ;;  %v3319_v31 = vadd.f32 %v3283_v23, %v3227_v19  ;;  %v10590_v19 = vpack.c.bf16 %v4697_v11, %v4696_v25  ;;  %v5364_v23 = vpack.c.bf16 %v5333_v43, %v5332_v26  ;;  %v4698_v26 = vld [vmem:[#allocation2 + $0xf4] sm:$0xff]  ;;  %v4699_v43 = vld [vmem:[#allocation2 + $0xfc] sm:$0xff] }
 0x6d0   : > { %11427 = vst [vmem:[#allocation66_spill] sm:$0xff] %v10580_v9 }
 0x6d1   : > { %v3645_v53 = vadd.f32 %v10415_v41, %v3319_v31  ;;  %v5046_v31 = vpack.c.bf16 %v5023_v40, %v5022_v29  ;;  %v10596_v9 = vpop.f32.mrf.mxu0  ;;  %v5335_v29 = vld [vmem:[#allocation2 + $0x7e] sm:$0xff]  ;;  %v5024_v40 = vld [vmem:[#allocation2 + $0xf5] sm:$0xff] }
 0x6d3   : > { %3681 = vst [vmem:[#allocation3 + $0xb8] sm:$0xff] %v3645_v53  ;;  %4483 = vmatmul.bf16.gmra.mxu2 %v10389_v61  ;;  %v10594_v61 = vpop.f32.mrf.mxu3 }
 0x6d6   : > { %v3230_v34 = vpop.f32.mrf.mxu2 }
 0x6d7   : > { %v10588_v18 = vpop.f32.mrf.mxu1  ;;  %v3320_v41 = vadd.f32 %v3284_v55, %v3230_v34  ;;  %v5025_v34 = vld [vmem:[#allocation2 + $0xfd] sm:$0xff] }
 0x6d8   : > { %11428 = vst [vmem:[#allocation67_spill] sm:$0xff] %v10588_v18 }
 0x6d9   : > { %4859 = vmatmul.bf16.gmra.mxu3 %v10590_v19  ;;  %v3646_v53 = vadd.f32 %v10426_v13, %v3320_v41  ;;  %5185 = vmatmul.bf16.gmra.mxu0 %v5046_v31  ;;  %v5334_v13 = vld [vmem:[#allocation2 + $0x76] sm:$0xff] }
 0x6da   : > { %5471 = vmatmul.bf16.gmra.mxu1 %v5364_v23  ;;  %v3286_v41 = vld [vmem:[#allocation3 + $0xd0] sm:$0xff] }
 0x6db   : > { %3682 = vst [vmem:[#allocation3 + $0xc0] sm:$0xff] %v3646_v53  ;;  %v10604_v31 = vpop.f32.mrf.mxu3  ;;  %v10606_v53 = vpop.f32.mrf.mxu0 }
 0x6de   : > { %v3232_v16 = vpop.f32.mrf.mxu2 }
 0x6df   : > { %v10598_v39 = vpop.f32.mrf.mxu1  ;;  %v3321_v25 = vadd.f32 %v3285_v24, %v3232_v16  ;;  %v4721_v24 = vpack.c.bf16 %v4699_v43, %v4698_v26  ;;  %v4700_v43 = vld [vmem:[#allocation2 + $0x104] sm:$0xff] }
 0x6e0   : > { %11429 = vst [vmem:[#allocation68_spill] sm:$0xff] %v10598_v39  ;;  %v3287_v39 = vld [vmem:[#allocation3 + $0xd8] sm:$0xff] }
 0x6e1   : > { %v3647_v11 = vadd.f32 %v10438_v36, %v3321_v25  ;;  %v5365_v36 = vpack.c.bf16 %v5335_v29, %v5334_v13  ;;  %v5047_v25 = vpack.c.bf16 %v5025_v34, %v5024_v40  ;;  %v4701_v13 = vld [vmem:[#allocation2 + $0x10c] sm:$0xff] }
 0x6e2   : > { %v5337_v29 = vld [vmem:[#allocation2 + $0x8e] sm:$0xff]  ;;  %v5026_v40 = vld [vmem:[#allocation2 + $0x105] sm:$0xff] }
 0x6e3   : > { %3683 = vst [vmem:[#allocation3 + $0xc8] sm:$0xff] %v3647_v11  ;;  %4488 = vmatmul.bf16.gmra.mxu2 %v10408_v12  ;;  %v10613_v50 = vpop.f32.mrf.mxu0  ;;  %v5027_v34 = vld [vmem:[#allocation2 + $0x10d] sm:$0xff] }
 0x6e6   : > { %v3235_v55 = vpop.f32.mrf.mxu2 }
 0x6e7   : > { %v10602_v23 = vpop.f32.mrf.mxu1  ;;  %v3322_v16 = vadd.f32 %v3286_v41, %v3235_v55  ;;  %v3288_v41 = vld [vmem:[#allocation3 + $0xe0] sm:$0xff] }
 0x6e8   : > { %11430 = vst [vmem:[#allocation69_spill] sm:$0xff] %v10602_v23  ;;  %v10611_v23 = vpop.f32.mrf.mxu3 }
 0x6e9   : > { %4864 = vmatmul.bf16.gmra.mxu3 %v4721_v24  ;;  %v3648_v12 = vadd.f32 %v10450_v63, %v3322_v16  ;;  %5190 = vmatmul.bf16.gmra.mxu0 %v5047_v25  ;;  %v5336_v63 = vld [vmem:[#allocation2 + $0x86] sm:$0xff]  ;;  %v5048_v25 = vpack.c.bf16 %v5027_v34, %v5026_v40 }
 0x6ea   : > { %5476 = vmatmul.bf16.gmra.mxu1 %v5365_v36  ;;  %v5366_v36 = vpack.c.bf16 %v5337_v29, %v5336_v63  ;;  %v4703_v63 = vld [vmem:[#allocation2 + $0x11c] sm:$0xff] }
 0x6eb   : > { %3684 = vst [vmem:[#allocation3 + $0xd0] sm:$0xff] %v3648_v12  ;;  %v5339_v29 = vld [vmem:[#allocation2 + $0x9e] sm:$0xff] }
 0x6ee   : > { %v3237_v11 = vpop.f32.mrf.mxu2 }
 0x6ef   : > { %v10609_v18 = vpop.f32.mrf.mxu1  ;;  %v3323_v30 = vadd.f32 %v3287_v39, %v3237_v11  ;;  %v4722_v39 = vpack.c.bf16 %v4701_v13, %v4700_v43  ;;  %v3289_v11 = vld [vmem:[#allocation3 + $0xe8] sm:$0xff] }
 0x6f0   : > { %11431 = vst [vmem:[#allocation70_spill] sm:$0xff] %v10609_v18  ;;  %v4702_v13 = vld [vmem:[#allocation2 + $0x114] sm:$0xff] }
 0x6f1   : > { %v3649_v26 = vadd.f32 %v10461_v6, %v3323_v30  ;;  %v10622_v30 = vpop.f32.mrf.mxu0 }
 0x6f3   : > { %3685 = vst [vmem:[#allocation3 + $0xd8] sm:$0xff] %v3649_v26  ;;  %4493 = vmatmul.bf16.gmra.mxu2 %v10430_v10  ;;  %v10620_v10 = vpop.f32.mrf.mxu3 }
 0x6f6   : > { %v3240_v55 = vpop.f32.mrf.mxu2 }
 0x6f7   : > { %v10617_v24 = vpop.f32.mrf.mxu1  ;;  %v3324_v16 = vadd.f32 %v3288_v41, %v3240_v55  ;;  %v5028_v55 = vld [vmem:[#allocation2 + $0x115] sm:$0xff]  ;;  %v5029_v41 = vld [vmem:[#allocation2 + $0x11d] sm:$0xff] }
 0x6f8   : > { %11432 = vst [vmem:[#allocation71_spill] sm:$0xff] %v10617_v24 }
 0x6f9   : > { %4869 = vmatmul.bf16.gmra.mxu3 %v4722_v39  ;;  %v3650_v6 = vadd.f32 %v10474_v2, %v3324_v16  ;;  %5195 = vmatmul.bf16.gmra.mxu0 %v5048_v25  ;;  %v5338_v2 = vld [vmem:[#allocation2 + $0x96] sm:$0xff]  ;;  %v10630_v34 = vpop.f32.mrf.mxu0  ;;  %v4723_v25 = vpack.c.bf16 %v4703_v63, %v4702_v13  ;;  %v4704_v63 = vld [vmem:[#allocation2 + $0x124] sm:$0xff] }
 0x6fa   : > { %5481 = vmatmul.bf16.gmra.mxu1 %v5366_v36  ;;  %v3290_v16 = vld [vmem:[#allocation3 + $0xf0] sm:$0xff] }
 0x6fb   : > { %3686 = vst [vmem:[#allocation3 + $0xe0] sm:$0xff] %v3650_v6  ;;  %v10628_v40 = vpop.f32.mrf.mxu3 }
 0x6fe   : > { %v3242_v12 = vpop.f32.mrf.mxu2 }
 0x6ff   : > { %v10624_v26 = vpop.f32.mrf.mxu1  ;;  %v3325_v18 = vadd.f32 %v3289_v11, %v3242_v12  ;;  %v3291_v11 = vld [vmem:[#allocation3 + $0xf8] sm:$0xff] }
 0x700   : > { %11433 = vst [vmem:[#allocation72_spill] sm:$0xff] %v10624_v26 }
 0x701   : > { %v3651_v43 = vadd.f32 %v10486_v15, %v3325_v18  ;;  %v5367_v15 = vpack.c.bf16 %v5339_v29, %v5338_v2  ;;  %v5049_v18 = vpack.c.bf16 %v5029_v41, %v5028_v55  ;;  %v10639_v49 = vpop.f32.mrf.mxu0  ;;  %v4705_v2 = vld [vmem:[#allocation2 + $0x12c] sm:$0xff] }
 0x702   : > { %v5341_v29 = vld [vmem:[#allocation2 + $0xae] sm:$0xff]  ;;  %v5030_v55 = vld [vmem:[#allocation2 + $0x125] sm:$0xff] }
 0x703   : > { %3687 = vst [vmem:[#allocation3 + $0xe8] sm:$0xff] %v3651_v43  ;;  %4498 = vmatmul.bf16.gmra.mxu2 %v10445_v5  ;;  %v10637_v26 = vpop.f32.mrf.mxu3  ;;  %v5031_v41 = vld [vmem:[#allocation2 + $0x12d] sm:$0xff] }
 0x706   : > { %v3245_v39 = vpop.f32.mrf.mxu2 }
 0x707   : > { %v10632_v36 = vpop.f32.mrf.mxu1  ;;  %v3326_v6 = vadd.f32 %v3290_v16, %v3245_v39  ;;  %v3292_v16 = vld [vmem:[#allocation3 + $0x100] sm:$0xff] }
 0x708   : > { %11434 = vst [vmem:[#allocation73_spill] sm:$0xff] %v10632_v36 }
 0x709   : > { %4874 = vmatmul.bf16.gmra.mxu3 %v4723_v25  ;;  %v3652_v5 = vadd.f32 %v10498_v1, %v3326_v6  ;;  %5200 = vmatmul.bf16.gmra.mxu0 %v5049_v18  ;;  %v5340_v1 = vld [vmem:[#allocation2 + $0xa6] sm:$0xff]  ;;  %v4724_v6 = vpack.c.bf16 %v4705_v2, %v4704_v63  ;;  %v5342_v63 = vld [vmem:[#allocation2 + $0xb6] sm:$0xff]  ;;  %v5343_v2 = vld [vmem:[#allocation2 + $0xbe] sm:$0xff] }
 0x70a   : > { %5486 = vmatmul.bf16.gmra.mxu1 %v5367_v15  ;;  %v5368_v18 = vpack.c.bf16 %v5341_v29, %v5340_v1  ;;  %v3294_v29 = vld [vmem:[#allocation3 + $0x110] sm:$0xff] }
 0x70b   : > { %3688 = vst [vmem:[#allocation3 + $0xf0] sm:$0xff] %v3652_v5  ;;  %v5050_v5 = vpack.c.bf16 %v5031_v41, %v5030_v55  ;;  %v5369_v41 = vpack.c.bf16 %v5343_v2, %v5342_v63  ;;  %v10662_v63 = vld [vmem:[%s11011_s10] ss:$0 sm:$0xff] }
 0x70e   : > { %v3247_v12 = vpop.f32.mrf.mxu2 }
 0x70f   : > { %v10635_v43 = vpop.f32.mrf.mxu1  ;;  %v3327_v24 = vadd.f32 %v3291_v11, %v3247_v12  ;;  %v10643_v12 = vpop.f32.mrf.mxu3  ;;  %v3293_v11 = vld [vmem:[#allocation3 + $0x108] sm:$0xff] }
 0x710   : > { %11435 = vst [vmem:[#allocation74_spill] sm:$0xff] %v10635_v43 }
 0x711   : > { %v3653_v13 = vadd.f32 %v10512_v56, %v3327_v24 }
 0x713   : > { %3689 = vst [vmem:[#allocation3 + $0xf8] sm:$0xff] %v3653_v13  ;;  %4503 = vmatmul.bf16.gmra.mxu2 %v10467_v7  ;;  %v10646_v7 = vpop.f32.mrf.mxu0 }
 0x716   : > { %v3250_v39 = vpop.f32.mrf.mxu2 }
 0x717   : > { %v5452_v25 = vpop.f32.mrf.mxu1  ;;  %v3328_v15 = vadd.f32 %v3292_v16, %v3250_v39 }
 0x719   : > { %4879 = vmatmul.bf16.gmra.mxu3 %v4724_v6  ;;  %v3654_v56 = vadd.f32 %v10522_v45, %v3328_v15  ;;  %5205 = vmatmul.bf16.gmra.mxu0 %v5050_v5  ;;  %v3295_v6 = vld [vmem:[#allocation3 + $0x118] sm:$0xff]  ;;  %v3912_v15 = vld [vmem:[#allocation3] sm:$0xff] }
 0x71a   : > { %5491 = vmatmul.bf16.gmra.mxu1 %v5368_v18  ;;  %v5345_v5 = vld [vmem:[#allocation2 + $0xce] sm:$0xff] }
 0x71b   : > { %3690 = vst [vmem:[#allocation3 + $0x100] sm:$0xff] %v3654_v56 }
 0x71e   : > { %v3252_v24 = vpop.f32.mrf.mxu2 }
 0x71f   : > { %v5454_v13 = vpop.f32.mrf.mxu1  ;;  %v3329_v43 = vadd.f32 %v3293_v11, %v3252_v24  ;;  %v3913_v24 = vld [vmem:[#allocation3 + $0x8] sm:$0xff] }
 0x721   : > { %v3655_v36 = vadd.f32 %v10534_v42, %v3329_v43  ;;  %v5344_v43 = vld [vmem:[#allocation2 + $0xc6] sm:$0xff] }
 0x723   : > { %3691 = vst [vmem:[#allocation3 + $0x108] sm:$0xff] %v3655_v36  ;;  %4508 = vmatmul.bf16.gmra.mxu2 %v10482_v48  ;;  %v3948_v48 = vadd.f32 %v3912_v15, %v10238_v8  ;;  %v5370_v8 = vpack.c.bf16 %v5345_v5, %v5344_v43  ;;  %v11436_v5 = vld [vmem:[#allocation20_spill] sm:$0xff] }
 0x726   : > { %v3255_v1 = vpop.f32.mrf.mxu2 }
 0x727   : > { %v5457_v55 = vpop.f32.mrf.mxu1  ;;  %v3330_v45 = vadd.f32 %v3294_v29, %v3255_v1 }
 0x729   : > { %v3656_v39 = vadd.f32 %v10545_v4, %v3330_v45  ;;  %v4274_v4 = vadd.f32 %v10344_v17, %v3948_v48  ;;  %v6848_v17 = vld [vmem:[%s7184_s9] sm:$0xff]  ;;  %v5347_v48 = vld [vmem:[#allocation2 + $0xde] sm:$0xff] }
 0x72a   : > { %5496 = vmatmul.bf16.gmra.mxu1 %v5369_v41  ;;  %v5654_v29 = vadd.f32 %v6848_v17, %v10662_v63 }
 0x72b   : > { %3692 = vst [vmem:[#allocation3 + $0x110] sm:$0xff] %v3656_v39 }
 0x72e   : > { %v3257_v16 = vpop.f32.mrf.mxu2 }
 0x72f   : > { %v10651_v18 = vpop.f32.mrf.mxu1  ;;  %v3331_v42 = vadd.f32 %v3295_v6, %v3257_v16  ;;  %v3914_v16 = vld [vmem:[#allocation3 + $0x10] sm:$0xff] }
 0x731   : > { %v3657_v36 = vadd.f32 %v10552_v44, %v3331_v42 }
 0x733   : > { %3693 = vst [vmem:[#allocation3 + $0x118] sm:$0xff] %v3657_v36  ;;  %4513 = vmatmul.bf16.gmra.mxu2 %v10505_v3  ;;  %v3949_v3 = vadd.f32 %v3913_v24, %v10247_v35  ;;  %v5346_v36 = vld [vmem:[#allocation2 + $0xd6] sm:$0xff]  ;;  %v3915_v24 = vld [vmem:[#allocation3 + $0x18] sm:$0xff] }
 0x735   : > { %v4275_v41 = vadd.f32 %v10351_v51, %v3949_v3  ;;  %v6849_v51 = vld [vmem:[%s7184_s9 + $0x8] sm:$0xff] }
 0x736   : > { %v4474_v56 = vpop.f32.mrf.mxu2 }
 0x737   : > { %v10657_v11 = vpop.f32.mrf.mxu1  ;;  %v4600_v44 = vadd.f32 %v4474_v56, %v4274_v4 }
 0x739   : > { %v4926_v2 = vadd.f32 %v10564_v27, %v4600_v44 }
 0x73a   : > { %5501 = vmatmul.bf16.gmra.mxu1 %v5370_v8  ;;  %v5371_v8 = vpack.c.bf16 %v5347_v48, %v5346_v36 }
 0x73b   : > { %v5252_v1 = vadd.f32 %v10566_v32, %v4926_v2  ;;  %v3950_v32 = vadd.f32 %v3914_v16, %v10253_v37  ;;  %v11437_v2 = vld [vmem:[#allocation49_spill] sm:$0xff] }
 0x73c   : > { %v3951_v3 = vadd.f32 %v3915_v24, %v11437_v2 }
 0x73d   : > { %v5578_v45 = vadd.f32 %v5452_v25, %v5252_v1  ;;  %v5655_v25 = vadd.f32 %v6849_v51, %v10662_v63  ;;  %v4276_v4 = vadd.f32 %v11436_v5, %v3950_v32  ;;  %v11440_v32 = vld [vmem:[#allocation24_spill] sm:$0xff]  ;;  %v11441_v5 = vld [vmem:[#allocation51_spill] sm:$0xff] }
 0x73e   : > { %v4476_v39 = vpop.f32.mrf.mxu2 }
 0x73f   : > { %v10670_v6 = vpop.f32.mrf.mxu1  ;;  %5614 = vst [vmem:[#allocation3] sm:$0xff] %v5578_v45  ;;  %v5688_v15 = vadd.f32 %v5654_v29, %v5578_v45  ;;  %v4601_v42 = vadd.f32 %v4476_v39, %v4275_v41  ;;  %v3916_v45 = vld [vmem:[#allocation3 + $0x20] sm:$0xff] }
 0x741   : > { %5690 = vst [vmem:[%s10674_s28] sm:$0xff] %v5688_v15  ;;  %v4927_v35 = vadd.f32 %v10574_v62, %v4601_v42  ;;  %v11439_v15 = vld [vmem:[#allocation50_spill] sm:$0xff] }
 0x742   : > { %v3952_v42 = vadd.f32 %v3916_v45, %v11439_v15  ;;  %v5351_v15 = vld [vmem:[#allocation2 + $0xfe] sm:$0xff] }
 0x743   : > { %v5253_v27 = vadd.f32 %v10576_v21, %v4927_v35  ;;  %4518 = vmatmul.bf16.gmra.mxu2 %v10526_v38  ;;  %v5348_v35 = vld [vmem:[#allocation2 + $0xe6] sm:$0xff] }
 0x745   : > { %v5579_v43 = vadd.f32 %v5454_v13, %v5253_v27  ;;  %v11438_v13 = vld [vmem:[#allocation22_spill] sm:$0xff]  ;;  %v4278_v27 = vadd.f32 %v11440_v32, %v3952_v42 }
 0x746   : > { %v4479_v56 = vpop.f32.mrf.mxu2  ;;  %v4277_v17 = vadd.f32 %v11438_v13, %v3951_v3  ;;  %v3918_v3 = vld [vmem:[#allocation3 + $0x30] sm:$0xff] }
 0x747   : > { %v10684_v44 = vpop.f32.mrf.mxu1  ;;  %5615 = vst [vmem:[#allocation3 + $0x8] sm:$0xff] %v5579_v43  ;;  %v5689_v62 = vadd.f32 %v5655_v25, %v5579_v43  ;;  %v4602_v37 = vadd.f32 %v4479_v56, %v4276_v4  ;;  %v3917_v25 = vld [vmem:[#allocation3 + $0x28] sm:$0xff]  ;;  %v10701_v43 = vpop.f32.mrf.mxu3 }
 0x748   : > { %v10705_v4 = vpop.f32.mrf.mxu0 }
 0x749   : > { %5691 = vst [vmem:[%s10674_s28 + $0x8] sm:$0xff] %v5689_v62  ;;  %v4928_v21 = vadd.f32 %v10583_v57, %v4602_v37  ;;  %v11442_v37 = vld [vmem:[#allocation25_spill] sm:$0xff] }
 0x74a   : > { %5506 = vmatmul.bf16.gmra.mxu1 %v5371_v8 }
 0x74b   : > { %v5254_v38 = vadd.f32 %v10585_v22, %v4928_v21  ;;  %v5349_v22 = vld [vmem:[#allocation2 + $0xee] sm:$0xff] }
 0x74d   : > { %v5580_v1 = vadd.f32 %v5457_v55, %v5254_v38 }
 0x74e   : > { %v4481_v29 = vpop.f32.mrf.mxu2 }
 0x74f   : > { %v10691_v41 = vpop.f32.mrf.mxu1  ;;  %5616 = vst [vmem:[#allocation3 + $0x10] sm:$0xff] %v5580_v1  ;;  %v4603_v39 = vadd.f32 %v4481_v29, %v4277_v17  ;;  %v11443_v17 = vld [vmem:[#allocation52_spill] sm:$0xff]  ;;  %v10717_v45 = vpop.f32.mrf.mxu3 }
 0x750   : > { %v3954_v29 = vadd.f32 %v3918_v3, %v11443_v17  ;;  %v10723_v42 = vpop.f32.mrf.mxu0  ;;  %v6853_v3 = vld [vmem:[%s7184_s9 + $0x28] sm:$0xff]  ;;  %v11446_v17 = vld [vmem:[#allocation29_spill] sm:$0xff] }
 0x751   : > { %v4929_v16 = vadd.f32 %v10594_v61, %v4603_v39  ;;  %v5372_v61 = vpack.c.bf16 %v5349_v22, %v5348_v35 }
 0x753   : > { %v5255_v57 = vadd.f32 %v10596_v9, %v4929_v16  ;;  %4523 = vmatmul.bf16.gmra.mxu2 %v10541_v47  ;;  %v3953_v47 = vadd.f32 %v3917_v25, %v11441_v5  ;;  %v5350_v16 = vld [vmem:[#allocation2 + $0xf6] sm:$0xff]  ;;  %v11444_v25 = vld [vmem:[#allocation53_spill] sm:$0xff] }
 0x755   : > { %v5581_v55 = vadd.f32 %v10651_v18, %v5255_v57  ;;  %v6850_v18 = vld [vmem:[%s7184_s9 + $0x10] sm:$0xff]  ;;  %v4279_v8 = vadd.f32 %v11442_v37, %v3953_v47 }
 0x756   : > { %v4484_v51 = vpop.f32.mrf.mxu2  ;;  %v5656_v56 = vadd.f32 %v6850_v18, %v10662_v63 }
 0x757   : > { %v10699_v36 = vpop.f32.mrf.mxu1  ;;  %5617 = vst [vmem:[#allocation3 + $0x18] sm:$0xff] %v5581_v55  ;;  %v4604_v48 = vadd.f32 %v4484_v51, %v4278_v27  ;;  %v3919_v55 = vld [vmem:[#allocation3 + $0x38] sm:$0xff] }
 0x759   : > { %v4930_v9 = vadd.f32 %v10604_v31, %v4604_v48  ;;  %v3955_v48 = vadd.f32 %v3919_v55, %v11444_v25 }
 0x75a   : > { %5511 = vmatmul.bf16.gmra.mxu1 %v5372_v61  ;;  %v6852_v61 = vld [vmem:[%s7184_s9 + $0x20] sm:$0xff] }
 0x75b   : > { %v5256_v24 = vadd.f32 %v10606_v53, %v4930_v9  ;;  %v6851_v53 = vld [vmem:[%s7184_s9 + $0x18] sm:$0xff]  ;;  %v10735_v9 = vpop.f32.mrf.mxu3  ;;  %v4281_v47 = vadd.f32 %v10398_v0, %v3955_v48 }
 0x75d   : > { %v5582_v62 = vadd.f32 %v10657_v11, %v5256_v24  ;;  %v5657_v11 = vadd.f32 %v6851_v53, %v10662_v63  ;;  %v3920_v24 = vld [vmem:[#allocation3 + $0x40] sm:$0xff] }
 0x75e   : > { %v5692_v21 = vld [vmem:[#allocation3 + $0x12] sm:$0xff]  ;;  %v4486_v2 = vpop.f32.mrf.mxu2 }
 0x75f   : > { %v10712_v31 = vpop.f32.mrf.mxu1  ;;  %v5694_v38 = vadd.f32 %v5692_v21, %v5656_v56  ;;  %5618 = vst [vmem:[#allocation3 + $0x20] sm:$0xff] %v5582_v62  ;;  %v4605_v1 = vadd.f32 %v4486_v2, %v4279_v8  ;;  %v10741_v8 = vpop.f32.mrf.mxu0 }
 0x761   : > { %6359 = vst [vmem:[%s10674_s28 + $0x10] sm:$0xff] %v5694_v38  ;;  %v4931_v13 = vadd.f32 %v10611_v23, %v4605_v1  ;;  %v4280_v23 = vadd.f32 %v10387_v60, %v3954_v29  ;;  %v5352_v38 = vld [vmem:[#allocation2 + $0x106] sm:$0xff]  ;;  %v5353_v1 = vld [vmem:[#allocation2 + $0x10e] sm:$0xff] }
 0x763   : > { %v5257_v39 = vadd.f32 %v10613_v50, %v4931_v13  ;;  %4528 = vmatmul.bf16.gmra.mxu2 %v10558_v59  ;;  %v5373_v50 = vpack.c.bf16 %v5351_v15, %v5350_v16 }
 0x765   : > { %v5583_v57 = vadd.f32 %v10670_v6, %v5257_v39  ;;  %v5658_v6 = vadd.f32 %v6852_v61, %v10662_v63 }
 0x766   : > { %v5693_v35 = vld [vmem:[#allocation3 + $0x1a] sm:$0xff]  ;;  %v4489_v22 = vpop.f32.mrf.mxu2 }
 0x767   : > { %v10727_v32 = vpop.f32.mrf.mxu1  ;;  %v5695_v27 = vadd.f32 %v5693_v35, %v5657_v11  ;;  %5619 = vst [vmem:[#allocation3 + $0x28] sm:$0xff] %v5583_v57  ;;  %v4606_v51 = vadd.f32 %v4489_v22, %v4280_v23  ;;  %v5374_v57 = vpack.c.bf16 %v5353_v1, %v5352_v38  ;;  %v10754_v23 = vpop.f32.mrf.mxu3  ;;  %v6854_v22 = vld [vmem:[%s7184_s9 + $0x30] sm:$0xff]  ;;  %v3923_v1 = vld [vmem:[#allocation3 + $0x58] sm:$0xff] }
 0x768   : > { %v10759_v35 = vpop.f32.mrf.mxu0  ;;  %v5660_v55 = vadd.f32 %v6854_v22, %v10662_v63 }
 0x769   : > { %6360 = vst [vmem:[%s10674_s28 + $0x18] sm:$0xff] %v5695_v27  ;;  %v4932_v59 = vadd.f32 %v10620_v10, %v4606_v51 }
 0x76a   : > { %5516 = vmatmul.bf16.gmra.mxu1 %v5373_v50  ;;  %v11448_v50 = vld [vmem:[#allocation31_spill] sm:$0xff] }
 0x76b   : > { %v5258_v60 = vadd.f32 %v10622_v30, %v4932_v59  ;;  %v11445_v30 = vld [vmem:[#allocation54_spill] sm:$0xff] }
 0x76c   : > { %v3956_v2 = vadd.f32 %v3920_v24, %v11445_v30  ;;  %v5354_v30 = vld [vmem:[#allocation2 + $0x116] sm:$0xff] }
 0x76d   : > { %v5584_v5 = vadd.f32 %v10684_v44, %v5258_v60  ;;  %v5659_v44 = vadd.f32 %v6853_v3, %v10662_v63  ;;  %v11450_v3 = vld [vmem:[#allocation32_spill] sm:$0xff] }
 0x76e   : > { %v5699_v18 = vld [vmem:[#allocation3 + $0x24] sm:$0xff]  ;;  %v4491_v56 = vpop.f32.mrf.mxu2  ;;  %v4282_v29 = vadd.f32 %v11446_v17, %v3956_v2  ;;  %v5355_v2 = vld [vmem:[#allocation2 + $0x11e] sm:$0xff] }
 0x76f   : > { %v10739_v10 = vpop.f32.mrf.mxu1  ;;  %v5701_v62 = vadd.f32 %v5699_v18, %v5658_v6  ;;  %5620 = vst [vmem:[#allocation3 + $0x30] sm:$0xff] %v5584_v5  ;;  %v4607_v37 = vadd.f32 %v4491_v56, %v4281_v47  ;;  %v11449_v47 = vld [vmem:[#allocation56_spill] sm:$0xff]  ;;  %v10771_v56 = vpop.f32.mrf.mxu3 }
 0x771   : > { %6361 = vst [vmem:[%s10674_s28 + $0x20] sm:$0xff] %v5701_v62  ;;  %v4933_v21 = vadd.f32 %v10628_v40, %v4607_v37  ;;  %v3921_v40 = vld [vmem:[#allocation3 + $0x48] sm:$0xff]  ;;  %v6856_v62 = vld [vmem:[%s7184_s9 + $0x40] sm:$0xff] }
 0x772   : > { %v5662_v37 = vadd.f32 %v6856_v62, %v10662_v63 }
 0x773   : > { %v5259_v0 = vadd.f32 %v10630_v34, %v4933_v21  ;;  %4533 = vmatmul.bf16.gmra.mxu2 %v10572_v46  ;;  %v11447_v34 = vld [vmem:[#allocation55_spill] sm:$0xff]  ;;  %v10779_v21 = vpop.f32.mrf.mxu0 }
 0x775   : > { %v5585_v13 = vadd.f32 %v10691_v41, %v5259_v0  ;;  %v3957_v41 = vadd.f32 %v3921_v40, %v11447_v34 }
 0x776   : > { %v5700_v53 = vld [vmem:[#allocation3 + $0x2c] sm:$0xff]  ;;  %v4494_v11 = vpop.f32.mrf.mxu2 }
 0x777   : > { %v10752_v39 = vpop.f32.mrf.mxu1  ;;  %v5702_v16 = vadd.f32 %v5700_v53, %v5659_v44  ;;  %5621 = vst [vmem:[#allocation3 + $0x38] sm:$0xff] %v5585_v13  ;;  %v4608_v15 = vadd.f32 %v4494_v11, %v4282_v29  ;;  %v4283_v59 = vadd.f32 %v11448_v50, %v3957_v41  ;;  %v11451_v11 = vld [vmem:[#allocation57_spill] sm:$0xff] }
 0x778   : > { %v3959_v40 = vadd.f32 %v3923_v1, %v11451_v11 }
 0x779   : > { %6362 = vst [vmem:[%s10674_s28 + $0x28] sm:$0xff] %v5702_v16  ;;  %v4934_v46 = vadd.f32 %v10637_v26, %v4608_v15  ;;  %v3922_v26 = vld [vmem:[#allocation3 + $0x50] sm:$0xff]  ;;  %v6857_v16 = vld [vmem:[%s7184_s9 + $0x48] sm:$0xff] }
 0x77a   : > { %5521 = vmatmul.bf16.gmra.mxu1 %v5374_v57  ;;  %v3958_v18 = vadd.f32 %v3922_v26, %v11449_v47  ;;  %v5663_v15 = vadd.f32 %v6857_v16, %v10662_v63  ;;  %v10792_v57 = vpop.f32.mrf.mxu3  ;;  %v4285_v34 = vadd.f32 %v10435_v33, %v3959_v40  ;;  %v5356_v33 = vld [vmem:[#allocation2 + $0x126] sm:$0xff] }
 0x77b   : > { %v5260_v27 = vadd.f32 %v10639_v49, %v4934_v46  ;;  %v6855_v49 = vld [vmem:[%s7184_s9 + $0x38] sm:$0xff]  ;;  %v10796_v41 = vpop.f32.mrf.mxu0 }
 0x77c   : > { %v4284_v44 = vadd.f32 %v11450_v3, %v3958_v18 }
 0x77d   : > { %v5586_v51 = vadd.f32 %v10699_v36, %v5260_v27  ;;  %v5661_v36 = vadd.f32 %v6855_v49, %v10662_v63  ;;  %v3924_v27 = vld [vmem:[#allocation3 + $0x60] sm:$0xff]  ;;  %v3925_v49 = vld [vmem:[#allocation3 + $0x68] sm:$0xff] }
 0x77e   : > { %v5706_v25 = vld [vmem:[#allocation3 + $0x36] sm:$0xff]  ;;  %v4496_v48 = vpop.f32.mrf.mxu2 }
 0x77f   : > { %v10766_v61 = vpop.f32.mrf.mxu1  ;;  %v5708_v6 = vadd.f32 %v5706_v25, %v5660_v55  ;;  %5622 = vst [vmem:[#allocation3 + $0x40] sm:$0xff] %v5586_v51  ;;  %v4609_v60 = vadd.f32 %v4496_v48, %v4283_v59  ;;  %v4375_v55 = vld [vmem:[#allocation2 + $0xfc] sm:$0xff]  ;;  %v11452_v48 = vld [vmem:[#allocation58_spill] sm:$0xff] }
 0x780   : > { %v3960_v26 = vadd.f32 %v3924_v27, %v11452_v48 }
 0x781   : > { %6363 = vst [vmem:[%s10674_s28 + $0x30] sm:$0xff] %v5708_v6  ;;  %v4935_v5 = vadd.f32 %v10643_v12, %v4609_v60  ;;  %v5357_v6 = vld [vmem:[#allocation2 + $0x12e] sm:$0xff] }
 0x782   : > { %v10806_v47 = vpop.f32.mrf.mxu3 }
 0x783   : > { %v5261_v24 = vadd.f32 %v10646_v7, %v4935_v5  ;;  %4538 = vmatmul.bf16.gmra.mxu2 %v10590_v19  ;;  %v5375_v19 = vpack.c.bf16 %v5355_v2, %v5354_v30  ;;  %v4286_v5 = vadd.f32 %v10443_v20, %v3960_v26  ;;  %v11454_v2 = vld [vmem:[#allocation36_spill] sm:$0xff]  ;;  %v4378_v26 = vld [vmem:[#allocation2 + $0x114] sm:$0xff] }
 0x785   : > { %v5587_v12 = vadd.f32 %v10712_v31, %v5261_v24  ;;  %v5376_v24 = vpack.c.bf16 %v5357_v6, %v5356_v33  ;;  %v4379_v6 = vld [vmem:[#allocation2 + $0x11c] sm:$0xff] }
 0x786   : > { %v5707_v0 = vld [vmem:[#allocation3 + $0x3e] sm:$0xff]  ;;  %v4499_v38 = vpop.f32.mrf.mxu2 }
 0x787   : > { %v10783_v7 = vpop.f32.mrf.mxu1  ;;  %v5709_v13 = vadd.f32 %v5707_v0, %v5661_v36  ;;  %5623 = vst [vmem:[#allocation3 + $0x48] sm:$0xff] %v5587_v12  ;;  %v5715_v17 = vadd.f32 %v5662_v37, %v5587_v12  ;;  %v4610_v29 = vadd.f32 %v4499_v38, %v4284_v44  ;;  %v11453_v37 = vld [vmem:[#allocation59_spill] sm:$0xff]  ;;  %v4376_v44 = vld [vmem:[#allocation2 + $0x104] sm:$0xff]  ;;  %v4377_v0 = vld [vmem:[#allocation2 + $0x10c] sm:$0xff] }
 0x788   : > { %v3926_v38 = vld [vmem:[#allocation3 + $0x70] sm:$0xff] }
 0x789   : > { %6364 = vst [vmem:[%s10674_s28 + $0x38] sm:$0xff] %v5709_v13  ;;  %v4936_v53 = vadd.f32 %v10701_v43, %v4610_v29  ;;  %v4374_v43 = vld [vmem:[#allocation2 + $0xf4] sm:$0xff]  ;;  %v11455_v29 = vld [vmem:[#allocation60_spill] sm:$0xff] }
 0x78a   : > { %5526 = vmatmul.bf16.gmra.mxu1 %v5375_v19  ;;  %6365 = vst [vmem:[%s10674_s28 + $0x40] sm:$0xff] %v5715_v17  ;;  %v4396_v25 = vpack.c.bf16 %v4375_v55, %v4374_v43  ;;  %v10817_v13 = vpop.f32.mrf.mxu3  ;;  %v4397_v17 = vpack.c.bf16 %v4377_v0, %v4376_v44  ;;  %v3962_v19 = vadd.f32 %v3926_v38, %v11455_v29  ;;  %v11456_v55 = vld [vmem:[#allocation17_spill] sm:$0xff]  ;;  %v3929_v38 = vld [vmem:[#allocation3 + $0x88] sm:$0xff]  ;;  %v11459_v29 = vld [vmem:[#allocation19_spill] sm:$0xff] }
 0x78b   : > { %v5262_v31 = vadd.f32 %v10705_v4, %v4936_v53 }
 0x78c   : > { %v4288_v16 = vadd.f32 %v10465_v14, %v3962_v19  ;;  %v3965_v19 = vadd.f32 %v3929_v38, %v11459_v29 }
 0x78d   : > { %v5588_v46 = vadd.f32 %v10727_v32, %v5262_v31 }
 0x78e   : > { %v4501_v22 = vpop.f32.mrf.mxu2 }
 0x78f   : > { %5624 = vst [vmem:[#allocation3 + $0x50] sm:$0xff] %v5588_v46  ;;  %v5716_v51 = vadd.f32 %v5663_v15, %v5588_v46  ;;  %v4611_v50 = vadd.f32 %v4501_v22, %v4285_v34  ;;  %v10798_v59 = vpop.f32.mrf.mxu1  ;;  %v3927_v46 = vld [vmem:[#allocation3 + $0x78] sm:$0xff] }
 0x790   : > { %v3963_v27 = vadd.f32 %v3927_v46, %v11456_v55 }
 0x791   : > { %6366 = vst [vmem:[%s10674_s28 + $0x48] sm:$0xff] %v5716_v51  ;;  %v4937_v4 = vadd.f32 %v10717_v45, %v4611_v50  ;;  %v10808_v45 = vpop.f32.mrf.mxu0 }
 0x792   : > { %v10833_v51 = vpop.f32.mrf.mxu3 }
 0x793   : > { %v5263_v32 = vadd.f32 %v10723_v42, %v4937_v4  ;;  %4543 = vmatmul.bf16.gmra.mxu2 %v4396_v25  ;;  %v3961_v42 = vadd.f32 %v3925_v49, %v11453_v37  ;;  %v11457_v25 = vld [vmem:[#allocation38_spill] sm:$0xff]  ;;  %v4398_v49 = vpack.c.bf16 %v4379_v6, %v4378_v26 }
 0x794   : > { %v4289_v48 = vadd.f32 %v11457_v25, %v3963_v27 }
 0x795   : > { %v5589_v60 = vadd.f32 %v10739_v10, %v5263_v32  ;;  %v4287_v12 = vadd.f32 %v11454_v2, %v3961_v42  ;;  %v6860_v42 = vld [vmem:[%s7184_s9 + $0x60] sm:$0xff] }
 0x796   : > { %v4504_v18 = vpop.f32.mrf.mxu2 }
 0x797   : > { %5625 = vst [vmem:[#allocation3 + $0x58] sm:$0xff] %v5589_v60  ;;  %v4612_v36 = vadd.f32 %v4504_v18, %v4286_v5  ;;  %v10812_v30 = vpop.f32.mrf.mxu1  ;;  %v3928_v60 = vld [vmem:[#allocation3 + $0x80] sm:$0xff] }
 0x799   : > { %v4938_v62 = vadd.f32 %v10735_v9, %v4612_v36  ;;  %v10821_v53 = vpop.f32.mrf.mxu0  ;;  %v11458_v36 = vld [vmem:[#allocation18_spill] sm:$0xff] }
 0x79a   : > { %5531 = vmatmul.bf16.gmra.mxu1 %v5376_v24  ;;  %v3964_v24 = vadd.f32 %v3928_v60, %v11458_v36  ;;  %v10850_v2 = vpop.f32.mrf.mxu3 }
 0x79b   : > { %v5264_v10 = vadd.f32 %v10741_v8, %v4938_v62  ;;  %v6858_v8 = vld [vmem:[%s7184_s9 + $0x50] sm:$0xff] }
 0x79c   : > { %v4707_v62 = vld [vmem:[#allocation2 + $0x13c] sm:$0xff] }
 0x79d   : > { %v5590_v20 = vadd.f32 %v10752_v39, %v5264_v10  ;;  %v5664_v39 = vadd.f32 %v6858_v8, %v10662_v63  ;;  %v5666_v10 = vadd.f32 %v6860_v42, %v10662_v63  ;;  %v5032_v8 = vld [vmem:[#allocation2 + $0x135] sm:$0xff] }
 0x79e   : > { %v4506_v3 = vpop.f32.mrf.mxu2  ;;  %v5358_v42 = vld [vmem:[#allocation2 + $0x136] sm:$0xff] }
 0x79f   : > { %5626 = vst [vmem:[#allocation3 + $0x60] sm:$0xff] %v5590_v20  ;;  %v4613_v1 = vadd.f32 %v4506_v3, %v4287_v12  ;;  %v10826_v40 = vpop.f32.mrf.mxu1 }
 0x7a1   : > { %v4939_v9 = vadd.f32 %v10754_v23, %v4613_v1  ;;  %v10838_v14 = vpop.f32.mrf.mxu0 }
 0x7a2   : > { %v10866_v46 = vpop.f32.mrf.mxu3 }
 0x7a3   : > { %v5265_v11 = vadd.f32 %v10759_v35, %v4939_v9  ;;  %4548 = vmatmul.bf16.gmra.mxu2 %v4397_v17  ;;  %v6859_v35 = vld [vmem:[%s7184_s9 + $0x58] sm:$0xff] }
 0x7a4   : > { %v5665_v50 = vadd.f32 %v6859_v35, %v10662_v63 }
 0x7a5   : > { %v5591_v31 = vadd.f32 %v10766_v61, %v5265_v11  ;;  %v6861_v11 = vld [vmem:[%s7184_s9 + $0x68] sm:$0xff] }
 0x7a6   : > { %v5720_v23 = vld [vmem:[#allocation3 + $0x5a] sm:$0xff]  ;;  %v4509_v15 = vpop.f32.mrf.mxu2 }
 0x7a7   : > { %v5722_v34 = vadd.f32 %v5720_v23, %v5664_v39  ;;  %5627 = vst [vmem:[#allocation3 + $0x68] sm:$0xff] %v5591_v31  ;;  %v4614_v22 = vadd.f32 %v4509_v15, %v4288_v16  ;;  %v10842_v33 = vpop.f32.mrf.mxu1  ;;  %v4291_v23 = vadd.f32 %v10493_v28, %v3965_v19  ;;  %v4380_v15 = vld [vmem:[#allocation2 + $0x124] sm:$0xff] }
 0x7a9   : > { %6367 = vst [vmem:[%s10674_s28 + $0x50] sm:$0xff] %v5722_v34  ;;  %v4940_v43 = vadd.f32 %v10771_v56, %v4614_v22  ;;  %v10854_v3 = vpop.f32.mrf.mxu0  ;;  %v4381_v22 = vld [vmem:[#allocation2 + $0x12c] sm:$0xff] }
 0x7ab   : > { %v5266_v61 = vadd.f32 %v10779_v21, %v4940_v43  ;;  %v3930_v43 = vld [vmem:[#allocation3 + $0x90] sm:$0xff] }
 0x7ad   : > { %v5592_v4 = vadd.f32 %v10783_v7, %v5266_v61  ;;  %v4706_v7 = vld [vmem:[#allocation2 + $0x134] sm:$0xff]  ;;  %v11460_v61 = vld [vmem:[#allocation21_spill] sm:$0xff] }
 0x7ae   : > { %v5721_v32 = vld [vmem:[#allocation3 + $0x62] sm:$0xff]  ;;  %v4511_v56 = vpop.f32.mrf.mxu2  ;;  %v4725_v37 = vpack.c.bf16 %v4707_v62, %v4706_v7 }
 0x7af   : > { %v5723_v5 = vadd.f32 %v5721_v32, %v5665_v50  ;;  %5628 = vst [vmem:[#allocation3 + $0x70] sm:$0xff] %v5592_v4  ;;  %v4615_v18 = vadd.f32 %v4511_v56, %v4289_v48  ;;  %v10856_v17 = vpop.f32.mrf.mxu1  ;;  %v4399_v50 = vpack.c.bf16 %v4381_v22, %v4380_v15  ;;  %v6862_v4 = vld [vmem:[%s7184_s9 + $0x70] sm:$0xff]  ;;  %v6864_v62 = vld [vmem:[%s7184_s9 + $0x80] sm:$0xff] }
 0x7b0   : > { %4884 = vmatmul.bf16.gmra.mxu3 %v4725_v37  ;;  %v5668_v25 = vadd.f32 %v6862_v4, %v10662_v63 }
 0x7b1   : > { %6368 = vst [vmem:[%s10674_s28 + $0x58] sm:$0xff] %v5723_v5  ;;  %v4941_v21 = vadd.f32 %v10792_v57, %v4615_v18  ;;  %v4290_v57 = vadd.f32 %v10480_v58, %v3964_v24  ;;  %v5667_v58 = vadd.f32 %v6861_v11, %v10662_v63  ;;  %v5176_v35 = vpop.f32.mrf.mxu0  ;;  %v4852_v18 = vpop.f32.mrf.mxu3  ;;  %v11463_v11 = vld [vmem:[#allocation43_spill] sm:$0xff] }
 0x7b3   : > { %v5267_v20 = vadd.f32 %v10796_v41, %v4941_v21  ;;  %4553 = vmatmul.bf16.gmra.mxu2 %v4398_v49  ;;  %v11461_v49 = vld [vmem:[#allocation23_spill] sm:$0xff] }
 0x7b5   : > { %v5593_v12 = vadd.f32 %v10798_v59, %v5267_v20  ;;  %v5033_v59 = vld [vmem:[#allocation2 + $0x13d] sm:$0xff] }
 0x7b6   : > { %v5727_v44 = vld [vmem:[#allocation3 + $0x6c] sm:$0xff]  ;;  %v4514_v0 = vpop.f32.mrf.mxu2  ;;  %v5051_v39 = vpack.c.bf16 %v5033_v59, %v5032_v8 }
 0x7b7   : > { %v5729_v1 = vadd.f32 %v5727_v44, %v5666_v10  ;;  %5629 = vst [vmem:[#allocation3 + $0x78] sm:$0xff] %v5593_v12  ;;  %v4616_v9 = vadd.f32 %v4514_v0, %v4290_v57  ;;  %v5502_v28 = vpop.f32.mrf.mxu1  ;;  %v5359_v10 = vld [vmem:[#allocation2 + $0x13e] sm:$0xff]  ;;  %v3932_v44 = vld [vmem:[#allocation3 + $0xa0] sm:$0xff]  ;;  %v6865_v8 = vld [vmem:[%s7184_s9 + $0x88] sm:$0xff] }
 0x7b8   : > { %5210 = vmatmul.bf16.gmra.mxu0 %v5051_v39 }
 0x7b9   : > { %6369 = vst [vmem:[%s10674_s28 + $0x60] sm:$0xff] %v5729_v1  ;;  %v4942_v41 = vadd.f32 %v10806_v47, %v4616_v9  ;;  %v5178_v24 = vpop.f32.mrf.mxu0  ;;  %v5377_v9 = vpack.c.bf16 %v5359_v10, %v5358_v42  ;;  %v4855_v19 = vpop.f32.mrf.mxu3  ;;  %v3936_v10 = vld [vmem:[#allocation3 + $0xc0] sm:$0xff] }
 0x7bb   : > { %v5268_v31 = vadd.f32 %v10808_v45, %v4942_v41  ;;  %v11462_v41 = vld [vmem:[#allocation26_spill] sm:$0xff] }
 0x7bc   : > { %v3968_v29 = vadd.f32 %v3932_v44, %v11462_v41  ;;  %v11470_v44 = vld [vmem:[#allocation33_spill] sm:$0xff] }
 0x7bd   : > { %v5594_v16 = vadd.f32 %v10812_v30, %v5268_v31  ;;  %v3966_v30 = vadd.f32 %v3930_v43, %v11460_v61  ;;  %v3934_v61 = vld [vmem:[#allocation3 + $0xb0] sm:$0xff] }
 0x7be   : > { %v5728_v47 = vld [vmem:[#allocation3 + $0x74] sm:$0xff]  ;;  %v4516_v34 = vpop.f32.mrf.mxu2 }
 0x7bf   : > { %v5730_v55 = vadd.f32 %v5728_v47, %v5667_v58  ;;  %5630 = vst [vmem:[#allocation3 + $0x80] sm:$0xff] %v5594_v16  ;;  %v4617_v27 = vadd.f32 %v4516_v34, %v4291_v23  ;;  %v4292_v32 = vadd.f32 %v10503_v54, %v3966_v30  ;;  %v5670_v54 = vadd.f32 %v6864_v62, %v10662_v63  ;;  %v5504_v37 = vpop.f32.mrf.mxu1  ;;  %v3933_v23 = vld [vmem:[#allocation3 + $0xa8] sm:$0xff]  ;;  %v11464_v34 = vld [vmem:[#allocation27_spill] sm:$0xff] }
 0x7c0   : > { %v4294_v58 = vadd.f32 %v11463_v11, %v3968_v29  ;;  %v3969_v22 = vadd.f32 %v3933_v23, %v11464_v34 }
 0x7c1   : > { %6370 = vst [vmem:[%s10674_s28 + $0x68] sm:$0xff] %v5730_v55  ;;  %v4943_v45 = vadd.f32 %v10817_v13, %v4617_v27  ;;  %v3931_v13 = vld [vmem:[#allocation3 + $0x98] sm:$0xff]  ;;  %v5181_v59 = vpop.f32.mrf.mxu0  ;;  %v4857_v55 = vpop.f32.mrf.mxu3  ;;  %v11465_v27 = vld [vmem:[#allocation45_spill] sm:$0xff] }
 0x7c2   : > { %v3967_v36 = vadd.f32 %v3931_v13, %v11461_v49  ;;  %v11468_v49 = vld [vmem:[#allocation30_spill] sm:$0xff] }
 0x7c3   : > { %v5269_v48 = vadd.f32 %v10821_v53, %v4943_v45  ;;  %4558 = vmatmul.bf16.gmra.mxu2 %v4399_v50  ;;  %v6863_v53 = vld [vmem:[%s7184_s9 + $0x78] sm:$0xff]  ;;  %v4295_v45 = vadd.f32 %v11465_v27, %v3969_v22 }
 0x7c4   : > { %v5669_v7 = vadd.f32 %v6863_v53, %v10662_v63 }
 0x7c5   : > { %v5595_v26 = vadd.f32 %v10826_v40, %v5269_v48  ;;  %v11466_v48 = vld [vmem:[#allocation28_spill] sm:$0xff] }
 0x7c6   : > { %v5734_v56 = vld [vmem:[#allocation3 + $0x7e] sm:$0xff]  ;;  %v4519_v6 = vpop.f32.mrf.mxu2 }
 0x7c7   : > { %v5736_v60 = vadd.f32 %v5734_v56, %v5668_v25  ;;  %5631 = vst [vmem:[#allocation3 + $0x88] sm:$0xff] %v5595_v26  ;;  %v4618_v5 = vadd.f32 %v4519_v6, %v4292_v32  ;;  %v5507_v31 = vpop.f32.mrf.mxu1  ;;  %v3970_v26 = vadd.f32 %v3934_v61, %v11466_v48  ;;  %v6869_v48 = vld [vmem:[%s7184_s9 + $0xa8] sm:$0xff] }
 0x7c9   : > { %6371 = vst [vmem:[%s10674_s28 + $0x70] sm:$0xff] %v5736_v60  ;;  %v4944_v21 = vadd.f32 %v10833_v51, %v4618_v5  ;;  %v4293_v51 = vadd.f32 %v10516_v52, %v3967_v36  ;;  %v5183_v50 = vpop.f32.mrf.mxu0  ;;  %v4860_v13 = vpop.f32.mrf.mxu3  ;;  %v3935_v60 = vld [vmem:[#allocation3 + $0xb8] sm:$0xff] }
 0x7ca   : > { %v3971_v36 = vadd.f32 %v3935_v60, %v11468_v49 }
 0x7cb   : > { %v5270_v40 = vadd.f32 %v10838_v14, %v4944_v21 }
 0x7cd   : > { %v5596_v20 = vadd.f32 %v10842_v33, %v5270_v40  ;;  %v5671_v33 = vadd.f32 %v6865_v8, %v10662_v63 }
 0x7ce   : > { %v5735_v12 = vld [vmem:[#allocation3 + $0x86] sm:$0xff]  ;;  %v4521_v57 = vpop.f32.mrf.mxu2 }
 0x7cf   : > { %v5737_v0 = vadd.f32 %v5735_v12, %v5669_v7  ;;  %5632 = vst [vmem:[#allocation3 + $0x90] sm:$0xff] %v5596_v20  ;;  %v5743_v38 = vadd.f32 %v5670_v54, %v5596_v20  ;;  %v4619_v1 = vadd.f32 %v4521_v57, %v4293_v51  ;;  %v5509_v4 = vpop.f32.mrf.mxu1  ;;  %v6866_v7 = vld [vmem:[%s7184_s9 + $0x90] sm:$0xff]  ;;  %v11469_v54 = vld [vmem:[#allocation61_spill] sm:$0xff] }
 0x7d0   : > { %v4297_v40 = vadd.f32 %v11469_v54, %v3971_v36 }
 0x7d1   : > { %6372 = vst [vmem:[%s10674_s28 + $0x78] sm:$0xff] %v5737_v0  ;;  %v4945_v14 = vadd.f32 %v10850_v2, %v4619_v1  ;;  %v5186_v5 = vpop.f32.mrf.mxu0  ;;  %v4862_v12 = vpop.f32.mrf.mxu3  ;;  %v3972_v0 = vadd.f32 %v3936_v10, %v11470_v44  ;;  %v6867_v1 = vld [vmem:[%s7184_s9 + $0x98] sm:$0xff] }
 0x7d2   : > { %6373 = vst [vmem:[%s10674_s28 + $0x80] sm:$0xff] %v5743_v38 }
 0x7d3   : > { %v5271_v52 = vadd.f32 %v10854_v3, %v4945_v14  ;;  %5536 = vmatmul.bf16.vlgmr.msra.gmra.mxu2 %v5377_v9  ;;  %v5673_v9 = vadd.f32 %v6867_v1, %v10662_v63  ;;  %v11478_v1 = vld [vmem:[#allocation39_spill] sm:$0xff] }
 0x7d5   : > { %v5597_v39 = vadd.f32 %v10856_v17, %v5271_v52 }
 0x7d6   : > { %v4524_v16 = vpop.f32.mrf.mxu2 }
 0x7d7   : > { %5633 = vst [vmem:[#allocation3 + $0x98] sm:$0xff] %v5597_v39  ;;  %v5744_v2 = vadd.f32 %v5671_v33, %v5597_v39  ;;  %v4620_v15 = vadd.f32 %v4524_v16, %v4294_v58  ;;  %v5512_v53 = vpop.f32.mrf.mxu1 }
 0x7d9   : > { %6374 = vst [vmem:[%s10674_s28 + $0x88] sm:$0xff] %v5744_v2  ;;  %v4946_v47 = vadd.f32 %v10866_v46, %v4620_v15  ;;  %v11467_v46 = vld [vmem:[#allocation47_spill] sm:$0xff]  ;;  %v5188_v38 = vpop.f32.mrf.mxu0  ;;  %v4865_v23 = vpop.f32.mrf.mxu3  ;;  %v6868_v2 = vld [vmem:[%s7184_s9 + $0xa0] sm:$0xff] }
 0x7da   : > { %v4296_v6 = vadd.f32 %v11467_v46, %v3970_v26  ;;  %v5674_v15 = vadd.f32 %v6868_v2, %v10662_v63  ;;  %v5675_v26 = vadd.f32 %v6869_v48, %v10662_v63 }
 0x7db   : > { %v5272_v43 = vadd.f32 %v5176_v35, %v4946_v47 }
 0x7dd   : > { %v5598_v3 = vadd.f32 %v5502_v28, %v5272_v43  ;;  %v11473_v43 = vld [vmem:[#allocation64_spill] sm:$0xff] }
 0x7de   : > { %v4526_v17 = vpop.f32.mrf.mxu2 }
 0x7df   : > { %5634 = vst [vmem:[#allocation3 + $0xa0] sm:$0xff] %v5598_v3  ;;  %v4621_v30 = vadd.f32 %v4526_v17, %v4295_v45  ;;  %v5514_v41 = vpop.f32.mrf.mxu1 }
 0x7e1   : > { %v4947_v25 = vadd.f32 %v4852_v18, %v4621_v30  ;;  %v5672_v18 = vadd.f32 %v6866_v7, %v10662_v63  ;;  %v5191_v34 = vpop.f32.mrf.mxu0  ;;  %v11476_v7 = vld [vmem:[#allocation37_spill] sm:$0xff] }
 0x7e3   : > { %v5273_v32 = vadd.f32 %v5178_v24, %v4947_v25 }
 0x7e5   : > { %v5599_v56 = vadd.f32 %v5504_v37, %v5273_v32 }
 0x7e6   : > { %v4529_v35 = vpop.f32.mrf.mxu2 }
 0x7e7   : > { %5635 = vst [vmem:[#allocation3 + $0xa8] sm:$0xff] %v5599_v56  ;;  %v4622_v28 = vadd.f32 %v4529_v35, %v4296_v6  ;;  %v5517_v27 = vpop.f32.mrf.mxu1  ;;  %v4867_v56 = vpop.f32.mrf.mxu3  ;;  %v11475_v6 = vld [vmem:[#allocation65_spill] sm:$0xff] }
 0x7e9   : > { %v4948_v21 = vadd.f32 %v4855_v19, %v4622_v28  ;;  %v11471_v19 = vld [vmem:[#allocation63_spill] sm:$0xff]  ;;  %v5193_v35 = vpop.f32.mrf.mxu0 }
 0x7ea   : > { %v4298_v8 = vadd.f32 %v11471_v19, %v3972_v0  ;;  %v6872_v19 = vld [vmem:[%s7184_s9 + $0xc0] sm:$0xff] }
 0x7eb   : > { %v5274_v62 = vadd.f32 %v5181_v59, %v4948_v21  ;;  %v3937_v59 = vld [vmem:[#allocation3 + $0xc8] sm:$0xff] }
 0x7ed   : > { %v5600_v24 = vadd.f32 %v5507_v31, %v5274_v62  ;;  %v11472_v31 = vld [vmem:[#allocation34_spill] sm:$0xff]  ;;  %v6870_v62 = vld [vmem:[%s7184_s9 + $0xb0] sm:$0xff] }
 0x7ee   : > { %v5748_v37 = vld [vmem:[#allocation3 + $0xa2] sm:$0xff]  ;;  %v4531_v42 = vpop.f32.mrf.mxu2  ;;  %v3973_v16 = vadd.f32 %v3937_v59, %v11472_v31  ;;  %v11479_v59 = vld [vmem:[#allocation67_spill] sm:$0xff] }
 0x7ef   : > { %v5750_v20 = vadd.f32 %v5748_v37, %v5672_v18  ;;  %5636 = vst [vmem:[#allocation3 + $0xb0] sm:$0xff] %v5600_v24  ;;  %v4623_v51 = vadd.f32 %v4531_v42, %v4297_v40  ;;  %v5519_v36 = vpop.f32.mrf.mxu1  ;;  %v5676_v24 = vadd.f32 %v6870_v62, %v10662_v63  ;;  %v11477_v37 = vld [vmem:[#allocation66_spill] sm:$0xff]  ;;  %v4870_v10 = vpop.f32.mrf.mxu3 }
 0x7f0   : > { %v3941_v31 = vld [vmem:[#allocation3 + $0xe8] sm:$0xff] }
 0x7f1   : > { %6375 = vst [vmem:[%s10674_s28 + $0x90] sm:$0xff] %v5750_v20  ;;  %v4949_v57 = vadd.f32 %v4857_v55, %v4623_v51  ;;  %v4299_v55 = vadd.f32 %v11473_v43, %v3973_v16  ;;  %v5196_v0 = vpop.f32.mrf.mxu0 }
 0x7f3   : > { %v5275_v14 = vadd.f32 %v5183_v50, %v4949_v57  ;;  %v3938_v50 = vld [vmem:[#allocation3 + $0xd0] sm:$0xff] }
 0x7f5   : > { %v5601_v29 = vadd.f32 %v5509_v4, %v5275_v14  ;;  %v11474_v4 = vld [vmem:[#allocation35_spill] sm:$0xff] }
 0x7f6   : > { %v5749_v33 = vld [vmem:[#allocation3 + $0xaa] sm:$0xff]  ;;  %v4534_v52 = vpop.f32.mrf.mxu2  ;;  %v3974_v25 = vadd.f32 %v3938_v50, %v11474_v4 }
 0x7f7   : > { %v5751_v39 = vadd.f32 %v5749_v33, %v5673_v9  ;;  %5637 = vst [vmem:[#allocation3 + $0xb8] sm:$0xff] %v5601_v29  ;;  %v4624_v11 = vadd.f32 %v4534_v52, %v4298_v8  ;;  %v5522_v14 = vpop.f32.mrf.mxu1  ;;  %v5678_v8 = vadd.f32 %v6872_v19, %v10662_v63  ;;  %v3942_v4 = vld [vmem:[#allocation3 + $0xf0] sm:$0xff] }
 0x7f9   : > { %6376 = vst [vmem:[%s10674_s28 + $0x98] sm:$0xff] %v5751_v39  ;;  %v4950_v58 = vadd.f32 %v4860_v13, %v4624_v11  ;;  %v4300_v13 = vadd.f32 %v11475_v6, %v3974_v25  ;;  %v5198_v43 = vpop.f32.mrf.mxu0 }
 0x7fb   : > { %v5276_v47 = vadd.f32 %v5186_v5, %v4950_v58  ;;  %v3939_v5 = vld [vmem:[#allocation3 + $0xd8] sm:$0xff] }
 0x7fc   : > { %v3975_v18 = vadd.f32 %v3939_v5, %v11476_v7  ;;  %v11484_v7 = vld [vmem:[#allocation42_spill] sm:$0xff] }
 0x7fd   : > { %v5602_v22 = vadd.f32 %v5512_v53, %v5276_v47 }
 0x7fe   : > { %v5755_v3 = vld [vmem:[#allocation3 + $0xb4] sm:$0xff]  ;;  %v4536_v45 = vpop.f32.mrf.mxu2  ;;  %v4301_v42 = vadd.f32 %v11477_v37, %v3975_v18 }
 0x7ff   : > { %v5757_v17 = vadd.f32 %v5755_v3, %v5674_v15  ;;  %5638 = vst [vmem:[#allocation3 + $0xc0] sm:$0xff] %v5602_v22  ;;  %v4625_v61 = vadd.f32 %v4536_v45, %v4299_v55  ;;  %v4872_v15 = vpop.f32.mrf.mxu3  ;;  %v6873_v55 = vld [vmem:[%s7184_s9 + $0xc8] sm:$0xff]  ;;  %v5524_v45 = vpop.f32.mrf.mxu1 }
 0x800   : > { %v5679_v3 = vadd.f32 %v6873_v55, %v10662_v63 }
 0x801   : > { %6377 = vst [vmem:[%s10674_s28 + $0xa0] sm:$0xff] %v5757_v17  ;;  %v4951_v30 = vadd.f32 %v4862_v12, %v4625_v61  ;;  %v3940_v12 = vld [vmem:[#allocation3 + $0xe0] sm:$0xff]  ;;  %v11481_v17 = vld [vmem:[#allocation68_spill] sm:$0xff] }
 0x802   : > { %v3976_v9 = vadd.f32 %v3940_v12, %v11478_v1 }
 0x803   : > { %v5277_v32 = vadd.f32 %v5188_v38, %v4951_v30 }
 0x804   : > { %v4302_v39 = vadd.f32 %v11479_v59, %v3976_v9 }
 0x805   : > { %v5603_v46 = vadd.f32 %v5514_v41, %v5277_v32  ;;  %v6871_v41 = vld [vmem:[%s7184_s9 + $0xb8] sm:$0xff]  ;;  %v11482_v32 = vld [vmem:[#allocation41_spill] sm:$0xff] }
 0x806   : > { %v5756_v60 = vld [vmem:[#allocation3 + $0xbc] sm:$0xff]  ;;  %v4539_v28 = vpop.f32.mrf.mxu2  ;;  %v5677_v29 = vadd.f32 %v6871_v41, %v10662_v63  ;;  %v11487_v41 = vld [vmem:[#allocation71_spill] sm:$0xff] }
 0x807   : > { %v5758_v21 = vadd.f32 %v5756_v60, %v5675_v26  ;;  %5639 = vst [vmem:[#allocation3 + $0xc8] sm:$0xff] %v5603_v46  ;;  %v4626_v49 = vadd.f32 %v4539_v28, %v4300_v13  ;;  %v4875_v46 = vpop.f32.mrf.mxu3  ;;  %v5201_v13 = vpop.f32.mrf.mxu0  ;;  %v11483_v60 = vld [vmem:[#allocation69_spill] sm:$0xff] }
 0x808   : > { %v5527_v5 = vpop.f32.mrf.mxu1 }
 0x809   : > { %6378 = vst [vmem:[%s10674_s28 + $0xa8] sm:$0xff] %v5758_v21  ;;  %v4952_v53 = vadd.f32 %v4865_v23, %v4626_v49  ;;  %v3943_v49 = vld [vmem:[#allocation3 + $0xf8] sm:$0xff] }
 0x80a   : > { %v3979_v18 = vadd.f32 %v3943_v49, %v11484_v7 }
 0x80b   : > { %v5278_v54 = vadd.f32 %v5191_v34, %v4952_v53  ;;  %v11480_v34 = vld [vmem:[#allocation40_spill] sm:$0xff] }
 0x80c   : > { %v3977_v22 = vadd.f32 %v3941_v31, %v11480_v34  ;;  %v11488_v31 = vld [vmem:[#allocation46_spill] sm:$0xff] }
 0x80d   : > { %v5604_v40 = vadd.f32 %v5517_v27, %v5278_v54 }
 0x80e   : > { %v5762_v20 = vld [vmem:[#allocation3 + $0xc6] sm:$0xff]  ;;  %v4541_v51 = vpop.f32.mrf.mxu2  ;;  %v4303_v61 = vadd.f32 %v11481_v17, %v3977_v22  ;;  %v11489_v22 = vld [vmem:[#allocation72_spill] sm:$0xff] }
 0x80f   : > { %v5764_v57 = vadd.f32 %v5762_v20, %v5676_v24  ;;  %5640 = vst [vmem:[#allocation3 + $0xd0] sm:$0xff] %v5604_v40  ;;  %v4627_v44 = vadd.f32 %v4541_v51, %v4301_v42  ;;  %v4877_v24 = vpop.f32.mrf.mxu3  ;;  %v11485_v40 = vld [vmem:[#allocation70_spill] sm:$0xff]  ;;  %v5203_v42 = vpop.f32.mrf.mxu0  ;;  %v3944_v20 = vld [vmem:[#allocation3 + $0x100] sm:$0xff] }
 0x810   : > { %v4305_v37 = vadd.f32 %v11485_v40, %v3979_v18  ;;  %v5529_v12 = vpop.f32.mrf.mxu1 }
 0x811   : > { %6379 = vst [vmem:[%s10674_s28 + $0xb0] sm:$0xff] %v5764_v57  ;;  %v4953_v38 = vadd.f32 %v4867_v56, %v4627_v44  ;;  %v3978_v56 = vadd.f32 %v3942_v4, %v11482_v32  ;;  %v11486_v44 = vld [vmem:[#allocation44_spill] sm:$0xff] }
 0x813   : > { %v5279_v33 = vadd.f32 %v5193_v35, %v4953_v38  ;;  %v4304_v28 = vadd.f32 %v11483_v60, %v3978_v56  ;;  %v6874_v38 = vld [vmem:[%s7184_s9 + $0xd0] sm:$0xff]  ;;  %v6878_v60 = vld [vmem:[%s7184_s9 + $0xe8] sm:$0xff] }
 0x814   : > { %v5680_v1 = vadd.f32 %v6874_v38, %v10662_v63  ;;  %v6875_v63 = vld [vmem:[%s7184_s9 + $0xd8] sm:$0xff] }
 0x815   : > { %v5605_v52 = vadd.f32 %v5519_v36, %v5279_v33 }
 0x816   : > { %v5763_v11 = vld [vmem:[#allocation3 + $0xce] sm:$0xff]  ;;  %v4544_v58 = vpop.f32.mrf.mxu2 }
 0x817   : > { %v5765_v16 = vadd.f32 %v5763_v11, %v5677_v29  ;;  %5641 = vst [vmem:[#allocation3 + $0xd8] sm:$0xff] %v5605_v52  ;;  %v5771_v23 = vadd.f32 %v5678_v8, %v5605_v52  ;;  %v4628_v2 = vadd.f32 %v4544_v58, %v4302_v39  ;;  %v4880_v19 = vpop.f32.mrf.mxu3  ;;  %v3945_v52 = vld [vmem:[#allocation3 + $0x108] sm:$0xff]  ;;  %v5206_v11 = vpop.f32.mrf.mxu0 }
 0x819   : > { %6380 = vst [vmem:[%s10674_s28 + $0xb8] sm:$0xff] %v5765_v16  ;;  %v4954_v47 = vadd.f32 %v4870_v10, %v4628_v2  ;;  %v3981_v16 = vadd.f32 %v3945_v52, %v11488_v31  ;;  %v6876_v2 = vld [vmem:[%s11011_s10] ss:$0 sm:$0xff] }
 0x81a   : > { %6381 = vst [vmem:[%s10674_s28 + $0xc0] sm:$0xff] %v5771_v23  ;;  %v5532_v23 = vpop.f32.mrf.mxu1 }
 0x81b   : > { %v5280_v27 = vadd.f32 %v5196_v0, %v4954_v47  ;;  %v3980_v0 = vadd.f32 %v3944_v20, %v11486_v44 }
 0x81d   : > { %v5606_v50 = vadd.f32 %v5522_v14, %v5280_v27  ;;  %v4306_v29 = vadd.f32 %v11487_v41, %v3980_v0 }
 0x81e   : > { %v4546_v30 = vpop.f32.mrf.mxu2 }
 0x81f   : > { %5642 = vst [vmem:[#allocation3 + $0xe0] sm:$0xff] %v5606_v50  ;;  %v5772_v25 = vadd.f32 %v5679_v3, %v5606_v50  ;;  %v4629_v48 = vadd.f32 %v4546_v30, %v4303_v61  ;;  %v4882_v50 = vpop.f32.mrf.mxu3  ;;  %v5208_v61 = vpop.f32.mrf.mxu0  ;;  %v6877_v30 = vld [vmem:[%s7184_s9 + $0xe0] sm:$0xff] }
 0x820   : > { %v5682_v4 = vadd.f32 %v6877_v30, %v6876_v2 }
 0x821   : > { %6382 = vst [vmem:[%s10674_s28 + $0xc8] sm:$0xff] %v5772_v25  ;;  %v4955_v26 = vadd.f32 %v4872_v15, %v4629_v48  ;;  %v5681_v15 = vadd.f32 %v6876_v2, %v6875_v63 }
 0x822   : > { %v5534_v48 = vpop.f32.mrf.mxu1 }
 0x823   : > { %v5281_v6 = vadd.f32 %v5198_v43, %v4955_v26  ;;  %v4307_v43 = vadd.f32 %v11489_v22, %v3981_v16  ;;  %v3946_v26 = vld [vmem:[#allocation3 + $0x110] sm:$0xff] }
 0x825   : > { %v5607_v35 = vadd.f32 %v5524_v45, %v5281_v6 }
 0x826   : > { %v4549_v21 = vpop.f32.mrf.mxu2 }
 0x827   : > { %5643 = vst [vmem:[#allocation3 + $0xe8] sm:$0xff] %v5607_v35  ;;  %v4630_v36 = vadd.f32 %v4549_v21, %v4304_v28  ;;  %v5683_v28 = vadd.f32 %v6878_v60, %v6876_v2 }
 0x829   : > { %v4956_v53 = vadd.f32 %v4875_v46, %v4630_v36  ;;  %v3947_v36 = vld [vmem:[#allocation3 + $0x118] sm:$0xff] }
 0x82b   : > { %v5282_v62 = vadd.f32 %v5201_v13, %v4956_v53  ;;  %v11490_v13 = vld [vmem:[#allocation48_spill] sm:$0xff] }
 0x82c   : > { %v3982_v35 = vadd.f32 %v3946_v26, %v11490_v13 }
 0x82d   : > { %v5608_v54 = vadd.f32 %v5527_v5, %v5282_v62  ;;  %v11491_v5 = vld [vmem:[#allocation73_spill] sm:$0xff] }
 0x82e   : > { %v4551_v10 = vpop.f32.mrf.mxu2  ;;  %v4308_v21 = vadd.f32 %v11491_v5, %v3982_v35 }
 0x82f   : > { %5644 = vst [vmem:[#allocation3 + $0xf0] sm:$0xff] %v5608_v54  ;;  %v4631_v51 = vadd.f32 %v4551_v10, %v4305_v37 }
 0x831   : > { %v4957_v57 = vadd.f32 %v4877_v24, %v4631_v51  ;;  %v11492_v24 = vld [vmem:[#allocation62_spill] sm:$0xff] }
 0x832   : > { %v3983_v54 = vadd.f32 %v3947_v36, %v11492_v24 }
 0x833   : > { %v5283_v9 = vadd.f32 %v5203_v42, %v4957_v57  ;;  %v4885_v49 = vpop.f32.mrf.mxu3  ;;  %v11493_v42 = vld [vmem:[#allocation74_spill] sm:$0xff] }
 0x834   : > { %v4309_v10 = vadd.f32 %v11493_v42, %v3983_v54 }
 0x835   : > { %v5609_v14 = vadd.f32 %v5529_v12, %v5283_v9  ;;  %v5211_v40 = vpop.f32.mrf.mxu0 }
 0x836   : > { %v5776_v8 = vld [vmem:[#allocation3 + $0xea] sm:$0xff]  ;;  %v4554_v33 = vpop.f32.mrf.mxu2 }
 0x837   : > { %v5778_v59 = vadd.f32 %v5776_v8, %v5680_v1  ;;  %5645 = vst [vmem:[#allocation3 + $0xf8] sm:$0xff] %v5609_v14  ;;  %v4632_v39 = vadd.f32 %v4554_v33, %v4306_v29  ;;  %v6879_v1 = vld [vmem:[%s7184_s9 + $0xf0] sm:$0xff]  ;;  %v6880_v33 = vld [vmem:[%s7184_s9 + $0xf8] sm:$0xff]  ;;  %s6961_s9 = scalar_lea.hbm %s11012_s11, 512 }
 0x838   : > { %v5684_v9 = vadd.f32 %v6879_v1, %v6876_v2  ;;  %v5685_v52 = vadd.f32 %v6880_v33, %v6876_v2  ;;  %p6963_p9 = scmp.lt.s32.totalorder %s6961_s9, %s6957_s26 }
 0x839   : > { %6383 = vst [vmem:[%s10674_s28 + $0xd0] sm:$0xff] %v5778_v59  ;;  %v4958_v58 = vadd.f32 %v4880_v19, %v4632_v39 }
 0x83a   : > { %p6964_p2 = por %p6963_p9, %p6962_p11 }
 0x83b   : > { %v5284_v47 = vadd.f32 %v5206_v11, %v4958_v58  ;;  %v4887_v12 = vpop.f32.mrf.mxu3 }
 0x83c   : > { %p6965_p10 = pnand %p6964_p2, %p6960_p8 }
 0x83d   : > { %v5610_v34 = vadd.f32 %v5532_v23, %v5284_v47  ;;  %v5213_v38 = vpop.f32.mrf.mxu0 }
 0x83e   : > { %v5777_v55 = vld [vmem:[#allocation3 + $0xf2] sm:$0xff]  ;;  %v4556_v3 = vpop.f32.mrf.mxu2 }
 0x83f   : > { %v5779_v27 = vadd.f32 %v5777_v55, %v5681_v15  ;;  %5646 = vst [vmem:[#allocation3 + $0x100] sm:$0xff] %v5610_v34  ;;  %v4633_v45 = vadd.f32 %v4556_v3, %v4307_v43 }
 0x841   : > { %6384 = vst [vmem:[%s10674_s28 + $0xd8] sm:$0xff] %v5779_v27  ;;  %v4959_v17 = vadd.f32 %v4882_v50, %v4633_v45 }
 0x843   : > { %v5285_v25 = vadd.f32 %v5208_v61, %v4959_v17 }
 0x845   : > { %v5611_v32 = vadd.f32 %v5534_v48, %v5285_v25 }
 0x846   : > { %v5783_v56 = vld [vmem:[#allocation3 + $0xfc] sm:$0xff]  ;;  %v4559_v46 = vpop.f32.mrf.mxu2 }
 0x847   : > { %v5785_v6 = vadd.f32 %v5783_v56, %v5682_v4  ;;  %5647 = vst [vmem:[#allocation3 + $0x108] sm:$0xff] %v5611_v32  ;;  %v4634_v53 = vadd.f32 %v4559_v46, %v4308_v21 }
 0x849   : > { %6385 = vst [vmem:[%s10674_s28 + $0xe0] sm:$0xff] %v5785_v6  ;;  %v4960_v37 = vadd.f32 %v4885_v49, %v4634_v53 }
 0x84b   : > { %v5286_v51 = vadd.f32 %v5211_v40, %v4960_v37 }
 0x84e   : > { %v5784_v7 = vld [vmem:[#allocation3 + $0x104] sm:$0xff]  ;;  %v4561_v18 = vpop.f32.mrf.mxu2 }
 0x84f   : > { %v5786_v62 = vadd.f32 %v5784_v7, %v5683_v28  ;;  %v4635_v20 = vadd.f32 %v4561_v18, %v4309_v10 }
 0x851   : > { %6386 = vst [vmem:[%s10674_s28 + $0xe8] sm:$0xff] %v5786_v62  ;;  %v4961_v0 = vadd.f32 %v4887_v12, %v4635_v20 }
 0x853   : > { %v5287_v14 = vadd.f32 %v5213_v38, %v4961_v0 }
 0x856   : > { %v5537_v57 = vpop.f32.mrf.mxu2 }
 0x857   : > { %v5612_v44 = vadd.f32 %v5537_v57, %v5286_v51 }
 0x859   : > { %5648 = vst [vmem:[#allocation3 + $0x110] sm:$0xff] %v5612_v44 }
 0x85e   : > { %v5539_v41 = vpop.f32.mrf.mxu2 }
 0x85f   : > { %v5613_v29 = vadd.f32 %v5539_v41, %v5287_v14 }
 0x860   : > { %v5790_v19 = vld [vmem:[#allocation3 + $0x10e] sm:$0xff] }
 0x861   : > { %v5792_v8 = vadd.f32 %v5790_v19, %v5684_v9  ;;  %5649 = vst [vmem:[#allocation3 + $0x118] sm:$0xff] %v5613_v29 }
 0x863   : > { %6387 = vst [vmem:[%s10674_s28 + $0xf0] sm:$0xff] %v5792_v8 }
 0x868   : > { %v5791_v59 = vld [vmem:[#allocation3 + $0x116] sm:$0xff] }
 0x869   : > { %v5793_v39 = vadd.f32 %v5791_v59, %v5685_v52 }
 0x86b   : > { %6388 = vst [vmem:[%s10674_s28 + $0xf8] sm:$0xff] %v5793_v39 }
 0x86c   : > { %6968 = shalt.err (!%p6965_p10)
}
 0x86d   : > { %s7021_s24 = smov 128   ;;  %s7022_s28 = smov 8  }
 0x86e   : > { %6506 = dma.vmem_to_hbm [thread:$0]  (%p7150_p7), %s5811_s29, 4096, %s5813_s27, %s5798_s30, %s7021_s24, %s7021_s24, %s7022_s28  }
 0x86f PF: > { %s5827_s15 = sand.u32 1, %s6999_s17   ;;  %p11495_p12 = scmp.ge.s32.totalorder %s7011_s20, 2 }
 0x870   : > { %s5828_s23 = scalar_lea.sflag [#allocation6], %s5827_s15 }
 0x871   : > { %p6517_p13 = pnand %p11495_p12, %p7118_p6 }
 0x873   : > { %p6518_p0 = pneg %p6517_p13 }
 0x875   : > { %6994 = dma.done.wait (%p6518_p0), %s5828_s23, 4096  }
 0x876   : > { %6996 = vsyncadd (%p6518_p0), %s5828_s23, 4294963200  ;;  %s11496_s20 = sld [smem:[#allocation15_spill]]  ;;  %s11499_s17 = smov %s7003_s18 }
 0x877   : > { %s11497_s16 = sld [smem:[#allocation13_spill]] }
 0x878   : > { %s11498_s19 = sld [smem:[#allocation16_spill]] }
 0x87c   : > { %p25_p3 = scmp.ge.s32.totalorder %s11496_s20, 4  }
 0x87d   : > { %s11500_s18 = smov %s11497_s16 }
 0x87e   :  { %27 = sbr.rel (!%p25_p3) target bundleno = 8 (0x8), region = 136 }
 0x883   :  { %5834 = vsyncpa [#allocation5], 1 }
 0x884   :  { %5836 = vsyncpa [#allocation5 + $0x1], 1 }
 0x885   :  { %5837 = vsyncpa [#allocation8], 1 }
 0x886   :  { %5838 = vsyncpa [#allocation6], 1 }
 0x887   :  { %5840 = vsyncpa [#allocation6 + $0x1], 1 }

</bundles_post_ra>
